<compile_context>
chip_gen: v5e
topology: v5e:2x2
jax: 0.10.0
libtpu: 0.0.40
codegen_flags: <defaults>
</compile_context>

<pallas_src>
import jax
import jax.numpy as jnp
from jax.experimental import pallas as pl
from jax.experimental.pallas import tpu as pltpu

CLASS_NUM = 3
IMG_SIZE = 32 * 32
D_IN = IMG_SIZE + CLASS_NUM          # 1027
H1, H2, H3, D_OUT = 1024, 512, 256, 1

LANE = 128
SUBLANE = 8
TILE_B_MAX = 1024                    # big tiles amortize per-step overhead (v6e/v5e)
VMEM_LIMIT_BYTES = 48 * 1024 * 1024  # explicit scoped-VMEM budget, safe on v5e/v6e/v7x


def _round_up(x, m):
    return (x + m - 1) // m * m


D_OUT_PAD = _round_up(D_OUT, LANE)   # 128 (lane-dense output stores; sliced off)


def _leaky_relu(x, slope=0.2):
    # 1 mul + 1 max instead of cmp + select + mul.
    return jnp.maximum(x, slope * x)


def discriminator_kernel(x_ref,
                         w1_ref, b1_ref,
                         w2_ref, b2_ref,
                         w3_ref, b3_ref,
                         w4_ref, b4_ref,
                         o_ref):
    # x tile: (tile_b, 1027) f32 -> cast to bf16 in-kernel (hidden under MXU).
    x = x_ref[...].astype(jnp.bfloat16)

    # bf16 operands, f32 accumulation on the MXU; activations in f32.
    h = jnp.dot(x, w1_ref[...], preferred_element_type=jnp.float32) + b1_ref[...]
    h = _leaky_relu(h).astype(jnp.bfloat16)

    h = jnp.dot(h, w2_ref[...], preferred_element_type=jnp.float32) + b2_ref[...]
    h = _leaky_relu(h).astype(jnp.bfloat16)

    h = jnp.dot(h, w3_ref[...], preferred_element_type=jnp.float32) + b3_ref[...]
    h = _leaky_relu(h).astype(jnp.bfloat16)

    h = jnp.dot(h, w4_ref[...], preferred_element_type=jnp.float32) + b4_ref[...]
    # Padded output lanes are sigmoid(0)=0.5 and sliced off in the wrapper.
    o_ref[...] = jax.nn.sigmoid(h)


def prepare_params(params):
    """One-time layout: weights -> bf16 (in_features, out_features); biases -> (1, H) f32.
    Only the final layer is lane-padded (1 -> 128); padding is mathematically inert."""
    w1, b1, w2, b2, w3, b3, w4, b4 = params
    w4_p = jnp.zeros((H3, D_OUT_PAD), jnp.bfloat16).at[:, :D_OUT].set(
        w4.astype(jnp.bfloat16))
    b4_p = jnp.zeros((1, D_OUT_PAD), jnp.float32).at[:, :D_OUT].set(
        b4.reshape(1, -1).astype(jnp.float32))
    return (
        w1.astype(jnp.bfloat16), b1.reshape(1, H1).astype(jnp.float32),
        w2.astype(jnp.bfloat16), b2.reshape(1, H2).astype(jnp.float32),
        w3.astype(jnp.bfloat16), b3.reshape(1, H3).astype(jnp.float32),
        w4_p, b4_p,
    )


@jax.jit
def discriminator_forward(x, prepared_params):
    """x: (B, 1027) float32. prepared_params: output of prepare_params.
    Returns (B, 1) float32."""
    w1_p, b1_p, w2_p, b2_p, w3_p, b3_p, w4_p, b4_p = prepared_params
    B = x.shape[0]

    # Adaptive tile: >= 2 grid steps once B >= 16 (lets the "parallel" axis use
    # both v7x TensorCores), capped at TILE_B_MAX, rows kept a multiple of 8.
    b_min = _round_up(max(B, SUBLANE), SUBLANE)
    tile_b = min(TILE_B_MAX, _round_up(-(-b_min // 2), SUBLANE))
    Bp = _round_up(b_min, tile_b)
    num_tiles = Bp // tile_b

    # Only a cheap batch-row pad, and only when needed (zero rows are inert).
    if Bp != B:
        x = jnp.pad(x, ((0, Bp - B), (0, 0)))

    # x / out are tiled over the batch; last dims (1027 / 128) are full-dim / lane-aligned.
    x_spec = pl.BlockSpec((tile_b, D_IN), lambda i: (i, 0))
    out_spec = pl.BlockSpec((tile_b, D_OUT_PAD), lambda i: (i, 0))

    def const_spec(shape):
        # Full-array block with a constant index_map: fetched once, VMEM-resident
        # across all grid steps. Single-buffered -- double-buffering a block whose
        # index never changes is pure VMEM waste (~3.4 MiB reclaimed).
        return pl.BlockSpec(shape, lambda i: (0, 0), pipeline_mode=pl.Buffered(1))

    out = pl.pallas_call(
        discriminator_kernel,
        out_shape=jax.ShapeDtypeStruct((Bp, D_OUT_PAD), jnp.float32),
        grid=(num_tiles,),
        in_specs=[
            x_spec,
            const_spec((D_IN, H1)), const_spec((1, H1)),
            const_spec((H1, H2)),   const_spec((1, H2)),
            const_spec((H2, H3)),   const_spec((1, H3)),
            const_spec((H3, D_OUT_PAD)), const_spec((1, D_OUT_PAD)),
        ],
        out_specs=out_spec,
        compiler_params=pltpu.CompilerParams(
            dimension_semantics=("parallel",),
            vmem_limit_bytes=VMEM_LIMIT_BYTES,
        ),
    )(x, w1_p, b1_p, w2_p, b2_p, w3_p, b3_p, w4_p, b4_p)

    return out[:B, :D_OUT]


def init_params(key):
    """Deterministic PyTorch-Linear-style init: U(-1/sqrt(fan_in), 1/sqrt(fan_in)).
    Weights stored (in_features, out_features) so forward is x @ W + b."""
    dims = [(D_IN, H1), (H1, H2), (H2, H3), (H3, D_OUT)]
    params = []
    for i, (fan_in, fan_out) in enumerate(dims):
        kw, kb = jax.random.split(jax.random.fold_in(key, i))
        bound = 1.0 / jnp.sqrt(float(fan_in))
        w = jax.random.uniform(kw, (fan_in, fan_out), jnp.float32, -bound, bound)
        b = jax.random.uniform(kb, (fan_out,), jnp.float32, -bound, bound)
        params.extend([w, b])
    return tuple(params)


def _reference_forward(x, params):
    w1, b1, w2, b2, w3, b3, w4, b4 = params
    h = jnp.where(x @ w1 + b1 > 0, x @ w1 + b1, 0.2 * (x @ w1 + b1))
    h = jnp.where(h @ w2 + b2 > 0, h @ w2 + b2, 0.2 * (h @ w2 + b2))
    h = jnp.where(h @ w3 + b3 > 0, h @ w3 + b3, 0.2 * (h @ w3 + b3))
    return jax.nn.sigmoid(h @ w4 + b4)


if __name__ == "__main__":
    key = jax.random.PRNGKey(0)
    k_params, k_x = jax.random.split(key)

    params = init_params(k_params)
    prepared = prepare_params(params)   # one-time padding/cast, reused across calls

    # Small shape consistent with the module: batch=2, features = 32*32 img + 3 class logits.
    B = 2
    x = jax.random.normal(k_x, (B, D_IN), jnp.float32)

    y = discriminator_forward(x, prepared)
    y = jax.block_until_ready(y)

    y_ref = _reference_forward(x, params)  # f32 reference
    assert y.shape == (B, 1), y.shape
    # bf16 matmul operands with f32 accumulation -> loosened tolerance vs f32 reference.
    assert jnp.allclose(y, y_ref, atol=2e-2, rtol=2e-2), (y, y_ref)

    # Also exercise a multi-tile batch (2 grid steps -> megacore path on v7x).
    B2 = 1030
    x2 = jax.random.normal(jax.random.fold_in(k_x, 1), (B2, D_IN), jnp.float32)
    y2 = jax.block_until_ready(discriminator_forward(x2, prepared))
    y2_ref = _reference_forward(x2, params)
    assert y2.shape == (B2, 1), y2.shape
    assert jnp.allclose(y2, y2_ref, atol=2e-2, rtol=2e-2)

    print("KERNEL_OK")
</pallas_src>

<mosaic_0001>
module attributes {stable_mosaic.version = 11 : i64} {
  func.func @discriminator_kernel(%arg0: i32, %arg1: memref<8x1027xf32, #tpu.memory_space<vmem>>, %arg2: memref<1027x1024xbf16, #tpu.memory_space<vmem>>, %arg3: memref<1x1024xf32, #tpu.memory_space<vmem>>, %arg4: memref<1024x512xbf16, #tpu.memory_space<vmem>>, %arg5: memref<1x512xf32, #tpu.memory_space<vmem>>, %arg6: memref<512x256xbf16, #tpu.memory_space<vmem>>, %arg7: memref<1x256xf32, #tpu.memory_space<vmem>>, %arg8: memref<256x128xbf16, #tpu.memory_space<vmem>>, %arg9: memref<1x128xf32, #tpu.memory_space<vmem>>, %arg10: memref<8x128xf32, #tpu.memory_space<vmem>>) attributes {dimension_semantics = [#tpu.dimension_semantics<parallel>], iteration_bounds = array<i64: 1>, scalar_prefetch = 0 : i64, scratch_operands = 0 : i64, tpu.core_type = #tpu.core_type<tc>, window_params = [{transform_indices = @transform_0, window_bounds = array<i64: 8, 1027>}, {pipeline_mode = #tpu.pipeline_mode<synchronous>, transform_indices = @transform_1, window_bounds = array<i64: 1027, 1024>}, {pipeline_mode = #tpu.pipeline_mode<synchronous>, transform_indices = @transform_2, window_bounds = array<i64: 1, 1024>}, {pipeline_mode = #tpu.pipeline_mode<synchronous>, transform_indices = @transform_3, window_bounds = array<i64: 1024, 512>}, {pipeline_mode = #tpu.pipeline_mode<synchronous>, transform_indices = @transform_4, window_bounds = array<i64: 1, 512>}, {pipeline_mode = #tpu.pipeline_mode<synchronous>, transform_indices = @transform_5, window_bounds = array<i64: 512, 256>}, {pipeline_mode = #tpu.pipeline_mode<synchronous>, transform_indices = @transform_6, window_bounds = array<i64: 1, 256>}, {pipeline_mode = #tpu.pipeline_mode<synchronous>, transform_indices = @transform_7, window_bounds = array<i64: 256, 128>}, {pipeline_mode = #tpu.pipeline_mode<synchronous>, transform_indices = @transform_8, window_bounds = array<i64: 1, 128>}, {transform_indices = @transform_9, window_bounds = array<i64: 8, 128>}]} {
    %c0 = arith.constant 0 : index
    %c0_0 = arith.constant 0 : index
    %0 = vector.load %arg1[%c0, %c0_0] : memref<8x1027xf32, #tpu.memory_space<vmem>>, vector<8x1027xf32>
    %1 = arith.truncf %0 : vector<8x1027xf32> to vector<8x1027xbf16>
    %c0_1 = arith.constant 0 : index
    %c0_2 = arith.constant 0 : index
    %2 = vector.load %arg2[%c0_1, %c0_2] : memref<1027x1024xbf16, #tpu.memory_space<vmem>>, vector<1027x1024xbf16>
    %cst = arith.constant dense<0.000000e+00> : vector<8x1024xf32>
    %3 = tpu.matmul %1, %2, %cst {dimension_numbers = #tpu.dot_dimension_numbers<[1], [0], [0], [1], [0, 0, 1, 1], [], []>} : vector<8x1027xbf16>, vector<1027x1024xbf16>, vector<8x1024xf32> -> vector<8x1024xf32>
    %c0_3 = arith.constant 0 : index
    %c0_4 = arith.constant 0 : index
    %4 = vector.load %arg3[%c0_3, %c0_4] : memref<1x1024xf32, #tpu.memory_space<vmem>>, vector<1x1024xf32>
    %5 = vector.broadcast %4 : vector<1x1024xf32> to vector<8x1024xf32>
    %6 = arith.addf %3, %5 : vector<8x1024xf32>
    %cst_5 = arith.constant 2.000000e-01 : f32
    %7 = vector.broadcast %cst_5 : f32 to vector<8x1024xf32>
    %8 = arith.mulf %7, %6 : vector<8x1024xf32>
    %9 = arith.maximumf %6, %8 : vector<8x1024xf32>
    %10 = arith.truncf %9 : vector<8x1024xf32> to vector<8x1024xbf16>
    %c0_6 = arith.constant 0 : index
    %c0_7 = arith.constant 0 : index
    %11 = vector.load %arg4[%c0_6, %c0_7] : memref<1024x512xbf16, #tpu.memory_space<vmem>>, vector<1024x512xbf16>
    %cst_8 = arith.constant dense<0.000000e+00> : vector<8x512xf32>
    %12 = tpu.matmul %10, %11, %cst_8 {dimension_numbers = #tpu.dot_dimension_numbers<[1], [0], [0], [1], [0, 0, 1, 1], [], []>} : vector<8x1024xbf16>, vector<1024x512xbf16>, vector<8x512xf32> -> vector<8x512xf32>
    %c0_9 = arith.constant 0 : index
    %c0_10 = arith.constant 0 : index
    %13 = vector.load %arg5[%c0_9, %c0_10] : memref<1x512xf32, #tpu.memory_space<vmem>>, vector<1x512xf32>
    %14 = vector.broadcast %13 : vector<1x512xf32> to vector<8x512xf32>
    %15 = arith.addf %12, %14 : vector<8x512xf32>
    %cst_11 = arith.constant 2.000000e-01 : f32
    %16 = vector.broadcast %cst_11 : f32 to vector<8x512xf32>
    %17 = arith.mulf %16, %15 : vector<8x512xf32>
    %18 = arith.maximumf %15, %17 : vector<8x512xf32>
    %19 = arith.truncf %18 : vector<8x512xf32> to vector<8x512xbf16>
    %c0_12 = arith.constant 0 : index
    %c0_13 = arith.constant 0 : index
    %20 = vector.load %arg6[%c0_12, %c0_13] : memref<512x256xbf16, #tpu.memory_space<vmem>>, vector<512x256xbf16>
    %cst_14 = arith.constant dense<0.000000e+00> : vector<8x256xf32>
    %21 = tpu.matmul %19, %20, %cst_14 {dimension_numbers = #tpu.dot_dimension_numbers<[1], [0], [0], [1], [0, 0, 1, 1], [], []>} : vector<8x512xbf16>, vector<512x256xbf16>, vector<8x256xf32> -> vector<8x256xf32>
    %c0_15 = arith.constant 0 : index
    %c0_16 = arith.constant 0 : index
    %22 = vector.load %arg7[%c0_15, %c0_16] : memref<1x256xf32, #tpu.memory_space<vmem>>, vector<1x256xf32>
    %23 = vector.broadcast %22 : vector<1x256xf32> to vector<8x256xf32>
    %24 = arith.addf %21, %23 : vector<8x256xf32>
    %cst_17 = arith.constant 2.000000e-01 : f32
    %25 = vector.broadcast %cst_17 : f32 to vector<8x256xf32>
    %26 = arith.mulf %25, %24 : vector<8x256xf32>
    %27 = arith.maximumf %24, %26 : vector<8x256xf32>
    %28 = arith.truncf %27 : vector<8x256xf32> to vector<8x256xbf16>
    %c0_18 = arith.constant 0 : index
    %c0_19 = arith.constant 0 : index
    %29 = vector.load %arg8[%c0_18, %c0_19] : memref<256x128xbf16, #tpu.memory_space<vmem>>, vector<256x128xbf16>
    %cst_20 = arith.constant dense<0.000000e+00> : vector<8x128xf32>
    %30 = tpu.matmul %28, %29, %cst_20 {dimension_numbers = #tpu.dot_dimension_numbers<[1], [0], [0], [1], [0, 0, 1, 1], [], []>} : vector<8x256xbf16>, vector<256x128xbf16>, vector<8x128xf32> -> vector<8x128xf32>
    %c0_21 = arith.constant 0 : index
    %c0_22 = arith.constant 0 : index
    %31 = vector.load %arg9[%c0_21, %c0_22] : memref<1x128xf32, #tpu.memory_space<vmem>>, vector<1x128xf32>
    %32 = vector.broadcast %31 : vector<1x128xf32> to vector<8x128xf32>
    %33 = arith.addf %30, %32 : vector<8x128xf32>
    %34 = arith.negf %33 : vector<8x128xf32>
    %35 = math.exp %34 : vector<8x128xf32>
    %cst_23 = arith.constant 1.000000e+00 : f32
    %36 = vector.broadcast %cst_23 : f32 to vector<8x128xf32>
    %37 = arith.addf %36, %35 : vector<8x128xf32>
    %38 = arith.divf %36, %37 : vector<8x128xf32>
    %c0_24 = arith.constant 0 : index
    %c0_25 = arith.constant 0 : index
    %39 = vector.load %arg10[%c0_24, %c0_25] : memref<8x128xf32, #tpu.memory_space<vmem>>, vector<8x128xf32>
    tpu.vector_store %arg10[%c0_24, %c0_25], %38 {strides = array<i32>} : memref<8x128xf32, #tpu.memory_space<vmem>>, vector<8x128xf32>,
    return
  }
  func.func @transform_0(%arg0: i32) -> (i32, i32) {
    %c0_i32 = arith.constant 0 : i32
    %c0_i32_0 = arith.constant 0 : i32
    return %arg0, %c0_i32 : i32, i32
  }
  func.func @transform_1(%arg0: i32) -> (i32, i32) {
    %c0_i32 = arith.constant 0 : i32
    %c0_i32_0 = arith.constant 0 : i32
    %c0_i32_1 = arith.constant 0 : i32
    return %c0_i32, %c0_i32_0 : i32, i32
  }
  func.func @transform_2(%arg0: i32) -> (i32, i32) {
    %c0_i32 = arith.constant 0 : i32
    %c0_i32_0 = arith.constant 0 : i32
    %c0_i32_1 = arith.constant 0 : i32
    return %c0_i32, %c0_i32_0 : i32, i32
  }
  func.func @transform_3(%arg0: i32) -> (i32, i32) {
    %c0_i32 = arith.constant 0 : i32
    %c0_i32_0 = arith.constant 0 : i32
    %c0_i32_1 = arith.constant 0 : i32
    return %c0_i32, %c0_i32_0 : i32, i32
  }
  func.func @transform_4(%arg0: i32) -> (i32, i32) {
    %c0_i32 = arith.constant 0 : i32
    %c0_i32_0 = arith.constant 0 : i32
    %c0_i32_1 = arith.constant 0 : i32
    return %c0_i32, %c0_i32_0 : i32, i32
  }
  func.func @transform_5(%arg0: i32) -> (i32, i32) {
    %c0_i32 = arith.constant 0 : i32
    %c0_i32_0 = arith.constant 0 : i32
    %c0_i32_1 = arith.constant 0 : i32
    return %c0_i32, %c0_i32_0 : i32, i32
  }
  func.func @transform_6(%arg0: i32) -> (i32, i32) {
    %c0_i32 = arith.constant 0 : i32
    %c0_i32_0 = arith.constant 0 : i32
    %c0_i32_1 = arith.constant 0 : i32
    return %c0_i32, %c0_i32_0 : i32, i32
  }
  func.func @transform_7(%arg0: i32) -> (i32, i32) {
    %c0_i32 = arith.constant 0 : i32
    %c0_i32_0 = arith.constant 0 : i32
    %c0_i32_1 = arith.constant 0 : i32
    return %c0_i32, %c0_i32_0 : i32, i32
  }
  func.func @transform_8(%arg0: i32) -> (i32, i32) {
    %c0_i32 = arith.constant 0 : i32
    %c0_i32_0 = arith.constant 0 : i32
    %c0_i32_1 = arith.constant 0 : i32
    return %c0_i32, %c0_i32_0 : i32, i32
  }
  func.func @transform_9(%arg0: i32) -> (i32, i32) {
    %c0_i32 = arith.constant 0 : i32
    %c0_i32_0 = arith.constant 0 : i32
    return %arg0, %c0_i32 : i32, i32
  }
}

</mosaic_0001>

<bundles_post_ra>
// kernel: discriminator_forward.1
= control target key start
LH: loop header
LB: loop body
LE: loop exit
PB: predicated region body
PF: predicated region fallthrough
CT: control target
= control target key end

     0   :  { %14 = vsyncpa [#allocation3], 0  ;;  %s11895_s0 = inlined_call_operand.vmem [shape: f32[8,1027], index: 0, kind: input, shape index: {}]   ;;  %s11896_s1 = inlined_call_operand.hbm [shape: bf16[1027,1024], index: 1, kind: input, shape index: {}]   ;;  %s11897_s2 = inlined_call_operand.hbm [shape: f32[1,1024], index: 2, kind: input, shape index: {}]   ;;  %s11898_s3 = inlined_call_operand.hbm [shape: bf16[1024,512], index: 3, kind: input, shape index: {}]   ;;  %s11899_s4 = inlined_call_operand.hbm [shape: f32[1,512], index: 4, kind: input, shape index: {}]   ;;  %s11900_s5 = inlined_call_operand.hbm [shape: bf16[512,256], index: 5, kind: input, shape index: {}]   ;;  %s11901_s6 = inlined_call_operand.hbm [shape: f32[1,256], index: 6, kind: input, shape index: {}]   ;;  %s11902_s7 = inlined_call_operand.hbm [shape: bf16[256,128], index: 7, kind: input, shape index: {}]   ;;  %s11903_s8 = inlined_call_operand.hbm [shape: f32[1,128], index: 8, kind: input, shape index: {}]   ;;  %s11904_s9 = inlined_call_operand.vmem [shape: f32[8,128], index: 9, kind: output, shape index: {}]  }
   0x1   :  { %15 = vsyncpa [#allocation5], 0 }
   0x2   :  { %16 = vsyncpa [#allocation8], 0 }
   0x3   :  { %17 = vsyncpa [#allocation11], 0  ;;  %s39_s11 = sshll.u32 %s11897_s2, 4  ;;  %s40_s11 = int_to_ptr.hbm [resolvable:$true] %s39_s11 }
   0x4   :  { %18 = vsyncpa [#allocation14], 0  ;;  %s11412_s12 = smov [#allocation4]   ;;  %s63_s16 = sshll.u32 %s11899_s4, 4  ;;  %s64_s16 = int_to_ptr.hbm [resolvable:$true] %s63_s16 }
   0x5   :  { %s41_s13 = sshll.u32 %s11412_s12, 4  ;;  %s11413_s17 = smov [#allocation7]   ;;  %s42_s13 = int_to_ptr.vmem [resolvable:$true] %s41_s13 }
   0x6   :  { %44 = dma.hbm_to_vmem [thread:$0]  %s40_s11, 128, %s42_s13, [#allocation5]  }
   0x7   :  { %s65_s18 = sshll.u32 %s11413_s17, 4  ;;  %s87_s21 = sshll.u32 %s11901_s6, 4  ;;  %s66_s18 = int_to_ptr.vmem [resolvable:$true] %s65_s18  ;;  %s88_s21 = int_to_ptr.hbm [resolvable:$true] %s87_s21 }
   0x8   :  { %68 = dma.hbm_to_vmem [thread:$0]  %s64_s16, 64, %s66_s18, [#allocation8]  }
   0x9   :  { %s25_s23 = sshll.u32 %s11896_s1, 4  ;;  %s11414_s24 = smov [#allocation10]   ;;  %s26_s23 = int_to_ptr.hbm [resolvable:$true] %s25_s23 }
   0xa   :  { %s89_s25 = sshll.u32 %s11414_s24, 4  ;;  %s11415_s4 = smov [#allocation2]   ;;  %s90_s25 = int_to_ptr.vmem [resolvable:$true] %s89_s25 }
   0xb   :  { %92 = dma.hbm_to_vmem [thread:$0]  %s88_s21, 32, %s90_s25, [#allocation11]  }
   0xc   :  { %s27_s26 = sshll.u32 %s11415_s4, 4  ;;  %s11416_s27 = smov 512   ;;  %s28_s26 = int_to_ptr.vmem [resolvable:$true] %s27_s26 }
   0xd   :  { %s11417_s28 = smov 32   ;;  %s49_s30 = sshll.u32 %s11898_s3, 4  ;;  %s50_s30 = int_to_ptr.hbm [resolvable:$true] %s49_s30 }
   0xe   :  { %33 = dma.hbm_to_vmem [thread:$0]  %s26_s23, 66048, %s28_s26, [#allocation3], %s11416_s27, %s11416_s27, %s11417_s28  }
   0xf   :  { %s11418_s10 = smov [#allocation6]   ;;  %s73_s13 = sshll.u32 %s11900_s5, 4  ;;  %s74_s13 = int_to_ptr.hbm [resolvable:$true] %s73_s13 }
  0x10   :  { %s51_s11 = sshll.u32 %s11418_s10, 4  ;;  %s11419_s14 = smov 256   ;;  %s52_s11 = int_to_ptr.vmem [resolvable:$true] %s51_s11 }
  0x11   :  { %s11420_s15 = smov 16   ;;  %s11421_s16 = smov [#allocation9]  }
  0x12   :  { %57 = dma.hbm_to_vmem [thread:$0]  %s50_s30, 32768, %s52_s11, [#allocation5], %s11419_s14, %s11419_s14, %s11420_s15  }
  0x13   :  { %s75_s17 = sshll.u32 %s11421_s16, 4  ;;  %s11422_s18 = smov 128   ;;  %s76_s17 = int_to_ptr.vmem [resolvable:$true] %s75_s17 }
  0x14   :  { %s11423_s19 = smov 8   ;;  %s97_s21 = sshll.u32 %s11902_s7, 4  ;;  %s98_s21 = int_to_ptr.hbm [resolvable:$true] %s97_s21 }
  0x15   :  { %81 = dma.hbm_to_vmem [thread:$0]  %s74_s13, 8192, %s76_s17, [#allocation8], %s11422_s18, %s11422_s18, %s11423_s19  }
  0x16   :  { %s11424_s2 = smov [#allocation12]   ;;  %s111_s24 = sshll.u32 %s11903_s8, 4  ;;  %s112_s24 = int_to_ptr.hbm [resolvable:$true] %s111_s24 }
  0x17   :  { %s99_s22 = sshll.u32 %s11424_s2, 4  ;;  %s11425_s25 = smov 64   ;;  %s100_s22 = int_to_ptr.vmem [resolvable:$true] %s99_s22 }
  0x18   :  { %s11426_s4 = smov 4   ;;  %s11427_s26 = smov [#allocation13]  }
  0x19   :  { %105 = dma.hbm_to_vmem [thread:$0]  %s98_s21, 2048, %s100_s22, [#allocation11], %s11425_s25, %s11425_s25, %s11426_s4  }
  0x1a   :  { %s113_s27 = sshll.u32 %s11427_s26, 4  ;;  %s114_s27 = int_to_ptr.vmem [resolvable:$true] %s113_s27 }
  0x1b   :  { %116 = dma.hbm_to_vmem [thread:$0]  %s112_s24, 16, %s114_s27, [#allocation14]  }
  0x1c   :  { %11402 = dma.done.wait [#allocation3], 66048  }
  0x1d   :  { %11403 = vsyncadd [#allocation3], 4294901248 }
  0x1e   :  { %11404 = dma.done.wait [#allocation5], 32896  }
  0x1f   :  { %11405 = vsyncadd [#allocation5], 4294934400 }
  0x20   :  { %11406 = dma.done.wait [#allocation8], 8256  }
  0x21   :  { %11407 = vsyncadd [#allocation8], 4294959040 }
  0x22   :  { %11408 = dma.done.wait [#allocation11], 2080  }
  0x23   :  { %11409 = vsyncadd [#allocation11], 4294965216 }
  0x24   :  { %11410 = dma.done.wait [#allocation14], 16  }
  0x25   :  { %11411 = vsyncadd [#allocation14], 4294967280  ;;  %v7161_v0 = vld [vmem:[#allocation2 + $0x1c0] sm:$0xf]  ;;  %vm3286_vm0 = vcmask 1040384   ;;  %vm3287_vm1 = vcmask 1041408  }
  0x26   :  { %v10396_v1 = vld [vmem:[#allocation2 + $0x1dc] sm:$0xf0]  ;;  %vm3282_vm2 = vcmask 23552  }
  0x27   :  { %v7417_v2 = vld [vmem:[#allocation2 + $0x3c0] sm:$0xf]  ;;  %v7162_v3 = vor.u32 %v10396_v1, %v7161_v0 }
  0x28   :  { %v10460_v4 = vld [vmem:[#allocation2 + $0x3dc] sm:$0xf0] }
  0x29   :  { %v7673_v5 = vld [vmem:[#allocation2 + $0x5c0] sm:$0xf]  ;;  %v7418_v7 = vor.u32 %v10460_v4, %v7417_v2  ;;  %3314 = vmatpush.bf16.msra.mxu0 %v7162_v3 }
  0x2a   :  { %v10524_v6 = vld [vmem:[#allocation2 + $0x5dc] sm:$0xf0] }
  0x2b   :  { %v7674_v8 = vor.u32 %v10524_v6, %v7673_v5  ;;  %v7929_v9 = vld [vmem:[#allocation2 + $0x7c0] sm:$0xf]  ;;  %3327 = vmatpush.bf16.msra.mxu1 %v7418_v7 }
  0x2c   :  { %v10588_v10 = vld [vmem:[#allocation2 + $0x7dc] sm:$0xf0] }
  0x2d   :  { %v7129_v11 = vld [vmem:[#allocation2 + $0x180] sm:$0xf]  ;;  %v7930_v12 = vor.u32 %v10588_v10, %v7929_v9  ;;  %3340 = vmatpush.bf16.msra.mxu2 %v7674_v8 }
  0x2e   :  { %v10388_v13 = vld [vmem:[#allocation2 + $0x19c] sm:$0xf0] }
  0x2f   :  { %v7385_v14 = vld [vmem:[#allocation2 + $0x380] sm:$0xf]  ;;  %v7130_v16 = vor.u32 %v10388_v13, %v7129_v11  ;;  %3353 = vmatpush.bf16.msra.mxu3 %v7930_v12 }
  0x30   :  { %v10452_v15 = vld [vmem:[#allocation2 + $0x39c] sm:$0xf0] }
  0x31   :  { %v7386_v17 = vor.u32 %v10452_v15, %v7385_v14  ;;  %v7641_v18 = vld [vmem:[#allocation2 + $0x580] sm:$0xf]  ;;  %3315 = vmatpush.bf16.msra.mxu0 %v7130_v16 }
  0x32   :  { %v10516_v19 = vld [vmem:[#allocation2 + $0x59c] sm:$0xf0] }
  0x33   :  { %v7897_v20 = vld [vmem:[#allocation2 + $0x780] sm:$0xf]  ;;  %v7642_v21 = vor.u32 %v10516_v19, %v7641_v18  ;;  %3328 = vmatpush.bf16.msra.mxu1 %v7386_v17 }
  0x34   :  { %v10580_v22 = vld [vmem:[#allocation2 + $0x79c] sm:$0xf0] }
  0x35   :  { %v7097_v23 = vld [vmem:[#allocation2 + $0x140] sm:$0xf]  ;;  %v7898_v25 = vor.u32 %v10580_v22, %v7897_v20  ;;  %3341 = vmatpush.bf16.msra.mxu2 %v7642_v21 }
  0x36   :  { %v10380_v24 = vld [vmem:[#allocation2 + $0x15c] sm:$0xf0] }
  0x37   :  { %v7353_v26 = vld [vmem:[#allocation2 + $0x340] sm:$0xf]  ;;  %v7098_v29 = vor.u32 %v10380_v24, %v7097_v23  ;;  %3354 = vmatpush.bf16.msra.mxu3 %v7898_v25 }
  0x38   :  { %v10444_v27 = vld [vmem:[#allocation2 + $0x35c] sm:$0xf0] }
  0x39   :  { %v7609_v28 = vld [vmem:[#allocation2 + $0x540] sm:$0xf]  ;;  %v7354_v33 = vor.u32 %v10444_v27, %v7353_v26  ;;  %3316 = vmatpush.bf16.msra.mxu0 %v7098_v29 }
  0x3a   :  { %v10508_v30 = vld [vmem:[#allocation2 + $0x55c] sm:$0xf0] }
  0x3b   :  { %v7865_v31 = vld [vmem:[#allocation2 + $0x740] sm:$0xf]  ;;  %v7610_v34 = vor.u32 %v10508_v30, %v7609_v28  ;;  %3329 = vmatpush.bf16.msra.mxu1 %v7354_v33 }
  0x3c   :  { %v10572_v32 = vld [vmem:[#allocation2 + $0x75c] sm:$0xf0] }
  0x3d   :  { %v7065_v35 = vld [vmem:[#allocation2 + $0x100] sm:$0xf]  ;;  %v7866_v38 = vor.u32 %v10572_v32, %v7865_v31  ;;  %3342 = vmatpush.bf16.msra.mxu2 %v7610_v34 }
  0x3e   :  { %v10372_v36 = vld [vmem:[#allocation2 + $0x11c] sm:$0xf0] }
  0x3f   :  { %v7321_v37 = vld [vmem:[#allocation2 + $0x300] sm:$0xf]  ;;  %v7066_v44 = vor.u32 %v10372_v36, %v7065_v35  ;;  %3355 = vmatpush.bf16.msra.mxu3 %v7866_v38 }
  0x40   :  { %v10436_v39 = vld [vmem:[#allocation2 + $0x31c] sm:$0xf0] }
  0x41   :  { %v7577_v40 = vld [vmem:[#allocation2 + $0x500] sm:$0xf]  ;;  %v7322_v45 = vor.u32 %v10436_v39, %v7321_v37  ;;  %3317 = vmatpush.bf16.msra.mxu0 %v7066_v44 }
  0x42   :  { %v10500_v41 = vld [vmem:[#allocation2 + $0x51c] sm:$0xf0] }
  0x43   :  { %v7833_v42 = vld [vmem:[#allocation2 + $0x700] sm:$0xf]  ;;  %v7578_v46 = vor.u32 %v10500_v41, %v7577_v40  ;;  %3330 = vmatpush.bf16.msra.mxu1 %v7322_v45 }
  0x44   :  { %v10564_v43 = vld [vmem:[#allocation2 + $0x71c] sm:$0xf0] }
  0x45   :  { %v7033_v47 = vld [vmem:[#allocation2 + $0xc0] sm:$0xf]  ;;  %v7834_v50 = vor.u32 %v10564_v43, %v7833_v42  ;;  %3343 = vmatpush.bf16.msra.mxu2 %v7578_v46 }
  0x46   :  { %v10364_v48 = vld [vmem:[#allocation2 + $0xdc] sm:$0xf0] }
  0x47   :  { %v7289_v49 = vld [vmem:[#allocation2 + $0x2c0] sm:$0xf]  ;;  %v7034_v56 = vor.u32 %v10364_v48, %v7033_v47  ;;  %3356 = vmatpush.bf16.msra.mxu3 %v7834_v50 }
  0x48   :  { %v10428_v51 = vld [vmem:[#allocation2 + $0x2dc] sm:$0xf0] }
  0x49   :  { %v7545_v52 = vld [vmem:[#allocation2 + $0x4c0] sm:$0xf]  ;;  %v7290_v57 = vor.u32 %v10428_v51, %v7289_v49  ;;  %3318 = vmatpush.bf16.msra.mxu0 %v7034_v56 }
  0x4a   :  { %v10492_v53 = vld [vmem:[#allocation2 + $0x4dc] sm:$0xf0] }
  0x4b   :  { %v7801_v54 = vld [vmem:[#allocation2 + $0x6c0] sm:$0xf]  ;;  %v7546_v58 = vor.u32 %v10492_v53, %v7545_v52  ;;  %3331 = vmatpush.bf16.msra.mxu1 %v7290_v57  ;;  %v152_v52 = vld [vmem:[%s11895_s0 + $0x10] sm:$0xff] }
  0x4c   :  { %v10556_v55 = vld [vmem:[#allocation2 + $0x6dc] sm:$0xf0] }
  0x4d   :  { %v7001_v59 = vld [vmem:[#allocation2 + $0x80] sm:$0xf]  ;;  %v7802_v62 = vor.u32 %v10556_v55, %v7801_v54  ;;  %3344 = vmatpush.bf16.msra.mxu2 %v7546_v58  ;;  %v11506_v54 = vpack.c.bf16 %v152_v52, %v152_v52 }
  0x4e   :  { %v10356_v60 = vld [vmem:[#allocation2 + $0x9c] sm:$0xf0] }
  0x4f   :  { %v7257_v61 = vld [vmem:[#allocation2 + $0x280] sm:$0xf]  ;;  %v7002_v4 = vor.u32 %v10356_v60, %v7001_v59  ;;  %3357 = vmatpush.bf16.msra.mxu3 %v7802_v62 }
  0x50   :  { %v10420_v63 = vld [vmem:[#allocation2 + $0x29c] sm:$0xf0] }
  0x51   :  { %v7513_v0 = vld [vmem:[#allocation2 + $0x480] sm:$0xf]  ;;  %v7258_v5 = vor.u32 %v10420_v63, %v7257_v61  ;;  %3319 = vmatpush.bf16.msra.mxu0 %v7002_v4 }
  0x52   :  { %v10484_v1 = vld [vmem:[#allocation2 + $0x49c] sm:$0xf0] }
  0x53   :  { %v7769_v2 = vld [vmem:[#allocation2 + $0x680] sm:$0xf]  ;;  %v7514_v6 = vor.u32 %v10484_v1, %v7513_v0  ;;  %3332 = vmatpush.bf16.msra.mxu1 %v7258_v5 }
  0x54   :  { %v10548_v3 = vld [vmem:[#allocation2 + $0x69c] sm:$0xf0] }
  0x55   :  { %v6969_v7 = vld [vmem:[#allocation2 + $0x40] sm:$0xf]  ;;  %v7770_v10 = vor.u32 %v10548_v3, %v7769_v2  ;;  %3345 = vmatpush.bf16.msra.mxu2 %v7514_v6 }
  0x56   :  { %v10348_v8 = vld [vmem:[#allocation2 + $0x5c] sm:$0xf0] }
  0x57   :  { %v7225_v9 = vld [vmem:[#allocation2 + $0x240] sm:$0xf]  ;;  %v6970_v16 = vor.u32 %v10348_v8, %v6969_v7  ;;  %3358 = vmatpush.bf16.msra.mxu3 %v7770_v10  ;;  %v153_v10 = vld [vmem:[%s11895_s0 + $0x18] sm:$0xff] }
  0x58   :  { %v10412_v11 = vld [vmem:[#allocation2 + $0x25c] sm:$0xf0] }
  0x59   :  { %v7481_v12 = vld [vmem:[#allocation2 + $0x440] sm:$0xf]  ;;  %v7226_v19 = vor.u32 %v10412_v11, %v7225_v9  ;;  %3320 = vmatpush.bf16.msra.mxu0 %v6970_v16  ;;  %v151_v11 = vld [vmem:[%s11895_s0 + $0x8] sm:$0xff]  ;;  %v11520_v16 = vpack.c.bf16 %v153_v10, %v153_v10  ;;  %v10520_v10 = vld [vmem:[#allocation2 + $0x5c4] sm:$0xf] }
  0x5a   :  { %v10476_v13 = vld [vmem:[#allocation2 + $0x45c] sm:$0xf0] }
  0x5b   :  { %v7737_v14 = vld [vmem:[#allocation2 + $0x640] sm:$0xf]  ;;  %v7482_v20 = vor.u32 %v10476_v13, %v7481_v12  ;;  %3333 = vmatpush.bf16.msra.mxu1 %v7226_v19 }
  0x5c   :  { %v10540_v15 = vld [vmem:[#allocation2 + $0x65c] sm:$0xf0] }
  0x5d   :  { %v6937_v17 = vld [vmem:[#allocation2] sm:$0xf]  ;;  %v7738_v24 = vor.u32 %v10540_v15, %v7737_v14  ;;  %3346 = vmatpush.bf16.msra.mxu2 %v7482_v20 }
  0x5e   :  { %v10340_v18 = vld [vmem:[#allocation2 + $0x1c] sm:$0xf0] }
  0x5f   :  { %v7193_v21 = vld [vmem:[#allocation2 + $0x200] sm:$0xf]  ;;  %v6938_v31 = vor.u32 %v10340_v18, %v6937_v17  ;;  %3359 = vmatpush.bf16.msra.mxu3 %v7738_v24  ;;  %v11522_v17 = vpack.c.bf16 %v151_v11, %v151_v11  ;;  %v11428_v11 = vmov 65535  }
  0x60   :  { %v10404_v22 = vld [vmem:[#allocation2 + $0x21c] sm:$0xf0] }
  0x61   :  { %v7449_v23 = vld [vmem:[#allocation2 + $0x400] sm:$0xf]  ;;  %v7194_v35 = vor.u32 %v10404_v22, %v7193_v21  ;;  %3321 = vmatpush.bf16.msra.mxu0 %v6938_v31 }
  0x62   :  { %v10468_v25 = vld [vmem:[#allocation2 + $0x41c] sm:$0xf0] }
  0x63   :  { %v7705_v26 = vld [vmem:[#allocation2 + $0x600] sm:$0xf]  ;;  %v7450_v36 = vor.u32 %v10468_v25, %v7449_v23  ;;  %3334 = vmatpush.bf16.msra.mxu1 %v7194_v35 }
  0x64   :  { %v10532_v27 = vld [vmem:[#allocation2 + $0x61c] sm:$0xf0] }
  0x65   :  { %v8185_v28 = vld [vmem:[#allocation2 + $0x9c0] sm:$0xf]  ;;  %v7706_v39 = vor.u32 %v10532_v27, %v7705_v26  ;;  %3347 = vmatpush.bf16.msra.mxu2 %v7450_v36 }
  0x66   :  { %v10652_v29 = vld [vmem:[#allocation2 + $0x9dc] sm:$0xf0]  ;;  %3335 = vmatmul.bf16.vlgmr.msra.gmra.mxu1 %v11522_v17 }
  0x67   :  { %v8441_v30 = vld [vmem:[#allocation2 + $0xbc0] sm:$0xf]  ;;  %v8186_v40 = vor.u32 %v10652_v29, %v8185_v28  ;;  %3360 = vmatpush.bf16.msra.mxu3 %v7706_v39 }
  0x68   :  { %v10716_v32 = vld [vmem:[#allocation2 + $0xbdc] sm:$0xf0]  ;;  %3348 = vmatmul.bf16.vlgmr.msra.gmra.mxu2 %v11506_v54 }
  0x69   :  { %v8697_v33 = vld [vmem:[#allocation2 + $0xdc0] sm:$0xf]  ;;  %v8442_v41 = vor.u32 %v10716_v32, %v8441_v30  ;;  %3366 = vmatpush.bf16.msrb.mxu0 %v8186_v40 }
  0x6a   :  { %v10780_v34 = vld [vmem:[#allocation2 + $0xddc] sm:$0xf0]  ;;  %3361 = vmatmul.bf16.vlgmr.msra.gmra.mxu3 %v11520_v16 }
  0x6b   :  { %v8953_v37 = vld [vmem:[#allocation2 + $0xfc0] sm:$0xf]  ;;  %v8698_v42 = vor.u32 %v10780_v34, %v8697_v33  ;;  %3379 = vmatpush.bf16.msrb.mxu1 %v8442_v41 }
  0x6c   :  { %v10844_v38 = vld [vmem:[#allocation2 + $0xfdc] sm:$0xf0] }
  0x6d   :  { %v8153_v43 = vld [vmem:[#allocation2 + $0x980] sm:$0xf]  ;;  %v8954_v46 = vor.u32 %v10844_v38, %v8953_v37  ;;  %3392 = vmatpush.bf16.msrb.mxu2 %v8698_v42 }
  0x6e   :  { %v10644_v44 = vld [vmem:[#allocation2 + $0x99c] sm:$0xf0] }
  0x6f   :  { %v8409_v45 = vld [vmem:[#allocation2 + $0xb80] sm:$0xf]  ;;  %v8154_v53 = vor.u32 %v10644_v44, %v8153_v43  ;;  %3405 = vmatpush.bf16.msrb.mxu3 %v8954_v46 }
  0x70   :  { %v10708_v47 = vld [vmem:[#allocation2 + $0xb9c] sm:$0xf0] }
  0x71   :  { %v8665_v48 = vld [vmem:[#allocation2 + $0xd80] sm:$0xf]  ;;  %v8410_v55 = vor.u32 %v10708_v47, %v8409_v45  ;;  %3367 = vmatpush.bf16.msrb.mxu0 %v8154_v53 }
  0x72   :  { %v10772_v49 = vld [vmem:[#allocation2 + $0xd9c] sm:$0xf0] }
  0x73   :  { %v8921_v50 = vld [vmem:[#allocation2 + $0xf80] sm:$0xf]  ;;  %v8666_v56 = vor.u32 %v10772_v49, %v8665_v48  ;;  %3380 = vmatpush.bf16.msrb.mxu1 %v8410_v55 }
  0x74   :  { %v10836_v51 = vld [vmem:[#allocation2 + $0xf9c] sm:$0xf0] }
  0x75   :  { %v8121_v57 = vld [vmem:[#allocation2 + $0x940] sm:$0xf]  ;;  %v8922_v60 = vor.u32 %v10836_v51, %v8921_v50  ;;  %3393 = vmatpush.bf16.msrb.mxu2 %v8666_v56 }
  0x76   :  { %v10636_v58 = vld [vmem:[#allocation2 + $0x95c] sm:$0xf0] }
  0x77   :  { %v8377_v59 = vld [vmem:[#allocation2 + $0xb40] sm:$0xf]  ;;  %v8122_v2 = vor.u32 %v10636_v58, %v8121_v57  ;;  %3406 = vmatpush.bf16.msrb.mxu3 %v8922_v60 }
  0x78   :  { %v10700_v61 = vld [vmem:[#allocation2 + $0xb5c] sm:$0xf0] }
  0x79   :  { %v8633_v62 = vld [vmem:[#allocation2 + $0xd40] sm:$0xf]  ;;  %v8378_v6 = vor.u32 %v10700_v61, %v8377_v59  ;;  %3368 = vmatpush.bf16.msrb.mxu0 %v8122_v2 }
  0x7a   :  { %v10764_v63 = vld [vmem:[#allocation2 + $0xd5c] sm:$0xf0] }
  0x7b   :  { %v8889_v0 = vld [vmem:[#allocation2 + $0xf40] sm:$0xf]  ;;  %v8634_v7 = vor.u32 %v10764_v63, %v8633_v62  ;;  %3381 = vmatpush.bf16.msrb.mxu1 %v8378_v6 }
  0x7c   :  { %v10828_v1 = vld [vmem:[#allocation2 + $0xf5c] sm:$0xf0] }
  0x7d   :  { %v8089_v3 = vld [vmem:[#allocation2 + $0x900] sm:$0xf]  ;;  %v8890_v12 = vor.u32 %v10828_v1, %v8889_v0  ;;  %3394 = vmatpush.bf16.msrb.mxu2 %v8634_v7  ;;  %v10392_v7 = vld [vmem:[#allocation2 + $0x1c4] sm:$0xf] }
  0x7e   :  { %v10628_v4 = vld [vmem:[#allocation2 + $0x91c] sm:$0xf0] }
  0x7f   :  { %v150_v5 = vld [vmem:[%s11895_s0] sm:$0xff]  ;;  %v8090_v20 = vor.u32 %v10628_v4, %v8089_v3  ;;  %3407 = vmatpush.bf16.msrb.mxu3 %v8890_v12  ;;  %v3288_v12 = vsel %vm3286_vm0, 4294967295, %v11428_v11 }
  0x80   :  { %v8345_v8 = vld [vmem:[#allocation2 + $0xb00] sm:$0xf]  ;;  %v11512_v9 = vpack.c.bf16 %v150_v5, %v150_v5 }
  0x81   :  { %v10692_v13 = vld [vmem:[#allocation2 + $0xb1c] sm:$0xf0]  ;;  %3369 = vmatpush.bf16.msrb.mxu0 %v8090_v20 }
  0x82   :  { %v8601_v14 = vld [vmem:[#allocation2 + $0xd00] sm:$0xf]  ;;  %3322 = vmatmul.bf16.vlgmr.msra.gmra.mxu0 %v11512_v9  ;;  %v8346_v21 = vor.u32 %v10692_v13, %v8345_v8  ;;  %v7163_v8 = vld [vmem:[#allocation2 + $0x1e0] sm:$0xf0] }
  0x83   :  { %v10756_v15 = vld [vmem:[#allocation2 + $0xd1c] sm:$0xf0] }
  0x84   :  { %v8857_v18 = vld [vmem:[#allocation2 + $0xf00] sm:$0xf]  ;;  %v8602_v22 = vor.u32 %v10756_v15, %v8601_v14  ;;  %3382 = vmatpush.bf16.msrb.mxu1 %v8346_v21  ;;  %v7675_v14 = vld [vmem:[#allocation2 + $0x5e0] sm:$0xf0]  ;;  %v156_v21 = vld [vmem:[%s11895_s0 + $0x30] sm:$0xff] }
  0x85   :  { %v10820_v19 = vld [vmem:[#allocation2 + $0xf1c] sm:$0xf0]  ;;  %v10584_v15 = vld [vmem:[#allocation2 + $0x7c4] sm:$0xf] }
  0x86   :  { %v8057_v23 = vld [vmem:[#allocation2 + $0x8c0] sm:$0xf]  ;;  %v8858_v26 = vor.u32 %v10820_v19, %v8857_v18  ;;  %3395 = vmatpush.bf16.msrb.mxu2 %v8602_v22  ;;  %v7931_v18 = vld [vmem:[#allocation2 + $0x7e0] sm:$0xf0] }
  0x87   :  { %v10620_v24 = vld [vmem:[#allocation2 + $0x8dc] sm:$0xf0] }
  0x88   :  { %v8313_v25 = vld [vmem:[#allocation2 + $0xac0] sm:$0xf]  ;;  %v8058_v32 = vor.u32 %v10620_v24, %v8057_v23  ;;  %3408 = vmatpush.bf16.msrb.mxu3 %v8858_v26  ;;  %v11538_v26 = vsel %vm3287_vm1, %v3288_v12, 0 }
  0x89   :  { %v10684_v27 = vld [vmem:[#allocation2 + $0xadc] sm:$0xf0] }
  0x8a   :  { %v8569_v28 = vld [vmem:[#allocation2 + $0xcc0] sm:$0xf]  ;;  %v8314_v33 = vor.u32 %v10684_v27, %v8313_v25  ;;  %3370 = vmatpush.bf16.msrb.mxu0 %v8058_v32  ;;  %v7166_v25 = vor.u32 %v10392_v7, %v7163_v8  ;;  %v10456_v27 = vld [vmem:[#allocation2 + $0x3c4] sm:$0xf] }
  0x8b   :  { %v10748_v29 = vld [vmem:[#allocation2 + $0xcdc] sm:$0xf0]  ;;  %v10384_v32 = vld [vmem:[#allocation2 + $0x184] sm:$0xf] }
  0x8c   :  { %v8825_v30 = vld [vmem:[#allocation2 + $0xec0] sm:$0xf]  ;;  %v8570_v34 = vor.u32 %v10748_v29, %v8569_v28  ;;  %3383 = vmatpush.bf16.msrb.mxu1 %v8314_v33  ;;  %v7419_v28 = vld [vmem:[#allocation2 + $0x3e0] sm:$0xf0]  ;;  %v157_v29 = vld [vmem:[%s11895_s0 + $0x38] sm:$0xff] }
  0x8d   :  { %v10812_v31 = vld [vmem:[#allocation2 + $0xedc] sm:$0xf0]  ;;  %v7131_v33 = vld [vmem:[#allocation2 + $0x1a0] sm:$0xf0] }
  0x8e   :  { %v8025_v35 = vld [vmem:[#allocation2 + $0x880] sm:$0xf]  ;;  %v8826_v38 = vor.u32 %v10812_v31, %v8825_v30  ;;  %3396 = vmatpush.bf16.msrb.mxu2 %v8570_v34  ;;  %v7678_v30 = vor.u32 %v10520_v10, %v7675_v14  ;;  %v7934_v31 = vor.u32 %v10584_v15, %v7931_v18  ;;  %v10512_v34 = vld [vmem:[#allocation2 + $0x584] sm:$0xf] }
  0x8f   :  { %v10612_v36 = vld [vmem:[#allocation2 + $0x89c] sm:$0xf0]  ;;  %v10432_v8 = vld [vmem:[#allocation2 + $0x304] sm:$0xf] }
  0x90   :  { %v8281_v37 = vld [vmem:[#allocation2 + $0xa80] sm:$0xf]  ;;  %v8026_v44 = vor.u32 %v10612_v36, %v8025_v35  ;;  %3409 = vmatpush.bf16.msrb.mxu3 %v8826_v38  ;;  %v11543_v35 = vpack.c.bf16 %v156_v21, %v156_v21  ;;  %v7643_v36 = vld [vmem:[#allocation2 + $0x5a0] sm:$0xf0] }
  0x91   :  { %v10676_v39 = vld [vmem:[#allocation2 + $0xa9c] sm:$0xf0]  ;;  %v7899_v38 = vld [vmem:[#allocation2 + $0x7a0] sm:$0xf0] }
  0x92   :  { %v8537_v40 = vld [vmem:[#allocation2 + $0xc80] sm:$0xf]  ;;  %v8282_v46 = vor.u32 %v10676_v39, %v8281_v37  ;;  %3371 = vmatpush.bf16.msrb.mxu0 %v8026_v44  ;;  %v10576_v37 = vld [vmem:[#allocation2 + $0x784] sm:$0xf]  ;;  %v7134_v44 = vor.u32 %v10384_v32, %v7131_v33 }
  0x93   :  { %v10740_v41 = vld [vmem:[#allocation2 + $0xc9c] sm:$0xf0]  ;;  %v7323_v10 = vld [vmem:[#allocation2 + $0x320] sm:$0xf0] }
  0x94   :  { %v8793_v42 = vld [vmem:[#allocation2 + $0xe80] sm:$0xf]  ;;  %v8538_v47 = vor.u32 %v10740_v41, %v8537_v40  ;;  %3384 = vmatpush.bf16.msrb.mxu1 %v8282_v46  ;;  %v11548_v41 = vpack.c.bf16 %v157_v29, %v157_v29  ;;  %v7387_v46 = vld [vmem:[#allocation2 + $0x3a0] sm:$0xf0] }
  0x95   :  { %v10804_v43 = vld [vmem:[#allocation2 + $0xe9c] sm:$0xf0]  ;;  %v7035_v14 = vld [vmem:[#allocation2 + $0xe0] sm:$0xf0] }
  0x96   :  { %v7993_v45 = vld [vmem:[#allocation2 + $0x840] sm:$0xf]  ;;  %v8794_v51 = vor.u32 %v10804_v43, %v8793_v42  ;;  %3397 = vmatpush.bf16.msrb.mxu2 %v8538_v47  ;;  %v155_v42 = vld [vmem:[%s11895_s0 + $0x28] sm:$0xff]  ;;  %v7422_v43 = vor.u32 %v10456_v27, %v7419_v28  ;;  %v7646_v47 = vor.u32 %v10512_v34, %v7643_v36  ;;  %v10488_v15 = vld [vmem:[#allocation2 + $0x4c4] sm:$0xf] }
  0x97   :  { %v10604_v48 = vld [vmem:[#allocation2 + $0x85c] sm:$0xf0]  ;;  %v7547_v18 = vld [vmem:[#allocation2 + $0x4e0] sm:$0xf0] }
  0x98   :  { %v8249_v49 = vld [vmem:[#allocation2 + $0xa40] sm:$0xf]  ;;  %v7994_v58 = vor.u32 %v10604_v48, %v7993_v45  ;;  %3410 = vmatpush.bf16.msrb.mxu3 %v8794_v51  ;;  %v10448_v45 = vld [vmem:[#allocation2 + $0x384] sm:$0xf]  ;;  %v7902_v48 = vor.u32 %v10576_v37, %v7899_v38  ;;  %v7550_v27 = vor.u32 %v10488_v15, %v7547_v18 }
  0x99   :  { %v10668_v50 = vld [vmem:[#allocation2 + $0xa5c] sm:$0xf0]  ;;  %v10504_v51 = vld [vmem:[#allocation2 + $0x544] sm:$0xf] }
  0x9a   :  { %v8505_v52 = vld [vmem:[#allocation2 + $0xc40] sm:$0xf]  ;;  %v8250_v62 = vor.u32 %v10668_v50, %v8249_v49  ;;  %3372 = vmatpush.bf16.msrb.mxu0 %v7994_v58  ;;  %v10376_v49 = vld [vmem:[#allocation2 + $0x144] sm:$0xf]  ;;  %v7390_v58 = vor.u32 %v10448_v45, %v7387_v46 }
  0x9b   :  { %v10732_v53 = vld [vmem:[#allocation2 + $0xc5c] sm:$0xf0]  ;;  %v7099_v50 = vld [vmem:[#allocation2 + $0x160] sm:$0xf0] }
  0x9c   :  { %v11527_v55 = vld [vmem:[#allocation2 + $0x1000] sm:$0x33]  ;;  %v8506_v63 = vor.u32 %v10732_v53, %v8505_v52  ;;  %3385 = vmatpush.bf16.msrb.mxu1 %v8250_v62 }
  0x9d   :  { %v8761_v56 = vld [vmem:[#allocation2 + $0xe40] sm:$0xf]  ;;  %v2242_v3 = vunpack.c.l.b16 %v11527_v55  ;;  %v7611_v52 = vld [vmem:[#allocation2 + $0x560] sm:$0xf0] }
  0x9e   :  { %v10796_v57 = vld [vmem:[#allocation2 + $0xe5c] sm:$0xf0]  ;;  %3398 = vmatpush.bf16.msrb.mxu2 %v8506_v63  ;;  %v10568_v53 = vld [vmem:[#allocation2 + $0x744] sm:$0xf]  ;;  %v7614_v62 = vor.u32 %v10504_v51, %v7611_v52 }
  0x9f   :  { %v7961_v59 = vld [vmem:[#allocation2 + $0x800] sm:$0xf]  ;;  %v8762_v4 = vor.u32 %v10796_v57, %v8761_v56  ;;  %v2762_v22 = vpack.c.b16 %v2242_v3, %v2242_v3  ;;  %v7867_v56 = vld [vmem:[#allocation2 + $0x760] sm:$0xf0]  ;;  %v11555_v57 = vpack.c.bf16 %v155_v42, %v155_v42 }
  0xa0   :  { %v10596_v60 = vld [vmem:[#allocation2 + $0x81c] sm:$0xf0]  ;;  %v7870_v63 = vor.u32 %v10568_v53, %v7867_v56  ;;  %v7579_v3 = vld [vmem:[#allocation2 + $0x520] sm:$0xf0] }
  0xa1   :  { %v8217_v61 = vld [vmem:[#allocation2 + $0xa00] sm:$0xf]  ;;  %v7962_v13 = vor.u32 %v10596_v60, %v7961_v59  ;;  %3411 = vmatpush.bf16.msrb.mxu3 %v8762_v4  ;;  %v3291_v40 = vand.u32 %v11538_v26, %v2762_v22  ;;  %v7102_v59 = vor.u32 %v10376_v49, %v7099_v50  ;;  %v10440_v60 = vld [vmem:[#allocation2 + $0x344] sm:$0xf]  ;;  %v7326_v22 = vor.u32 %v10432_v8, %v7323_v10 }
  0xa2   :  { %v10660_v0 = vld [vmem:[#allocation2 + $0xa1c] sm:$0xf0]  ;;  %v10560_v4 = vld [vmem:[#allocation2 + $0x704] sm:$0xf] }
  0xa3   :  { %v8473_v1 = vld [vmem:[#allocation2 + $0xc00] sm:$0xf]  ;;  %v8218_v19 = vor.u32 %v10660_v0, %v8217_v61  ;;  %3373 = vmatpush.bf16.msrb.mxu0 %v7962_v13  ;;  %v7355_v61 = vld [vmem:[#allocation2 + $0x360] sm:$0xf0] }
  0xa4   :  { %v10724_v2 = vld [vmem:[#allocation2 + $0xc1c] sm:$0xf0]  ;;  %v10368_v0 = vld [vmem:[#allocation2 + $0x104] sm:$0xf] }
  0xa5   :  { %v8729_v5 = vld [vmem:[#allocation2 + $0xe00] sm:$0xf]  ;;  %v8474_v20 = vor.u32 %v10724_v2, %v8473_v1  ;;  %3386 = vmatpush.bf16.msrb.mxu1 %v8218_v19  ;;  %v7067_v1 = vld [vmem:[#allocation2 + $0x120] sm:$0xf0] }
  0xa6   :  { %v10788_v6 = vld [vmem:[#allocation2 + $0xe1c] sm:$0xf0]  ;;  %v10496_v2 = vld [vmem:[#allocation2 + $0x504] sm:$0xf]  ;;  %v7070_v7 = vor.u32 %v10368_v0, %v7067_v1 }
  0xa7   :  { %v154_v23 = vld [vmem:[%s11895_s0 + $0x20] sm:$0xff]  ;;  %v8730_v24 = vor.u32 %v10788_v6, %v8729_v5  ;;  %3399 = vmatpush.bf16.msrb.mxu2 %v8474_v20  ;;  %3470 = vmatpush.bf16.msra.mxu0 %v7934_v31  ;;  %v7358_v6 = vor.u32 %v10440_v60, %v7355_v61  ;;  %v7582_v11 = vor.u32 %v10496_v2, %v7579_v3 }
  0xa8   :  { %v11545_v39 = vpack.c.bf16 %v154_v23, %v154_v23  ;;  %3387 = vmatmul.bf16.vlgmr.msrb.gmra.mxu1 %v11555_v57  ;;  %v7835_v5 = vld [vmem:[#allocation2 + $0x720] sm:$0xf0] }
  0xa9   :  { %3412 = vmatpush.bf16.msrb.mxu3 %v8730_v24  ;;  %3431 = vmatpush.bf16.msra.mxu1 %v7166_v25  ;;  %v7838_v12 = vor.u32 %v10560_v4, %v7835_v5  ;;  %v10360_v13 = vld [vmem:[#allocation2 + $0xc4] sm:$0xf] }
  0xaa   :  { %3400 = vmatmul.bf16.vlgmr.msrb.gmra.mxu2 %v11543_v35  ;;  %3374 = vmatmul.bf16.vlgmr.msrb.gmra.mxu0 %v11545_v39  ;;  %v10552_v19 = vld [vmem:[#allocation2 + $0x6c4] sm:$0xf]  ;;  %v7038_v23 = vor.u32 %v10360_v13, %v7035_v14 }
  0xab   :  { %3425 = vmatpush.bf16.msra.mxu2 %v3291_v40  ;;  %3471 = vmatpush.bf16.msra.mxu0 %v7902_v48  ;;  %v7803_v20 = vld [vmem:[#allocation2 + $0x6e0] sm:$0xf0] }
  0xac   :  { %3413 = vmatmul.bf16.vlgmr.msrb.gmra.mxu3 %v11548_v41  ;;  %v158_v21 = vld [vmem:[%s11895_s0 + $0x40] sm:$0xff]  ;;  %v7806_v28 = vor.u32 %v10552_v19, %v7803_v20 }
  0xad   :  { %3457 = vmatpush.bf16.msra.mxu3 %v7678_v30  ;;  %3432 = vmatpush.bf16.msra.mxu1 %v7134_v44  ;;  %v10424_v24 = vld [vmem:[#allocation2 + $0x2c4] sm:$0xf]  ;;  %v11562_v32 = vpack.c.bf16 %v158_v21, %v158_v21 }
  0xae   :  { %v7291_v25 = vld [vmem:[#allocation2 + $0x2e0] sm:$0xf0] }
  0xaf   :  { %3444 = vmatpush.bf16.msrb.mxu2 %v7422_v43  ;;  %3472 = vmatpush.bf16.msra.mxu0 %v7870_v63  ;;  %v10352_v29 = vld [vmem:[#allocation2 + $0x84] sm:$0xf]  ;;  %v7294_v37 = vor.u32 %v10424_v24, %v7291_v25 }
  0xb0   :  { %v7003_v30 = vld [vmem:[#allocation2 + $0xa0] sm:$0xf0] }
  0xb1   :  { %3458 = vmatpush.bf16.msra.mxu3 %v7646_v47  ;;  %3433 = vmatpush.bf16.msra.mxu1 %v7102_v59  ;;  %v10480_v31 = vld [vmem:[#allocation2 + $0x484] sm:$0xf]  ;;  %v7006_v38 = vor.u32 %v10352_v29, %v7003_v30 }
  0xb2   :  { %v7515_v33 = vld [vmem:[#allocation2 + $0x4a0] sm:$0xf0] }
  0xb3   :  { %3445 = vmatpush.bf16.msrb.mxu2 %v7390_v58  ;;  %3473 = vmatpush.bf16.msra.mxu0 %v7838_v12  ;;  %v10544_v34 = vld [vmem:[#allocation2 + $0x684] sm:$0xf]  ;;  %v7518_v43 = vor.u32 %v10480_v31, %v7515_v33 }
  0xb4   :  { %v7771_v36 = vld [vmem:[#allocation2 + $0x6a0] sm:$0xf0] }
  0xb5   :  { %3459 = vmatpush.bf16.msra.mxu3 %v7614_v62  ;;  %3434 = vmatpush.bf16.msra.mxu1 %v7070_v7  ;;  %v10416_v40 = vld [vmem:[#allocation2 + $0x284] sm:$0xf]  ;;  %v7774_v44 = vor.u32 %v10544_v34, %v7771_v36 }
  0xb6   :  { %v7259_v42 = vld [vmem:[#allocation2 + $0x2a0] sm:$0xf0] }
  0xb7   :  { %3446 = vmatpush.bf16.msrb.mxu2 %v7358_v6  ;;  %3474 = vmatpush.bf16.msra.mxu0 %v7806_v28  ;;  %v10344_v45 = vld [vmem:[#allocation2 + $0x44] sm:$0xf]  ;;  %v7262_v52 = vor.u32 %v10416_v40, %v7259_v42 }
  0xb8   :  { %v6971_v46 = vld [vmem:[#allocation2 + $0x60] sm:$0xf0] }
  0xb9   :  { %3460 = vmatpush.bf16.msra.mxu3 %v7582_v11  ;;  %3435 = vmatpush.bf16.msra.mxu1 %v7038_v23  ;;  %v10472_v47 = vld [vmem:[#allocation2 + $0x444] sm:$0xf]  ;;  %v6974_v53 = vor.u32 %v10344_v45, %v6971_v46 }
  0xba   :  { %8983 = vmatmul.msk.bf16.vlgmr.msra.gmra.mxu2 %vm3282_vm2, %v11562_v32  ;;  %v7483_v48 = vld [vmem:[#allocation2 + $0x460] sm:$0xf0] }
  0xbb   :  { %3447 = vmatpush.bf16.msrb.mxu2 %v7326_v22  ;;  %v10536_v49 = vld [vmem:[#allocation2 + $0x644] sm:$0xf]  ;;  %3475 = vmatpush.bf16.msra.mxu0 %v7774_v44  ;;  %v7486_v60 = vor.u32 %v10472_v47, %v7483_v48 }
  0xbc   :  { %v7739_v50 = vld [vmem:[#allocation2 + $0x660] sm:$0xf0] }
  0xbd   :  { %3461 = vmatpush.bf16.msra.mxu3 %v7550_v27  ;;  %v10408_v51 = vld [vmem:[#allocation2 + $0x244] sm:$0xf]  ;;  %3436 = vmatpush.bf16.msra.mxu1 %v7006_v38  ;;  %v7742_v61 = vor.u32 %v10536_v49, %v7739_v50 }
  0xbe   :  { %v7227_v56 = vld [vmem:[#allocation2 + $0x260] sm:$0xf0] }
  0xbf   :  { %3448 = vmatpush.bf16.msrb.mxu2 %v7294_v37  ;;  %v10336_v58 = vld [vmem:[#allocation2 + $0x4] sm:$0xf]  ;;  %v7230_v6 = vor.u32 %v10408_v51, %v7227_v56  ;;  %3476 = vmatpush.bf16.msra.mxu0 %v7742_v61 }
  0xc0   :  { %v6939_v59 = vld [vmem:[#allocation2 + $0x20] sm:$0xf0] }
  0xc1   :  { %3462 = vmatpush.bf16.msra.mxu3 %v7518_v43  ;;  %v10464_v62 = vld [vmem:[#allocation2 + $0x404] sm:$0xf]  ;;  %3437 = vmatpush.bf16.msra.mxu1 %v6974_v53  ;;  %v6942_v7 = vor.u32 %v10336_v58, %v6939_v59 }
  0xc2   :  { %v7451_v63 = vld [vmem:[#allocation2 + $0x420] sm:$0xf0] }
  0xc3   :  { %v10528_v0 = vld [vmem:[#allocation2 + $0x604] sm:$0xf]  ;;  %3449 = vmatpush.bf16.msrb.mxu2 %v7262_v52  ;;  %v7454_v11 = vor.u32 %v10464_v62, %v7451_v63 }
  0xc4   :  { %v7707_v1 = vld [vmem:[#allocation2 + $0x620] sm:$0xf0] }
  0xc5   :  { %v10648_v2 = vld [vmem:[#allocation2 + $0x9c4] sm:$0xf]  ;;  %3463 = vmatpush.bf16.msra.mxu3 %v7486_v60  ;;  %v7710_v12 = vor.u32 %v10528_v0, %v7707_v1  ;;  %3438 = vmatpush.bf16.msra.mxu1 %v6942_v7 }
  0xc6   :  { %v8187_v3 = vld [vmem:[#allocation2 + $0x9e0] sm:$0xf0] }
  0xc7   :  { %v10776_v4 = vld [vmem:[#allocation2 + $0xdc4] sm:$0xf]  ;;  %v8190_v15 = vor.u32 %v10648_v2, %v8187_v3  ;;  %3450 = vmatpush.bf16.msrb.mxu2 %v7230_v6  ;;  %3477 = vmatpush.bf16.msra.mxu0 %v7710_v12 }
  0xc8   :  { %v8699_v5 = vld [vmem:[#allocation2 + $0xde0] sm:$0xf0]  ;;  %3439 = vmatmul.bf16.vlgmr.msra.gmra.mxu1 %v11512_v9 }
  0xc9   :  { %v10840_v8 = vld [vmem:[#allocation2 + $0xfc4] sm:$0xf]  ;;  %v8702_v18 = vor.u32 %v10776_v4, %v8699_v5  ;;  %3464 = vmatpush.bf16.msra.mxu3 %v7454_v11  ;;  %3483 = vmatpush.bf16.msrb.mxu1 %v8190_v15 }
  0xca   :  { %v8955_v10 = vld [vmem:[#allocation2 + $0xfe0] sm:$0xf0]  ;;  %3478 = vmatmul.bf16.vlgmr.msra.gmra.mxu0 %v11520_v16 }
  0xcb   :  { %v10400_v13 = vld [vmem:[#allocation2 + $0x204] sm:$0xf]  ;;  %v8958_v22 = vor.u32 %v10840_v8, %v8955_v10 }
  0xcc   :  { %v7195_v14 = vld [vmem:[#allocation2 + $0x220] sm:$0xf0]  ;;  %3465 = vmatmul.bf16.vlgmr.msra.gmra.mxu3 %v11506_v54 }
  0xcd   :  { %v10712_v19 = vld [vmem:[#allocation2 + $0xbc4] sm:$0xf]  ;;  %v7198_v27 = vor.u32 %v10400_v13, %v7195_v14  ;;  %3509 = vmatpush.bf16.msrb.mxu3 %v8702_v18  ;;  %3522 = vmatpush.bf16.msrb.mxu0 %v8958_v22 }
  0xce   :  { %v8443_v20 = vld [vmem:[#allocation2 + $0xbe0] sm:$0xf0] }
  0xcf   :  { %v10640_v21 = vld [vmem:[#allocation2 + $0x984] sm:$0xf]  ;;  %v8446_v30 = vor.u32 %v10712_v19, %v8443_v20  ;;  %3451 = vmatpush.bf16.msrb.mxu2 %v7198_v27 }
  0xd0   :  { %v8155_v23 = vld [vmem:[#allocation2 + $0x9a0] sm:$0xf0] }
  0xd1   :  { %v10768_v24 = vld [vmem:[#allocation2 + $0xd84] sm:$0xf]  ;;  %v8158_v31 = vor.u32 %v10640_v21, %v8155_v23 }
  0xd2   :  { %v8667_v25 = vld [vmem:[#allocation2 + $0xda0] sm:$0xf0]  ;;  %3452 = vmatmul.bf16.vlgmr.msrb.gmra.mxu2 %v11522_v17 }
  0xd3   :  { %v10832_v28 = vld [vmem:[#allocation2 + $0xf84] sm:$0xf]  ;;  %v8670_v33 = vor.u32 %v10768_v24, %v8667_v25  ;;  %3496 = vmatpush.bf16.msra.mxu2 %v8446_v30  ;;  %3484 = vmatpush.bf16.msrb.mxu1 %v8158_v31 }
  0xd4   :  { %v8923_v29 = vld [vmem:[#allocation2 + $0xfa0] sm:$0xf0] }
  0xd5   :  { %v10704_v34 = vld [vmem:[#allocation2 + $0xb84] sm:$0xf]  ;;  %v8926_v38 = vor.u32 %v10832_v28, %v8923_v29  ;;  %3510 = vmatpush.bf16.msrb.mxu3 %v8670_v33 }
  0xd6   :  { %v8411_v36 = vld [vmem:[#allocation2 + $0xba0] sm:$0xf0] }
  0xd7   :  { %v10632_v37 = vld [vmem:[#allocation2 + $0x944] sm:$0xf]  ;;  %v8414_v46 = vor.u32 %v10704_v34, %v8411_v36  ;;  %3523 = vmatpush.bf16.msrb.mxu0 %v8926_v38 }
  0xd8   :  { %v8123_v40 = vld [vmem:[#allocation2 + $0x960] sm:$0xf0] }
  0xd9   :  { %v10760_v42 = vld [vmem:[#allocation2 + $0xd44] sm:$0xf]  ;;  %v8126_v47 = vor.u32 %v10632_v37, %v8123_v40  ;;  %3497 = vmatpush.bf16.msra.mxu2 %v8414_v46  ;;  %v2243_v40 = vunpack.c.h.b16 %v11527_v55 }
  0xda   :  { %v8635_v43 = vld [vmem:[#allocation2 + $0xd60] sm:$0xf0] }
  0xdb   :  { %v10824_v44 = vld [vmem:[#allocation2 + $0xf44] sm:$0xf]  ;;  %v8638_v48 = vor.u32 %v10760_v42, %v8635_v43  ;;  %3485 = vmatpush.bf16.msrb.mxu1 %v8126_v47 }
  0xdc   :  { %v8891_v45 = vld [vmem:[#allocation2 + $0xf60] sm:$0xf0] }
  0xdd   :  { %v10696_v49 = vld [vmem:[#allocation2 + $0xb44] sm:$0xf]  ;;  %v8894_v52 = vor.u32 %v10824_v44, %v8891_v45  ;;  %3511 = vmatpush.bf16.msrb.mxu3 %v8638_v48 }
  0xde   :  { %v8379_v50 = vld [vmem:[#allocation2 + $0xb60] sm:$0xf0] }
  0xdf   :  { %v10624_v51 = vld [vmem:[#allocation2 + $0x904] sm:$0xf]  ;;  %v8382_v61 = vor.u32 %v10696_v49, %v8379_v50  ;;  %3524 = vmatpush.bf16.msrb.mxu0 %v8894_v52 }
  0xe0   :  { %v8091_v53 = vld [vmem:[#allocation2 + $0x920] sm:$0xf0] }
  0xe1   :  { %v10752_v56 = vld [vmem:[#allocation2 + $0xd04] sm:$0xf]  ;;  %v8094_v62 = vor.u32 %v10624_v51, %v8091_v53  ;;  %3498 = vmatpush.bf16.msra.mxu2 %v8382_v61  ;;  %v10525_v61 = vld [vmem:[#allocation2 + $0x5e4] sm:$0xf0] }
  0xe2   :  { %v8603_v58 = vld [vmem:[#allocation2 + $0xd20] sm:$0xf0] }
  0xe3   :  { %v10816_v59 = vld [vmem:[#allocation2 + $0xf04] sm:$0xf]  ;;  %v8606_v63 = vor.u32 %v10752_v56, %v8603_v58  ;;  %3486 = vmatpush.bf16.msrb.mxu1 %v8094_v62  ;;  %v7937_v56 = vld [vmem:[#allocation2 + $0x7c8] sm:$0xf] }
  0xe4   :  { %v8859_v60 = vld [vmem:[#allocation2 + $0xf20] sm:$0xf0]  ;;  %v10589_v58 = vld [vmem:[#allocation2 + $0x7e4] sm:$0xf0] }
  0xe5   :  { %v10688_v0 = vld [vmem:[#allocation2 + $0xb04] sm:$0xf]  ;;  %v8862_v3 = vor.u32 %v10816_v59, %v8859_v60  ;;  %3512 = vmatpush.bf16.msrb.mxu3 %v8606_v63  ;;  %v2763_v59 = vpack.c.b16 %v2243_v40, %v2243_v40  ;;  %v7681_v60 = vld [vmem:[#allocation2 + $0x5c8] sm:$0xf] }
  0xe6   :  { %v8347_v1 = vld [vmem:[#allocation2 + $0xb20] sm:$0xf0] }
  0xe7   :  { %v10616_v2 = vld [vmem:[#allocation2 + $0x8c4] sm:$0xf]  ;;  %v8350_v10 = vor.u32 %v10688_v0, %v8347_v1  ;;  %3525 = vmatpush.bf16.msrb.mxu0 %v8862_v3  ;;  %v7938_v3 = vor.u32 %v10589_v58, %v7937_v56  ;;  %v10437_v56 = vld [vmem:[#allocation2 + $0x324] sm:$0xf0] }
  0xe8   :  { %v8059_v4 = vld [vmem:[#allocation2 + $0x8e0] sm:$0xf0]  ;;  %v7809_v58 = vld [vmem:[#allocation2 + $0x6c8] sm:$0xf] }
  0xe9   :  { %v10744_v5 = vld [vmem:[#allocation2 + $0xcc4] sm:$0xf]  ;;  %v8062_v11 = vor.u32 %v10616_v2, %v8059_v4  ;;  %3499 = vmatpush.bf16.msra.mxu2 %v8350_v10  ;;  %v7169_v4 = vld [vmem:[#allocation2 + $0x1c8] sm:$0xf] }
  0xea   :  { %v8571_v6 = vld [vmem:[#allocation2 + $0xce0] sm:$0xf0]  ;;  %v10461_v10 = vld [vmem:[#allocation2 + $0x3e4] sm:$0xf0] }
  0xeb   :  { %v10808_v7 = vld [vmem:[#allocation2 + $0xec4] sm:$0xf]  ;;  %v8574_v12 = vor.u32 %v10744_v5, %v8571_v6  ;;  %3487 = vmatpush.bf16.msrb.mxu1 %v8062_v11  ;;  %v10397_v5 = vld [vmem:[#allocation2 + $0x1e4] sm:$0xf0] }
  0xec   :  { %v8827_v8 = vld [vmem:[#allocation2 + $0xee0] sm:$0xf0]  ;;  %v7425_v6 = vld [vmem:[#allocation2 + $0x3c8] sm:$0xf] }
  0xed   :  { %v10680_v13 = vld [vmem:[#allocation2 + $0xac4] sm:$0xf]  ;;  %v8830_v18 = vor.u32 %v10808_v7, %v8827_v8  ;;  %3513 = vmatpush.bf16.msrb.mxu3 %v8574_v12  ;;  %v7682_v7 = vor.u32 %v10525_v61, %v7681_v60  ;;  %v3294_v8 = vand.u32 %v11538_v26, %v2763_v59  ;;  %v7905_v11 = vld [vmem:[#allocation2 + $0x788] sm:$0xf] }
  0xee   :  { %v8315_v14 = vld [vmem:[#allocation2 + $0xae0] sm:$0xf0]  ;;  %v10581_v12 = vld [vmem:[#allocation2 + $0x7a4] sm:$0xf0] }
  0xef   :  { %v10608_v15 = vld [vmem:[#allocation2 + $0x884] sm:$0xf]  ;;  %v8318_v24 = vor.u32 %v10680_v13, %v8315_v14  ;;  %3526 = vmatpush.bf16.msrb.mxu0 %v8830_v18  ;;  %v7649_v14 = vld [vmem:[#allocation2 + $0x588] sm:$0xf]  ;;  %v7170_v18 = vor.u32 %v10397_v5, %v7169_v4 }
  0xf0   :  { %v8027_v19 = vld [vmem:[#allocation2 + $0x8a0] sm:$0xf0]  ;;  %v10557_v59 = vld [vmem:[#allocation2 + $0x6e4] sm:$0xf0] }
  0xf1   :  { %v10736_v20 = vld [vmem:[#allocation2 + $0xc84] sm:$0xf]  ;;  %v8030_v25 = vor.u32 %v10608_v15, %v8027_v19  ;;  %3500 = vmatpush.bf16.msra.mxu2 %v8318_v24  ;;  %v10517_v15 = vld [vmem:[#allocation2 + $0x5a4] sm:$0xf0]  ;;  %v7426_v19 = vor.u32 %v10461_v10, %v7425_v6 }
  0xf2   :  { %v8539_v21 = vld [vmem:[#allocation2 + $0xca0] sm:$0xf0]  ;;  %v7650_v24 = vor.u32 %v10517_v15, %v7649_v14  ;;  %v10493_v60 = vld [vmem:[#allocation2 + $0x4e4] sm:$0xf0] }
  0xf3   :  { %v10800_v22 = vld [vmem:[#allocation2 + $0xe84] sm:$0xf]  ;;  %v8542_v27 = vor.u32 %v10736_v20, %v8539_v21  ;;  %3488 = vmatpush.bf16.msrb.mxu1 %v8030_v25  ;;  %v7906_v20 = vor.u32 %v10581_v12, %v7905_v11  ;;  %v7137_v21 = vld [vmem:[#allocation2 + $0x188] sm:$0xf] }
  0xf4   :  { %v8795_v23 = vld [vmem:[#allocation2 + $0xea0] sm:$0xf0]  ;;  %v10453_v25 = vld [vmem:[#allocation2 + $0x3a4] sm:$0xf0] }
  0xf5   :  { %v10672_v28 = vld [vmem:[#allocation2 + $0xa84] sm:$0xf]  ;;  %v8798_v31 = vor.u32 %v10800_v22, %v8795_v23  ;;  %3514 = vmatpush.bf16.msrb.mxu3 %v8542_v27  ;;  %v10389_v22 = vld [vmem:[#allocation2 + $0x1a4] sm:$0xf0] }
  0xf6   :  { %v8283_v29 = vld [vmem:[#allocation2 + $0xaa0] sm:$0xf0]  ;;  %v7393_v23 = vld [vmem:[#allocation2 + $0x388] sm:$0xf] }
  0xf7   :  { %v10600_v30 = vld [vmem:[#allocation2 + $0x844] sm:$0xf]  ;;  %v8286_v42 = vor.u32 %v10672_v28, %v8283_v29  ;;  %3527 = vmatpush.bf16.msrb.mxu0 %v8798_v31  ;;  %v7873_v27 = vld [vmem:[#allocation2 + $0x748] sm:$0xf]  ;;  %v7138_v31 = vor.u32 %v10389_v22, %v7137_v21 }
  0xf8   :  { %v7995_v33 = vld [vmem:[#allocation2 + $0x860] sm:$0xf0]  ;;  %v10573_v28 = vld [vmem:[#allocation2 + $0x764] sm:$0xf0] }
  0xf9   :  { %v10728_v34 = vld [vmem:[#allocation2 + $0xc44] sm:$0xf]  ;;  %v7998_v44 = vor.u32 %v10600_v30, %v7995_v33  ;;  %3501 = vmatpush.bf16.msra.mxu2 %v8286_v42  ;;  %v7617_v29 = vld [vmem:[#allocation2 + $0x548] sm:$0xf]  ;;  %v7394_v33 = vor.u32 %v10453_v25, %v7393_v23 }
  0xfa   :  { %v8507_v36 = vld [vmem:[#allocation2 + $0xc60] sm:$0xf0]  ;;  %v10509_v30 = vld [vmem:[#allocation2 + $0x564] sm:$0xf0] }
  0xfb   :  { %v10792_v37 = vld [vmem:[#allocation2 + $0xe44] sm:$0xf]  ;;  %v8510_v45 = vor.u32 %v10728_v34, %v8507_v36  ;;  %3489 = vmatpush.bf16.msrb.mxu1 %v7998_v44  ;;  %v7874_v34 = vor.u32 %v10573_v28, %v7873_v27  ;;  %v7105_v36 = vld [vmem:[#allocation2 + $0x148] sm:$0xf]  ;;  %v7618_v40 = vor.u32 %v10509_v30, %v7617_v29 }
  0xfc   :  { %v8763_v38 = vld [vmem:[#allocation2 + $0xe60] sm:$0xf0]  ;;  %v10445_v42 = vld [vmem:[#allocation2 + $0x364] sm:$0xf0] }
  0xfd   :  { %v10664_v43 = vld [vmem:[#allocation2 + $0xa44] sm:$0xf]  ;;  %v8766_v49 = vor.u32 %v10792_v37, %v8763_v38  ;;  %3515 = vmatpush.bf16.msrb.mxu3 %v8510_v45  ;;  %v10381_v37 = vld [vmem:[#allocation2 + $0x164] sm:$0xf0] }
  0xfe   :  { %v8251_v46 = vld [vmem:[#allocation2 + $0xa60] sm:$0xf0]  ;;  %v7361_v38 = vld [vmem:[#allocation2 + $0x348] sm:$0xf] }
  0xff   :  { %v10592_v47 = vld [vmem:[#allocation2 + $0x804] sm:$0xf]  ;;  %v8254_v55 = vor.u32 %v10664_v43, %v8251_v46  ;;  %3528 = vmatpush.bf16.msrb.mxu0 %v8766_v49  ;;  %v7841_v43 = vld [vmem:[#allocation2 + $0x708] sm:$0xf] }
 0x100   :  { %v7963_v48 = vld [vmem:[#allocation2 + $0x820] sm:$0xf0]  ;;  %v10565_v44 = vld [vmem:[#allocation2 + $0x724] sm:$0xf0] }
 0x101   :  { %v10720_v50 = vld [vmem:[#allocation2 + $0xc04] sm:$0xf]  ;;  %v7966_v62 = vor.u32 %v10592_v47, %v7963_v48  ;;  %3502 = vmatpush.bf16.msra.mxu2 %v8254_v55  ;;  %v7585_v45 = vld [vmem:[#allocation2 + $0x508] sm:$0xf]  ;;  %v7106_v47 = vor.u32 %v10381_v37, %v7105_v36  ;;  %v7362_v48 = vor.u32 %v10445_v42, %v7361_v38  ;;  %v7842_v49 = vor.u32 %v10565_v44, %v7841_v43 }
 0x102   :  { %v8475_v51 = vld [vmem:[#allocation2 + $0xc20] sm:$0xf0]  ;;  %v10501_v46 = vld [vmem:[#allocation2 + $0x524] sm:$0xf0] }
 0x103   :  { %v10784_v52 = vld [vmem:[#allocation2 + $0xe04] sm:$0xf]  ;;  %v8478_v63 = vor.u32 %v10720_v50, %v8475_v51  ;;  %3490 = vmatpush.bf16.msrb.mxu1 %v7966_v62  ;;  %v7073_v50 = vld [vmem:[#allocation2 + $0x108] sm:$0xf] }
 0x104   :  { %v8731_v53 = vld [vmem:[#allocation2 + $0xe20] sm:$0xf0]  ;;  %v10373_v51 = vld [vmem:[#allocation2 + $0x124] sm:$0xf0] }
 0x105   :  { %v10656_v0 = vld [vmem:[#allocation2 + $0xa04] sm:$0xf]  ;;  %v8734_v2 = vor.u32 %v10784_v52, %v8731_v53  ;;  %3516 = vmatpush.bf16.msrb.mxu3 %v8478_v63  ;;  %v7329_v52 = vld [vmem:[#allocation2 + $0x308] sm:$0xf]  ;;  %v7586_v53 = vor.u32 %v10501_v46, %v7585_v45  ;;  %v7074_v61 = vor.u32 %v10373_v51, %v7073_v50  ;;  %v7810_v63 = vor.u32 %v10557_v59, %v7809_v58 }
 0x106   :  { %v8219_v1 = vld [vmem:[#allocation2 + $0xa20] sm:$0xf0]  ;;  %3491 = vmatmul.bf16.vlgmr.msrb.gmra.mxu1 %v11545_v39  ;;  %v7553_v55 = vld [vmem:[#allocation2 + $0x4c8] sm:$0xf]  ;;  %v7330_v62 = vor.u32 %v10437_v56, %v7329_v52 }
 0x107   :  { %v8222_v13 = vor.u32 %v10656_v0, %v8219_v1  ;;  %3529 = vmatpush.bf16.msrb.mxu0 %v8734_v2  ;;  %3587 = vmatpush.bf16.msra.mxu1 %v7938_v3  ;;  %v7041_v0 = vld [vmem:[#allocation2 + $0xc8] sm:$0xf]  ;;  %v7554_v3 = vor.u32 %v10493_v60, %v7553_v55 }
 0x108   :  { %3517 = vmatmul.bf16.vlgmr.msrb.gmra.mxu3 %v11543_v35  ;;  %v10365_v1 = vld [vmem:[#allocation2 + $0xe4] sm:$0xf0] }
 0x109   :  { %3542 = vmatpush.bf16.msra.mxu3 %v3294_v8  ;;  %3503 = vmatpush.bf16.msra.mxu2 %v8222_v13  ;;  %v7297_v2 = vld [vmem:[#allocation2 + $0x2c8] sm:$0xf]  ;;  %v7042_v10 = vor.u32 %v10365_v1, %v7041_v0 }
 0x10a   :  { %3530 = vmatmul.bf16.vlgmr.msrb.gmra.mxu0 %v11548_v41  ;;  %v10429_v4 = vld [vmem:[#allocation2 + $0x2e4] sm:$0xf0] }
 0x10b   :  { %3574 = vmatpush.bf16.msra.mxu0 %v7682_v7  ;;  %3588 = vmatpush.bf16.msra.mxu1 %v7906_v20  ;;  %v7777_v5 = vld [vmem:[#allocation2 + $0x688] sm:$0xf]  ;;  %v7298_v11 = vor.u32 %v10429_v4, %v7297_v2 }
 0x10c   :  { %3504 = vmatmul.bf16.vlgmr.msra.gmra.mxu2 %v11555_v57  ;;  %v10549_v6 = vld [vmem:[#allocation2 + $0x6a4] sm:$0xf0] }
 0x10d   :  { %3548 = vmatpush.bf16.msrb.mxu2 %v7170_v18  ;;  %3561 = vmatpush.bf16.msrb.mxu3 %v7426_v19  ;;  %v7521_v7 = vld [vmem:[#allocation2 + $0x488] sm:$0xf]  ;;  %v7778_v12 = vor.u32 %v10549_v6, %v7777_v5 }
 0x10e   :  { %v10485_v8 = vld [vmem:[#allocation2 + $0x4a4] sm:$0xf0] }
 0x10f   :  { %3575 = vmatpush.bf16.msra.mxu0 %v7650_v24  ;;  %3589 = vmatpush.bf16.msra.mxu1 %v7874_v34  ;;  %v7009_v13 = vld [vmem:[#allocation2 + $0x88] sm:$0xf]  ;;  %v7522_v18 = vor.u32 %v10485_v8, %v7521_v7 }
 0x110   :  { %v10357_v14 = vld [vmem:[#allocation2 + $0xa4] sm:$0xf0] }
 0x111   :  { %3549 = vmatpush.bf16.msrb.mxu2 %v7138_v31  ;;  %3562 = vmatpush.bf16.msrb.mxu3 %v7394_v33  ;;  %v7265_v15 = vld [vmem:[#allocation2 + $0x288] sm:$0xf]  ;;  %v7010_v24 = vor.u32 %v10357_v14, %v7009_v13 }
 0x112   :  { %v10421_v19 = vld [vmem:[#allocation2 + $0x2a4] sm:$0xf0] }
 0x113   :  { %3576 = vmatpush.bf16.msra.mxu0 %v7618_v40  ;;  %3590 = vmatpush.bf16.msra.mxu1 %v7842_v49  ;;  %v7745_v20 = vld [vmem:[#allocation2 + $0x648] sm:$0xf]  ;;  %v7266_v27 = vor.u32 %v10421_v19, %v7265_v15 }
 0x114   :  { %v10541_v21 = vld [vmem:[#allocation2 + $0x664] sm:$0xf0] }
 0x115   :  { %3550 = vmatpush.bf16.msrb.mxu2 %v7106_v47  ;;  %3563 = vmatpush.bf16.msrb.mxu3 %v7362_v48  ;;  %v7489_v22 = vld [vmem:[#allocation2 + $0x448] sm:$0xf]  ;;  %v7746_v28 = vor.u32 %v10541_v21, %v7745_v20 }
 0x116   :  { %v10477_v23 = vld [vmem:[#allocation2 + $0x464] sm:$0xf0] }
 0x117   :  { %3577 = vmatpush.bf16.msra.mxu0 %v7586_v53  ;;  %3591 = vmatpush.bf16.msra.mxu1 %v7810_v63  ;;  %v6977_v25 = vld [vmem:[#allocation2 + $0x48] sm:$0xf]  ;;  %v7490_v33 = vor.u32 %v10477_v23, %v7489_v22 }
 0x118   :  { %8984 = vmatmul.msk.bf16.vlgmr.msra.gmra.mxu3 %vm3282_vm2, %v11562_v32  ;;  %v10349_v29 = vld [vmem:[#allocation2 + $0x64] sm:$0xf0] }
 0x119   :  { %3551 = vmatpush.bf16.msrb.mxu2 %v7074_v61  ;;  %3564 = vmatpush.bf16.msrb.mxu3 %v7330_v62  ;;  %v7233_v30 = vld [vmem:[#allocation2 + $0x248] sm:$0xf]  ;;  %v6978_v43 = vor.u32 %v10349_v29, %v6977_v25 }
 0x11a   :  { %v10413_v31 = vld [vmem:[#allocation2 + $0x264] sm:$0xf0] }
 0x11b   :  { %3578 = vmatpush.bf16.msra.mxu0 %v7554_v3  ;;  %3592 = vmatpush.bf16.msra.mxu1 %v7778_v12  ;;  %v7457_v34 = vld [vmem:[#allocation2 + $0x408] sm:$0xf]  ;;  %v7234_v47 = vor.u32 %v10413_v31, %v7233_v30 }
 0x11c   :  { %v7713_v36 = vld [vmem:[#allocation2 + $0x608] sm:$0xf] }
 0x11d   :  { %3552 = vmatpush.bf16.msrb.mxu2 %v7042_v10  ;;  %3565 = vmatpush.bf16.msrb.mxu3 %v7298_v11  ;;  %v10533_v37 = vld [vmem:[#allocation2 + $0x624] sm:$0xf0] }
 0x11e   :  { %v10469_v38 = vld [vmem:[#allocation2 + $0x424] sm:$0xf0]  ;;  %v7714_v48 = vor.u32 %v10533_v37, %v7713_v36 }
 0x11f   :  { %3579 = vmatpush.bf16.msra.mxu0 %v7522_v18  ;;  %v8961_v40 = vld [vmem:[#allocation2 + $0xfc8] sm:$0xf]  ;;  %3593 = vmatpush.bf16.msra.mxu1 %v7746_v28  ;;  %v7458_v52 = vor.u32 %v10469_v38, %v7457_v34 }
 0x120   :  { %v10845_v42 = vld [vmem:[#allocation2 + $0xfe4] sm:$0xf0] }
 0x121   :  { %3553 = vmatpush.bf16.msrb.mxu2 %v7010_v24  ;;  %v8705_v44 = vld [vmem:[#allocation2 + $0xdc8] sm:$0xf]  ;;  %3566 = vmatpush.bf16.msrb.mxu3 %v7266_v27  ;;  %v8962_v53 = vor.u32 %v10845_v42, %v8961_v40  ;;  %v11582_v40 = vld [vmem:[#allocation4] sm:$0xff] }
 0x122   :  { %v10781_v45 = vld [vmem:[#allocation2 + $0xde4] sm:$0xf0] }
 0x123   :  { %v6945_v46 = vld [vmem:[#allocation2 + $0x8] sm:$0xf]  ;;  %3580 = vmatpush.bf16.msra.mxu0 %v7490_v33  ;;  %v8706_v55 = vor.u32 %v10781_v45, %v8705_v44  ;;  %3594 = vmatpush.bf16.msra.mxu1 %v7714_v48 }
 0x124   :  { %v10341_v49 = vld [vmem:[#allocation2 + $0x24] sm:$0xf0] }
 0x125   :  { %v7201_v50 = vld [vmem:[#allocation2 + $0x208] sm:$0xf]  ;;  %3554 = vmatpush.bf16.msrb.mxu2 %v6978_v43  ;;  %v6946_v63 = vor.u32 %v10341_v49, %v6945_v46  ;;  %3567 = vmatpush.bf16.msrb.mxu3 %v7234_v47  ;;  %v686_v49 = vperm.slane %v11582_v40, 0 }
 0x126   :  { %v10405_v51 = vld [vmem:[#allocation2 + $0x224] sm:$0xf0]  ;;  %3595 = vmatmul.bf16.vlgmr.msra.gmra.mxu1 %v11520_v16 }
 0x127   :  { %v8193_v56 = vld [vmem:[#allocation2 + $0x9c8] sm:$0xf]  ;;  %v7202_v2 = vor.u32 %v10405_v51, %v7201_v50  ;;  %3581 = vmatpush.bf16.msra.mxu0 %v7458_v52  ;;  %3639 = vmatpush.bf16.msrb.mxu1 %v8962_v53 }
 0x128   :  { %v10653_v58 = vld [vmem:[#allocation2 + $0x9e4] sm:$0xf0] }
 0x129   :  { %v8449_v59 = vld [vmem:[#allocation2 + $0xbc8] sm:$0xf]  ;;  %v8194_v3 = vor.u32 %v10653_v58, %v8193_v56  ;;  %3555 = vmatpush.bf16.msrb.mxu2 %v6946_v63  ;;  %3568 = vmatpush.bf16.msrb.mxu3 %v7202_v2  ;;  %v3323_v63 = vpop.f32.mrf.mxu0 }
 0x12a   :  { %v10717_v60 = vld [vmem:[#allocation2 + $0xbe4] sm:$0xf0]  ;;  %3582 = vmatmul.bf16.vlgmr.msra.gmra.mxu0 %v11506_v54  ;;  %v3324_v2 = vadd.f32 %v3323_v63, %v686_v49  ;;  %v7171_v63 = vld [vmem:[#allocation2 + $0x1e8] sm:$0xf0] }
 0x12b   :  { %v8929_v61 = vld [vmem:[#allocation2 + $0xf88] sm:$0xf]  ;;  %v8450_v4 = vor.u32 %v10717_v60, %v8449_v59  ;;  %3626 = vmatpush.bf16.msrb.mxu0 %v8706_v55 }
 0x12c   :  { %v10837_v62 = vld [vmem:[#allocation2 + $0xfa4] sm:$0xf0]  ;;  %3556 = vmatmul.bf16.vlgmr.msrb.gmra.mxu2 %v11512_v9  ;;  %3569 = vmatmul.bf16.vlgmr.msrb.gmra.mxu3 %v11522_v17 }
 0x12d   :  { %v8673_v0 = vld [vmem:[#allocation2 + $0xd88] sm:$0xf]  ;;  %v8930_v5 = vor.u32 %v10837_v62, %v8929_v61  ;;  %3600 = vmatpush.bf16.msra.mxu2 %v8194_v3  ;;  %3613 = vmatpush.bf16.msra.mxu3 %v8450_v4  ;;  %v3349_v3 = vpop.f32.mrf.mxu2 }
 0x12e   :  { %v10773_v1 = vld [vmem:[#allocation2 + $0xda4] sm:$0xf0] }
 0x12f   :  { %v8161_v6 = vld [vmem:[#allocation2 + $0x988] sm:$0xf]  ;;  %v8674_v10 = vor.u32 %v10773_v1, %v8673_v0  ;;  %3640 = vmatpush.bf16.msrb.mxu1 %v8930_v5 }
 0x130   :  { %v10645_v7 = vld [vmem:[#allocation2 + $0x9a4] sm:$0xf0] }
 0x131   :  { %v8417_v8 = vld [vmem:[#allocation2 + $0xb88] sm:$0xf]  ;;  %v8162_v18 = vor.u32 %v10645_v7, %v8161_v6  ;;  %3627 = vmatpush.bf16.msrb.mxu0 %v8674_v10 }
 0x132   :  { %v10709_v11 = vld [vmem:[#allocation2 + $0xba4] sm:$0xf0] }
 0x133   :  { %v8897_v12 = vld [vmem:[#allocation2 + $0xf48] sm:$0xf]  ;;  %v8418_v19 = vor.u32 %v10709_v11, %v8417_v8  ;;  %3601 = vmatpush.bf16.msra.mxu2 %v8162_v18 }
 0x134   :  { %v10829_v13 = vld [vmem:[#allocation2 + $0xf64] sm:$0xf0] }
 0x135   :  { %v8641_v14 = vld [vmem:[#allocation2 + $0xd48] sm:$0xf]  ;;  %v8898_v20 = vor.u32 %v10829_v13, %v8897_v12  ;;  %3614 = vmatpush.bf16.msra.mxu3 %v8418_v19  ;;  %v3336_v13 = vpop.f32.mrf.mxu1 }
 0x136   :  { %v10765_v15 = vld [vmem:[#allocation2 + $0xd64] sm:$0xf0]  ;;  %v3337_v19 = vadd.f32 %v3336_v13, %v3324_v2 }
 0x137   :  { %v8129_v21 = vld [vmem:[#allocation2 + $0x948] sm:$0xf]  ;;  %v8642_v24 = vor.u32 %v10765_v15, %v8641_v14  ;;  %3641 = vmatpush.bf16.msrb.mxu1 %v8898_v20 }
 0x138   :  { %v10637_v22 = vld [vmem:[#allocation2 + $0x964] sm:$0xf0] }
 0x139   :  { %v8385_v23 = vld [vmem:[#allocation2 + $0xb48] sm:$0xf]  ;;  %v8130_v31 = vor.u32 %v10637_v22, %v8129_v21  ;;  %3628 = vmatpush.bf16.msrb.mxu0 %v8642_v24 }
 0x13a   :  { %v10701_v25 = vld [vmem:[#allocation2 + $0xb64] sm:$0xf0] }
 0x13b   :  { %v8865_v27 = vld [vmem:[#allocation2 + $0xf08] sm:$0xf]  ;;  %v8386_v34 = vor.u32 %v10701_v25, %v8385_v23  ;;  %3602 = vmatpush.bf16.msra.mxu2 %v8130_v31 }
 0x13c   :  { %v10821_v28 = vld [vmem:[#allocation2 + $0xf24] sm:$0xf0] }
 0x13d   :  { %v8609_v29 = vld [vmem:[#allocation2 + $0xd08] sm:$0xf]  ;;  %v8866_v36 = vor.u32 %v10821_v28, %v8865_v27  ;;  %3615 = vmatpush.bf16.msra.mxu3 %v8386_v34 }
 0x13e   :  { %v10757_v30 = vld [vmem:[#allocation2 + $0xd24] sm:$0xf0] }
 0x13f   :  { %v8097_v33 = vld [vmem:[#allocation2 + $0x908] sm:$0xf]  ;;  %v8610_v42 = vor.u32 %v10757_v30, %v8609_v29  ;;  %3642 = vmatpush.bf16.msrb.mxu1 %v8866_v36  ;;  %v3350_v29 = vadd.f32 %v3349_v3, %v3337_v19  ;;  %v3362_v36 = vpop.f32.mrf.mxu3  ;;  %v10449_v3 = vld [vmem:[#allocation2 + $0x38c] sm:$0xf] }
 0x140   :  { %v10629_v37 = vld [vmem:[#allocation2 + $0x924] sm:$0xf0]  ;;  %v10505_v19 = vld [vmem:[#allocation2 + $0x54c] sm:$0xf] }
 0x141   :  { %v8353_v38 = vld [vmem:[#allocation2 + $0xb08] sm:$0xf]  ;;  %v8098_v48 = vor.u32 %v10629_v37, %v8097_v33  ;;  %3629 = vmatpush.bf16.msrb.mxu0 %v8610_v42  ;;  %v7683_v42 = vld [vmem:[#allocation2 + $0x5e8] sm:$0xf0] }
 0x142   :  { %v10693_v43 = vld [vmem:[#allocation2 + $0xb24] sm:$0xf0] }
 0x143   :  { %v8833_v44 = vld [vmem:[#allocation2 + $0xec8] sm:$0xf]  ;;  %v8354_v50 = vor.u32 %v10693_v43, %v8353_v38  ;;  %3603 = vmatpush.bf16.msra.mxu2 %v8098_v48  ;;  %v10521_v38 = vld [vmem:[#allocation2 + $0x5cc] sm:$0xf]  ;;  %v11588_v43 = vadd.f32 %v3362_v36, %v3350_v29  ;;  %v3351_v48 = vpop.f32.mrf.mxu2 }
 0x144   :  { %v10813_v45 = vld [vmem:[#allocation2 + $0xee4] sm:$0xf0]  ;;  %v10377_v29 = vld [vmem:[#allocation2 + $0x14c] sm:$0xf] }
 0x145   :  { %v8577_v46 = vld [vmem:[#allocation2 + $0xcc8] sm:$0xf]  ;;  %v8834_v51 = vor.u32 %v10813_v45, %v8833_v44  ;;  %3616 = vmatpush.bf16.msra.mxu3 %v8354_v50  ;;  %v3325_v44 = vpop.f32.mrf.mxu0 }
 0x146   :  { %v10749_v47 = vld [vmem:[#allocation2 + $0xce4] sm:$0xf0]  ;;  %v7875_v44 = vld [vmem:[#allocation2 + $0x768] sm:$0xf0] }
 0x147   :  { %v8065_v52 = vld [vmem:[#allocation2 + $0x8c8] sm:$0xf]  ;;  %v8578_v58 = vor.u32 %v10749_v47, %v8577_v46  ;;  %3643 = vmatpush.bf16.msrb.mxu1 %v8834_v51  ;;  %v10457_v46 = vld [vmem:[#allocation2 + $0x3cc] sm:$0xf]  ;;  %v3364_v13 = vpop.f32.mrf.mxu3 }
 0x148   :  { %v10621_v53 = vld [vmem:[#allocation2 + $0x8e4] sm:$0xf0]  ;;  %v7427_v47 = vld [vmem:[#allocation2 + $0x3e8] sm:$0xf0] }
 0x149   :  { %v8321_v56 = vld [vmem:[#allocation2 + $0xac8] sm:$0xf]  ;;  %v8066_v0 = vor.u32 %v10621_v53, %v8065_v52  ;;  %3630 = vmatpush.bf16.msrb.mxu0 %v8578_v58  ;;  %v7686_v58 = vor.u32 %v10521_v38, %v7683_v42  ;;  %v7331_v38 = vld [vmem:[#allocation2 + $0x328] sm:$0xf0] }
 0x14a   :  { %v10685_v59 = vld [vmem:[#allocation2 + $0xae4] sm:$0xf0]  ;;  %v10569_v42 = vld [vmem:[#allocation2 + $0x74c] sm:$0xf] }
 0x14b   :  { %v8801_v55 = vld [vmem:[#allocation2 + $0xe88] sm:$0xf]  ;;  %v8322_v4 = vor.u32 %v10685_v59, %v8321_v56  ;;  %3604 = vmatpush.bf16.msra.mxu2 %v8066_v0  ;;  %v10513_v0 = vld [vmem:[#allocation2 + $0x58c] sm:$0xf] }
 0x14c   :  { %v10805_v60 = vld [vmem:[#allocation2 + $0xea4] sm:$0xf0] }
 0x14d   :  { %v8545_v61 = vld [vmem:[#allocation2 + $0xc88] sm:$0xf]  ;;  %v8802_v5 = vor.u32 %v10805_v60, %v8801_v55  ;;  %3617 = vmatpush.bf16.msra.mxu3 %v8322_v4  ;;  %v10393_v60 = vld [vmem:[#allocation2 + $0x1cc] sm:$0xf] }
 0x14e   :  { %v10741_v62 = vld [vmem:[#allocation2 + $0xca4] sm:$0xf0]  ;;  %v7395_v4 = vld [vmem:[#allocation2 + $0x3a8] sm:$0xf0] }
 0x14f   :  { %v8033_v1 = vld [vmem:[#allocation2 + $0x888] sm:$0xf]  ;;  %v8546_v10 = vor.u32 %v10741_v62, %v8545_v61  ;;  %3644 = vmatpush.bf16.msrb.mxu1 %v8802_v5  ;;  %v3338_v61 = vpop.f32.mrf.mxu1  ;;  %v7430_v62 = vor.u32 %v10457_v46, %v7427_v47  ;;  %v10369_v47 = vld [vmem:[#allocation2 + $0x10c] sm:$0xf] }
 0x150   :  { %v10613_v6 = vld [vmem:[#allocation2 + $0x8a4] sm:$0xf0] }
 0x151   :  { %v8289_v7 = vld [vmem:[#allocation2 + $0xa88] sm:$0xf]  ;;  %v8034_v20 = vor.u32 %v10613_v6, %v8033_v1  ;;  %3631 = vmatpush.bf16.msrb.mxu0 %v8546_v10  ;;  %v7651_v1 = vld [vmem:[#allocation2 + $0x5a8] sm:$0xf0]  ;;  %v7174_v10 = vor.u32 %v10393_v60, %v7171_v63 }
 0x152   :  { %v10677_v8 = vld [vmem:[#allocation2 + $0xaa4] sm:$0xf0]  ;;  %v7843_v60 = vld [vmem:[#allocation2 + $0x728] sm:$0xf0] }
 0x153   :  { %v8769_v11 = vld [vmem:[#allocation2 + $0xe48] sm:$0xf]  ;;  %v8290_v22 = vor.u32 %v10677_v8, %v8289_v7  ;;  %3605 = vmatpush.bf16.msra.mxu2 %v8034_v20  ;;  %v10585_v7 = vld [vmem:[#allocation2 + $0x7cc] sm:$0xf] }
 0x154   :  { %v10797_v12 = vld [vmem:[#allocation2 + $0xe64] sm:$0xf0]  ;;  %v7939_v8 = vld [vmem:[#allocation2 + $0x7e8] sm:$0xf0] }
 0x155   :  { %v11585_v14 = vld [vmem:[#allocation2 + $0x1008] sm:$0x33]  ;;  %v8770_v23 = vor.u32 %v10797_v12, %v8769_v11  ;;  %3618 = vmatpush.bf16.msra.mxu3 %v8290_v22  ;;  %v7654_v11 = vor.u32 %v10513_v0, %v7651_v1 }
 0x156   :  { %v8513_v15 = vld [vmem:[#allocation2 + $0xc48] sm:$0xf]  ;;  %v2244_v28 = vunpack.c.l.b16 %v11585_v14  ;;  %v10385_v12 = vld [vmem:[#allocation2 + $0x18c] sm:$0xf] }
 0x157   :  { %v10733_v18 = vld [vmem:[#allocation2 + $0xc64] sm:$0xf0]  ;;  %3645 = vmatpush.bf16.msrb.mxu1 %v8770_v23  ;;  %v7619_v20 = vld [vmem:[#allocation2 + $0x568] sm:$0xf0] }
 0x158   :  { %v8001_v21 = vld [vmem:[#allocation2 + $0x848] sm:$0xf]  ;;  %v8514_v30 = vor.u32 %v10733_v18, %v8513_v15  ;;  %v2764_v53 = vpack.c.b16 %v2244_v28, %v2244_v28  ;;  %v7398_v15 = vor.u32 %v10449_v3, %v7395_v4  ;;  %v7139_v18 = vld [vmem:[#allocation2 + $0x1a8] sm:$0xf0]  ;;  %v7622_v28 = vor.u32 %v10505_v19, %v7619_v20  ;;  %v3414_v20 = vpop.f32.mrf.mxu3 }
 0x159   :  { %v10605_v24 = vld [vmem:[#allocation2 + $0x864] sm:$0xf0]  ;;  %v10441_v22 = vld [vmem:[#allocation2 + $0x34c] sm:$0xf] }
 0x15a   :  { %v8257_v25 = vld [vmem:[#allocation2 + $0xa48] sm:$0xf]  ;;  %v8002_v45 = vor.u32 %v10605_v24, %v8001_v21  ;;  %3632 = vmatpush.bf16.msrb.mxu0 %v8514_v30  ;;  %v3297_v6 = vand.u32 %v11538_v26, %v2764_v53  ;;  %v7942_v21 = vor.u32 %v10585_v7, %v7939_v8  ;;  %v7363_v23 = vld [vmem:[#allocation2 + $0x368] sm:$0xf0] }
 0x15b   :  { %v10669_v27 = vld [vmem:[#allocation2 + $0xa64] sm:$0xf0]  ;;  %v10577_v24 = vld [vmem:[#allocation2 + $0x78c] sm:$0xf]  ;;  %v7366_v30 = vor.u32 %v10441_v22, %v7363_v23 }
 0x15c   :  { %v8481_v31 = vld [vmem:[#allocation2 + $0xc08] sm:$0xf]  ;;  %v8258_v49 = vor.u32 %v10669_v27, %v8257_v25  ;;  %3606 = vmatpush.bf16.msra.mxu2 %v8002_v45  ;;  %v7907_v25 = vld [vmem:[#allocation2 + $0x7a8] sm:$0xf0]  ;;  %v7142_v27 = vor.u32 %v10385_v12, %v7139_v18 }
 0x15d   :  { %v8737_v33 = vld [vmem:[#allocation2 + $0xe08] sm:$0xf]  ;;  %v7910_v36 = vor.u32 %v10577_v24, %v7907_v25  ;;  %v10425_v53 = vld [vmem:[#allocation2 + $0x2cc] sm:$0xf] }
 0x15e   :  { %v10789_v34 = vld [vmem:[#allocation2 + $0xe24] sm:$0xf0]  ;;  %3619 = vmatpush.bf16.msra.mxu3 %v8258_v49  ;;  %v7075_v49 = vld [vmem:[#allocation2 + $0x128] sm:$0xf0] }
 0x15f   :  { %v10725_v37 = vld [vmem:[#allocation2 + $0xc24] sm:$0xf0]  ;;  %v8738_v50 = vor.u32 %v10789_v34, %v8737_v33  ;;  %v10497_v33 = vld [vmem:[#allocation2 + $0x50c] sm:$0xf]  ;;  %v7078_v61 = vor.u32 %v10369_v47, %v7075_v49 }
 0x160   :  { %v7969_v51 = vld [vmem:[#allocation2 + $0x808] sm:$0xf]  ;;  %v8482_v56 = vor.u32 %v10725_v37, %v8481_v31  ;;  %v7107_v31 = vld [vmem:[#allocation2 + $0x168] sm:$0xf0] }
 0x161   :  { %v10597_v52 = vld [vmem:[#allocation2 + $0x824] sm:$0xf0]  ;;  %3646 = vmatpush.bf16.msrb.mxu1 %v8738_v50  ;;  %v7587_v34 = vld [vmem:[#allocation2 + $0x528] sm:$0xf0]  ;;  %v7110_v45 = vor.u32 %v10377_v29, %v7107_v31 }
 0x162   :  { %v8225_v59 = vld [vmem:[#allocation2 + $0xa08] sm:$0xf]  ;;  %v7970_v2 = vor.u32 %v10597_v52, %v7969_v51  ;;  %3633 = vmatpush.bf16.msrb.mxu0 %v8482_v56  ;;  %v10433_v37 = vld [vmem:[#allocation2 + $0x30c] sm:$0xf]  ;;  %v7590_v46 = vor.u32 %v10497_v33, %v7587_v34  ;;  %v7878_v52 = vor.u32 %v10569_v42, %v7875_v44 }
 0x163   :  { %v10661_v55 = vld [vmem:[#allocation2 + $0xa24] sm:$0xf0]  ;;  %v7334_v48 = vor.u32 %v10433_v37, %v7331_v38  ;;  %v10489_v50 = vld [vmem:[#allocation2 + $0x4cc] sm:$0xf] }
 0x164   :  { %v8226_v5 = vor.u32 %v10661_v55, %v8225_v59  ;;  %3607 = vmatpush.bf16.msra.mxu2 %v7970_v2  ;;  %3647 = vmatmul.bf16.vlgmr.msrb.gmra.mxu1 %v11548_v41  ;;  %v7555_v51 = vld [vmem:[#allocation2 + $0x4e8] sm:$0xf0] }
 0x165   :  { %3691 = vmatpush.bf16.msra.mxu1 %v7686_v58  ;;  %3634 = vmatmul.bf16.vlgmr.msrb.gmra.mxu0 %v11543_v35  ;;  %v7299_v56 = vld [vmem:[#allocation2 + $0x2e8] sm:$0xf0]  ;;  %v3375_v58 = vpop.f32.mrf.mxu0 }
 0x166   :  { %3678 = vmatpush.bf16.msra.mxu0 %v7430_v62  ;;  %3620 = vmatpush.bf16.msra.mxu3 %v8226_v5  ;;  %v3376_v59 = vadd.f32 %v3375_v58, %v11588_v43  ;;  %v10561_v55 = vld [vmem:[#allocation2 + $0x70c] sm:$0xf]  ;;  %v7558_v62 = vor.u32 %v10489_v50, %v7555_v51  ;;  %v7302_v0 = vor.u32 %v10425_v53, %v7299_v56  ;;  %v3388_v5 = vpop.f32.mrf.mxu1 }
 0x167   :  { %3608 = vmatmul.bf16.vlgmr.msra.gmra.mxu2 %v11545_v39  ;;  %v10361_v63 = vld [vmem:[#allocation2 + $0xcc] sm:$0xf]  ;;  %v7846_v4 = vor.u32 %v10561_v55, %v7843_v60 }
 0x168   :  { %3659 = vmatpush.bf16.msrb.mxu2 %v3297_v6  ;;  %v7043_v1 = vld [vmem:[#allocation2 + $0xe8] sm:$0xf0]  ;;  %v3389_v8 = vadd.f32 %v3388_v5, %v3376_v59 }
 0x169   :  { %3692 = vmatpush.bf16.msra.mxu1 %v7654_v11  ;;  %3621 = vmatmul.bf16.vlgmr.msra.gmra.mxu3 %v11555_v57  ;;  %v10481_v2 = vld [vmem:[#allocation2 + $0x48c] sm:$0xf]  ;;  %v3401_v11 = vpop.f32.mrf.mxu2  ;;  %v7046_v12 = vor.u32 %v10361_v63, %v7043_v1 }
 0x16a   :  { %3665 = vmatpush.bf16.msrb.mxu3 %v7174_v10  ;;  %3679 = vmatpush.bf16.msra.mxu0 %v7398_v15  ;;  %v7523_v3 = vld [vmem:[#allocation2 + $0x4a8] sm:$0xf0]  ;;  %v3402_v19 = vadd.f32 %v3401_v11, %v3389_v8 }
 0x16b   :  { %v10417_v6 = vld [vmem:[#allocation2 + $0x28c] sm:$0xf]  ;;  %v7526_v13 = vor.u32 %v10481_v2, %v7523_v3  ;;  %v3416_v2 = vpop.f32.mrf.mxu3 }
 0x16c   :  { %3704 = vmatpush.bf16.msra.mxu2 %v7942_v21  ;;  %v7267_v7 = vld [vmem:[#allocation2 + $0x2a8] sm:$0xf0]  ;;  %v11596_v29 = vadd.f32 %v3414_v20, %v3402_v19 }
 0x16d   :  { %3693 = vmatpush.bf16.msra.mxu1 %v7622_v28  ;;  %v10553_v10 = vld [vmem:[#allocation2 + $0x6cc] sm:$0xf]  ;;  %v7270_v18 = vor.u32 %v10417_v6, %v7267_v7  ;;  %v3377_v28 = vpop.f32.mrf.mxu0 }
 0x16e   :  { %3666 = vmatpush.bf16.msrb.mxu3 %v7142_v27  ;;  %3680 = vmatpush.bf16.msra.mxu0 %v7366_v30  ;;  %v7811_v43 = vld [vmem:[#allocation2 + $0x6e8] sm:$0xf0]  ;;  %v3390_v51 = vpop.f32.mrf.mxu1 }
 0x16f   :  { %v10353_v15 = vld [vmem:[#allocation2 + $0x8c] sm:$0xf]  ;;  %v7814_v24 = vor.u32 %v10553_v10, %v7811_v43 }
 0x170   :  { %3705 = vmatpush.bf16.msra.mxu2 %v7910_v36  ;;  %v7011_v21 = vld [vmem:[#allocation2 + $0xa8] sm:$0xf0] }
 0x171   :  { %3694 = vmatpush.bf16.msra.mxu1 %v7590_v46  ;;  %v10473_v22 = vld [vmem:[#allocation2 + $0x44c] sm:$0xf]  ;;  %v7014_v33 = vor.u32 %v10353_v15, %v7011_v21  ;;  %v3403_v58 = vpop.f32.mrf.mxu2 }
 0x172   :  { %3667 = vmatpush.bf16.msrb.mxu3 %v7110_v45  ;;  %3681 = vmatpush.bf16.msra.mxu0 %v7334_v48  ;;  %v7491_v23 = vld [vmem:[#allocation2 + $0x468] sm:$0xf0] }
 0x173   :  { %v10409_v25 = vld [vmem:[#allocation2 + $0x24c] sm:$0xf]  ;;  %v7494_v34 = vor.u32 %v10473_v22, %v7491_v23 }
 0x174   :  { %3706 = vmatpush.bf16.msra.mxu2 %v7878_v52  ;;  %v7235_v27 = vld [vmem:[#allocation2 + $0x268] sm:$0xf0] }
 0x175   :  { %3695 = vmatpush.bf16.msra.mxu1 %v7558_v62  ;;  %v10545_v30 = vld [vmem:[#allocation2 + $0x68c] sm:$0xf]  ;;  %v7238_v42 = vor.u32 %v10409_v25, %v7235_v27 }
 0x176   :  { %3668 = vmatpush.bf16.msrb.mxu3 %v7078_v61  ;;  %3682 = vmatpush.bf16.msra.mxu0 %v7302_v0  ;;  %v7779_v31 = vld [vmem:[#allocation2 + $0x6a8] sm:$0xf0] }
 0x177   :  { %v10345_v36 = vld [vmem:[#allocation2 + $0x4c] sm:$0xf]  ;;  %8985 = vmatmul.msk.bf16.vlgmr.msrb.gmra.mxu2 %vm3282_vm2, %v11562_v32  ;;  %v7782_v47 = vor.u32 %v10545_v30, %v7779_v31 }
 0x178   :  { %3707 = vmatpush.bf16.msra.mxu2 %v7846_v4  ;;  %v6979_v37 = vld [vmem:[#allocation2 + $0x68] sm:$0xf0] }
 0x179   :  { %3696 = vmatpush.bf16.msra.mxu1 %v7526_v13  ;;  %v10401_v38 = vld [vmem:[#allocation2 + $0x20c] sm:$0xf]  ;;  %v6982_v59 = vor.u32 %v10345_v36, %v6979_v37  ;;  %v3427_v30 = vpop.f32.mrf.mxu2 }
 0x17a   :  { %3669 = vmatpush.bf16.msrb.mxu3 %v7046_v12  ;;  %3683 = vmatpush.bf16.msra.mxu0 %v7270_v18  ;;  %v7203_v44 = vld [vmem:[#allocation2 + $0x228] sm:$0xf0] }
 0x17b   :  { %v10465_v45 = vld [vmem:[#allocation2 + $0x40c] sm:$0xf]  ;;  %v7206_v61 = vor.u32 %v10401_v38, %v7203_v44 }
 0x17c   :  { %v7459_v46 = vld [vmem:[#allocation2 + $0x428] sm:$0xf0]  ;;  %3708 = vmatpush.bf16.msra.mxu2 %v7814_v24 }
 0x17d   :  { %v10713_v48 = vld [vmem:[#allocation2 + $0xbcc] sm:$0xf]  ;;  %3697 = vmatpush.bf16.msra.mxu1 %v7494_v34  ;;  %v7462_v55 = vor.u32 %v10465_v45, %v7459_v46  ;;  %v11603_v34 = vadd.f32 %v3427_v30, %v11596_v29 }
 0x17e   :  { %v10777_v49 = vld [vmem:[#allocation2 + $0xdcc] sm:$0xf]  ;;  %3670 = vmatpush.bf16.msrb.mxu3 %v7014_v33  ;;  %3684 = vmatpush.bf16.msra.mxu0 %v7238_v42 }
 0x17f   :  { %v8707_v50 = vld [vmem:[#allocation2 + $0xde8] sm:$0xf0] }
 0x180   :  { %v8451_v52 = vld [vmem:[#allocation2 + $0xbe8] sm:$0xf0]  ;;  %v8710_v62 = vor.u32 %v10777_v49, %v8707_v50  ;;  %3709 = vmatpush.bf16.msra.mxu2 %v7782_v47 }
 0x181   :  { %v10537_v53 = vld [vmem:[#allocation2 + $0x64c] sm:$0xf]  ;;  %v8454_v3 = vor.u32 %v10713_v48, %v8451_v52  ;;  %3698 = vmatpush.bf16.msra.mxu1 %v7462_v55  ;;  %v3429_v2 = vpop.f32.mrf.mxu2 }
 0x182   :  { %v7747_v56 = vld [vmem:[#allocation2 + $0x668] sm:$0xf0]  ;;  %3671 = vmatpush.bf16.msrb.mxu3 %v6982_v59  ;;  %3685 = vmatpush.bf16.msra.mxu0 %v7206_v61 }
 0x183   :  { %v10337_v60 = vld [vmem:[#allocation2 + $0xc] sm:$0xf]  ;;  %v7750_v4 = vor.u32 %v10537_v53, %v7747_v56 }
 0x184   :  { %v6947_v63 = vld [vmem:[#allocation2 + $0x28] sm:$0xf0]  ;;  %3699 = vmatmul.bf16.vlgmr.msra.gmra.mxu1 %v11506_v54 }
 0x185   :  { %v10649_v0 = vld [vmem:[#allocation2 + $0x9cc] sm:$0xf]  ;;  %v6950_v11 = vor.u32 %v10337_v60, %v6947_v63  ;;  %3743 = vmatpush.bf16.msrb.mxu1 %v8710_v62  ;;  %3710 = vmatpush.bf16.msra.mxu2 %v7750_v4  ;;  %v3440_v63 = vpop.f32.mrf.mxu1 }
 0x186   :  { %v8195_v1 = vld [vmem:[#allocation2 + $0x9e8] sm:$0xf0]  ;;  %3730 = vmatpush.bf16.msrb.mxu0 %v8454_v3 }
 0x187   :  { %v10705_v5 = vld [vmem:[#allocation2 + $0xb8c] sm:$0xf]  ;;  %v8198_v15 = vor.u32 %v10649_v0, %v8195_v1  ;;  %3672 = vmatpush.bf16.msrb.mxu3 %v6950_v11  ;;  %3686 = vmatmul.bf16.vlgmr.msra.gmra.mxu0 %v11522_v17  ;;  %v687_v11 = vperm.slane %v11582_v40, 1 }
 0x188   :  { %v10769_v6 = vld [vmem:[#allocation2 + $0xd8c] sm:$0xf] }
 0x189   :  { %v8675_v7 = vld [vmem:[#allocation2 + $0xda8] sm:$0xf0] }
 0x18a   :  { %v8419_v8 = vld [vmem:[#allocation2 + $0xba8] sm:$0xf0]  ;;  %v8678_v18 = vor.u32 %v10769_v6, %v8675_v7  ;;  %3673 = vmatmul.bf16.vlgmr.msrb.gmra.mxu3 %v11512_v9  ;;  %v11607_v7 = vpop.f32.mrf.mxu0 }
 0x18b   :  { %v10529_v10 = vld [vmem:[#allocation2 + $0x60c] sm:$0xf]  ;;  %v8422_v20 = vor.u32 %v10705_v5, %v8419_v8  ;;  %3717 = vmatpush.bf16.msra.mxu3 %v8198_v15 }
 0x18c   :  { %v7715_v43 = vld [vmem:[#allocation2 + $0x628] sm:$0xf0]  ;;  %3744 = vmatpush.bf16.msrb.mxu1 %v8678_v18 }
 0x18d   :  { %v10841_v12 = vld [vmem:[#allocation2 + $0xfcc] sm:$0xf]  ;;  %v7718_v21 = vor.u32 %v10529_v10, %v7715_v43  ;;  %3731 = vmatpush.bf16.msrb.mxu0 %v8422_v20 }
 0x18e   :  { %v8963_v13 = vld [vmem:[#allocation2 + $0xfe8] sm:$0xf0] }
 0x18f   :  { %v10641_v19 = vld [vmem:[#allocation2 + $0x98c] sm:$0xf]  ;;  %v8966_v25 = vor.u32 %v10841_v12, %v8963_v13  ;;  %3711 = vmatpush.bf16.msra.mxu2 %v7718_v21 }
 0x190   :  { %v8163_v22 = vld [vmem:[#allocation2 + $0x9a8] sm:$0xf0] }
 0x191   :  { %v10761_v23 = vld [vmem:[#allocation2 + $0xd4c] sm:$0xf]  ;;  %v8166_v36 = vor.u32 %v10641_v19, %v8163_v22 }
 0x192   :  { %v8643_v24 = vld [vmem:[#allocation2 + $0xd68] sm:$0xf0]  ;;  %3712 = vmatmul.bf16.vlgmr.msra.gmra.mxu2 %v11520_v16 }
 0x193   :  { %v10697_v27 = vld [vmem:[#allocation2 + $0xb4c] sm:$0xf]  ;;  %v8646_v37 = vor.u32 %v10761_v23, %v8643_v24  ;;  %3756 = vmatpush.bf16.msrb.mxu2 %v8966_v25  ;;  %3718 = vmatpush.bf16.msra.mxu3 %v8166_v36  ;;  %v3466_v24 = vpop.f32.mrf.mxu3  ;;  %v3442_v36 = vpop.f32.mrf.mxu1 }
 0x194   :  { %v8387_v28 = vld [vmem:[#allocation2 + $0xb68] sm:$0xf0] }
 0x195   :  { %v10833_v31 = vld [vmem:[#allocation2 + $0xf8c] sm:$0xf]  ;;  %v8390_v42 = vor.u32 %v10697_v27, %v8387_v28  ;;  %3745 = vmatpush.bf16.msrb.mxu1 %v8646_v37  ;;  %v3441_v27 = vadd.f32 %v3440_v63, %v687_v11 }
 0x196   :  { %v8931_v33 = vld [vmem:[#allocation2 + $0xfa8] sm:$0xf0] }
 0x197   :  { %v10633_v38 = vld [vmem:[#allocation2 + $0x94c] sm:$0xf]  ;;  %v8934_v47 = vor.u32 %v10833_v31, %v8931_v33  ;;  %3732 = vmatpush.bf16.msrb.mxu0 %v8390_v42 }
 0x198   :  { %v8131_v44 = vld [vmem:[#allocation2 + $0x968] sm:$0xf0] }
 0x199   :  { %v10753_v45 = vld [vmem:[#allocation2 + $0xd0c] sm:$0xf]  ;;  %v8134_v29 = vor.u32 %v10633_v38, %v8131_v44  ;;  %3757 = vmatpush.bf16.msrb.mxu2 %v8934_v47 }
 0x19a   :  { %v8611_v46 = vld [vmem:[#allocation2 + $0xd28] sm:$0xf0] }
 0x19b   :  { %v10689_v48 = vld [vmem:[#allocation2 + $0xb0c] sm:$0xf]  ;;  %v8614_v52 = vor.u32 %v10753_v45, %v8611_v46  ;;  %3719 = vmatpush.bf16.msra.mxu3 %v8134_v29 }
 0x19c   :  { %v8355_v49 = vld [vmem:[#allocation2 + $0xb28] sm:$0xf0] }
 0x19d   :  { %v10825_v50 = vld [vmem:[#allocation2 + $0xf4c] sm:$0xf]  ;;  %v8358_v56 = vor.u32 %v10689_v48, %v8355_v49  ;;  %3746 = vmatpush.bf16.msrb.mxu1 %v8614_v52  ;;  %v3453_v48 = vpop.f32.mrf.mxu2  ;;  %v3481_v49 = vpop.f32.mrf.mxu0 }
 0x19e   :  { %v8899_v51 = vld [vmem:[#allocation2 + $0xf68] sm:$0xf0] }
 0x19f   :  { %v10625_v53 = vld [vmem:[#allocation2 + $0x90c] sm:$0xf]  ;;  %v8902_v60 = vor.u32 %v10825_v50, %v8899_v51  ;;  %3733 = vmatpush.bf16.msrb.mxu0 %v8358_v56  ;;  %v2245_v56 = vunpack.c.h.b16 %v11585_v14 }
 0x1a0   :  { %v8099_v58 = vld [vmem:[#allocation2 + $0x928] sm:$0xf0] }
 0x1a1   :  { %v10745_v59 = vld [vmem:[#allocation2 + $0xccc] sm:$0xf]  ;;  %v8102_v3 = vor.u32 %v10625_v53, %v8099_v58  ;;  %3758 = vmatpush.bf16.msrb.mxu2 %v8902_v60  ;;  %v3454_v53 = vadd.f32 %v3453_v48, %v3441_v27  ;;  %v10462_v60 = vld [vmem:[#allocation2 + $0x3ec] sm:$0xf0] }
 0x1a2   :  { %v8579_v55 = vld [vmem:[#allocation2 + $0xce8] sm:$0xf0]  ;;  %v7945_v27 = vld [vmem:[#allocation2 + $0x7d0] sm:$0xf] }
 0x1a3   :  { %v10681_v61 = vld [vmem:[#allocation2 + $0xacc] sm:$0xf]  ;;  %v8582_v4 = vor.u32 %v10745_v59, %v8579_v55  ;;  %3720 = vmatpush.bf16.msra.mxu3 %v8102_v3  ;;  %v7177_v59 = vld [vmem:[#allocation2 + $0x1d0] sm:$0xf] }
 0x1a4   :  { %v8323_v62 = vld [vmem:[#allocation2 + $0xae8] sm:$0xf0]  ;;  %v7433_v55 = vld [vmem:[#allocation2 + $0x3d0] sm:$0xf] }
 0x1a5   :  { %v10817_v0 = vld [vmem:[#allocation2 + $0xf0c] sm:$0xf]  ;;  %v8326_v8 = vor.u32 %v10681_v61, %v8323_v62  ;;  %3747 = vmatpush.bf16.msrb.mxu1 %v8582_v4  ;;  %v10398_v61 = vld [vmem:[#allocation2 + $0x1ec] sm:$0xf0]  ;;  %v7434_v4 = vor.u32 %v10462_v60, %v7433_v55 }
 0x1a6   :  { %v8867_v1 = vld [vmem:[#allocation2 + $0xf28] sm:$0xf0]  ;;  %v10582_v48 = vld [vmem:[#allocation2 + $0x7ac] sm:$0xf0] }
 0x1a7   :  { %v10617_v5 = vld [vmem:[#allocation2 + $0x8cc] sm:$0xf]  ;;  %v8870_v12 = vor.u32 %v10817_v0, %v8867_v1  ;;  %3734 = vmatpush.bf16.msrb.mxu0 %v8326_v8  ;;  %v3467_v0 = vadd.f32 %v3466_v24, %v3454_v53  ;;  %v3455_v24 = vpop.f32.mrf.mxu2  ;;  %v10374_v53 = vld [vmem:[#allocation2 + $0x12c] sm:$0xf0] }
 0x1a8   :  { %v8067_v6 = vld [vmem:[#allocation2 + $0x8e8] sm:$0xf0]  ;;  %v7881_v60 = vld [vmem:[#allocation2 + $0x750] sm:$0xf] }
 0x1a9   :  { %v10737_v10 = vld [vmem:[#allocation2 + $0xc8c] sm:$0xf]  ;;  %v8070_v20 = vor.u32 %v10617_v5, %v8067_v6  ;;  %3759 = vmatpush.bf16.msrb.mxu2 %v8870_v12  ;;  %v3468_v5 = vpop.f32.mrf.mxu3  ;;  %v11612_v14 = vadd.f32 %v11607_v7, %v3467_v0  ;;  %v7145_v12 = vld [vmem:[#allocation2 + $0x190] sm:$0xf] }
 0x1aa   :  { %v8547_v43 = vld [vmem:[#allocation2 + $0xca8] sm:$0xf0]  ;;  %v10430_v0 = vld [vmem:[#allocation2 + $0x2ec] sm:$0xf0] }
 0x1ab   :  { %v10673_v13 = vld [vmem:[#allocation2 + $0xa8c] sm:$0xf]  ;;  %v8550_v21 = vor.u32 %v10737_v10, %v8547_v43  ;;  %3721 = vmatpush.bf16.msra.mxu3 %v8070_v20  ;;  %v2765_v10 = vpack.c.b16 %v2245_v56, %v2245_v56  ;;  %v7178_v43 = vor.u32 %v10398_v61, %v7177_v59  ;;  %v10510_v59 = vld [vmem:[#allocation2 + $0x56c] sm:$0xf0] }
 0x1ac   :  { %v8291_v15 = vld [vmem:[#allocation2 + $0xaa8] sm:$0xf0]  ;;  %v10574_v61 = vld [vmem:[#allocation2 + $0x76c] sm:$0xf0] }
 0x1ad   :  { %v10809_v18 = vld [vmem:[#allocation2 + $0xecc] sm:$0xf]  ;;  %v8294_v23 = vor.u32 %v10673_v13, %v8291_v15  ;;  %3748 = vmatpush.bf16.msrb.mxu1 %v8550_v21  ;;  %v7401_v13 = vld [vmem:[#allocation2 + $0x390] sm:$0xf]  ;;  %v7882_v5 = vor.u32 %v10574_v61, %v7881_v60 }
 0x1ae   :  { %v8835_v19 = vld [vmem:[#allocation2 + $0xee8] sm:$0xf0]  ;;  %v10454_v15 = vld [vmem:[#allocation2 + $0x3ac] sm:$0xf0] }
 0x1af   :  { %v10609_v22 = vld [vmem:[#allocation2 + $0x88c] sm:$0xf]  ;;  %v8838_v40 = vor.u32 %v10809_v18, %v8835_v19  ;;  %3735 = vmatpush.bf16.msrb.mxu0 %v8294_v23  ;;  %v10390_v18 = vld [vmem:[#allocation2 + $0x1ac] sm:$0xf0]  ;;  %v7402_v7 = vor.u32 %v10454_v15, %v7401_v13 }
 0x1b0   :  { %v8035_v25 = vld [vmem:[#allocation2 + $0x8a8] sm:$0xf0]  ;;  %v10526_v23 = vld [vmem:[#allocation2 + $0x5ec] sm:$0xf0] }
 0x1b1   :  { %v10729_v28 = vld [vmem:[#allocation2 + $0xc4c] sm:$0xf]  ;;  %v8038_v42 = vor.u32 %v10609_v22, %v8035_v25  ;;  %3760 = vmatpush.bf16.msrb.mxu2 %v8838_v40  ;;  %v7689_v22 = vld [vmem:[#allocation2 + $0x5d0] sm:$0xf]  ;;  %v3300_v25 = vand.u32 %v11538_v26, %v2765_v10 }
 0x1b2   :  { %v8515_v30 = vld [vmem:[#allocation2 + $0xc68] sm:$0xf0]  ;;  %v7690_v36 = vor.u32 %v10526_v23, %v7689_v22  ;;  %v7273_v15 = vld [vmem:[#allocation2 + $0x290] sm:$0xf] }
 0x1b3   :  { %v10665_v31 = vld [vmem:[#allocation2 + $0xa4c] sm:$0xf]  ;;  %v8518_v44 = vor.u32 %v10729_v28, %v8515_v30  ;;  %3722 = vmatpush.bf16.msra.mxu3 %v8038_v42  ;;  %v10590_v28 = vld [vmem:[#allocation2 + $0x7ec] sm:$0xf0]  ;;  %v7146_v30 = vor.u32 %v10390_v18, %v7145_v12 }
 0x1b4   :  { %v8259_v33 = vld [vmem:[#allocation2 + $0xa68] sm:$0xf0]  ;;  %v7946_v42 = vor.u32 %v10590_v28, %v7945_v27  ;;  %v10566_v12 = vld [vmem:[#allocation2 + $0x72c] sm:$0xf0] }
 0x1b5   :  { %v10801_v37 = vld [vmem:[#allocation2 + $0xe8c] sm:$0xf]  ;;  %v8262_v50 = vor.u32 %v10665_v31, %v8259_v33  ;;  %3749 = vmatpush.bf16.msrb.mxu1 %v8518_v44  ;;  %v7369_v31 = vld [vmem:[#allocation2 + $0x350] sm:$0xf] }
 0x1b6   :  { %v8803_v38 = vld [vmem:[#allocation2 + $0xea8] sm:$0xf0]  ;;  %v10446_v33 = vld [vmem:[#allocation2 + $0x36c] sm:$0xf0] }
 0x1b7   :  { %v10601_v45 = vld [vmem:[#allocation2 + $0x84c] sm:$0xf]  ;;  %v8806_v58 = vor.u32 %v10801_v37, %v8803_v38  ;;  %3736 = vmatpush.bf16.msrb.mxu0 %v8262_v50  ;;  %v7113_v37 = vld [vmem:[#allocation2 + $0x150] sm:$0xf] }
 0x1b8   :  { %v8003_v46 = vld [vmem:[#allocation2 + $0x868] sm:$0xf0]  ;;  %v10382_v38 = vld [vmem:[#allocation2 + $0x16c] sm:$0xf0] }
 0x1b9   :  { %v10657_v47 = vld [vmem:[#allocation2 + $0xa0c] sm:$0xf]  ;;  %v8006_v1 = vor.u32 %v10601_v45, %v8003_v46  ;;  %3761 = vmatpush.bf16.msrb.mxu2 %v8806_v58  ;;  %v7657_v44 = vld [vmem:[#allocation2 + $0x590] sm:$0xf]  ;;  %v7370_v46 = vor.u32 %v10446_v33, %v7369_v31  ;;  %v7114_v49 = vor.u32 %v10382_v38, %v7113_v37  ;;  %v3518_v31 = vpop.f32.mrf.mxu3 }
 0x1ba   :  { %v8227_v51 = vld [vmem:[#allocation2 + $0xa28] sm:$0xf0]  ;;  %v10518_v45 = vld [vmem:[#allocation2 + $0x5ac] sm:$0xf0] }
 0x1bb   :  { %v10721_v29 = vld [vmem:[#allocation2 + $0xc0c] sm:$0xf]  ;;  %v8230_v3 = vor.u32 %v10657_v47, %v8227_v51  ;;  %3723 = vmatpush.bf16.msra.mxu3 %v8006_v1  ;;  %v7913_v47 = vld [vmem:[#allocation2 + $0x790] sm:$0xf] }
 0x1bc   :  { %v8483_v52 = vld [vmem:[#allocation2 + $0xc28] sm:$0xf0]  ;;  %v7337_v50 = vld [vmem:[#allocation2 + $0x310] sm:$0xf]  ;;  %v7914_v56 = vor.u32 %v10582_v48, %v7913_v47 }
 0x1bd   :  { %v10793_v62 = vld [vmem:[#allocation2 + $0xe4c] sm:$0xf]  ;;  %v8486_v2 = vor.u32 %v10721_v29, %v8483_v52  ;;  %3737 = vmatpush.bf16.msrb.mxu0 %v8230_v3  ;;  %v10438_v51 = vld [vmem:[#allocation2 + $0x32c] sm:$0xf0]  ;;  %v7658_v29 = vor.u32 %v10518_v45, %v7657_v44 }
 0x1be   :  { %v8771_v63 = vld [vmem:[#allocation2 + $0xe68] sm:$0xf0]  ;;  %v7081_v52 = vld [vmem:[#allocation2 + $0x110] sm:$0xf]  ;;  %v7338_v55 = vor.u32 %v10438_v51, %v7337_v50 }
 0x1bf   :  { %v10593_v6 = vld [vmem:[#allocation2 + $0x80c] sm:$0xf]  ;;  %v8774_v11 = vor.u32 %v10793_v62, %v8771_v63  ;;  %3750 = vmatpush.bf16.msrb.mxu1 %v8486_v2  ;;  %v7625_v58 = vld [vmem:[#allocation2 + $0x550] sm:$0xf]  ;;  %v7082_v62 = vor.u32 %v10374_v53, %v7081_v52 }
 0x1c0   :  { %v7971_v8 = vld [vmem:[#allocation2 + $0x828] sm:$0xf0]  ;;  %3738 = vmatmul.bf16.vlgmr.msrb.gmra.mxu0 %v11555_v57  ;;  %v7305_v63 = vld [vmem:[#allocation2 + $0x2d0] sm:$0xf]  ;;  %v7626_v1 = vor.u32 %v10510_v59, %v7625_v58 }
 0x1c1   :  { %v10785_v19 = vld [vmem:[#allocation2 + $0xe0c] sm:$0xf]  ;;  %v7974_v21 = vor.u32 %v10593_v6, %v7971_v8  ;;  %3782 = vmatpush.bf16.msra.mxu0 %v7178_v43  ;;  %3762 = vmatpush.bf16.msrb.mxu2 %v8774_v11  ;;  %v7049_v2 = vld [vmem:[#allocation2 + $0xd0] sm:$0xf]  ;;  %v7306_v43 = vor.u32 %v10430_v0, %v7305_v63 }
 0x1c2   :  { %v8739_v20 = vld [vmem:[#allocation2 + $0xe28] sm:$0xf0]  ;;  %3751 = vmatmul.bf16.vlgmr.msrb.gmra.mxu1 %v11543_v35  ;;  %v10366_v3 = vld [vmem:[#allocation2 + $0xec] sm:$0xf0] }
 0x1c3   :  { %3795 = vmatpush.bf16.msra.mxu1 %v7434_v4  ;;  %v8742_v40 = vor.u32 %v10785_v19, %v8739_v20  ;;  %3724 = vmatpush.bf16.msra.mxu3 %v7974_v21  ;;  %v3492_v4 = vpop.f32.mrf.mxu1  ;;  %v7593_v6 = vld [vmem:[#allocation2 + $0x510] sm:$0xf]  ;;  %v7050_v13 = vor.u32 %v10366_v3, %v7049_v2 }
 0x1c4   :  { %v10502_v8 = vld [vmem:[#allocation2 + $0x52c] sm:$0xf0]  ;;  %v3493_v10 = vadd.f32 %v3492_v4, %v11612_v14 }
 0x1c5   :  { %3783 = vmatpush.bf16.msra.mxu0 %v7146_v30  ;;  %3763 = vmatpush.bf16.msrb.mxu2 %v8742_v40  ;;  %v7849_v11 = vld [vmem:[#allocation2 + $0x710] sm:$0xf]  ;;  %v7594_v19 = vor.u32 %v10502_v8, %v7593_v6 }
 0x1c6   :  { %3725 = vmatmul.bf16.vlgmr.msra.gmra.mxu3 %v11545_v39  ;;  %v10422_v18 = vld [vmem:[#allocation2 + $0x2ac] sm:$0xf0]  ;;  %v7850_v22 = vor.u32 %v10566_v12, %v7849_v11  ;;  %v3520_v11 = vpop.f32.mrf.mxu3 }
 0x1c7   :  { %3796 = vmatpush.bf16.msra.mxu1 %v7402_v7  ;;  %3776 = vmatpush.bf16.msrb.mxu3 %v3300_v25  ;;  %v7017_v20 = vld [vmem:[#allocation2 + $0x90] sm:$0xf]  ;;  %v3531_v7 = vpop.f32.mrf.mxu0  ;;  %v7274_v25 = vor.u32 %v10422_v18, %v7273_v15 }
 0x1c8   :  { %3764 = vmatmul.bf16.vlgmr.msrb.gmra.mxu2 %v11548_v41  ;;  %v10358_v21 = vld [vmem:[#allocation2 + $0xac] sm:$0xf0] }
 0x1c9   :  { %3808 = vmatpush.bf16.msra.mxu2 %v7690_v36  ;;  %3784 = vmatpush.bf16.msra.mxu0 %v7114_v49  ;;  %v7561_v23 = vld [vmem:[#allocation2 + $0x4d0] sm:$0xf]  ;;  %v7018_v28 = vor.u32 %v10358_v21, %v7017_v20 }
 0x1ca   :  { %v10494_v24 = vld [vmem:[#allocation2 + $0x4ec] sm:$0xf0] }
 0x1cb   :  { %3821 = vmatpush.bf16.msra.mxu3 %v7946_v42  ;;  %3797 = vmatpush.bf16.msra.mxu1 %v7370_v46  ;;  %v7817_v14 = vld [vmem:[#allocation2 + $0x6d0] sm:$0xf]  ;;  %v7562_v33 = vor.u32 %v10494_v24, %v7561_v23  ;;  %v3494_v45 = vpop.f32.mrf.mxu1  ;;  %v3505_v46 = vpop.f32.mrf.mxu2 }
 0x1cc   :  { %v10558_v27 = vld [vmem:[#allocation2 + $0x6ec] sm:$0xf0]  ;;  %v3506_v51 = vadd.f32 %v3505_v46, %v3493_v10 }
 0x1cd   :  { %3809 = vmatpush.bf16.msra.mxu2 %v7658_v29  ;;  %3785 = vmatpush.bf16.msra.mxu0 %v7082_v62  ;;  %v7241_v30 = vld [vmem:[#allocation2 + $0x250] sm:$0xf]  ;;  %v7818_v38 = vor.u32 %v10558_v27, %v7817_v14 }
 0x1ce   :  { %v10414_v40 = vld [vmem:[#allocation2 + $0x26c] sm:$0xf0]  ;;  %v3519_v61 = vadd.f32 %v3518_v31, %v3506_v51  ;;  %v3544_v51 = vpop.f32.mrf.mxu3 }
 0x1cf   :  { %3822 = vmatpush.bf16.msra.mxu3 %v7914_v56  ;;  %3798 = vmatpush.bf16.msra.mxu1 %v7338_v55  ;;  %v6985_v36 = vld [vmem:[#allocation2 + $0x50] sm:$0xf]  ;;  %v7242_v47 = vor.u32 %v10414_v40, %v7241_v30  ;;  %v3533_v2 = vpop.f32.mrf.mxu0 }
 0x1d0   :  { %v10350_v37 = vld [vmem:[#allocation2 + $0x6c] sm:$0xf0]  ;;  %v3532_v6 = vadd.f32 %v3531_v7, %v3519_v61 }
 0x1d1   :  { %3810 = vmatpush.bf16.msra.mxu2 %v7626_v1  ;;  %3786 = vmatpush.bf16.msra.mxu0 %v7050_v13  ;;  %v7529_v42 = vld [vmem:[#allocation2 + $0x490] sm:$0xf]  ;;  %v6986_v29 = vor.u32 %v10350_v37, %v6985_v36 }
 0x1d2   :  { %v10486_v44 = vld [vmem:[#allocation2 + $0x4ac] sm:$0xf0] }
 0x1d3   :  { %3823 = vmatpush.bf16.msra.mxu3 %v7882_v5  ;;  %3799 = vmatpush.bf16.msra.mxu1 %v7306_v43  ;;  %v7785_v48 = vld [vmem:[#allocation2 + $0x690] sm:$0xf]  ;;  %v7530_v58 = vor.u32 %v10486_v44, %v7529_v42  ;;  %v3507_v14 = vpop.f32.mrf.mxu2 }
 0x1d4   :  { %v10550_v49 = vld [vmem:[#allocation2 + $0x6ac] sm:$0xf0] }
 0x1d5   :  { %3811 = vmatpush.bf16.msra.mxu2 %v7594_v19  ;;  %v6953_v50 = vld [vmem:[#allocation2 + $0x10] sm:$0xf]  ;;  %3787 = vmatpush.bf16.msra.mxu0 %v7018_v28  ;;  %v7786_v62 = vor.u32 %v10550_v49, %v7785_v48 }
 0x1d6   :  { %v10342_v52 = vld [vmem:[#allocation2 + $0x2c] sm:$0xf0]  ;;  %8986 = vmatmul.msk.bf16.vlgmr.msrb.gmra.mxu3 %vm3282_vm2, %v11562_v32 }
 0x1d7   :  { %3824 = vmatpush.bf16.msra.mxu3 %v7850_v22  ;;  %3800 = vmatpush.bf16.msra.mxu1 %v7274_v25  ;;  %v7209_v53 = vld [vmem:[#allocation2 + $0x210] sm:$0xf]  ;;  %v6954_v8 = vor.u32 %v10342_v52, %v6953_v50 }
 0x1d8   :  { %v10406_v56 = vld [vmem:[#allocation2 + $0x22c] sm:$0xf0] }
 0x1d9   :  { %3812 = vmatpush.bf16.msra.mxu2 %v7562_v33  ;;  %v8201_v59 = vld [vmem:[#allocation2 + $0x9d0] sm:$0xf]  ;;  %v7210_v3 = vor.u32 %v10406_v56, %v7209_v53  ;;  %3788 = vmatpush.bf16.msra.mxu0 %v6986_v29  ;;  %v11624_v56 = vadd.f32 %v3544_v51, %v3532_v6 }
 0x1da   :  { %v8457_v55 = vld [vmem:[#allocation2 + $0xbd0] sm:$0xf] }
 0x1db   :  { %v10718_v60 = vld [vmem:[#allocation2 + $0xbec] sm:$0xf0]  ;;  %3825 = vmatpush.bf16.msra.mxu3 %v7818_v38  ;;  %3801 = vmatpush.bf16.msra.mxu1 %v7242_v47 }
 0x1dc   :  { %v10654_v63 = vld [vmem:[#allocation2 + $0x9ec] sm:$0xf0]  ;;  %v8458_v10 = vor.u32 %v10718_v60, %v8457_v55 }
 0x1dd   :  { %v7497_v0 = vld [vmem:[#allocation2 + $0x450] sm:$0xf]  ;;  %3813 = vmatpush.bf16.msra.mxu2 %v7530_v58  ;;  %v8202_v12 = vor.u32 %v10654_v63, %v8201_v59  ;;  %3789 = vmatpush.bf16.msra.mxu0 %v6954_v8 }
 0x1de   :  { %v10478_v1 = vld [vmem:[#allocation2 + $0x46c] sm:$0xf0] }
 0x1df   :  { %v7753_v4 = vld [vmem:[#allocation2 + $0x650] sm:$0xf]  ;;  %v7498_v13 = vor.u32 %v10478_v1, %v7497_v0  ;;  %3826 = vmatpush.bf16.msra.mxu3 %v7786_v62  ;;  %3802 = vmatpush.bf16.msra.mxu1 %v7210_v3 }
 0x1e0   :  { %v10542_v5 = vld [vmem:[#allocation2 + $0x66c] sm:$0xf0]  ;;  %3790 = vmatmul.bf16.vlgmr.msra.gmra.mxu0 %v11512_v9 }
 0x1e1   :  { %v8169_v43 = vld [vmem:[#allocation2 + $0x990] sm:$0xf]  ;;  %v7754_v20 = vor.u32 %v10542_v5, %v7753_v4  ;;  %3834 = vmatpush.bf16.msrb.mxu0 %v8202_v12  ;;  %3814 = vmatpush.bf16.msra.mxu2 %v7498_v13  ;;  %v11628_v12 = vpop.f32.mrf.mxu1 }
 0x1e2   :  { %v10646_v15 = vld [vmem:[#allocation2 + $0x9ac] sm:$0xf0]  ;;  %3803 = vmatmul.bf16.vlgmr.msra.gmra.mxu1 %v11522_v17 }
 0x1e3   :  { %v8425_v18 = vld [vmem:[#allocation2 + $0xb90] sm:$0xf]  ;;  %3847 = vmatpush.bf16.msrb.mxu1 %v8458_v10  ;;  %v8170_v40 = vor.u32 %v10646_v15, %v8169_v43  ;;  %3827 = vmatpush.bf16.msra.mxu3 %v7754_v20  ;;  %v3546_v20 = vpop.f32.mrf.mxu3 }
 0x1e4   :  { %v10710_v19 = vld [vmem:[#allocation2 + $0xbac] sm:$0xf0] }
 0x1e5   :  { %v7465_v21 = vld [vmem:[#allocation2 + $0x410] sm:$0xf]  ;;  %v8426_v27 = vor.u32 %v10710_v19, %v8425_v18  ;;  %3835 = vmatpush.bf16.msrb.mxu0 %v8170_v40 }
 0x1e6   :  { %v10470_v22 = vld [vmem:[#allocation2 + $0x42c] sm:$0xf0] }
 0x1e7   :  { %v7721_v23 = vld [vmem:[#allocation2 + $0x610] sm:$0xf]  ;;  %v7466_v31 = vor.u32 %v10470_v22, %v7465_v21  ;;  %3848 = vmatpush.bf16.msrb.mxu1 %v8426_v27 }
 0x1e8   :  { %v10534_v24 = vld [vmem:[#allocation2 + $0x62c] sm:$0xf0] }
 0x1e9   :  { %v8713_v25 = vld [vmem:[#allocation2 + $0xdd0] sm:$0xf]  ;;  %v7722_v37 = vor.u32 %v10534_v24, %v7721_v23  ;;  %3815 = vmatpush.bf16.msra.mxu2 %v7466_v31 }
 0x1ea   :  { %v10782_v7 = vld [vmem:[#allocation2 + $0xdec] sm:$0xf0] }
 0x1eb   :  { %v8969_v28 = vld [vmem:[#allocation2 + $0xfd0] sm:$0xf]  ;;  %v8714_v38 = vor.u32 %v10782_v7, %v8713_v25  ;;  %3828 = vmatpush.bf16.msra.mxu3 %v7722_v37 }
 0x1ec   :  { %v10846_v30 = vld [vmem:[#allocation2 + $0xfec] sm:$0xf0]  ;;  %3816 = vmatmul.bf16.vlgmr.msra.gmra.mxu2 %v11506_v54 }
 0x1ed   :  { %v8393_v33 = vld [vmem:[#allocation2 + $0xb50] sm:$0xf]  ;;  %v8970_v45 = vor.u32 %v10846_v30, %v8969_v28  ;;  %3860 = vmatpush.bf16.msrb.mxu2 %v8714_v38  ;;  %v3583_v30 = vpop.f32.mrf.mxu0 }
 0x1ee   :  { %v10702_v36 = vld [vmem:[#allocation2 + $0xb6c] sm:$0xf0]  ;;  %3829 = vmatmul.bf16.vlgmr.msra.gmra.mxu3 %v11520_v16 }
 0x1ef   :  { %v8137_v42 = vld [vmem:[#allocation2 + $0x950] sm:$0xf]  ;;  %v8394_v48 = vor.u32 %v10702_v36, %v8393_v33  ;;  %3873 = vmatpush.bf16.msrb.mxu3 %v8970_v45 }
 0x1f0   :  { %v10638_v44 = vld [vmem:[#allocation2 + $0x96c] sm:$0xf0] }
 0x1f1   :  { %v8681_v46 = vld [vmem:[#allocation2 + $0xd90] sm:$0xf]  ;;  %v8138_v29 = vor.u32 %v10638_v44, %v8137_v42  ;;  %3849 = vmatpush.bf16.msrb.mxu1 %v8394_v48  ;;  %v11632_v42 = vld [vmem:[#allocation4] sm:$0xff] }
 0x1f2   :  { %v10774_v47 = vld [vmem:[#allocation2 + $0xdac] sm:$0xf0]  ;;  %v688_v44 = vperm.slane %v11632_v42, 2 }
 0x1f3   :  { %v8937_v49 = vld [vmem:[#allocation2 + $0xf90] sm:$0xf]  ;;  %v8682_v58 = vor.u32 %v10774_v47, %v8681_v46  ;;  %3836 = vmatpush.bf16.msrb.mxu0 %v8138_v29  ;;  %v3598_v29 = vpop.f32.mrf.mxu1 }
 0x1f4   :  { %v10838_v50 = vld [vmem:[#allocation2 + $0xfac] sm:$0xf0]  ;;  %v7915_v29 = vld [vmem:[#allocation2 + $0x7b0] sm:$0xf0] }
 0x1f5   :  { %v8361_v52 = vld [vmem:[#allocation2 + $0xb10] sm:$0xf]  ;;  %v8938_v60 = vor.u32 %v10838_v50, %v8937_v49  ;;  %3861 = vmatpush.bf16.msrb.mxu2 %v8682_v58 }
 0x1f6   :  { %v10694_v53 = vld [vmem:[#allocation2 + $0xb2c] sm:$0xf0] }
 0x1f7   :  { %v8105_v59 = vld [vmem:[#allocation2 + $0x910] sm:$0xf]  ;;  %v8362_v63 = vor.u32 %v10694_v53, %v8361_v52  ;;  %3874 = vmatpush.bf16.msrb.mxu3 %v8938_v60 }
 0x1f8   :  { %v10630_v55 = vld [vmem:[#allocation2 + $0x92c] sm:$0xf0] }
 0x1f9   :  { %v8649_v61 = vld [vmem:[#allocation2 + $0xd50] sm:$0xf]  ;;  %v8106_v2 = vor.u32 %v10630_v55, %v8105_v59  ;;  %3850 = vmatpush.bf16.msrb.mxu1 %v8362_v63  ;;  %v3557_v59 = vpop.f32.mrf.mxu2 }
 0x1fa   :  { %v10766_v62 = vld [vmem:[#allocation2 + $0xd6c] sm:$0xf0]  ;;  %v3558_v63 = vadd.f32 %v3557_v59, %v688_v44  ;;  %v7435_v44 = vld [vmem:[#allocation2 + $0x3f0] sm:$0xf0] }
 0x1fb   :  { %v8905_v0 = vld [vmem:[#allocation2 + $0xf50] sm:$0xf]  ;;  %v8650_v5 = vor.u32 %v10766_v62, %v8649_v61  ;;  %3837 = vmatpush.bf16.msrb.mxu0 %v8106_v2 }
 0x1fc   :  { %v10830_v1 = vld [vmem:[#allocation2 + $0xf6c] sm:$0xf0] }
 0x1fd   :  { %v8329_v3 = vld [vmem:[#allocation2 + $0xad0] sm:$0xf]  ;;  %v8906_v10 = vor.u32 %v10830_v1, %v8905_v0  ;;  %3862 = vmatpush.bf16.msrb.mxu2 %v8650_v5  ;;  %v3570_v0 = vpop.f32.mrf.mxu3 }
 0x1fe   :  { %v10686_v4 = vld [vmem:[#allocation2 + $0xaec] sm:$0xf0] }
 0x1ff   :  { %v8073_v6 = vld [vmem:[#allocation2 + $0x8d0] sm:$0xf]  ;;  %v8330_v13 = vor.u32 %v10686_v4, %v8329_v3  ;;  %3875 = vmatpush.bf16.msrb.mxu3 %v8906_v10  ;;  %v10394_v3 = vld [vmem:[#allocation2 + $0x1d4] sm:$0xf] }
 0x200   :  { %v10622_v8 = vld [vmem:[#allocation2 + $0x8ec] sm:$0xf0]  ;;  %v7179_v4 = vld [vmem:[#allocation2 + $0x1f0] sm:$0xf0] }
 0x201   :  { %v8617_v43 = vld [vmem:[#allocation2 + $0xd10] sm:$0xf]  ;;  %v8074_v19 = vor.u32 %v10622_v8, %v8073_v6  ;;  %3851 = vmatpush.bf16.msrb.mxu1 %v8330_v13  ;;  %v7182_v20 = vor.u32 %v10394_v3, %v7179_v4  ;;  %v10370_v3 = vld [vmem:[#allocation2 + $0x114] sm:$0xf] }
 0x202   :  { %v10758_v11 = vld [vmem:[#allocation2 + $0xd2c] sm:$0xf0]  ;;  %v7083_v4 = vld [vmem:[#allocation2 + $0x130] sm:$0xf0] }
 0x203   :  { %v8873_v15 = vld [vmem:[#allocation2 + $0xf10] sm:$0xf]  ;;  %v8618_v23 = vor.u32 %v10758_v11, %v8617_v43  ;;  %3838 = vmatpush.bf16.msrb.mxu0 %v8074_v19  ;;  %v3571_v43 = vadd.f32 %v3570_v0, %v3558_v63  ;;  %v3585_v11 = vpop.f32.mrf.mxu0  ;;  %v10514_v63 = vld [vmem:[#allocation2 + $0x594] sm:$0xf] }
 0x204   :  { %v10822_v18 = vld [vmem:[#allocation2 + $0xf2c] sm:$0xf0]  ;;  %v7659_v0 = vld [vmem:[#allocation2 + $0x5b0] sm:$0xf0]  ;;  %v7086_v11 = vor.u32 %v10370_v3, %v7083_v4 }
 0x205   :  { %v8297_v21 = vld [vmem:[#allocation2 + $0xa90] sm:$0xf]  ;;  %v8874_v7 = vor.u32 %v10822_v18, %v8873_v15  ;;  %3863 = vmatpush.bf16.msrb.mxu2 %v8618_v23  ;;  %v7531_v3 = vld [vmem:[#allocation2 + $0x4b0] sm:$0xf0] }
 0x206   :  { %v10678_v22 = vld [vmem:[#allocation2 + $0xaac] sm:$0xf0]  ;;  %v10538_v4 = vld [vmem:[#allocation2 + $0x654] sm:$0xf] }
 0x207   :  { %v8041_v24 = vld [vmem:[#allocation2 + $0x890] sm:$0xf]  ;;  %v8298_v40 = vor.u32 %v10678_v22, %v8297_v21  ;;  %3876 = vmatpush.bf16.msrb.mxu3 %v8874_v7  ;;  %v10586_v21 = vld [vmem:[#allocation2 + $0x7d4] sm:$0xf]  ;;  %v3584_v22 = vadd.f32 %v3583_v30, %v3571_v43  ;;  %v3559_v30 = vpop.f32.mrf.mxu2 }
 0x208   :  { %v10614_v25 = vld [vmem:[#allocation2 + $0x8ac] sm:$0xf0]  ;;  %v10386_v7 = vld [vmem:[#allocation2 + $0x194] sm:$0xf] }
 0x209   :  { %v8585_v14 = vld [vmem:[#allocation2 + $0xcd0] sm:$0xf]  ;;  %v8042_v36 = vor.u32 %v10614_v25, %v8041_v24  ;;  %3852 = vmatpush.bf16.msrb.mxu1 %v8298_v40  ;;  %v7947_v25 = vld [vmem:[#allocation2 + $0x7f0] sm:$0xf0] }
 0x20a   :  { %v10750_v27 = vld [vmem:[#allocation2 + $0xcec] sm:$0xf0] }
 0x20b   :  { %v11630_v28 = vld [vmem:[#allocation2 + $0x1010] sm:$0x33]  ;;  %v8586_v45 = vor.u32 %v10750_v27, %v8585_v14  ;;  %3839 = vmatpush.bf16.msrb.mxu0 %v8042_v36  ;;  %v11638_v36 = vadd.f32 %v11628_v12, %v3584_v22 }
 0x20c   :  { %v8841_v31 = vld [vmem:[#allocation2 + $0xed0] sm:$0xf]  ;;  %v2246_v48 = vunpack.c.l.b16 %v11630_v28  ;;  %v7147_v14 = vld [vmem:[#allocation2 + $0x1b0] sm:$0xf0] }
 0x20d   :  { %v10814_v33 = vld [vmem:[#allocation2 + $0xeec] sm:$0xf0]  ;;  %3864 = vmatpush.bf16.msrb.mxu2 %v8586_v45  ;;  %v7950_v45 = vor.u32 %v10586_v21, %v7947_v25  ;;  %v7115_v12 = vld [vmem:[#allocation2 + $0x170] sm:$0xf0] }
 0x20e   :  { %v8265_v37 = vld [vmem:[#allocation2 + $0xa50] sm:$0xf]  ;;  %v8842_v49 = vor.u32 %v10814_v33, %v8841_v31  ;;  %v2766_v5 = vpack.c.b16 %v2246_v48, %v2246_v48  ;;  %v7691_v48 = vld [vmem:[#allocation2 + $0x5f0] sm:$0xf0] }
 0x20f   :  { %v10670_v38 = vld [vmem:[#allocation2 + $0xa6c] sm:$0xf0]  ;;  %v7051_v21 = vld [vmem:[#allocation2 + $0xf0] sm:$0xf0] }
 0x210   :  { %v8009_v46 = vld [vmem:[#allocation2 + $0x850] sm:$0xf]  ;;  %v8266_v52 = vor.u32 %v10670_v38, %v8265_v37  ;;  %3877 = vmatpush.bf16.msrb.mxu3 %v8842_v49  ;;  %v3303_v24 = vand.u32 %v11538_v26, %v2766_v5  ;;  %v10458_v38 = vld [vmem:[#allocation2 + $0x3d4] sm:$0xf] }
 0x211   :  { %v10606_v47 = vld [vmem:[#allocation2 + $0x86c] sm:$0xf0]  ;;  %v10578_v49 = vld [vmem:[#allocation2 + $0x794] sm:$0xf] }
 0x212   :  { %v8553_v50 = vld [vmem:[#allocation2 + $0xc90] sm:$0xf]  ;;  %v8010_v55 = vor.u32 %v10606_v47, %v8009_v46  ;;  %3853 = vmatpush.bf16.msrb.mxu1 %v8266_v52  ;;  %v7150_v46 = vor.u32 %v10386_v7, %v7147_v14  ;;  %v10522_v47 = vld [vmem:[#allocation2 + $0x5d4] sm:$0xf]  ;;  %v11644_v7 = vpop.f32.mrf.mxu1 }
 0x213   :  { %v10742_v51 = vld [vmem:[#allocation2 + $0xcac] sm:$0xf0]  ;;  %v10378_v52 = vld [vmem:[#allocation2 + $0x154] sm:$0xf]  ;;  %v7694_v59 = vor.u32 %v10522_v47, %v7691_v48 }
 0x214   :  { %v8809_v53 = vld [vmem:[#allocation2 + $0xe90] sm:$0xf]  ;;  %v8554_v1 = vor.u32 %v10742_v51, %v8553_v50  ;;  %3840 = vmatpush.bf16.msrb.mxu0 %v8010_v55  ;;  %v3572_v50 = vpop.f32.mrf.mxu3  ;;  %v10450_v55 = vld [vmem:[#allocation2 + $0x394] sm:$0xf] }
 0x215   :  { %v10806_v58 = vld [vmem:[#allocation2 + $0xeac] sm:$0xf0]  ;;  %v7339_v25 = vld [vmem:[#allocation2 + $0x330] sm:$0xf0] }
 0x216   :  { %v7977_v60 = vld [vmem:[#allocation2 + $0x810] sm:$0xf]  ;;  %v8810_v6 = vor.u32 %v10806_v58, %v8809_v53  ;;  %3865 = vmatpush.bf16.msrb.mxu2 %v8554_v1  ;;  %v7438_v58 = vor.u32 %v10458_v38, %v7435_v44  ;;  %v10570_v1 = vld [vmem:[#allocation2 + $0x754] sm:$0xf] }
 0x217   :  { %v8233_v61 = vld [vmem:[#allocation2 + $0xa10] sm:$0xf]  ;;  %v10354_v38 = vld [vmem:[#allocation2 + $0x94] sm:$0xf] }
 0x218   :  { %v10662_v62 = vld [vmem:[#allocation2 + $0xa2c] sm:$0xf0]  ;;  %3878 = vmatpush.bf16.msrb.mxu3 %v8810_v6  ;;  %v7662_v6 = vor.u32 %v10514_v63, %v7659_v0  ;;  %v7019_v44 = vld [vmem:[#allocation2 + $0xb0] sm:$0xf0]  ;;  %v3609_v63 = vpop.f32.mrf.mxu2 }
 0x219   :  { %v10598_v2 = vld [vmem:[#allocation2 + $0x82c] sm:$0xf0]  ;;  %v8234_v13 = vor.u32 %v10662_v62, %v8233_v61  ;;  %v7918_v61 = vor.u32 %v10578_v49, %v7915_v29  ;;  %v7118_v62 = vor.u32 %v10378_v52, %v7115_v12  ;;  %v7307_v47 = vld [vmem:[#allocation2 + $0x2f0] sm:$0xf0]  ;;  %v7022_v49 = vor.u32 %v10354_v38, %v7019_v44  ;;  %v3635_v52 = vpop.f32.mrf.mxu0 }
 0x21a   :  { %v8521_v8 = vld [vmem:[#allocation2 + $0xc50] sm:$0xf]  ;;  %v7978_v19 = vor.u32 %v10598_v2, %v7977_v60  ;;  %v7403_v60 = vld [vmem:[#allocation2 + $0x3b0] sm:$0xf0] }
 0x21b   :  { %v10734_v10 = vld [vmem:[#allocation2 + $0xc6c] sm:$0xf0]  ;;  %3854 = vmatpush.bf16.msrb.mxu1 %v8234_v13  ;;  %v7883_v2 = vld [vmem:[#allocation2 + $0x770] sm:$0xf0]  ;;  %v7406_v5 = vor.u32 %v10450_v55, %v7403_v60 }
 0x21c   :  { %v8777_v15 = vld [vmem:[#allocation2 + $0xe50] sm:$0xf]  ;;  %v8522_v23 = vor.u32 %v10734_v10, %v8521_v8  ;;  %3841 = vmatpush.bf16.msrb.mxu0 %v7978_v19  ;;  %v10442_v8 = vld [vmem:[#allocation2 + $0x354] sm:$0xf]  ;;  %v7886_v43 = vor.u32 %v10570_v1, %v7883_v2 }
 0x21d   :  { %v10798_v18 = vld [vmem:[#allocation2 + $0xe6c] sm:$0xf0]  ;;  %v7371_v10 = vld [vmem:[#allocation2 + $0x370] sm:$0xf0] }
 0x21e   :  { %v8778_v27 = vor.u32 %v10798_v18, %v8777_v15  ;;  %v8489_v40 = vld [vmem:[#allocation2 + $0xc10] sm:$0xf]  ;;  %3866 = vmatpush.bf16.msrb.mxu2 %v8522_v23  ;;  %3855 = vmatmul.bf16.vlgmr.msrb.gmra.mxu1 %v11555_v57  ;;  %v10506_v13 = vld [vmem:[#allocation2 + $0x554] sm:$0xf]  ;;  %v7374_v22 = vor.u32 %v10442_v8, %v7371_v10 }
 0x21f   :  { %v10726_v31 = vld [vmem:[#allocation2 + $0xc2c] sm:$0xf0]  ;;  %3899 = vmatpush.bf16.msra.mxu1 %v7182_v20  ;;  %3842 = vmatmul.bf16.vlgmr.msrb.gmra.mxu0 %v11545_v39  ;;  %v7627_v15 = vld [vmem:[#allocation2 + $0x570] sm:$0xf0] }
 0x220   :  { %v8745_v33 = vld [vmem:[#allocation2 + $0xe10] sm:$0xf]  ;;  %3893 = vmatpush.bf16.msra.mxu0 %v3303_v24  ;;  %v8490_v51 = vor.u32 %v10726_v31, %v8489_v40  ;;  %3879 = vmatpush.bf16.msrb.mxu3 %v8778_v27  ;;  %v10562_v18 = vld [vmem:[#allocation2 + $0x714] sm:$0xf]  ;;  %v7630_v23 = vor.u32 %v10506_v13, %v7627_v15 }
 0x221   :  { %v10790_v37 = vld [vmem:[#allocation2 + $0xe2c] sm:$0xf0]  ;;  %v7851_v19 = vld [vmem:[#allocation2 + $0x730] sm:$0xf0] }
 0x222   :  { %v8746_v53 = vor.u32 %v10790_v37, %v8745_v33  ;;  %3867 = vmatpush.bf16.msrb.mxu2 %v8490_v51  ;;  %v10362_v20 = vld [vmem:[#allocation2 + $0xd4] sm:$0xf]  ;;  %v7854_v14 = vor.u32 %v10562_v18, %v7851_v19 }
 0x223   :  { %3900 = vmatpush.bf16.msra.mxu1 %v7150_v46  ;;  %v10434_v24 = vld [vmem:[#allocation2 + $0x314] sm:$0xf]  ;;  %v7054_v27 = vor.u32 %v10362_v20, %v7051_v21 }
 0x224   :  { %3938 = vmatpush.bf16.msrb.mxu0 %v7950_v45  ;;  %3880 = vmatpush.bf16.msrb.mxu3 %v8746_v53  ;;  %v10498_v40 = vld [vmem:[#allocation2 + $0x514] sm:$0xf]  ;;  %v7342_v30 = vor.u32 %v10434_v24, %v7339_v25 }
 0x225   :  { %3868 = vmatmul.bf16.vlgmr.msrb.gmra.mxu2 %v11543_v35  ;;  %v7595_v31 = vld [vmem:[#allocation2 + $0x530] sm:$0xf0] }
 0x226   :  { %3912 = vmatpush.bf16.msra.mxu2 %v7438_v58  ;;  %v10554_v33 = vld [vmem:[#allocation2 + $0x6d4] sm:$0xf]  ;;  %v7598_v45 = vor.u32 %v10498_v40, %v7595_v31 }
 0x227   :  { %3901 = vmatpush.bf16.msra.mxu1 %v7118_v62  ;;  %3881 = vmatmul.bf16.vlgmr.msrb.gmra.mxu3 %v11548_v41  ;;  %v7819_v37 = vld [vmem:[#allocation2 + $0x6f0] sm:$0xf0]  ;;  %v3650_v62 = vpop.f32.mrf.mxu1 }
 0x228   :  { %3925 = vmatpush.bf16.msra.mxu3 %v7694_v59  ;;  %3939 = vmatpush.bf16.msrb.mxu0 %v7918_v61  ;;  %v10426_v46 = vld [vmem:[#allocation2 + $0x2d4] sm:$0xf]  ;;  %v7822_v48 = vor.u32 %v10554_v33, %v7819_v37 }
 0x229   :  { %v10490_v50 = vld [vmem:[#allocation2 + $0x4d4] sm:$0xf]  ;;  %v7310_v59 = vor.u32 %v10426_v46, %v7307_v47 }
 0x22a   :  { %3913 = vmatpush.bf16.msra.mxu2 %v7406_v5  ;;  %v7563_v51 = vld [vmem:[#allocation2 + $0x4f0] sm:$0xf0]  ;;  %v3610_v5 = vadd.f32 %v3609_v63, %v11638_v36  ;;  %v3637_v36 = vpop.f32.mrf.mxu0 }
 0x22b   :  { %3902 = vmatpush.bf16.msra.mxu1 %v7086_v11  ;;  %v10546_v29 = vld [vmem:[#allocation2 + $0x694] sm:$0xf]  ;;  %v7566_v55 = vor.u32 %v10490_v50, %v7563_v51  ;;  %v3611_v50 = vpop.f32.mrf.mxu2 }
 0x22c   :  { %3926 = vmatpush.bf16.msra.mxu3 %v7662_v6  ;;  %3940 = vmatpush.bf16.msrb.mxu0 %v7886_v43  ;;  %v7787_v12 = vld [vmem:[#allocation2 + $0x6b0] sm:$0xf0]  ;;  %v3622_v6 = vpop.f32.mrf.mxu3 }
 0x22d   :  { %v10346_v53 = vld [vmem:[#allocation2 + $0x54] sm:$0xf]  ;;  %v7790_v0 = vor.u32 %v10546_v29, %v7787_v12  ;;  %v3623_v18 = vadd.f32 %v3622_v6, %v3610_v5 }
 0x22e   :  { %3914 = vmatpush.bf16.msra.mxu2 %v7374_v22  ;;  %v6987_v58 = vld [vmem:[#allocation2 + $0x70] sm:$0xf0] }
 0x22f   :  { %3903 = vmatpush.bf16.msra.mxu1 %v7054_v27  ;;  %8987 = vmatmul.msk.bf16.vlgmr.msra.gmra.mxu0 %vm3282_vm2, %v11562_v32  ;;  %v10418_v60 = vld [vmem:[#allocation2 + $0x294] sm:$0xf]  ;;  %v6990_v1 = vor.u32 %v10346_v53, %v6987_v58 }
 0x230   :  { %3927 = vmatpush.bf16.msra.mxu3 %v7630_v23  ;;  %3941 = vmatpush.bf16.msrb.mxu0 %v7854_v14  ;;  %v7275_v61 = vld [vmem:[#allocation2 + $0x2b0] sm:$0xf0]  ;;  %v3636_v14 = vadd.f32 %v3635_v52, %v3623_v18 }
 0x231   :  { %v10482_v2 = vld [vmem:[#allocation2 + $0x494] sm:$0xf]  ;;  %v7278_v11 = vor.u32 %v10418_v60, %v7275_v61 }
 0x232   :  { %3915 = vmatpush.bf16.msra.mxu2 %v7342_v30  ;;  %v7755_v8 = vld [vmem:[#allocation2 + $0x670] sm:$0xf0]  ;;  %v7534_v19 = vor.u32 %v10482_v2, %v7531_v3 }
 0x233   :  { %3904 = vmatpush.bf16.msra.mxu1 %v7022_v49  ;;  %v10338_v10 = vld [vmem:[#allocation2 + $0x14] sm:$0xf]  ;;  %v7758_v22 = vor.u32 %v10538_v4, %v7755_v8 }
 0x234   :  { %3928 = vmatpush.bf16.msra.mxu3 %v7598_v45  ;;  %3942 = vmatpush.bf16.msrb.mxu0 %v7822_v48  ;;  %v6955_v43 = vld [vmem:[#allocation2 + $0x30] sm:$0xf0]  ;;  %v3649_v45 = vadd.f32 %v11644_v7, %v3636_v14  ;;  %v3624_v61 = vpop.f32.mrf.mxu3 }
 0x235   :  { %v10650_v13 = vld [vmem:[#allocation2 + $0x9d4] sm:$0xf]  ;;  %v6958_v23 = vor.u32 %v10338_v10, %v6955_v43 }
 0x236   :  { %3916 = vmatpush.bf16.msra.mxu2 %v7310_v59  ;;  %v8203_v15 = vld [vmem:[#allocation2 + $0x9f0] sm:$0xf0] }
 0x237   :  { %v10410_v20 = vld [vmem:[#allocation2 + $0x254] sm:$0xf]  ;;  %3905 = vmatpush.bf16.msra.mxu1 %v6990_v1  ;;  %v8206_v27 = vor.u32 %v10650_v13, %v8203_v15 }
 0x238   :  { %3929 = vmatpush.bf16.msra.mxu3 %v7566_v55  ;;  %v7243_v21 = vld [vmem:[#allocation2 + $0x270] sm:$0xf0]  ;;  %3943 = vmatpush.bf16.msrb.mxu0 %v7790_v0 }
 0x239   :  { %v10474_v24 = vld [vmem:[#allocation2 + $0x454] sm:$0xf]  ;;  %v7246_v37 = vor.u32 %v10410_v20, %v7243_v21  ;;  %v3661_v20 = vpop.f32.mrf.mxu2 }
 0x23a   :  { %v7499_v25 = vld [vmem:[#allocation2 + $0x470] sm:$0xf0]  ;;  %3917 = vmatpush.bf16.msra.mxu2 %v7278_v11 }
 0x23b   :  { %v10530_v40 = vld [vmem:[#allocation2 + $0x614] sm:$0xf]  ;;  %v7502_v46 = vor.u32 %v10474_v24, %v7499_v25  ;;  %3906 = vmatpush.bf16.msra.mxu1 %v6958_v23  ;;  %v11652_v24 = vadd.f32 %v3661_v20, %v3649_v45 }
 0x23c   :  { %v7723_v31 = vld [vmem:[#allocation2 + $0x630] sm:$0xf0]  ;;  %3930 = vmatpush.bf16.msra.mxu3 %v7534_v19  ;;  %3944 = vmatpush.bf16.msrb.mxu0 %v7758_v22 }
 0x23d   :  { %v10842_v33 = vld [vmem:[#allocation2 + $0xfd4] sm:$0xf]  ;;  %v7726_v51 = vor.u32 %v10530_v40, %v7723_v31 }
 0x23e   :  { %v8971_v38 = vld [vmem:[#allocation2 + $0xff0] sm:$0xf0]  ;;  %3918 = vmatpush.bf16.msra.mxu2 %v7246_v37  ;;  %3907 = vmatmul.bf16.vlgmr.msra.gmra.mxu1 %v11512_v9 }
 0x23f   :  { %v10642_v44 = vld [vmem:[#allocation2 + $0x994] sm:$0xf]  ;;  %3951 = vmatpush.bf16.msrb.mxu1 %v8206_v27  ;;  %v8974_v53 = vor.u32 %v10842_v33, %v8971_v38 }
 0x240   :  { %v8171_v30 = vld [vmem:[#allocation2 + $0x9b0] sm:$0xf0]  ;;  %3931 = vmatpush.bf16.msra.mxu3 %v7502_v46  ;;  %3945 = vmatpush.bf16.msrb.mxu0 %v7726_v51  ;;  %v11656_v46 = vpop.f32.mrf.mxu1 }
 0x241   :  { %v10402_v47 = vld [vmem:[#allocation2 + $0x214] sm:$0xf]  ;;  %v8174_v58 = vor.u32 %v10642_v44, %v8171_v30  ;;  %v3663_v61 = vpop.f32.mrf.mxu2 }
 0x242   :  { %v7211_v48 = vld [vmem:[#allocation2 + $0x230] sm:$0xf0] }
 0x243   :  { %v10466_v49 = vld [vmem:[#allocation2 + $0x414] sm:$0xf]  ;;  %v7214_v7 = vor.u32 %v10402_v47, %v7211_v48  ;;  %3952 = vmatpush.bf16.msrb.mxu1 %v8174_v58  ;;  %3946 = vmatmul.bf16.vlgmr.msrb.gmra.mxu0 %v11520_v16 }
 0x244   :  { %v7467_v29 = vld [vmem:[#allocation2 + $0x430] sm:$0xf0]  ;;  %3990 = vmatpush.bf16.msra.mxu0 %v8974_v53 }
 0x245   :  { %v10714_v52 = vld [vmem:[#allocation2 + $0xbd4] sm:$0xf]  ;;  %v7470_v1 = vor.u32 %v10466_v49, %v7467_v29  ;;  %3919 = vmatpush.bf16.msra.mxu2 %v7214_v7  ;;  %v3687_v29 = vpop.f32.mrf.mxu0 }
 0x246   :  { %v8459_v12 = vld [vmem:[#allocation2 + $0xbf0] sm:$0xf0] }
 0x247   :  { %v10778_v59 = vld [vmem:[#allocation2 + $0xdd4] sm:$0xf]  ;;  %v8462_v2 = vor.u32 %v10714_v52, %v8459_v12  ;;  %3932 = vmatpush.bf16.msra.mxu3 %v7470_v1 }
 0x248   :  { %v8715_v55 = vld [vmem:[#allocation2 + $0xdf0] sm:$0xf0]  ;;  %3920 = vmatmul.bf16.vlgmr.msra.gmra.mxu2 %v11522_v17 }
 0x249   :  { %v10834_v60 = vld [vmem:[#allocation2 + $0xf94] sm:$0xf]  ;;  %v8718_v3 = vor.u32 %v10778_v59, %v8715_v55  ;;  %3964 = vmatpush.bf16.msrb.mxu2 %v8462_v2 }
 0x24a   :  { %v8939_v62 = vld [vmem:[#allocation2 + $0xfb0] sm:$0xf0]  ;;  %3933 = vmatmul.bf16.vlgmr.msra.gmra.mxu3 %v11506_v54 }
 0x24b   :  { %v10634_v63 = vld [vmem:[#allocation2 + $0x954] sm:$0xf]  ;;  %v8942_v6 = vor.u32 %v10834_v60, %v8939_v62  ;;  %3977 = vmatpush.bf16.msrb.mxu3 %v8718_v3 }
 0x24c   :  { %v8139_v0 = vld [vmem:[#allocation2 + $0x970] sm:$0xf0] }
 0x24d   :  { %v10706_v4 = vld [vmem:[#allocation2 + $0xb94] sm:$0xf]  ;;  %v8142_v8 = vor.u32 %v10634_v63, %v8139_v0  ;;  %3991 = vmatpush.bf16.msra.mxu0 %v8942_v6 }
 0x24e   :  { %v8427_v5 = vld [vmem:[#allocation2 + $0xbb0] sm:$0xf0] }
 0x24f   :  { %v10770_v10 = vld [vmem:[#allocation2 + $0xd94] sm:$0xf]  ;;  %v8430_v19 = vor.u32 %v10706_v4, %v8427_v5  ;;  %3953 = vmatpush.bf16.msrb.mxu1 %v8142_v8  ;;  %v2247_v5 = vunpack.c.h.b16 %v11630_v28  ;;  %v689_v8 = vperm.slane %v11632_v42, 3 }
 0x250   :  { %v8683_v43 = vld [vmem:[#allocation2 + $0xdb0] sm:$0xf0] }
 0x251   :  { %v10826_v11 = vld [vmem:[#allocation2 + $0xf54] sm:$0xf]  ;;  %v8686_v21 = vor.u32 %v10770_v10, %v8683_v43  ;;  %3965 = vmatpush.bf16.msrb.mxu2 %v8430_v19 }
 0x252   :  { %v8907_v13 = vld [vmem:[#allocation2 + $0xf70] sm:$0xf0] }
 0x253   :  { %v10626_v15 = vld [vmem:[#allocation2 + $0x914] sm:$0xf]  ;;  %v8910_v25 = vor.u32 %v10826_v11, %v8907_v13  ;;  %3978 = vmatpush.bf16.msrb.mxu3 %v8686_v21  ;;  %v3702_v13 = vpop.f32.mrf.mxu1 }
 0x254   :  { %v8107_v18 = vld [vmem:[#allocation2 + $0x930] sm:$0xf0] }
 0x255   :  { %v10698_v22 = vld [vmem:[#allocation2 + $0xb54] sm:$0xf]  ;;  %v8110_v36 = vor.u32 %v10626_v15, %v8107_v18  ;;  %3992 = vmatpush.bf16.msra.mxu0 %v8910_v25 }
 0x256   :  { %v8395_v23 = vld [vmem:[#allocation2 + $0xb70] sm:$0xf0] }
 0x257   :  { %v10762_v14 = vld [vmem:[#allocation2 + $0xd54] sm:$0xf]  ;;  %v8398_v38 = vor.u32 %v10698_v22, %v8395_v23  ;;  %3954 = vmatpush.bf16.msrb.mxu1 %v8110_v36  ;;  %v3689_v22 = vpop.f32.mrf.mxu0  ;;  %v3674_v23 = vpop.f32.mrf.mxu3 }
 0x258   :  { %v8651_v27 = vld [vmem:[#allocation2 + $0xd70] sm:$0xf0]  ;;  %v3675_v42 = vadd.f32 %v3674_v23, %v689_v8  ;;  %v7921_v8 = vld [vmem:[#allocation2 + $0x798] sm:$0xf] }
 0x259   :  { %v10818_v40 = vld [vmem:[#allocation2 + $0xf14] sm:$0xf]  ;;  %v8654_v44 = vor.u32 %v10762_v14, %v8651_v27  ;;  %3966 = vmatpush.bf16.msrb.mxu2 %v8398_v38  ;;  %v2767_v14 = vpack.c.b16 %v2247_v5, %v2247_v5  ;;  %v7409_v22 = vld [vmem:[#allocation2 + $0x398] sm:$0xf] }
 0x25a   :  { %v8875_v31 = vld [vmem:[#allocation2 + $0xf30] sm:$0xf0] }
 0x25b   :  { %v10618_v33 = vld [vmem:[#allocation2 + $0x8d4] sm:$0xf]  ;;  %v8878_v47 = vor.u32 %v10818_v40, %v8875_v31  ;;  %3979 = vmatpush.bf16.msrb.mxu3 %v8654_v44 }
 0x25c   :  { %v8075_v37 = vld [vmem:[#allocation2 + $0x8f0] sm:$0xf0] }
 0x25d   :  { %v10690_v30 = vld [vmem:[#allocation2 + $0xb14] sm:$0xf]  ;;  %v8078_v48 = vor.u32 %v10618_v33, %v8075_v37  ;;  %3993 = vmatpush.bf16.msra.mxu0 %v8878_v47  ;;  %v3688_v47 = vadd.f32 %v3687_v29, %v3675_v42  ;;  %v7633_v42 = vld [vmem:[#allocation2 + $0x558] sm:$0xf] }
 0x25e   :  { %v8363_v45 = vld [vmem:[#allocation2 + $0xb30] sm:$0xf0] }
 0x25f   :  { %v10754_v49 = vld [vmem:[#allocation2 + $0xd14] sm:$0xf]  ;;  %v8366_v58 = vor.u32 %v10690_v30, %v8363_v45  ;;  %3955 = vmatpush.bf16.msrb.mxu1 %v8078_v48  ;;  %v3713_v48 = vpop.f32.mrf.mxu2  ;;  %v3676_v5 = vpop.f32.mrf.mxu3 }
 0x260   :  { %v8619_v50 = vld [vmem:[#allocation2 + $0xd30] sm:$0xf0]  ;;  %v7057_v5 = vld [vmem:[#allocation2 + $0xd8] sm:$0xf] }
 0x261   :  { %v10810_v51 = vld [vmem:[#allocation2 + $0xed4] sm:$0xf]  ;;  %v8622_v59 = vor.u32 %v10754_v49, %v8619_v50  ;;  %3967 = vmatpush.bf16.msrb.mxu2 %v8366_v58  ;;  %v3306_v50 = vand.u32 %v11538_v26, %v2767_v14  ;;  %v10527_v58 = vld [vmem:[#allocation2 + $0x5f4] sm:$0xf0] }
 0x262   :  { %v8843_v52 = vld [vmem:[#allocation2 + $0xef0] sm:$0xf0]  ;;  %v10575_v14 = vld [vmem:[#allocation2 + $0x774] sm:$0xf0] }
 0x263   :  { %v10610_v12 = vld [vmem:[#allocation2 + $0x894] sm:$0xf]  ;;  %v8846_v7 = vor.u32 %v10810_v51, %v8843_v52  ;;  %3980 = vmatpush.bf16.msrb.mxu3 %v8622_v59  ;;  %v7953_v51 = vld [vmem:[#allocation2 + $0x7d8] sm:$0xf] }
 0x264   :  { %v8043_v53 = vld [vmem:[#allocation2 + $0x8b0] sm:$0xf0]  ;;  %v10591_v52 = vld [vmem:[#allocation2 + $0x7f4] sm:$0xf0] }
 0x265   :  { %v10682_v55 = vld [vmem:[#allocation2 + $0xad4] sm:$0xf]  ;;  %v8046_v62 = vor.u32 %v10610_v12, %v8043_v53  ;;  %3994 = vmatpush.bf16.msra.mxu0 %v8846_v7  ;;  %v7697_v53 = vld [vmem:[#allocation2 + $0x5d8] sm:$0xf] }
 0x266   :  { %v8331_v60 = vld [vmem:[#allocation2 + $0xaf0] sm:$0xf0] }
 0x267   :  { %v10746_v63 = vld [vmem:[#allocation2 + $0xcd4] sm:$0xf]  ;;  %v8334_v6 = vor.u32 %v10682_v55, %v8331_v60  ;;  %3956 = vmatpush.bf16.msrb.mxu1 %v8046_v62  ;;  %v3701_v55 = vadd.f32 %v11656_v46, %v3688_v47  ;;  %v10583_v46 = vld [vmem:[#allocation2 + $0x7b4] sm:$0xf0]  ;;  %v3715_v23 = vpop.f32.mrf.mxu2 }
 0x268   :  { %v8587_v0 = vld [vmem:[#allocation2 + $0xcf0] sm:$0xf0]  ;;  %v7857_v47 = vld [vmem:[#allocation2 + $0x718] sm:$0xf] }
 0x269   :  { %v10802_v1 = vld [vmem:[#allocation2 + $0xe94] sm:$0xf]  ;;  %v8590_v10 = vor.u32 %v10746_v63, %v8587_v0  ;;  %3968 = vmatpush.bf16.msrb.mxu2 %v8334_v6  ;;  %v7954_v63 = vor.u32 %v10591_v52, %v7953_v51  ;;  %v7185_v0 = vld [vmem:[#allocation2 + $0x1d8] sm:$0xf] }
 0x26a   :  { %v8811_v2 = vld [vmem:[#allocation2 + $0xeb0] sm:$0xf0]  ;;  %v10463_v6 = vld [vmem:[#allocation2 + $0x3f4] sm:$0xf0] }
 0x26b   :  { %v10602_v3 = vld [vmem:[#allocation2 + $0x854] sm:$0xf]  ;;  %v8814_v15 = vor.u32 %v10802_v1, %v8811_v2  ;;  %3981 = vmatpush.bf16.msrb.mxu3 %v8590_v10  ;;  %v10399_v1 = vld [vmem:[#allocation2 + $0x1f4] sm:$0xf0] }
 0x26c   :  { %v8011_v4 = vld [vmem:[#allocation2 + $0x870] sm:$0xf0]  ;;  %v7441_v2 = vld [vmem:[#allocation2 + $0x3d8] sm:$0xf] }
 0x26d   :  { %v10674_v43 = vld [vmem:[#allocation2 + $0xa94] sm:$0xf]  ;;  %v8014_v18 = vor.u32 %v10602_v3, %v8011_v4  ;;  %3995 = vmatpush.bf16.msra.mxu0 %v8814_v15  ;;  %v11662_v3 = vadd.f32 %v3713_v48, %v3701_v55  ;;  %v7698_v4 = vor.u32 %v10527_v58, %v7697_v53  ;;  %v7186_v15 = vor.u32 %v10399_v1, %v7185_v0  ;;  %v10567_v48 = vld [vmem:[#allocation2 + $0x734] sm:$0xf0]  ;;  %v11668_v55 = vpop.f32.mrf.mxu1 }
 0x26e   :  { %v8299_v11 = vld [vmem:[#allocation2 + $0xab0] sm:$0xf0]  ;;  %v7089_v53 = vld [vmem:[#allocation2 + $0x118] sm:$0xf] }
 0x26f   :  { %v10738_v19 = vld [vmem:[#allocation2 + $0xc94] sm:$0xf]  ;;  %v8302_v27 = vor.u32 %v10674_v43, %v8299_v11  ;;  %3957 = vmatpush.bf16.msrb.mxu1 %v8014_v18  ;;  %v7665_v43 = vld [vmem:[#allocation2 + $0x598] sm:$0xf]  ;;  %v7442_v18 = vor.u32 %v10463_v6, %v7441_v2 }
 0x270   :  { %v8555_v20 = vld [vmem:[#allocation2 + $0xcb0] sm:$0xf0]  ;;  %v10519_v11 = vld [vmem:[#allocation2 + $0x5b4] sm:$0xf0] }
 0x271   :  { %v10794_v21 = vld [vmem:[#allocation2 + $0xe54] sm:$0xf]  ;;  %v8558_v40 = vor.u32 %v10738_v19, %v8555_v20  ;;  %3969 = vmatpush.bf16.msrb.mxu2 %v8302_v27  ;;  %v7922_v19 = vor.u32 %v10583_v46, %v7921_v8  ;;  %v7153_v20 = vld [vmem:[#allocation2 + $0x198] sm:$0xf] }
 0x272   :  { %v8779_v25 = vld [vmem:[#allocation2 + $0xe70] sm:$0xf0]  ;;  %v10511_v27 = vld [vmem:[#allocation2 + $0x574] sm:$0xf0] }
 0x273   :  { %v10594_v28 = vld [vmem:[#allocation2 + $0x814] sm:$0xf]  ;;  %v8782_v37 = vor.u32 %v10794_v21, %v8779_v25  ;;  %3982 = vmatpush.bf16.msrb.mxu3 %v8558_v40  ;;  %v10391_v21 = vld [vmem:[#allocation2 + $0x1b4] sm:$0xf0]  ;;  %v7666_v25 = vor.u32 %v10519_v11, %v7665_v43 }
 0x274   :  { %v7979_v36 = vld [vmem:[#allocation2 + $0x830] sm:$0xf0]  ;;  %v7154_v40 = vor.u32 %v10391_v21, %v7153_v20  ;;  %v10375_v58 = vld [vmem:[#allocation2 + $0x134] sm:$0xf0] }
 0x275   :  { %v10666_v31 = vld [vmem:[#allocation2 + $0xa54] sm:$0xf]  ;;  %v7982_v38 = vor.u32 %v10594_v28, %v7979_v36  ;;  %3996 = vmatpush.bf16.msra.mxu0 %v8782_v37  ;;  %v10455_v28 = vld [vmem:[#allocation2 + $0x3b4] sm:$0xf0]  ;;  %v7090_v1 = vor.u32 %v10375_v58, %v7089_v53 }
 0x276   :  { %v8267_v33 = vld [vmem:[#allocation2 + $0xa70] sm:$0xf0]  ;;  %v7889_v36 = vld [vmem:[#allocation2 + $0x758] sm:$0xf] }
 0x277   :  { %v10730_v44 = vld [vmem:[#allocation2 + $0xc54] sm:$0xf]  ;;  %v8270_v12 = vor.u32 %v10666_v31, %v8267_v33  ;;  %3958 = vmatpush.bf16.msrb.mxu1 %v7982_v38  ;;  %v7410_v31 = vor.u32 %v10455_v28, %v7409_v22  ;;  %v7890_v33 = vor.u32 %v10575_v14, %v7889_v36  ;;  %v7121_v37 = vld [vmem:[#allocation2 + $0x158] sm:$0xf] }
 0x278   :  { %v8523_v30 = vld [vmem:[#allocation2 + $0xc70] sm:$0xf0]  ;;  %v10383_v38 = vld [vmem:[#allocation2 + $0x174] sm:$0xf0] }
 0x279   :  { %v10786_v45 = vld [vmem:[#allocation2 + $0xe14] sm:$0xf]  ;;  %v8526_v60 = vor.u32 %v10730_v44, %v8523_v30  ;;  %3970 = vmatpush.bf16.msrb.mxu2 %v8270_v12  ;;  %v7377_v44 = vld [vmem:[#allocation2 + $0x358] sm:$0xf]  ;;  %v7634_v30 = vor.u32 %v10511_v27, %v7633_v42  ;;  %v7122_v51 = vor.u32 %v10383_v38, %v7121_v37  ;;  %v7858_v12 = vor.u32 %v10567_v48, %v7857_v47 }
 0x27a   :  { %v8747_v49 = vld [vmem:[#allocation2 + $0xe30] sm:$0xf0]  ;;  %3959 = vmatmul.bf16.vlgmr.msrb.gmra.mxu1 %v11545_v39  ;;  %v10495_v0 = vld [vmem:[#allocation2 + $0x4f4] sm:$0xf0] }
 0x27b   :  { %v10658_v59 = vld [vmem:[#allocation2 + $0xa14] sm:$0xf]  ;;  %v8750_v29 = vor.u32 %v10786_v45, %v8747_v49  ;;  %4010 = vmatpush.bf16.msra.mxu1 %v3306_v50  ;;  %3983 = vmatpush.bf16.msrb.mxu3 %v8526_v60  ;;  %v10447_v45 = vld [vmem:[#allocation2 + $0x374] sm:$0xf0] }
 0x27c   :  { %v8235_v61 = vld [vmem:[#allocation2 + $0xa30] sm:$0xf0]  ;;  %v7601_v49 = vld [vmem:[#allocation2 + $0x518] sm:$0xf]  ;;  %v7378_v52 = vor.u32 %v10447_v45, %v7377_v44 }
 0x27d   :  { %v10722_v7 = vld [vmem:[#allocation2 + $0xc14] sm:$0xf]  ;;  %v8238_v10 = vor.u32 %v10658_v59, %v8235_v61  ;;  %3997 = vmatpush.bf16.msra.mxu0 %v8750_v29  ;;  %v10503_v50 = vld [vmem:[#allocation2 + $0x534] sm:$0xf0]  ;;  %v3739_v29 = vpop.f32.mrf.mxu0 }
 0x27e   :  { %v8491_v62 = vld [vmem:[#allocation2 + $0xc30] sm:$0xf0]  ;;  %v7345_v59 = vld [vmem:[#allocation2 + $0x318] sm:$0xf]  ;;  %v7602_v60 = vor.u32 %v10503_v50, %v7601_v49 }
 0x27f   :  { %v8494_v13 = vor.u32 %v10722_v7, %v8491_v62  ;;  %4055 = vmatpush.bf16.msrb.mxu1 %v7954_v63  ;;  %3971 = vmatpush.bf16.msrb.mxu2 %v8238_v10  ;;  %v10439_v61 = vld [vmem:[#allocation2 + $0x334] sm:$0xf0] }
 0x280   :  { %3998 = vmatmul.bf16.vlgmr.msra.gmra.mxu0 %v11548_v41  ;;  %v7825_v7 = vld [vmem:[#allocation2 + $0x6d8] sm:$0xf]  ;;  %v7346_v2 = vor.u32 %v10439_v61, %v7345_v59 }
 0x281   :  { %4042 = vmatpush.bf16.msrb.mxu0 %v7698_v4  ;;  %3984 = vmatpush.bf16.msrb.mxu3 %v8494_v13  ;;  %v10559_v62 = vld [vmem:[#allocation2 + $0x6f4] sm:$0xf0] }
 0x282   :  { %3972 = vmatmul.bf16.vlgmr.msrb.gmra.mxu2 %v11555_v57  ;;  %v7569_v63 = vld [vmem:[#allocation2 + $0x4d8] sm:$0xf]  ;;  %v7826_v4 = vor.u32 %v10559_v62, %v7825_v7 }
 0x283   :  { %4016 = vmatpush.bf16.msra.mxu2 %v7186_v15  ;;  %4056 = vmatpush.bf16.msrb.mxu1 %v7922_v19  ;;  %v10367_v6 = vld [vmem:[#allocation2 + $0xf4] sm:$0xf0]  ;;  %v7570_v46 = vor.u32 %v10495_v0, %v7569_v63 }
 0x284   :  { %3985 = vmatmul.bf16.vlgmr.msrb.gmra.mxu3 %v11543_v35  ;;  %v7313_v8 = vld [vmem:[#allocation2 + $0x2d8] sm:$0xf] }
 0x285   :  { %4029 = vmatpush.bf16.msra.mxu3 %v7442_v18  ;;  %4043 = vmatpush.bf16.msrb.mxu0 %v7666_v25  ;;  %v10431_v10 = vld [vmem:[#allocation2 + $0x2f4] sm:$0xf0]  ;;  %v7058_v18 = vor.u32 %v10367_v6, %v7057_v5  ;;  %v3754_v25 = vpop.f32.mrf.mxu1  ;;  %v3741_v27 = vpop.f32.mrf.mxu0 }
 0x286   :  { %v7793_v43 = vld [vmem:[#allocation2 + $0x698] sm:$0xf]  ;;  %v7314_v19 = vor.u32 %v10431_v10, %v7313_v8 }
 0x287   :  { %4017 = vmatpush.bf16.msra.mxu2 %v7154_v40  ;;  %4057 = vmatpush.bf16.msrb.mxu1 %v7890_v33  ;;  %v10551_v11 = vld [vmem:[#allocation2 + $0x6b4] sm:$0xf0]  ;;  %v3726_v40 = vpop.f32.mrf.mxu3 }
 0x288   :  { %v7537_v13 = vld [vmem:[#allocation2 + $0x498] sm:$0xf]  ;;  %v7794_v20 = vor.u32 %v10551_v11, %v7793_v43  ;;  %v3727_v37 = vadd.f32 %v3726_v40, %v11662_v3 }
 0x289   :  { %4030 = vmatpush.bf16.msra.mxu3 %v7410_v31  ;;  %4044 = vmatpush.bf16.msrb.mxu0 %v7634_v30  ;;  %v10487_v15 = vld [vmem:[#allocation2 + $0x4b4] sm:$0xf0]  ;;  %v3765_v30 = vpop.f32.mrf.mxu2 }
 0x28a   :  { %8988 = vmatmul.msk.bf16.vlgmr.msra.gmra.mxu1 %vm3282_vm2, %v11562_v32  ;;  %v7025_v21 = vld [vmem:[#allocation2 + $0x98] sm:$0xf]  ;;  %v7538_v28 = vor.u32 %v10487_v15, %v7537_v13 }
 0x28b   :  { %4018 = vmatpush.bf16.msra.mxu2 %v7122_v51  ;;  %4058 = vmatpush.bf16.msrb.mxu1 %v7858_v12  ;;  %v10359_v22 = vld [vmem:[#allocation2 + $0xb4] sm:$0xf0]  ;;  %v3740_v51 = vadd.f32 %v3739_v29, %v3727_v37 }
 0x28c   :  { %v7281_v23 = vld [vmem:[#allocation2 + $0x298] sm:$0xf]  ;;  %v7026_v38 = vor.u32 %v10359_v22, %v7025_v21 }
 0x28d   :  { %4031 = vmatpush.bf16.msra.mxu3 %v7378_v52  ;;  %4045 = vmatpush.bf16.msrb.mxu0 %v7602_v60  ;;  %v10423_v36 = vld [vmem:[#allocation2 + $0x2b4] sm:$0xf0]  ;;  %v3753_v61 = vadd.f32 %v11668_v55, %v3740_v51 }
 0x28e   :  { %v7761_v14 = vld [vmem:[#allocation2 + $0x658] sm:$0xf]  ;;  %v7282_v45 = vor.u32 %v10423_v36, %v7281_v23 }
 0x28f   :  { %4019 = vmatpush.bf16.msra.mxu2 %v7090_v1  ;;  %4059 = vmatpush.bf16.msrb.mxu1 %v7826_v4  ;;  %v10543_v42 = vld [vmem:[#allocation2 + $0x674] sm:$0xf0]  ;;  %v3766_v6 = vadd.f32 %v3765_v30, %v3753_v61  ;;  %v3728_v55 = vpop.f32.mrf.mxu3 }
 0x290   :  { %v7505_v31 = vld [vmem:[#allocation2 + $0x458] sm:$0xf]  ;;  %v7762_v47 = vor.u32 %v10543_v42, %v7761_v14 }
 0x291   :  { %4032 = vmatpush.bf16.msra.mxu3 %v7346_v2  ;;  %4046 = vmatpush.bf16.msrb.mxu0 %v7570_v46  ;;  %v10479_v33 = vld [vmem:[#allocation2 + $0x474] sm:$0xf0] }
 0x292   :  { %v6993_v44 = vld [vmem:[#allocation2 + $0x58] sm:$0xf]  ;;  %v7506_v52 = vor.u32 %v10479_v33, %v7505_v31 }
 0x293   :  { %4020 = vmatpush.bf16.msra.mxu2 %v7058_v18  ;;  %4060 = vmatpush.bf16.msrb.mxu1 %v7794_v20  ;;  %v10351_v48 = vld [vmem:[#allocation2 + $0x74] sm:$0xf0] }
 0x294   :  { %v7249_v49 = vld [vmem:[#allocation2 + $0x258] sm:$0xf]  ;;  %v6994_v7 = vor.u32 %v10351_v48, %v6993_v44 }
 0x295   :  { %4033 = vmatpush.bf16.msra.mxu3 %v7314_v19  ;;  %v10415_v50 = vld [vmem:[#allocation2 + $0x274] sm:$0xf0]  ;;  %4047 = vmatpush.bf16.msrb.mxu0 %v7538_v28  ;;  %v3767_v28 = vpop.f32.mrf.mxu2 }
 0x296   :  { %v7473_v12 = vld [vmem:[#allocation2 + $0x418] sm:$0xf]  ;;  %v7250_v1 = vor.u32 %v10415_v50, %v7249_v49 }
 0x297   :  { %v7729_v53 = vld [vmem:[#allocation2 + $0x618] sm:$0xf]  ;;  %4021 = vmatpush.bf16.msra.mxu2 %v7026_v38  ;;  %4061 = vmatpush.bf16.msrb.mxu1 %v7762_v47 }
 0x298   :  { %v10535_v58 = vld [vmem:[#allocation2 + $0x634] sm:$0xf0] }
 0x299   :  { %v10471_v59 = vld [vmem:[#allocation2 + $0x434] sm:$0xf0]  ;;  %4034 = vmatpush.bf16.msra.mxu3 %v7282_v45  ;;  %v7730_v2 = vor.u32 %v10535_v58, %v7729_v53  ;;  %4048 = vmatpush.bf16.msrb.mxu0 %v7506_v52  ;;  %v3778_v52 = vpop.f32.mrf.mxu3 }
 0x29a   :  { %v8977_v60 = vld [vmem:[#allocation2 + $0xfd8] sm:$0xf]  ;;  %v7474_v8 = vor.u32 %v10471_v59, %v7473_v12 }
 0x29b   :  { %v10847_v3 = vld [vmem:[#allocation2 + $0xff4] sm:$0xf0]  ;;  %4022 = vmatpush.bf16.msra.mxu2 %v6994_v7  ;;  %4062 = vmatpush.bf16.msrb.mxu1 %v7730_v2  ;;  %v11678_v7 = vld [vmem:[#allocation4] sm:$0xff] }
 0x29c   :  { %v8721_v62 = vld [vmem:[#allocation2 + $0xdd8] sm:$0xf]  ;;  %v8978_v46 = vor.u32 %v10847_v3, %v8977_v60  ;;  %v11676_v60 = vadd.f32 %v3778_v52, %v3766_v6 }
 0x29d   :  { %v10783_v63 = vld [vmem:[#allocation2 + $0xdf4] sm:$0xf0]  ;;  %4035 = vmatpush.bf16.msra.mxu3 %v7250_v1  ;;  %4049 = vmatpush.bf16.msrb.mxu0 %v7474_v8 }
 0x29e   :  { %v6961_v0 = vld [vmem:[#allocation2 + $0x18] sm:$0xf]  ;;  %v8722_v13 = vor.u32 %v10783_v63, %v8721_v62  ;;  %4063 = vmatmul.bf16.vlgmr.msrb.gmra.mxu1 %v11520_v16  ;;  %v690_v62 = vperm.slane %v11678_v7, 4 }
 0x29f   :  { %v10343_v29 = vld [vmem:[#allocation2 + $0x34] sm:$0xf0]  ;;  %4107 = vmatpush.bf16.msra.mxu1 %v8978_v46 }
 0x2a0   :  { %v7217_v4 = vld [vmem:[#allocation2 + $0x218] sm:$0xf]  ;;  %v6962_v20 = vor.u32 %v10343_v29, %v6961_v0  ;;  %4050 = vmatmul.bf16.vlgmr.msrb.gmra.mxu0 %v11506_v54 }
 0x2a1   :  { %v10407_v5 = vld [vmem:[#allocation2 + $0x234] sm:$0xf0]  ;;  %4094 = vmatpush.bf16.msra.mxu0 %v8722_v13  ;;  %v3780_v28 = vpop.f32.mrf.mxu3 }
 0x2a2   :  { %v8209_v10 = vld [vmem:[#allocation2 + $0x9d8] sm:$0xf]  ;;  %v7218_v23 = vor.u32 %v10407_v5, %v7217_v4  ;;  %4023 = vmatpush.bf16.msra.mxu2 %v6962_v20  ;;  %v3804_v5 = vpop.f32.mrf.mxu1 }
 0x2a3   :  { %v10655_v43 = vld [vmem:[#allocation2 + $0x9f4] sm:$0xf0] }
 0x2a4   :  { %v8465_v11 = vld [vmem:[#allocation2 + $0xbd8] sm:$0xf]  ;;  %v8210_v25 = vor.u32 %v10655_v43, %v8209_v10  ;;  %4036 = vmatpush.bf16.msra.mxu3 %v7218_v23  ;;  %v3791_v43 = vpop.f32.mrf.mxu0 }
 0x2a5   :  { %v10719_v15 = vld [vmem:[#allocation2 + $0xbf4] sm:$0xf0]  ;;  %4024 = vmatmul.bf16.vlgmr.msra.gmra.mxu2 %v11512_v9  ;;  %v3792_v13 = vadd.f32 %v3791_v43, %v690_v62  ;;  %v10523_v43 = vld [vmem:[#allocation2 + $0x5dc] sm:$0xf] }
 0x2a6   :  { %v8945_v18 = vld [vmem:[#allocation2 + $0xf98] sm:$0xf]  ;;  %v8466_v36 = vor.u32 %v10719_v15, %v8465_v11  ;;  %4068 = vmatpush.bf16.msrb.mxu2 %v8210_v25 }
 0x2a7   :  { %v10839_v19 = vld [vmem:[#allocation2 + $0xfb4] sm:$0xf0]  ;;  %4037 = vmatmul.bf16.vlgmr.msra.gmra.mxu3 %v11522_v17  ;;  %v3805_v23 = vadd.f32 %v3804_v5, %v3792_v13  ;;  %v10459_v13 = vld [vmem:[#allocation2 + $0x3dc] sm:$0xf] }
 0x2a8   :  { %v8689_v21 = vld [vmem:[#allocation2 + $0xd98] sm:$0xf]  ;;  %v8946_v14 = vor.u32 %v10839_v19, %v8945_v18  ;;  %4081 = vmatpush.bf16.msrb.mxu3 %v8466_v36 }
 0x2a9   :  { %v10775_v22 = vld [vmem:[#allocation2 + $0xdb4] sm:$0xf0] }
 0x2aa   :  { %v8177_v42 = vld [vmem:[#allocation2 + $0x998] sm:$0xf]  ;;  %v8690_v31 = vor.u32 %v10775_v22, %v8689_v21  ;;  %4108 = vmatpush.bf16.msra.mxu1 %v8946_v14 }
 0x2ab   :  { %v10647_v27 = vld [vmem:[#allocation2 + $0x9b4] sm:$0xf0] }
 0x2ac   :  { %v8433_v40 = vld [vmem:[#allocation2 + $0xb98] sm:$0xf]  ;;  %v8178_v45 = vor.u32 %v10647_v27, %v8177_v42  ;;  %4095 = vmatpush.bf16.msra.mxu0 %v8690_v31 }
 0x2ad   :  { %v10711_v33 = vld [vmem:[#allocation2 + $0xbb4] sm:$0xf0] }
 0x2ae   :  { %v8913_v37 = vld [vmem:[#allocation2 + $0xf58] sm:$0xf]  ;;  %v8434_v47 = vor.u32 %v10711_v33, %v8433_v40  ;;  %4069 = vmatpush.bf16.msrb.mxu2 %v8178_v45 }
 0x2af   :  { %v10831_v38 = vld [vmem:[#allocation2 + $0xf74] sm:$0xf0] }
 0x2b0   :  { %v8657_v44 = vld [vmem:[#allocation2 + $0xd58] sm:$0xf]  ;;  %v8914_v48 = vor.u32 %v10831_v38, %v8913_v37  ;;  %4082 = vmatpush.bf16.msrb.mxu3 %v8434_v47  ;;  %v3806_v47 = vpop.f32.mrf.mxu1 }
 0x2b1   :  { %v10767_v30 = vld [vmem:[#allocation2 + $0xd74] sm:$0xf0]  ;;  %v10587_v47 = vld [vmem:[#allocation2 + $0x7dc] sm:$0xf] }
 0x2b2   :  { %v8145_v49 = vld [vmem:[#allocation2 + $0x958] sm:$0xf]  ;;  %v8658_v12 = vor.u32 %v10767_v30, %v8657_v44  ;;  %4109 = vmatpush.bf16.msra.mxu1 %v8914_v48 }
 0x2b3   :  { %v10639_v50 = vld [vmem:[#allocation2 + $0x974] sm:$0xf0] }
 0x2b4   :  { %v8401_v51 = vld [vmem:[#allocation2 + $0xb58] sm:$0xf]  ;;  %v8146_v63 = vor.u32 %v10639_v50, %v8145_v49  ;;  %4096 = vmatpush.bf16.msra.mxu0 %v8658_v12 }
 0x2b5   :  { %v10703_v53 = vld [vmem:[#allocation2 + $0xb74] sm:$0xf0] }
 0x2b6   :  { %v8881_v58 = vld [vmem:[#allocation2 + $0xf18] sm:$0xf]  ;;  %v8402_v0 = vor.u32 %v10703_v53, %v8401_v51  ;;  %4070 = vmatpush.bf16.msrb.mxu2 %v8146_v63  ;;  %v3793_v51 = vpop.f32.mrf.mxu0 }
 0x2b7   :  { %v10823_v59 = vld [vmem:[#allocation2 + $0xf34] sm:$0xf0] }
 0x2b8   :  { %v8625_v3 = vld [vmem:[#allocation2 + $0xd18] sm:$0xf]  ;;  %v8882_v1 = vor.u32 %v10823_v59, %v8881_v58  ;;  %4083 = vmatpush.bf16.msrb.mxu3 %v8402_v0 }
 0x2b9   :  { %v10759_v61 = vld [vmem:[#allocation2 + $0xd34] sm:$0xf0] }
 0x2ba   :  { %v8113_v2 = vld [vmem:[#allocation2 + $0x918] sm:$0xf]  ;;  %v8626_v6 = vor.u32 %v10759_v61, %v8625_v3  ;;  %4110 = vmatpush.bf16.msra.mxu1 %v8882_v1 }
 0x2bb   :  { %v10631_v29 = vld [vmem:[#allocation2 + $0x934] sm:$0xf0] }
 0x2bc   :  { %v8369_v4 = vld [vmem:[#allocation2 + $0xb18] sm:$0xf]  ;;  %v8114_v15 = vor.u32 %v10631_v29, %v8113_v2  ;;  %4097 = vmatpush.bf16.msra.mxu0 %v8626_v6  ;;  %v3817_v2 = vpop.f32.mrf.mxu2 }
 0x2bd   :  { %v10695_v8 = vld [vmem:[#allocation2 + $0xb34] sm:$0xf0] }
 0x2be   :  { %v8849_v46 = vld [vmem:[#allocation2 + $0xed8] sm:$0xf]  ;;  %v8370_v18 = vor.u32 %v10695_v8, %v8369_v4  ;;  %4071 = vmatpush.bf16.msrb.mxu2 %v8114_v15  ;;  %v3818_v8 = vadd.f32 %v3817_v2, %v3805_v23  ;;  %v7443_v15 = vld [vmem:[#allocation2 + $0x3f8] sm:$0xf0] }
 0x2bf   :  { %v10815_v10 = vld [vmem:[#allocation2 + $0xef4] sm:$0xf0]  ;;  %v7923_v2 = vld [vmem:[#allocation2 + $0x7b8] sm:$0xf0] }
 0x2c0   :  { %v8593_v11 = vld [vmem:[#allocation2 + $0xcd8] sm:$0xf]  ;;  %v8850_v19 = vor.u32 %v10815_v10, %v8849_v46  ;;  %4084 = vmatpush.bf16.msrb.mxu3 %v8370_v18  ;;  %v3830_v46 = vpop.f32.mrf.mxu3 }
 0x2c1   :  { %v10751_v55 = vld [vmem:[#allocation2 + $0xcf4] sm:$0xf0]  ;;  %v11686_v18 = vadd.f32 %v3830_v46, %v3818_v8  ;;  %v7123_v8 = vld [vmem:[#allocation2 + $0x178] sm:$0xf0] }
 0x2c2   :  { %v8081_v20 = vld [vmem:[#allocation2 + $0x8d8] sm:$0xf]  ;;  %v8594_v25 = vor.u32 %v10751_v55, %v8593_v11  ;;  %4111 = vmatpush.bf16.msra.mxu1 %v8850_v19  ;;  %v7699_v11 = vld [vmem:[#allocation2 + $0x5f8] sm:$0xf0] }
 0x2c3   :  { %v10623_v21 = vld [vmem:[#allocation2 + $0x8f4] sm:$0xf0]  ;;  %v7702_v23 = vor.u32 %v10523_v43, %v7699_v11  ;;  %v10499_v46 = vld [vmem:[#allocation2 + $0x51c] sm:$0xf] }
 0x2c4   :  { %v8337_v22 = vld [vmem:[#allocation2 + $0xad8] sm:$0xf]  ;;  %v8082_v31 = vor.u32 %v10623_v21, %v8081_v20  ;;  %4098 = vmatpush.bf16.msra.mxu0 %v8594_v25  ;;  %v10435_v11 = vld [vmem:[#allocation2 + $0x31c] sm:$0xf] }
 0x2c5   :  { %v10687_v36 = vld [vmem:[#allocation2 + $0xaf4] sm:$0xf0] }
 0x2c6   :  { %v8817_v14 = vld [vmem:[#allocation2 + $0xe98] sm:$0xf]  ;;  %v8338_v37 = vor.u32 %v10687_v36, %v8337_v22  ;;  %4072 = vmatpush.bf16.msrb.mxu2 %v8082_v31  ;;  %v10515_v31 = vld [vmem:[#allocation2 + $0x59c] sm:$0xf] }
 0x2c7   :  { %v10807_v42 = vld [vmem:[#allocation2 + $0xeb4] sm:$0xf0] }
 0x2c8   :  { %v8561_v27 = vld [vmem:[#allocation2 + $0xc98] sm:$0xf]  ;;  %v8818_v38 = vor.u32 %v10807_v42, %v8817_v14  ;;  %4085 = vmatpush.bf16.msrb.mxu3 %v8338_v37  ;;  %v10395_v42 = vld [vmem:[#allocation2 + $0x1dc] sm:$0xf] }
 0x2c9   :  { %v10743_v40 = vld [vmem:[#allocation2 + $0xcb4] sm:$0xf0] }
 0x2ca   :  { %v8049_v33 = vld [vmem:[#allocation2 + $0x898] sm:$0xf]  ;;  %v8562_v48 = vor.u32 %v10743_v40, %v8561_v27  ;;  %4112 = vmatpush.bf16.msra.mxu1 %v8818_v38  ;;  %v7446_v27 = vor.u32 %v10459_v13, %v7443_v15  ;;  %v7187_v40 = vld [vmem:[#allocation2 + $0x1f8] sm:$0xf0] }
 0x2cb   :  { %v10615_v44 = vld [vmem:[#allocation2 + $0x8b4] sm:$0xf0]  ;;  %v10451_v38 = vld [vmem:[#allocation2 + $0x39c] sm:$0xf] }
 0x2cc   :  { %v8305_v30 = vld [vmem:[#allocation2 + $0xa98] sm:$0xf]  ;;  %v8050_v58 = vor.u32 %v10615_v44, %v8049_v33  ;;  %4099 = vmatpush.bf16.msra.mxu0 %v8562_v48  ;;  %v7667_v33 = vld [vmem:[#allocation2 + $0x5b8] sm:$0xf0] }
 0x2cd   :  { %v10679_v45 = vld [vmem:[#allocation2 + $0xab4] sm:$0xf0]  ;;  %v7411_v44 = vld [vmem:[#allocation2 + $0x3b8] sm:$0xf0]  ;;  %v7670_v51 = vor.u32 %v10515_v31, %v7667_v33 }
 0x2ce   :  { %v8785_v49 = vld [vmem:[#allocation2 + $0xe58] sm:$0xf]  ;;  %v8306_v3 = vor.u32 %v10679_v45, %v8305_v30  ;;  %4073 = vmatpush.bf16.msrb.mxu2 %v8050_v58  ;;  %v7955_v48 = vld [vmem:[#allocation2 + $0x7f8] sm:$0xf0]  ;;  %v7414_v58 = vor.u32 %v10451_v38, %v7411_v44 }
 0x2cf   :  { %v10799_v50 = vld [vmem:[#allocation2 + $0xe74] sm:$0xf0]  ;;  %v10571_v13 = vld [vmem:[#allocation2 + $0x75c] sm:$0xf] }
 0x2d0   :  { %v11683_v52 = vld [vmem:[#allocation2 + $0x1018] sm:$0x33]  ;;  %v8786_v61 = vor.u32 %v10799_v50, %v8785_v49  ;;  %4086 = vmatpush.bf16.msrb.mxu3 %v8306_v3  ;;  %v3819_v49 = vpop.f32.mrf.mxu2  ;;  %v7190_v50 = vor.u32 %v10395_v42, %v7187_v40 }
 0x2d1   :  { %v8529_v12 = vld [vmem:[#allocation2 + $0xc58] sm:$0xf]  ;;  %v2248_v1 = vunpack.c.l.b16 %v11683_v52  ;;  %v10507_v3 = vld [vmem:[#allocation2 + $0x55c] sm:$0xf] }
 0x2d2   :  { %v10735_v53 = vld [vmem:[#allocation2 + $0xc74] sm:$0xf0]  ;;  %4113 = vmatpush.bf16.msra.mxu1 %v8786_v61  ;;  %v7635_v61 = vld [vmem:[#allocation2 + $0x578] sm:$0xf0] }
 0x2d3   :  { %v8017_v59 = vld [vmem:[#allocation2 + $0x858] sm:$0xf]  ;;  %v8530_v29 = vor.u32 %v10735_v53, %v8529_v12  ;;  %v2768_v25 = vpack.c.b16 %v2248_v1, %v2248_v1  ;;  %v10387_v12 = vld [vmem:[#allocation2 + $0x19c] sm:$0xf]  ;;  %v3832_v53 = vpop.f32.mrf.mxu3 }
 0x2d4   :  { %v10607_v62 = vld [vmem:[#allocation2 + $0x874] sm:$0xf0]  ;;  %v10579_v1 = vld [vmem:[#allocation2 + $0x79c] sm:$0xf] }
 0x2d5   :  { %v8273_v63 = vld [vmem:[#allocation2 + $0xa58] sm:$0xf]  ;;  %v8018_v55 = vor.u32 %v10607_v62, %v8017_v59  ;;  %4100 = vmatpush.bf16.msra.mxu0 %v8530_v29  ;;  %v3309_v45 = vand.u32 %v11538_v26, %v2768_v25  ;;  %v7155_v59 = vld [vmem:[#allocation2 + $0x1b8] sm:$0xf0]  ;;  %v7958_v62 = vor.u32 %v10587_v47, %v7955_v48  ;;  %v7926_v43 = vor.u32 %v10579_v1, %v7923_v2  ;;  %v3843_v25 = vpop.f32.mrf.mxu0 }
 0x2d6   :  { %v10671_v0 = vld [vmem:[#allocation2 + $0xa74] sm:$0xf0]  ;;  %v7158_v29 = vor.u32 %v10387_v12, %v7155_v59  ;;  %v7891_v15 = vld [vmem:[#allocation2 + $0x778] sm:$0xf0]  ;;  %v3844_v42 = vadd.f32 %v3843_v25, %v11686_v18 }
 0x2d7   :  { %v8497_v4 = vld [vmem:[#allocation2 + $0xc18] sm:$0xf]  ;;  %v8274_v19 = vor.u32 %v10671_v0, %v8273_v63  ;;  %4074 = vmatpush.bf16.msrb.mxu2 %v8018_v55  ;;  %v10443_v63 = vld [vmem:[#allocation2 + $0x35c] sm:$0xf] }
 0x2d8   :  { %v8753_v5 = vld [vmem:[#allocation2 + $0xe18] sm:$0xf]  ;;  %v7379_v0 = vld [vmem:[#allocation2 + $0x378] sm:$0xf0] }
 0x2d9   :  { %v10791_v6 = vld [vmem:[#allocation2 + $0xe34] sm:$0xf0]  ;;  %4087 = vmatpush.bf16.msrb.mxu3 %v8274_v19  ;;  %v7347_v55 = vld [vmem:[#allocation2 + $0x338] sm:$0xf0] }
 0x2da   :  { %v10727_v10 = vld [vmem:[#allocation2 + $0xc34] sm:$0xf0]  ;;  %v8754_v20 = vor.u32 %v10791_v6, %v8753_v5  ;;  %v10379_v5 = vld [vmem:[#allocation2 + $0x15c] sm:$0xf]  ;;  %v7382_v6 = vor.u32 %v10443_v63, %v7379_v0 }
 0x2db   :  { %v7985_v21 = vld [vmem:[#allocation2 + $0x818] sm:$0xf]  ;;  %v8498_v28 = vor.u32 %v10727_v10, %v8497_v4  ;;  %v7638_v4 = vor.u32 %v10507_v3, %v7635_v61  ;;  %v7603_v10 = vld [vmem:[#allocation2 + $0x538] sm:$0xf0]  ;;  %v7126_v19 = vor.u32 %v10379_v5, %v7123_v8 }
 0x2dc   :  { %v10599_v22 = vld [vmem:[#allocation2 + $0x834] sm:$0xf0]  ;;  %4114 = vmatpush.bf16.msra.mxu1 %v8754_v20  ;;  %v7606_v20 = vor.u32 %v10499_v46, %v7603_v10  ;;  %v10427_v40 = vld [vmem:[#allocation2 + $0x2dc] sm:$0xf] }
 0x2dd   :  { %v8241_v36 = vld [vmem:[#allocation2 + $0xa18] sm:$0xf]  ;;  %v7986_v37 = vor.u32 %v10599_v22, %v7985_v21  ;;  %4101 = vmatpush.bf16.msra.mxu0 %v8498_v28  ;;  %v10371_v21 = vld [vmem:[#allocation2 + $0x11c] sm:$0xf]  ;;  %v3856_v22 = vpop.f32.mrf.mxu1  ;;  %v7350_v28 = vor.u32 %v10435_v11, %v7347_v55  ;;  %v3845_v63 = vpop.f32.mrf.mxu0 }
 0x2de   :  { %v10663_v14 = vld [vmem:[#allocation2 + $0xa34] sm:$0xf0]  ;;  %v7315_v31 = vld [vmem:[#allocation2 + $0x2f8] sm:$0xf0] }
 0x2df   :  { %v8242_v30 = vor.u32 %v10663_v14, %v8241_v36  ;;  %4075 = vmatpush.bf16.msrb.mxu2 %v7986_v37  ;;  %4115 = vmatmul.bf16.vlgmr.msra.gmra.mxu1 %v11548_v41  ;;  %v10491_v36 = vld [vmem:[#allocation2 + $0x4dc] sm:$0xf]  ;;  %v7318_v47 = vor.u32 %v10427_v40, %v7315_v31 }
 0x2e0   :  { %4159 = vmatpush.bf16.msrb.mxu1 %v7702_v23  ;;  %4102 = vmatmul.bf16.vlgmr.msra.gmra.mxu0 %v11543_v35  ;;  %v7091_v23 = vld [vmem:[#allocation2 + $0x138] sm:$0xf0] }
 0x2e1   :  { %4146 = vmatpush.bf16.msrb.mxu0 %v7446_v27  ;;  %4088 = vmatpush.bf16.msrb.mxu3 %v8242_v30  ;;  %v7571_v14 = vld [vmem:[#allocation2 + $0x4f8] sm:$0xf0]  ;;  %v7894_v27 = vor.u32 %v10571_v13, %v7891_v15  ;;  %v7094_v38 = vor.u32 %v10371_v21, %v7091_v23  ;;  %v3869_v15 = vpop.f32.mrf.mxu2 }
 0x2e2   :  { %4076 = vmatmul.bf16.vlgmr.msrb.gmra.mxu2 %v11545_v39  ;;  %v10563_v33 = vld [vmem:[#allocation2 + $0x71c] sm:$0xf]  ;;  %v7574_v44 = vor.u32 %v10491_v36, %v7571_v14 }
 0x2e3   :  { %4127 = vmatpush.bf16.msra.mxu2 %v3309_v45  ;;  %v7859_v37 = vld [vmem:[#allocation2 + $0x738] sm:$0xf0]  ;;  %v3857_v45 = vadd.f32 %v3856_v22, %v3844_v42 }
 0x2e4   :  { %4160 = vmatpush.bf16.msrb.mxu1 %v7670_v51  ;;  %4089 = vmatmul.bf16.vlgmr.msrb.gmra.mxu3 %v11555_v57  ;;  %v10363_v30 = vld [vmem:[#allocation2 + $0xdc] sm:$0xf]  ;;  %v7862_v51 = vor.u32 %v10563_v33, %v7859_v37 }
 0x2e5   :  { %4133 = vmatpush.bf16.msra.mxu3 %v7190_v50  ;;  %4147 = vmatpush.bf16.msrb.mxu0 %v7414_v58  ;;  %v7059_v48 = vld [vmem:[#allocation2 + $0xf8] sm:$0xf0] }
 0x2e6   :  { %v10483_v49 = vld [vmem:[#allocation2 + $0x49c] sm:$0xf]  ;;  %v7062_v59 = vor.u32 %v10363_v30, %v7059_v48  ;;  %v3895_v30 = vpop.f32.mrf.mxu0 }
 0x2e7   :  { %4172 = vmatpush.bf16.msrb.mxu2 %v7958_v62  ;;  %v7539_v50 = vld [vmem:[#allocation2 + $0x4b8] sm:$0xf0]  ;;  %v3858_v62 = vpop.f32.mrf.mxu1 }
 0x2e8   :  { %4161 = vmatpush.bf16.msrb.mxu1 %v7638_v4  ;;  %v10419_v18 = vld [vmem:[#allocation2 + $0x29c] sm:$0xf]  ;;  %v7542_v3 = vor.u32 %v10483_v49, %v7539_v50 }
 0x2e9   :  { %4134 = vmatpush.bf16.msra.mxu3 %v7158_v29  ;;  %4148 = vmatpush.bf16.msrb.mxu0 %v7382_v6  ;;  %v7283_v12 = vld [vmem:[#allocation2 + $0x2b8] sm:$0xf0] }
 0x2ea   :  { %v10555_v53 = vld [vmem:[#allocation2 + $0x6dc] sm:$0xf]  ;;  %v7286_v0 = vor.u32 %v10419_v18, %v7283_v12 }
 0x2eb   :  { %4173 = vmatpush.bf16.msrb.mxu2 %v7926_v43  ;;  %v7827_v58 = vld [vmem:[#allocation2 + $0x6f8] sm:$0xf0] }
 0x2ec   :  { %4162 = vmatpush.bf16.msrb.mxu1 %v7606_v20  ;;  %v10355_v61 = vld [vmem:[#allocation2 + $0x9c] sm:$0xf]  ;;  %v7830_v4 = vor.u32 %v10555_v53, %v7827_v58 }
 0x2ed   :  { %4135 = vmatpush.bf16.msra.mxu3 %v7126_v19  ;;  %4149 = vmatpush.bf16.msrb.mxu0 %v7350_v28  ;;  %v7027_v1 = vld [vmem:[#allocation2 + $0xb8] sm:$0xf0]  ;;  %v3882_v19 = vpop.f32.mrf.mxu3  ;;  %v3870_v28 = vadd.f32 %v3869_v15, %v3857_v45 }
 0x2ee   :  { %v10475_v2 = vld [vmem:[#allocation2 + $0x45c] sm:$0xf]  ;;  %v7030_v10 = vor.u32 %v10355_v61, %v7027_v1 }
 0x2ef   :  { %4174 = vmatpush.bf16.msrb.mxu2 %v7894_v27  ;;  %v7507_v29 = vld [vmem:[#allocation2 + $0x478] sm:$0xf0]  ;;  %v3883_v33 = vadd.f32 %v3882_v19, %v3870_v28  ;;  %v3897_v28 = vpop.f32.mrf.mxu0 }
 0x2f0   :  { %4163 = vmatpush.bf16.msrb.mxu1 %v7574_v44  ;;  %v10411_v5 = vld [vmem:[#allocation2 + $0x25c] sm:$0xf]  ;;  %v7510_v43 = vor.u32 %v10475_v2, %v7507_v29 }
 0x2f1   :  { %4136 = vmatpush.bf16.msra.mxu3 %v7094_v38  ;;  %4150 = vmatpush.bf16.msrb.mxu0 %v7318_v47  ;;  %v7251_v6 = vld [vmem:[#allocation2 + $0x278] sm:$0xf0] }
 0x2f2   :  { %v10547_v8 = vld [vmem:[#allocation2 + $0x69c] sm:$0xf]  ;;  %8989 = vmatmul.msk.bf16.vlgmr.msra.gmra.mxu2 %vm3282_vm2, %v11562_v32  ;;  %v7254_v20 = vor.u32 %v10411_v5, %v7251_v6  ;;  %v3871_v6 = vpop.f32.mrf.mxu2 }
 0x2f3   :  { %4175 = vmatpush.bf16.msrb.mxu2 %v7862_v51  ;;  %v7795_v46 = vld [vmem:[#allocation2 + $0x6b8] sm:$0xf0]  ;;  %v11696_v51 = vadd.f32 %v3895_v30, %v3883_v33 }
 0x2f4   :  { %4164 = vmatpush.bf16.msrb.mxu1 %v7542_v3  ;;  %v10347_v11 = vld [vmem:[#allocation2 + $0x5c] sm:$0xf]  ;;  %v7798_v23 = vor.u32 %v10547_v8, %v7795_v46 }
 0x2f5   :  { %4137 = vmatpush.bf16.msra.mxu3 %v7062_v59  ;;  %v6995_v55 = vld [vmem:[#allocation2 + $0x78] sm:$0xf0]  ;;  %4151 = vmatpush.bf16.msrb.mxu0 %v7286_v0  ;;  %v3884_v5 = vpop.f32.mrf.mxu3 }
 0x2f6   :  { %v10403_v13 = vld [vmem:[#allocation2 + $0x21c] sm:$0xf]  ;;  %v6998_v37 = vor.u32 %v10347_v11, %v6995_v55 }
 0x2f7   :  { %v7219_v21 = vld [vmem:[#allocation2 + $0x238] sm:$0xf0]  ;;  %4176 = vmatpush.bf16.msrb.mxu2 %v7830_v4 }
 0x2f8   :  { %v10467_v22 = vld [vmem:[#allocation2 + $0x41c] sm:$0xf]  ;;  %4165 = vmatpush.bf16.msrb.mxu1 %v7510_v43  ;;  %v7222_v47 = vor.u32 %v10403_v13, %v7219_v21 }
 0x2f9   :  { %v7475_v25 = vld [vmem:[#allocation2 + $0x438] sm:$0xf0]  ;;  %4138 = vmatpush.bf16.msra.mxu3 %v7030_v10  ;;  %4152 = vmatpush.bf16.msrb.mxu0 %v7254_v20 }
 0x2fa   :  { %v10715_v36 = vld [vmem:[#allocation2 + $0xbdc] sm:$0xf]  ;;  %v7478_v38 = vor.u32 %v10467_v22, %v7475_v25 }
 0x2fb   :  { %v10779_v14 = vld [vmem:[#allocation2 + $0xddc] sm:$0xf]  ;;  %4177 = vmatpush.bf16.msrb.mxu2 %v7798_v23 }
 0x2fc   :  { %v8723_v42 = vld [vmem:[#allocation2 + $0xdf8] sm:$0xf0]  ;;  %4166 = vmatpush.bf16.msrb.mxu1 %v7478_v38 }
 0x2fd   :  { %v8467_v27 = vld [vmem:[#allocation2 + $0xbf8] sm:$0xf0]  ;;  %v8726_v48 = vor.u32 %v10779_v14, %v8723_v42  ;;  %4139 = vmatpush.bf16.msra.mxu3 %v6998_v37  ;;  %4153 = vmatpush.bf16.msrb.mxu0 %v7222_v47 }
 0x2fe   :  { %v10539_v40 = vld [vmem:[#allocation2 + $0x65c] sm:$0xf]  ;;  %v8470_v18 = vor.u32 %v10715_v36, %v8467_v27 }
 0x2ff   :  { %v7763_v31 = vld [vmem:[#allocation2 + $0x678] sm:$0xf0]  ;;  %4167 = vmatmul.bf16.vlgmr.msrb.gmra.mxu1 %v11506_v54 }
 0x300   :  { %v10339_v44 = vld [vmem:[#allocation2 + $0x1c] sm:$0xf]  ;;  %v7766_v12 = vor.u32 %v10539_v40, %v7763_v31  ;;  %4211 = vmatpush.bf16.msra.mxu1 %v8726_v48  ;;  %4154 = vmatmul.bf16.vlgmr.msrb.gmra.mxu0 %v11522_v17 }
 0x301   :  { %v6963_v49 = vld [vmem:[#allocation2 + $0x38] sm:$0xf0]  ;;  %4198 = vmatpush.bf16.msra.mxu0 %v8470_v18 }
 0x302   :  { %v10651_v45 = vld [vmem:[#allocation2 + $0x9dc] sm:$0xf]  ;;  %v6966_v63 = vor.u32 %v10339_v44, %v6963_v49  ;;  %4178 = vmatpush.bf16.msrb.mxu2 %v7766_v12  ;;  %v11701_v44 = vpop.f32.mrf.mxu1 }
 0x303   :  { %v8211_v50 = vld [vmem:[#allocation2 + $0x9f8] sm:$0xf0] }
 0x304   :  { %v10707_v53 = vld [vmem:[#allocation2 + $0xb9c] sm:$0xf]  ;;  %v8214_v2 = vor.u32 %v10651_v45, %v8211_v50  ;;  %4140 = vmatpush.bf16.msra.mxu3 %v6966_v63 }
 0x305   :  { %v10771_v58 = vld [vmem:[#allocation2 + $0xd9c] sm:$0xf] }
 0x306   :  { %v8691_v59 = vld [vmem:[#allocation2 + $0xdb8] sm:$0xf0] }
 0x307   :  { %v8435_v3 = vld [vmem:[#allocation2 + $0xbb8] sm:$0xf0]  ;;  %v8694_v29 = vor.u32 %v10771_v58, %v8691_v59  ;;  %4141 = vmatmul.bf16.vlgmr.msra.gmra.mxu3 %v11512_v9 }
 0x308   :  { %v10531_v61 = vld [vmem:[#allocation2 + $0x61c] sm:$0xf]  ;;  %v8438_v8 = vor.u32 %v10707_v53, %v8435_v3  ;;  %4185 = vmatpush.bf16.msrb.mxu3 %v8214_v2 }
 0x309   :  { %v7731_v62 = vld [vmem:[#allocation2 + $0x638] sm:$0xf0]  ;;  %4212 = vmatpush.bf16.msra.mxu1 %v8694_v29 }
 0x30a   :  { %v10843_v0 = vld [vmem:[#allocation2 + $0xfdc] sm:$0xf]  ;;  %v7734_v46 = vor.u32 %v10531_v61, %v7731_v62  ;;  %4199 = vmatpush.bf16.msra.mxu0 %v8438_v8 }
 0x30b   :  { %v8979_v1 = vld [vmem:[#allocation2 + $0xff8] sm:$0xf0] }
 0x30c   :  { %v10643_v4 = vld [vmem:[#allocation2 + $0x99c] sm:$0xf]  ;;  %v8982_v55 = vor.u32 %v10843_v0, %v8979_v1  ;;  %4179 = vmatpush.bf16.msrb.mxu2 %v7734_v46  ;;  %v11704_v0 = vpop.f32.mrf.mxu0  ;;  %v3910_v46 = vpop.f32.mrf.mxu1 }
 0x30d   :  { %v8179_v10 = vld [vmem:[#allocation2 + $0x9b8] sm:$0xf0]  ;;  %v9489_v46 = vld [vmem:[#allocation6 + $0x3e0] sm:$0xf] }
 0x30e   :  { %v10763_v43 = vld [vmem:[#allocation2 + $0xd5c] sm:$0xf]  ;;  %v8182_v21 = vor.u32 %v10643_v4, %v8179_v10 }
 0x30f   :  { %v8659_v11 = vld [vmem:[#allocation2 + $0xd78] sm:$0xf0]  ;;  %4180 = vmatmul.bf16.vlgmr.msrb.gmra.mxu2 %v11520_v16 }
 0x310   :  { %v10699_v13 = vld [vmem:[#allocation2 + $0xb5c] sm:$0xf]  ;;  %v8662_v22 = vor.u32 %v10763_v43, %v8659_v11  ;;  %4224 = vmatpush.bf16.msra.mxu2 %v8982_v55  ;;  %4186 = vmatpush.bf16.msrb.mxu3 %v8182_v21 }
 0x311   :  { %v8403_v15 = vld [vmem:[#allocation2 + $0xb78] sm:$0xf0] }
 0x312   :  { %v10835_v19 = vld [vmem:[#allocation2 + $0xf9c] sm:$0xf]  ;;  %v8406_v23 = vor.u32 %v10699_v13, %v8403_v15  ;;  %4213 = vmatpush.bf16.msra.mxu1 %v8662_v22 }
 0x313   :  { %v8947_v20 = vld [vmem:[#allocation2 + $0xfb8] sm:$0xf0] }
 0x314   :  { %v10635_v25 = vld [vmem:[#allocation2 + $0x95c] sm:$0xf]  ;;  %v8950_v54 = vor.u32 %v10835_v19, %v8947_v20  ;;  %4200 = vmatpush.bf16.msra.mxu0 %v8406_v23 }
 0x315   :  { %v8147_v36 = vld [vmem:[#allocation2 + $0x978] sm:$0xf0] }
 0x316   :  { %v10755_v14 = vld [vmem:[#allocation2 + $0xd1c] sm:$0xf]  ;;  %v8150_v33 = vor.u32 %v10635_v25, %v8147_v36  ;;  %4225 = vmatpush.bf16.msra.mxu2 %v8950_v54 }
 0x317   :  { %v8627_v42 = vld [vmem:[#allocation2 + $0xd38] sm:$0xf0] }
 0x318   :  { %v10691_v27 = vld [vmem:[#allocation2 + $0xb1c] sm:$0xf]  ;;  %v8630_v37 = vor.u32 %v10755_v14, %v8627_v42  ;;  %4187 = vmatpush.bf16.msrb.mxu3 %v8150_v33 }
 0x319   :  { %v8371_v40 = vld [vmem:[#allocation2 + $0xb38] sm:$0xf0] }
 0x31a   :  { %v10827_v31 = vld [vmem:[#allocation2 + $0xf5c] sm:$0xf]  ;;  %v8374_v30 = vor.u32 %v10691_v27, %v8371_v40  ;;  %4214 = vmatpush.bf16.msra.mxu1 %v8630_v37  ;;  %v2249_v40 = vunpack.c.h.b16 %v11683_v52  ;;  %v9105_v37 = vld [vmem:[#allocation6 + $0xe0] sm:$0xf] }
 0x31b   :  { %v8915_v17 = vld [vmem:[#allocation2 + $0xf78] sm:$0xf0] }
 0x31c   :  { %v10627_v38 = vld [vmem:[#allocation2 + $0x91c] sm:$0xf]  ;;  %v8918_v9 = vor.u32 %v10827_v31, %v8915_v17  ;;  %4201 = vmatpush.bf16.msra.mxu0 %v8374_v30  ;;  %v11707_v31 = vpop.f32.mrf.mxu2  ;;  %v11709_v17 = vpop.f32.mrf.mxu3  ;;  %v10910_v30 = vld [vmem:[#allocation6 + $0x1ec] sm:$0xf0] }
 0x31d   :  { %v8115_v47 = vld [vmem:[#allocation2 + $0x938] sm:$0xf0] }
 0x31e   :  { %v10747_v48 = vld [vmem:[#allocation2 + $0xcdc] sm:$0xf]  ;;  %v8118_v53 = vor.u32 %v10627_v38, %v8115_v47  ;;  %4226 = vmatpush.bf16.msra.mxu2 %v8918_v9  ;;  %v9233_v38 = vld [vmem:[#allocation6 + $0x1e0] sm:$0xf]  ;;  %v3949_v47 = vpop.f32.mrf.mxu0 }
 0x31f   :  { %v8595_v49 = vld [vmem:[#allocation2 + $0xcf8] sm:$0xf0]  ;;  %v9234_v52 = vor.u32 %v10910_v30, %v9233_v38  ;;  %v9329_v38 = vld [vmem:[#allocation6 + $0x2a0] sm:$0xf]  ;;  %v11716_v30 = vpop.f32.mrf.mxu1 }
 0x320   :  { %v10683_v45 = vld [vmem:[#allocation2 + $0xadc] sm:$0xf]  ;;  %v8598_v58 = vor.u32 %v10747_v48, %v8595_v49  ;;  %4188 = vmatpush.bf16.msrb.mxu3 %v8118_v53  ;;  %v10878_v48 = vld [vmem:[#allocation6 + $0xec] sm:$0xf0] }
 0x321   :  { %v8339_v50 = vld [vmem:[#allocation2 + $0xaf8] sm:$0xf0] }
 0x322   :  { %v10819_v18 = vld [vmem:[#allocation2 + $0xf1c] sm:$0xf]  ;;  %v8342_v3 = vor.u32 %v10683_v45, %v8339_v50  ;;  %4215 = vmatpush.bf16.msra.mxu1 %v8598_v58  ;;  %v2769_v58 = vpack.c.b16 %v2249_v40, %v2249_v40  ;;  %v9057_v40 = vld [vmem:[#allocation6 + $0x80] sm:$0xf] }
 0x323   :  { %v8883_v12 = vld [vmem:[#allocation2 + $0xf38] sm:$0xf0] }
 0x324   :  { %v10619_v59 = vld [vmem:[#allocation2 + $0x8dc] sm:$0xf]  ;;  %v8886_v16 = vor.u32 %v10819_v18, %v8883_v12  ;;  %4202 = vmatpush.bf16.msra.mxu0 %v8342_v3 }
 0x325   :  { %v8083_v61 = vld [vmem:[#allocation2 + $0x8f8] sm:$0xf0] }
 0x326   :  { %v10739_v62 = vld [vmem:[#allocation2 + $0xc9c] sm:$0xf]  ;;  %v8086_v5 = vor.u32 %v10619_v59, %v8083_v61  ;;  %4227 = vmatpush.bf16.msra.mxu2 %v8886_v16  ;;  %v9106_v59 = vor.u32 %v10878_v48, %v9105_v37  ;;  %v9089_v61 = vld [vmem:[#allocation6 + $0xc0] sm:$0xf]  ;;  %v10874_v16 = vld [vmem:[#allocation6 + $0xcc] sm:$0xf0] }
 0x327   :  { %v8563_v63 = vld [vmem:[#allocation2 + $0xcb8] sm:$0xf0]  ;;  %v9457_v48 = vld [vmem:[#allocation6 + $0x3a0] sm:$0xf] }
 0x328   :  { %v10675_v1 = vld [vmem:[#allocation2 + $0xa9c] sm:$0xf]  ;;  %v8566_v6 = vor.u32 %v10739_v62, %v8563_v63  ;;  %4189 = vmatpush.bf16.msrb.mxu3 %v8086_v5  ;;  %v9217_v62 = vld [vmem:[#allocation6 + $0x1c0] sm:$0xf]  ;;  %v10906_v63 = vld [vmem:[#allocation6 + $0x1cc] sm:$0xf0] }
 0x329   :  { %v8307_v2 = vld [vmem:[#allocation2 + $0xab8] sm:$0xf0]  ;;  %v10942_v5 = vld [vmem:[#allocation6 + $0x2ec] sm:$0xf0] }
 0x32a   :  { %v10811_v29 = vld [vmem:[#allocation2 + $0xedc] sm:$0xf]  ;;  %v8310_v10 = vor.u32 %v10675_v1, %v8307_v2  ;;  %4216 = vmatpush.bf16.msra.mxu1 %v8566_v6  ;;  %v9218_v6 = vor.u32 %v10906_v63, %v9217_v62  ;;  %v9153_v63 = vld [vmem:[#allocation6 + $0x140] sm:$0xf] }
 0x32b   :  { %v8851_v4 = vld [vmem:[#allocation2 + $0xef8] sm:$0xf0] }
 0x32c   :  { %v10611_v8 = vld [vmem:[#allocation2 + $0x89c] sm:$0xf]  ;;  %v8854_v13 = vor.u32 %v10811_v29, %v8851_v4  ;;  %4203 = vmatpush.bf16.msra.mxu0 %v8310_v10  ;;  %v9361_v4 = vld [vmem:[#allocation6 + $0x2e0] sm:$0xf]  ;;  %v10974_v10 = vld [vmem:[#allocation6 + $0x3ec] sm:$0xf0] }
 0x32d   :  { %v8051_v43 = vld [vmem:[#allocation2 + $0x8b8] sm:$0xf0] }
 0x32e   :  { %v10731_v11 = vld [vmem:[#allocation2 + $0xc5c] sm:$0xf]  ;;  %v8054_v22 = vor.u32 %v10611_v8, %v8051_v43  ;;  %4228 = vmatpush.bf16.msra.mxu2 %v8854_v13  ;;  %v3312_v8 = vand.u32 %v11538_v26, %v2769_v58  ;;  %v3923_v43 = vpop.f32.mrf.mxu2  ;;  %v9313_v58 = vld [vmem:[#allocation6 + $0x280] sm:$0xf] }
 0x32f   :  { %v8531_v55 = vld [vmem:[#allocation2 + $0xc78] sm:$0xf0]  ;;  %v9425_v43 = vld [vmem:[#allocation6 + $0x360] sm:$0xf] }
 0x330   :  { %v10667_v15 = vld [vmem:[#allocation2 + $0xa5c] sm:$0xf]  ;;  %v8534_v25 = vor.u32 %v10731_v11, %v8531_v55  ;;  %4190 = vmatpush.bf16.msrb.mxu3 %v8054_v22  ;;  %v3936_v11 = vpop.f32.mrf.mxu3  ;;  %v9090_v55 = vor.u32 %v10874_v16, %v9089_v61  ;;  %v10870_v22 = vld [vmem:[#allocation6 + $0xac] sm:$0xf0] }
 0x331   :  { %v8275_v19 = vld [vmem:[#allocation2 + $0xa78] sm:$0xf0]  ;;  %v10962_v61 = vld [vmem:[#allocation6 + $0x38c] sm:$0xf0] }
 0x332   :  { %v10803_v20 = vld [vmem:[#allocation2 + $0xe9c] sm:$0xf]  ;;  %v8278_v14 = vor.u32 %v10667_v15, %v8275_v19  ;;  %4217 = vmatpush.bf16.msra.mxu1 %v8534_v25  ;;  %v9201_v15 = vld [vmem:[#allocation6 + $0x1a0] sm:$0xf]  ;;  %v10902_v19 = vld [vmem:[#allocation6 + $0x1ac] sm:$0xf0]  ;;  %v9490_v25 = vor.u32 %v10974_v10, %v9489_v46  ;;  %v3962_v46 = vpop.f32.mrf.mxu1 }
 0x333   :  { %v8819_v21 = vld [vmem:[#allocation2 + $0xeb8] sm:$0xf0]  ;;  %v9202_v26 = vor.u32 %v10902_v19, %v9201_v15  ;;  %v10890_v16 = vld [vmem:[#allocation6 + $0x14c] sm:$0xf0]  ;;  %v9873_v46 = vld [vmem:[#allocation6 + $0x6e0] sm:$0xf] }
 0x334   :  { %v10603_v28 = vld [vmem:[#allocation2 + $0x85c] sm:$0xf]  ;;  %v8822_v33 = vor.u32 %v10803_v20, %v8819_v21  ;;  %4204 = vmatpush.bf16.msra.mxu0 %v8278_v14  ;;  %v9362_v20 = vor.u32 %v10942_v5, %v9361_v4  ;;  %v9073_v21 = vld [vmem:[#allocation6 + $0xa0] sm:$0xf]  ;;  %v10970_v14 = vld [vmem:[#allocation6 + $0x3cc] sm:$0xf0]  ;;  %v9154_v10 = vor.u32 %v10890_v16, %v9153_v63 }
 0x335   :  { %v8019_v23 = vld [vmem:[#allocation2 + $0x878] sm:$0xf0]  ;;  %v9297_v5 = vld [vmem:[#allocation6 + $0x260] sm:$0xf]  ;;  %v10958_v11 = vld [vmem:[#allocation6 + $0x36c] sm:$0xf0] }
 0x336   :  { %v10659_v36 = vld [vmem:[#allocation2 + $0xa1c] sm:$0xf]  ;;  %v8022_v45 = vor.u32 %v10603_v28, %v8019_v23  ;;  %4229 = vmatpush.bf16.msra.mxu2 %v8822_v33  ;;  %v9345_v28 = vld [vmem:[#allocation6 + $0x2c0] sm:$0xf]  ;;  %v10938_v23 = vld [vmem:[#allocation6 + $0x2cc] sm:$0xf0] }
 0x337   :  { %v8243_v42 = vld [vmem:[#allocation2 + $0xa38] sm:$0xf0]  ;;  %v10866_v33 = vld [vmem:[#allocation6 + $0x8c] sm:$0xf0] }
 0x338   :  { %v10723_v54 = vld [vmem:[#allocation2 + $0xc1c] sm:$0xf]  ;;  %v8246_v18 = vor.u32 %v10659_v36, %v8243_v42  ;;  %4191 = vmatpush.bf16.msrb.mxu3 %v8022_v45  ;;  %v9473_v36 = vld [vmem:[#allocation6 + $0x3c0] sm:$0xf]  ;;  %v9074_v42 = vor.u32 %v10870_v22, %v9073_v21  ;;  %v10886_v15 = vld [vmem:[#allocation6 + $0x12c] sm:$0xf0] }
 0x339   :  { %v8499_v27 = vld [vmem:[#allocation2 + $0xc38] sm:$0xf0]  ;;  %v9474_v37 = vor.u32 %v10970_v14, %v9473_v36  ;;  %v9169_v45 = vld [vmem:[#allocation6 + $0x160] sm:$0xf]  ;;  %v10854_v22 = vld [vmem:[#allocation6 + $0x2c] sm:$0xf0]  ;;  %v11725_v36 = vpop.f32.mrf.mxu2 }
 0x33a   :  { %v10795_v49 = vld [vmem:[#allocation2 + $0xe5c] sm:$0xf]  ;;  %v8502_v50 = vor.u32 %v10723_v54, %v8499_v27  ;;  %4205 = vmatpush.bf16.msra.mxu0 %v8246_v18  ;;  %v9185_v54 = vld [vmem:[#allocation6 + $0x180] sm:$0xf]  ;;  %v10898_v27 = vld [vmem:[#allocation6 + $0x18c] sm:$0xf0] }
 0x33b   :  { %v8787_v9 = vld [vmem:[#allocation2 + $0xe78] sm:$0xf0]  ;;  %v9186_v47 = vor.u32 %v10898_v27, %v9185_v54  ;;  %v9009_v21 = vld [vmem:[#allocation6 + $0x20] sm:$0xf]  ;;  %v10954_v54 = vld [vmem:[#allocation6 + $0x34c] sm:$0xf0] }
 0x33c   :  { %v10595_v12 = vld [vmem:[#allocation2 + $0x81c] sm:$0xf]  ;;  %v8790_v3 = vor.u32 %v10795_v49, %v8787_v9  ;;  %4218 = vmatpush.bf16.msra.mxu1 %v8502_v50  ;;  %v10966_v49 = vld [vmem:[#allocation6 + $0x3ac] sm:$0xf0]  ;;  %v9058_v9 = vor.u32 %v10866_v33, %v9057_v40  ;;  %v691_v50 = vperm.slane %v11678_v7, 5 }
 0x33d   :  { %v7987_v53 = vld [vmem:[#allocation2 + $0x838] sm:$0xf0]  ;;  %4206 = vmatmul.bf16.vlgmr.msra.gmra.mxu0 %v11555_v57  ;;  %v10934_v57 = vld [vmem:[#allocation6 + $0x2ac] sm:$0xf0]  ;;  %v8993_v27 = vld [vmem:[#allocation6] sm:$0xf] }
 0x33e   :  { %v10787_v1 = vld [vmem:[#allocation2 + $0xe1c] sm:$0xf]  ;;  %v7990_v29 = vor.u32 %v10595_v12, %v7987_v53  ;;  %5820 = vmatpush.bf16.msrb.mxu0 %v9106_v59  ;;  %4230 = vmatpush.bf16.msra.mxu2 %v8790_v3  ;;  %v9330_v18 = vor.u32 %v10934_v57, %v9329_v38  ;;  %v10862_v12 = vld [vmem:[#allocation6 + $0x6c] sm:$0xf0]  ;;  %v9458_v53 = vor.u32 %v10966_v49, %v9457_v48  ;;  %v9441_v3 = vld [vmem:[#allocation6 + $0x380] sm:$0xf] }
 0x33f   :  { %v8755_v2 = vld [vmem:[#allocation2 + $0xe38] sm:$0xf0]  ;;  %4219 = vmatmul.bf16.vlgmr.msra.gmra.mxu1 %v11543_v35  ;;  %v9346_v35 = vor.u32 %v10938_v23, %v9345_v28  ;;  %v10930_v59 = vld [vmem:[#allocation6 + $0x28c] sm:$0xf0]  ;;  %v9442_v4 = vor.u32 %v10962_v61, %v9441_v3  ;;  %v9426_v28 = vor.u32 %v10958_v11, %v9425_v43  ;;  %v9281_v23 = vld [vmem:[#allocation6 + $0x240] sm:$0xf] }
 0x340   :  { %5833 = vmatpush.bf16.msrb.mxu1 %v9234_v52  ;;  %v8758_v13 = vor.u32 %v10787_v1, %v8755_v2  ;;  %4192 = vmatpush.bf16.msrb.mxu3 %v7990_v29  ;;  %v9041_v52 = vld [vmem:[#allocation6 + $0x60] sm:$0xf]  ;;  %v3909_v1 = vadd.f32 %v11701_v44, %v691_v50  ;;  %v9314_v7 = vor.u32 %v10930_v59, %v9313_v58  ;;  %v10858_v29 = vld [vmem:[#allocation6 + $0x4c] sm:$0xf0]  ;;  %v4250_v44 = vmul.f32 0.2, %v11603_v34 }
 0x341   :  { %v9042_v62 = vor.u32 %v10862_v12, %v9041_v52  ;;  %v9025_v2 = vld [vmem:[#allocation6 + $0x40] sm:$0xf]  ;;  %v10850_v40 = vld [vmem:[#allocation6 + $0xc] sm:$0xf0]  ;;  %v4252_v59 = vmul.f32 0.2, %v11652_v24  ;;  %v3975_v43 = vpop.f32.mrf.mxu2 }
 0x342   :  { %5821 = vmatpush.bf16.msrb.mxu0 %v9090_v55  ;;  %4231 = vmatpush.bf16.msra.mxu2 %v8758_v13  ;;  %v9026_v55 = vor.u32 %v10858_v29, %v9025_v2  ;;  %v9137_v13 = vld [vmem:[#allocation6 + $0x120] sm:$0xf]  ;;  %v3922_v19 = vadd.f32 %v11707_v31, %v3909_v1  ;;  %v9010_v31 = vor.u32 %v10854_v22, %v9009_v21  ;;  %v11038_v49 = vld [vmem:[#allocation6 + $0x5ec] sm:$0xf0] }
 0x343   :  { %4193 = vmatmul.bf16.vlgmr.msrb.gmra.mxu3 %v11545_v39  ;;  %v10894_v39 = vld [vmem:[#allocation6 + $0x16c] sm:$0xf0]  ;;  %v9138_v14 = vor.u32 %v10886_v15, %v9137_v13  ;;  %v9121_v33 = vld [vmem:[#allocation6 + $0x100] sm:$0xf]  ;;  %v4258_v52 = vmax.f32 %v11603_v34, %v4250_v44  ;;  %v8994_v3 = vor.u32 %v10850_v40, %v8993_v27  ;;  %v4260_v22 = vmax.f32 %v11652_v24, %v4252_v59 }
 0x344   :  { %5834 = vmatpush.bf16.msrb.mxu1 %v9218_v6  ;;  %4244 = vmatpush.bf16.msra.mxu3 %v3312_v8  ;;  %v10926_v6 = vld [vmem:[#allocation6 + $0x26c] sm:$0xf0]  ;;  %v11720_v8 = vpop.f32.mrf.mxu0  ;;  %v3935_v38 = vadd.f32 %v11709_v17, %v3922_v19  ;;  %v9745_v48 = vld [vmem:[#allocation6 + $0x5e0] sm:$0xf]  ;;  %v11734_v17 = vpop.f32.mrf.mxu1 }
 0x345   :  { %4232 = vmatmul.bf16.vlgmr.msra.gmra.mxu2 %v11548_v41  ;;  %v9170_v41 = vor.u32 %v10894_v39, %v9169_v45  ;;  %v11006_v45 = vld [vmem:[#allocation6 + $0x4ec] sm:$0xf0]  ;;  %v9265_v39 = vld [vmem:[#allocation6 + $0x220] sm:$0xf]  ;;  %v9746_v61 = vor.u32 %v11038_v49, %v9745_v48  ;;  %v11739_v11 = vpack.c.bf16 %v4258_v52, %v4258_v52 }
 0x346   :  { %5846 = vmatpush.bf16.msrb.mxu2 %v9362_v20  ;;  %5822 = vmatpush.bf16.msrb.mxu0 %v9074_v42  ;;  %v9298_v20 = vor.u32 %v10926_v6, %v9297_v5  ;;  %v9409_v42 = vld [vmem:[#allocation6 + $0x340] sm:$0xf]  ;;  %v10918_v50 = vld [vmem:[#allocation6 + $0x22c] sm:$0xf0]  ;;  %v3948_v63 = vadd.f32 %v11704_v0, %v3935_v38 }
 0x347   :  { %v10950_v58 = vld [vmem:[#allocation6 + $0x32c] sm:$0xf0]  ;;  %v9266_v16 = vor.u32 %v10918_v50, %v9265_v39  ;;  %v9729_v1 = vld [vmem:[#allocation6 + $0x5c0] sm:$0xf] }
 0x348   :  { %5859 = vmatpush.bf16.msrb.mxu3 %v9490_v25  ;;  %5835 = vmatpush.bf16.msrb.mxu1 %v9202_v26  ;;  %v4251_v25 = vmul.f32 0.2, %v11624_v56  ;;  %v10922_v26 = vld [vmem:[#allocation6 + $0x24c] sm:$0xf0]  ;;  %v9249_v29 = vld [vmem:[#allocation6 + $0x200] sm:$0xf]  ;;  %v3961_v15 = vadd.f32 %v11716_v30, %v3948_v63 }
 0x349   :  { %v9282_v57 = vor.u32 %v10922_v26, %v9281_v23  ;;  %v9377_v5 = vld [vmem:[#allocation6 + $0x300] sm:$0xf]  ;;  %v10946_v6 = vld [vmem:[#allocation6 + $0x30c] sm:$0xf0] }
 0x34a   :  { %5847 = vmatpush.bf16.msrb.mxu2 %v9346_v35  ;;  %5823 = vmatpush.bf16.msrb.mxu0 %v9058_v9  ;;  %v11727_v35 = vpop.f32.mrf.mxu3  ;;  %v9410_v9 = vor.u32 %v10954_v54, %v9409_v42  ;;  %v4259_v12 = vmax.f32 %v11624_v56, %v4251_v25  ;;  %v11002_v56 = vld [vmem:[#allocation6 + $0x4cc] sm:$0xf0]  ;;  %v9378_v25 = vor.u32 %v10946_v6, %v9377_v5  ;;  %v9857_v30 = vld [vmem:[#allocation6 + $0x6c0] sm:$0xf] }
 0x34b   :  { %v11030_v21 = vld [vmem:[#allocation6 + $0x5ac] sm:$0xf0]  ;;  %v9697_v40 = vld [vmem:[#allocation6 + $0x580] sm:$0xf] }
 0x34c   :  { %5860 = vmatpush.bf16.msrb.mxu3 %v9474_v37  ;;  %5836 = vmatpush.bf16.msrb.mxu1 %v9186_v47  ;;  %v10882_v37 = vld [vmem:[#allocation6 + $0x10c] sm:$0xf0]  ;;  %v9617_v47 = vld [vmem:[#allocation6 + $0x4e0] sm:$0xf]  ;;  %v4014_v54 = vpop.f32.mrf.mxu1 }
 0x34d   :  { %v9618_v34 = vor.u32 %v11006_v45, %v9617_v47  ;;  %v10998_v23 = vld [vmem:[#allocation6 + $0x4ac] sm:$0xf0]  ;;  %v9569_v38 = vld [vmem:[#allocation6 + $0x480] sm:$0xf] }
 0x34e   :  { %5848 = vmatpush.bf16.msrb.mxu2 %v9330_v18  ;;  %5824 = vmatpush.bf16.msrb.mxu0 %v9042_v62  ;;  %v4001_v18 = vpop.f32.mrf.mxu0  ;;  %v9601_v62 = vld [vmem:[#allocation6 + $0x4c0] sm:$0xf]  ;;  %v11066_v42 = vld [vmem:[#allocation6 + $0x6cc] sm:$0xf0] }
 0x34f   :  { %v9602_v44 = vor.u32 %v11002_v56, %v9601_v62  ;;  %v9841_v48 = vld [vmem:[#allocation6 + $0x6a0] sm:$0xf]  ;;  %v11062_v49 = vld [vmem:[#allocation6 + $0x6ac] sm:$0xf0] }
 0x350   :  { %5861 = vmatpush.bf16.msrb.mxu3 %v9458_v53  ;;  %5837 = vmatpush.bf16.msrb.mxu1 %v9170_v41  ;;  %v9122_v53 = vor.u32 %v10882_v37, %v9121_v33  ;;  %v4253_v41 = vmul.f32 0.2, %v11676_v60  ;;  %v11026_v33 = vld [vmem:[#allocation6 + $0x58c] sm:$0xf0]  ;;  %v11749_v37 = vpack.c.bf16 %v4260_v22, %v4260_v22  ;;  %v9681_v39 = vld [vmem:[#allocation6 + $0x560] sm:$0xf] }
 0x351   :  { %v11022_v50 = vld [vmem:[#allocation6 + $0x56c] sm:$0xf0]  ;;  %v9553_v18 = vld [vmem:[#allocation6 + $0x460] sm:$0xf] }
 0x352   :  { %5849 = vmatpush.bf16.msrb.mxu2 %v9314_v7  ;;  %5825 = vmatpush.bf16.msrb.mxu0 %v9026_v55  ;;  %v11034_v7 = vld [vmem:[#allocation6 + $0x5cc] sm:$0xf0]  ;;  %v11741_v55 = vpack.c.bf16 %v4259_v12, %v4259_v12  ;;  %v3988_v13 = vpop.f32.mrf.mxu3  ;;  %v9842_v12 = vor.u32 %v11062_v49, %v9841_v48  ;;  %v9682_v59 = vor.u32 %v11022_v50, %v9681_v39  ;;  %v9537_v62 = vld [vmem:[#allocation6 + $0x440] sm:$0xf]  ;;  %v10872_v48 = vld [vmem:[#allocation6 + $0xc4] sm:$0xf] }
 0x353   :  { %8990 = vmatmul.msk.bf16.vlgmr.msra.gmra.mxu3 %vm3282_vm2, %v11562_v32  ;;  %v9393_v32 = vld [vmem:[#allocation6 + $0x320] sm:$0xf]  ;;  %v9730_v0 = vor.u32 %v11034_v7, %v9729_v1  ;;  %v10990_v52 = vld [vmem:[#allocation6 + $0x46c] sm:$0xf0]  ;;  %v4254_v13 = vmul.f32 0.2, %v11696_v51 }
 0x354   :  { %5862 = vmatpush.bf16.msrb.mxu3 %v9442_v4  ;;  %5838 = vmatpush.bf16.msrb.mxu1 %v9154_v10  ;;  %v9394_v2 = vor.u32 %v10950_v58, %v9393_v32  ;;  %v10914_v4 = vld [vmem:[#allocation6 + $0x20c] sm:$0xf0]  ;;  %v11756_v58 = vpop.f32.mrf.mxu1  ;;  %v9521_v5 = vld [vmem:[#allocation6 + $0x420] sm:$0xf]  ;;  %v10904_v49 = vld [vmem:[#allocation6 + $0x1c4] sm:$0xf] }
 0x355   :  { %v11070_v10 = vld [vmem:[#allocation6 + $0x6ec] sm:$0xf0]  ;;  %v9250_v19 = vor.u32 %v10914_v4, %v9249_v29  ;;  %v9649_v4 = vld [vmem:[#allocation6 + $0x520] sm:$0xf] }
 0x356   :  { %5850 = vmatpush.bf16.msrb.mxu2 %v9298_v20  ;;  %5826 = vmatpush.bf16.msrb.mxu0 %v9010_v31  ;;  %v9713_v20 = vld [vmem:[#allocation6 + $0x5a0] sm:$0xf]  ;;  %v9874_v26 = vor.u32 %v11070_v10, %v9873_v46  ;;  %v3974_v31 = vadd.f32 %v11725_v36, %v3961_v15  ;;  %v9698_v36 = vor.u32 %v11026_v33, %v9697_v40  ;;  %v11058_v32 = vld [vmem:[#allocation6 + $0x68c] sm:$0xf0]  ;;  %v11759_v1 = vpop.f32.mrf.mxu0 }
 0x357   :  { %v9714_v27 = vor.u32 %v11030_v21, %v9713_v20  ;;  %v10986_v63 = vld [vmem:[#allocation6 + $0x44c] sm:$0xf0]  ;;  %v9793_v10 = vld [vmem:[#allocation6 + $0x640] sm:$0xf]  ;;  %v11763_v20 = vpop.f32.mrf.mxu2 }
 0x358   :  { %5863 = vmatpush.bf16.msrb.mxu3 %v9426_v28  ;;  %5839 = vmatpush.bf16.msrb.mxu1 %v9138_v14  ;;  %v9585_v28 = vld [vmem:[#allocation6 + $0x4a0] sm:$0xf]  ;;  %v4261_v14 = vmax.f32 %v11676_v60, %v4253_v41  ;;  %v9858_v60 = vor.u32 %v11066_v42, %v9857_v30  ;;  %v11054_v56 = vld [vmem:[#allocation6 + $0x66c] sm:$0xf0]  ;;  %v9538_v29 = vor.u32 %v10986_v63, %v9537_v62  ;;  %v9107_v42 = vld [vmem:[#allocation6 + $0xf0] sm:$0xf0] }
 0x359   :  { %v9586_v24 = vor.u32 %v10998_v23, %v9585_v28  ;;  %v10982_v6 = vld [vmem:[#allocation6 + $0x42c] sm:$0xf0]  ;;  %v9633_v22 = vld [vmem:[#allocation6 + $0x500] sm:$0xf]  ;;  %v10876_v23 = vld [vmem:[#allocation6 + $0xe4] sm:$0xf] }
 0x35a   :  { %5851 = vmatpush.bf16.msrb.mxu2 %v9282_v57  ;;  %5827 = vmatpush.bf16.msrb.mxu0 %v8994_v3  ;;  %v10994_v57 = vld [vmem:[#allocation6 + $0x48c] sm:$0xf0]  ;;  %v11751_v47 = vpack.c.bf16 %v4261_v14, %v4261_v14  ;;  %v9665_v3 = vld [vmem:[#allocation6 + $0x540] sm:$0xf]  ;;  %v9522_v21 = vor.u32 %v10982_v6, %v9521_v5  ;;  %v11765_v28 = vpop.f32.mrf.mxu3  ;;  %v9235_v14 = vld [vmem:[#allocation6 + $0x1f0] sm:$0xf0] }
 0x35b   :  { %v9570_v45 = vor.u32 %v10994_v57, %v9569_v38  ;;  %v11050_v43 = vld [vmem:[#allocation6 + $0x64c] sm:$0xf0]  ;;  %v9777_v54 = vld [vmem:[#allocation6 + $0x620] sm:$0xf]  ;;  %v4262_v57 = vmax.f32 %v11696_v51, %v4254_v13  ;;  %v10868_v62 = vld [vmem:[#allocation6 + $0xa4] sm:$0xf] }
 0x35c   :  { %5864 = vmatpush.bf16.msrb.mxu3 %v9410_v9  ;;  %5840 = vmatpush.bf16.msrb.mxu1 %v9122_v53  ;;  %v3987_v9 = vadd.f32 %v11727_v35, %v3974_v31  ;;  %v9825_v53 = vld [vmem:[#allocation6 + $0x680] sm:$0xf]  ;;  %v9554_v35 = vor.u32 %v10990_v52, %v9553_v18  ;;  %v9794_v30 = vor.u32 %v11050_v43, %v9793_v10  ;;  %v11042_v50 = vld [vmem:[#allocation6 + $0x60c] sm:$0xf0]  ;;  %v10940_v52 = vld [vmem:[#allocation6 + $0x2e4] sm:$0xf] }
 0x35d   :  { %5828 = vmatmul.bf16.vlgmr.msrb.gmra.mxu0 %v11739_v11  ;;  %v9761_v39 = vld [vmem:[#allocation6 + $0x600] sm:$0xf]  ;;  %v11770_v51 = vpack.c.bf16 %v4262_v57, %v4262_v57  ;;  %v9075_v63 = vld [vmem:[#allocation6 + $0xb0] sm:$0xf0]  ;;  %v10864_v6 = vld [vmem:[#allocation6 + $0x84] sm:$0xf] }
 0x35e   :  { %5872 = vmatpush.bf16.msra.mxu0 %v9618_v34  ;;  %5852 = vmatpush.bf16.msrb.mxu2 %v9266_v16  ;;  %v4000_v41 = vadd.f32 %v11720_v8, %v3987_v9  ;;  %v9826_v34 = vor.u32 %v11058_v32, %v9825_v53  ;;  %v9809_v16 = vld [vmem:[#allocation6 + $0x660] sm:$0xf]  ;;  %v11014_v8 = vld [vmem:[#allocation6 + $0x52c] sm:$0xf0]  ;;  %v4053_v31 = vpop.f32.mrf.mxu0  ;;  %v9187_v5 = vld [vmem:[#allocation6 + $0x190] sm:$0xf0] }
 0x35f   :  { %5841 = vmatmul.bf16.vlgmr.msrb.gmra.mxu1 %v11741_v55  ;;  %v9810_v46 = vor.u32 %v11054_v56, %v9809_v16  ;;  %v9650_v15 = vor.u32 %v11014_v8, %v9649_v4  ;;  %v4027_v18 = vpop.f32.mrf.mxu2  ;;  %v11774_v16 = vld [vmem:[#allocation4] sm:$0xff]  ;;  %v9078_v4 = vor.u32 %v10868_v62, %v9075_v63  ;;  %v10896_v8 = vld [vmem:[#allocation6 + $0x184] sm:$0xf]  ;;  %v9331_v13 = vld [vmem:[#allocation6 + $0x2b0] sm:$0xf0] }
 0x360   :  { %5885 = vmatpush.bf16.msra.mxu1 %v9746_v61  ;;  %5865 = vmatpush.bf16.msrb.mxu3 %v9394_v2  ;;  %v11018_v61 = vld [vmem:[#allocation6 + $0x54c] sm:$0xf0]  ;;  %v4013_v2 = vadd.f32 %v11734_v17, %v4000_v41  ;;  %v692_v56 = vperm.slane %v11774_v16, 6  ;;  %v10852_v18 = vld [vmem:[#allocation6 + $0x24] sm:$0xf] }
 0x361   :  { %v9666_v7 = vor.u32 %v11018_v61, %v9665_v3  ;;  %v9203_v3 = vld [vmem:[#allocation6 + $0x1b0] sm:$0xf0]  ;;  %v9762_v61 = vor.u32 %v11042_v50, %v9761_v39 }
 0x362   :  { %5873 = vmatpush.bf16.msra.mxu0 %v9602_v44  ;;  %5853 = vmatpush.bf16.msrb.mxu2 %v9250_v19  ;;  %v9505_v44 = vld [vmem:[#allocation6 + $0x400] sm:$0xf]  ;;  %v10978_v19 = vld [vmem:[#allocation6 + $0x40c] sm:$0xf0]  ;;  %v4255_v17 = vmul.f32 0.2, %v4013_v2  ;;  %v4026_v43 = vadd.f32 %v11763_v20, %v692_v56 }
 0x363   :  { %v9506_v33 = vor.u32 %v10978_v19, %v9505_v44  ;;  %v10892_v19 = vld [vmem:[#allocation6 + $0x164] sm:$0xf]  ;;  %v11102_v20 = vld [vmem:[#allocation6 + $0x7ec] sm:$0xf0] }
 0x364   :  { %5886 = vmatpush.bf16.msra.mxu1 %v9730_v0  ;;  %5866 = vmatpush.bf16.msrb.mxu3 %v9378_v25  ;;  %v4066_v0 = vpop.f32.mrf.mxu1  ;;  %v11010_v25 = vld [vmem:[#allocation6 + $0x50c] sm:$0xf0]  ;;  %v4263_v40 = vmax.f32 %v4013_v2, %v4255_v17  ;;  %v9347_v2 = vld [vmem:[#allocation6 + $0x2d0] sm:$0xf0] }
 0x365   :  { %5854 = vmatmul.bf16.vlgmr.msrb.gmra.mxu2 %v11749_v37  ;;  %v10932_v0 = vld [vmem:[#allocation6 + $0x2a4] sm:$0xf]  ;;  %v9171_v17 = vld [vmem:[#allocation6 + $0x170] sm:$0xf0] }
 0x366   :  { %5898 = vmatpush.bf16.msra.mxu2 %v9874_v26  ;;  %5874 = vmatpush.bf16.msra.mxu0 %v9586_v24  ;;  %v10908_v26 = vld [vmem:[#allocation6 + $0x1e4] sm:$0xf]  ;;  %v9634_v24 = vor.u32 %v11010_v25, %v9633_v22  ;;  %v11768_v53 = vpack.c.bf16 %v4263_v40, %v4263_v40  ;;  %v9043_v22 = vld [vmem:[#allocation6 + $0x70] sm:$0xf0]  ;;  %v9334_v25 = vor.u32 %v10932_v0, %v9331_v13  ;;  %v11782_v39 = vpop.f32.mrf.mxu0  ;;  %v11090_v0 = vld [vmem:[#allocation6 + $0x78c] sm:$0xf0] }
 0x367   :  { %5867 = vmatmul.bf16.vlgmr.msrb.gmra.mxu3 %v11751_v47  ;;  %v9238_v38 = vor.u32 %v10908_v26, %v9235_v14  ;;  %v4039_v26 = vadd.f32 %v11765_v28, %v4026_v43  ;;  %v9315_v14 = vld [vmem:[#allocation6 + $0x290] sm:$0xf0]  ;;  %v10888_v40 = vld [vmem:[#allocation6 + $0x144] sm:$0xf] }
 0x368   :  { %5887 = vmatpush.bf16.msra.mxu1 %v9714_v27  ;;  %v11046_v27 = vld [vmem:[#allocation6 + $0x62c] sm:$0xf0] }
 0x369   :  { %v9778_v9 = vor.u32 %v11046_v27, %v9777_v54  ;;  %v9174_v54 = vor.u32 %v10892_v19, %v9171_v17  ;;  %v4052_v28 = vadd.f32 %v11759_v1, %v4039_v26  ;;  %v9267_v19 = vld [vmem:[#allocation6 + $0x230] sm:$0xf0]  ;;  %v11000_v26 = vld [vmem:[#allocation6 + $0x4c4] sm:$0xf] }
 0x36a   :  { %5899 = vmatpush.bf16.msra.mxu2 %v9858_v60  ;;  %5875 = vmatpush.bf16.msra.mxu0 %v9570_v45  ;;  %v9110_v60 = vor.u32 %v10876_v23, %v9107_v42  ;;  %v9091_v45 = vld [vmem:[#allocation6 + $0xd0] sm:$0xf0]  ;;  %v10928_v23 = vld [vmem:[#allocation6 + $0x284] sm:$0xf]  ;;  %v10001_v42 = vld [vmem:[#allocation6 + $0x7e0] sm:$0xf] }
 0x36b   :  { %v9094_v41 = vor.u32 %v10872_v48, %v9091_v45  ;;  %v10002_v27 = vor.u32 %v11102_v20, %v10001_v42  ;;  %v9318_v57 = vor.u32 %v10928_v23, %v9315_v14  ;;  %v11098_v48 = vld [vmem:[#allocation6 + $0x7cc] sm:$0xf0]  ;;  %v4065_v1 = vadd.f32 %v11756_v58, %v4052_v28  ;;  %v9953_v58 = vld [vmem:[#allocation6 + $0x780] sm:$0xf]  ;;  %v9603_v14 = vld [vmem:[#allocation6 + $0x4d0] sm:$0xf0] }
 0x36c   :  { %5888 = vmatpush.bf16.msra.mxu1 %v9698_v36  ;;  %v9219_v36 = vld [vmem:[#allocation6 + $0x1d0] sm:$0xf0]  ;;  %v9954_v17 = vor.u32 %v11090_v0, %v9953_v58  ;;  %v11032_v20 = vld [vmem:[#allocation6 + $0x5c4] sm:$0xf]  ;;  %v11074_v0 = vld [vmem:[#allocation6 + $0x70c] sm:$0xf0] }
 0x36d   :  { %v9222_v32 = vor.u32 %v10904_v49, %v9219_v36  ;;  %5911 = vmatpush.bf16.msra.mxu3 %v10002_v27  ;;  %v10924_v49 = vld [vmem:[#allocation6 + $0x264] sm:$0xf]  ;;  %v9299_v36 = vld [vmem:[#allocation6 + $0x270] sm:$0xf0] }
 0x36e   :  { %5900 = vmatpush.bf16.msra.mxu2 %v9842_v12  ;;  %5876 = vmatpush.bf16.msra.mxu0 %v9554_v35  ;;  %v9363_v12 = vld [vmem:[#allocation6 + $0x2f0] sm:$0xf0]  ;;  %v10900_v35 = vld [vmem:[#allocation6 + $0x1a4] sm:$0xf] }
 0x370   :  { %5889 = vmatpush.bf16.msra.mxu1 %v9682_v59  ;;  %v4040_v59 = vpop.f32.mrf.mxu3 }
 0x371   :  { %v9302_v59 = vor.u32 %v10924_v49, %v9299_v36  ;;  %v9606_v49 = vor.u32 %v11000_v26, %v9603_v14  ;;  %v10996_v36 = vld [vmem:[#allocation6 + $0x4a4] sm:$0xf] }
 0x372   :  { %5901 = vmatpush.bf16.msra.mxu2 %v9826_v34  ;;  %5877 = vmatpush.bf16.msra.mxu0 %v9538_v29  ;;  %v9366_v34 = vor.u32 %v10940_v52, %v9363_v12  ;;  %v9206_v29 = vor.u32 %v10900_v35, %v9203_v3  ;;  %v10884_v52 = vld [vmem:[#allocation6 + $0x124] sm:$0xf]  ;;  %v9139_v12 = vld [vmem:[#allocation6 + $0x130] sm:$0xf0]  ;;  %v11094_v35 = vld [vmem:[#allocation6 + $0x7ac] sm:$0xf0] }
 0x373   :  { %v10920_v3 = vld [vmem:[#allocation6 + $0x244] sm:$0xf]  ;;  %v9142_v56 = vor.u32 %v10884_v52, %v9139_v12  ;;  %v9587_v52 = vld [vmem:[#allocation6 + $0x4b0] sm:$0xf0]  ;;  %v9921_v12 = vld [vmem:[#allocation6 + $0x740] sm:$0xf] }
 0x374   :  { %5890 = vmatpush.bf16.msra.mxu1 %v9666_v7  ;;  %v10936_v7 = vld [vmem:[#allocation6 + $0x2c4] sm:$0xf] }
 0x375   :  { %v9350_v10 = vor.u32 %v10936_v7, %v9347_v2  ;;  %v10848_v7 = vld [vmem:[#allocation6 + $0x4] sm:$0xf]  ;;  %v8995_v2 = vld [vmem:[#allocation6 + $0x10] sm:$0xf0] }
 0x376   :  { %5902 = vmatpush.bf16.msra.mxu2 %v9810_v46  ;;  %5878 = vmatpush.bf16.msra.mxu0 %v9522_v21  ;;  %v9059_v46 = vld [vmem:[#allocation6 + $0x90] sm:$0xf0]  ;;  %v10860_v21 = vld [vmem:[#allocation6 + $0x64] sm:$0xf] }
 0x377   :  { %v9062_v44 = vor.u32 %v10864_v6, %v9059_v46  ;;  %v9046_v31 = vor.u32 %v10860_v21, %v9043_v22  ;;  %v11004_v6 = vld [vmem:[#allocation6 + $0x4e4] sm:$0xf]  ;;  %v4105_v22 = vpop.f32.mrf.mxu0 }
 0x378   :  { %5891 = vmatpush.bf16.msra.mxu1 %v9650_v15  ;;  %v9190_v15 = vor.u32 %v10896_v8, %v9187_v5  ;;  %v4090_v8 = vpop.f32.mrf.mxu3  ;;  %v9123_v5 = vld [vmem:[#allocation6 + $0x110] sm:$0xf0]  ;;  %v11036_v46 = vld [vmem:[#allocation6 + $0x5e4] sm:$0xf] }
 0x379   :  { %v9491_v22 = vld [vmem:[#allocation6 + $0x3f0] sm:$0xf0]  ;;  %v10984_v26 = vld [vmem:[#allocation6 + $0x444] sm:$0xf] }
 0x37a   :  { %5903 = vmatpush.bf16.msra.mxu2 %v9794_v30  ;;  %5879 = vmatpush.bf16.msra.mxu0 %v9506_v33  ;;  %v11779_v30 = vpop.f32.mrf.mxu1  ;;  %v9155_v33 = vld [vmem:[#allocation6 + $0x150] sm:$0xf0]  ;;  %v11016_v14 = vld [vmem:[#allocation6 + $0x544] sm:$0xf] }
 0x37b   :  { %v9158_v45 = vor.u32 %v10888_v40, %v9155_v33  ;;  %v9251_v40 = vld [vmem:[#allocation6 + $0x210] sm:$0xf0]  ;;  %v9937_v33 = vld [vmem:[#allocation6 + $0x760] sm:$0xf] }
 0x37c   :  { %5892 = vmatpush.bf16.msra.mxu1 %v9634_v24  ;;  %v10856_v24 = vld [vmem:[#allocation6 + $0x44] sm:$0xf] }
 0x37d   :  { %5880 = vmatmul.bf16.vlgmr.msra.gmra.mxu0 %v11770_v51 }
 0x37e   :  { %5924 = vmatpush.bf16.msrb.mxu0 %v9110_v60  ;;  %5904 = vmatpush.bf16.msra.mxu2 %v9778_v9  ;;  %v9985_v60 = vld [vmem:[#allocation6 + $0x7c0] sm:$0xf] }
 0x37f   :  { %5893 = vmatmul.bf16.vlgmr.msra.gmra.mxu1 %v11768_v53  ;;  %v9986_v9 = vor.u32 %v11098_v48, %v9985_v60 }
 0x380   :  { %5937 = vmatpush.bf16.msrb.mxu1 %v9238_v38  ;;  %v9027_v38 = vld [vmem:[#allocation6 + $0x50] sm:$0xf0]  ;;  %v4092_v28 = vpop.f32.mrf.mxu3 }
 0x381   :  { %v9030_v50 = vor.u32 %v10856_v24, %v9027_v38  ;;  %5912 = vmatpush.bf16.msra.mxu3 %v9986_v9  ;;  %v11086_v38 = vld [vmem:[#allocation6 + $0x76c] sm:$0xf0]  ;;  %v11028_v9 = vld [vmem:[#allocation6 + $0x5a4] sm:$0xf] }
 0x382   :  { %5925 = vmatpush.bf16.msrb.mxu0 %v9094_v41  ;;  %5905 = vmatpush.bf16.msra.mxu2 %v9762_v61  ;;  %v9969_v41 = vld [vmem:[#allocation6 + $0x7a0] sm:$0xf]  ;;  %v9283_v61 = vld [vmem:[#allocation6 + $0x250] sm:$0xf0]  ;;  %v4118_v63 = vpop.f32.mrf.mxu1  ;;  %v9938_v60 = vor.u32 %v11086_v38, %v9937_v33  ;;  %v10968_v38 = vld [vmem:[#allocation6 + $0x3c4] sm:$0xf] }
 0x383   :  { %v9970_v62 = vor.u32 %v11094_v35, %v9969_v41  ;;  %v9286_v43 = vor.u32 %v10920_v3, %v9283_v61  ;;  %v9590_v35 = vor.u32 %v10996_v36, %v9587_v52  ;;  %v11024_v3 = vld [vmem:[#allocation6 + $0x584] sm:$0xf]  ;;  %v9699_v61 = vld [vmem:[#allocation6 + $0x590] sm:$0xf0]  ;;  %v9905_v63 = vld [vmem:[#allocation6 + $0x720] sm:$0xf] }
 0x384   :  { %5938 = vmatpush.bf16.msrb.mxu1 %v9222_v32  ;;  %v9011_v32 = vld [vmem:[#allocation6 + $0x30] sm:$0xf0]  ;;  %v10980_v28 = vld [vmem:[#allocation6 + $0x424] sm:$0xf] }
 0x385   :  { %5913 = vmatpush.bf16.msra.mxu3 %v9970_v62  ;;  %v9651_v36 = vld [vmem:[#allocation6 + $0x530] sm:$0xf0] }
 0x386   :  { %5950 = vmatpush.bf16.msrb.mxu2 %v9366_v34  ;;  %5926 = vmatpush.bf16.msrb.mxu0 %v9078_v4  ;;  %v4077_v34 = vpop.f32.mrf.mxu2  ;;  %v9014_v4 = vor.u32 %v10852_v18, %v9011_v32  ;;  %v11082_v32 = vld [vmem:[#allocation6 + $0x74c] sm:$0xf0] }
 0x387   :  { %v4078_v13 = vadd.f32 %v4077_v34, %v4065_v1  ;;  %v10992_v1 = vld [vmem:[#allocation6 + $0x484] sm:$0xf]  ;;  %v11078_v34 = vld [vmem:[#allocation6 + $0x72c] sm:$0xf0] }
 0x388   :  { %5939 = vmatpush.bf16.msrb.mxu1 %v9206_v29  ;;  %v10880_v29 = vld [vmem:[#allocation6 + $0x104] sm:$0xf] }
 0x389   :  { %v9126_v21 = vor.u32 %v10880_v29, %v9123_v5  ;;  %5914 = vmatpush.bf16.msra.mxu3 %v9954_v17  ;;  %v4091_v24 = vadd.f32 %v4090_v8, %v4078_v13  ;;  %v9702_v29 = vor.u32 %v11024_v3, %v9699_v61  ;;  %v9555_v8 = vld [vmem:[#allocation6 + $0x470] sm:$0xf0]  ;;  %v11020_v5 = vld [vmem:[#allocation6 + $0x564] sm:$0xf] }
 0x38a   :  { %5951 = vmatpush.bf16.msrb.mxu2 %v9350_v10  ;;  %5927 = vmatpush.bf16.msrb.mxu0 %v9062_v44  ;;  %v9747_v10 = vld [vmem:[#allocation6 + $0x5f0] sm:$0xf0]  ;;  %v10916_v44 = vld [vmem:[#allocation6 + $0x224] sm:$0xf]  ;;  %v11789_v13 = vpop.f32.mrf.mxu1  ;;  %v11796_v61 = vpop.f32.mrf.mxu3 }
 0x38b   :  { %v9750_v23 = vor.u32 %v11036_v46, %v9747_v10  ;;  %v9270_v27 = vor.u32 %v10916_v44, %v9267_v19  ;;  %v4104_v18 = vadd.f32 %v11782_v39, %v4091_v24  ;;  %v9571_v39 = vld [vmem:[#allocation6 + $0x490] sm:$0xf0]  ;;  %v11068_v10 = vld [vmem:[#allocation6 + $0x6e4] sm:$0xf] }
 0x38c   :  { %5940 = vmatpush.bf16.msrb.mxu1 %v9190_v15  ;;  %v9619_v15 = vld [vmem:[#allocation6 + $0x4f0] sm:$0xf0]  ;;  %v10972_v44 = vld [vmem:[#allocation6 + $0x3e4] sm:$0xf] }
 0x38d   :  { %v9622_v42 = vor.u32 %v11004_v6, %v9619_v15  ;;  %5915 = vmatpush.bf16.msra.mxu3 %v9938_v60  ;;  %v4117_v62 = vadd.f32 %v11779_v30, %v4104_v18  ;;  %v9574_v6 = vor.u32 %v10992_v1, %v9571_v39  ;;  %v9683_v46 = vld [vmem:[#allocation6 + $0x570] sm:$0xf0]  ;;  %v9889_v30 = vld [vmem:[#allocation6 + $0x700] sm:$0xf]  ;;  %v11008_v39 = vld [vmem:[#allocation6 + $0x504] sm:$0xf] }
 0x38e   :  { %5952 = vmatpush.bf16.msrb.mxu2 %v9334_v25  ;;  %5928 = vmatpush.bf16.msrb.mxu0 %v9046_v31  ;;  %v8998_v25 = vor.u32 %v10848_v7, %v8995_v2  ;;  %v10912_v31 = vld [vmem:[#allocation6 + $0x204] sm:$0xf]  ;;  %v9906_v7 = vor.u32 %v11078_v34, %v9905_v63  ;;  %v9890_v15 = vor.u32 %v11074_v0, %v9889_v30  ;;  %v9859_v24 = vld [vmem:[#allocation6 + $0x6d0] sm:$0xf0] }
 0x38f   :  { %v9686_v17 = vor.u32 %v11020_v5, %v9683_v46  ;;  %v9843_v18 = vld [vmem:[#allocation6 + $0x6b0] sm:$0xf0]  ;;  %v10960_v46 = vld [vmem:[#allocation6 + $0x384] sm:$0xf] }
 0x390   :  { %5941 = vmatpush.bf16.msrb.mxu1 %v9174_v54  ;;  %v9731_v54 = vld [vmem:[#allocation6 + $0x5d0] sm:$0xf0] }
 0x391   :  { %v9734_v48 = vor.u32 %v11032_v20, %v9731_v54  ;;  %v9494_v20 = vor.u32 %v10972_v44, %v9491_v22  ;;  %v9635_v63 = vld [vmem:[#allocation6 + $0x510] sm:$0xf0]  ;;  %v11052_v44 = vld [vmem:[#allocation6 + $0x664] sm:$0xf]  ;;  %v10875_v22 = vld [vmem:[#allocation6 + $0xd4] sm:$0xf0] }
 0x392   :  { %5953 = vmatpush.bf16.msrb.mxu2 %v9318_v57  ;;  %5929 = vmatpush.bf16.msrb.mxu0 %v9030_v50  ;;  %v4079_v57 = vpop.f32.mrf.mxu2  ;;  %v9254_v50 = vor.u32 %v10912_v31, %v9251_v40  ;;  %v11064_v31 = vld [vmem:[#allocation6 + $0x6c4] sm:$0xf]  ;;  %v4170_v52 = vpop.f32.mrf.mxu1  ;;  %v9638_v5 = vor.u32 %v11008_v39, %v9635_v63 }
 0x393   :  { %v9475_v57 = vld [vmem:[#allocation6 + $0x3d0] sm:$0xf0]  ;;  %v11040_v63 = vld [vmem:[#allocation6 + $0x604] sm:$0xf] }
 0x394   :  { %5942 = vmatpush.bf16.msrb.mxu1 %v9158_v45  ;;  %v9715_v45 = vld [vmem:[#allocation6 + $0x5b0] sm:$0xf0] }
 0x395   :  { %v9718_v41 = vor.u32 %v11028_v9, %v9715_v45  ;;  %v9478_v9 = vor.u32 %v10968_v38, %v9475_v57  ;;  %v9523_v45 = vld [vmem:[#allocation6 + $0x430] sm:$0xf0]  ;;  %v9081_v38 = vld [vmem:[#allocation6 + $0xa8] sm:$0xf]  ;;  %v10871_v57 = vld [vmem:[#allocation6 + $0xb4] sm:$0xf0] }
 0x396   :  { %5954 = vmatpush.bf16.msrb.mxu2 %v9302_v59  ;;  %5930 = vmatpush.bf16.msrb.mxu0 %v9014_v4  ;;  %v9922_v59 = vor.u32 %v11082_v32, %v9921_v12  ;;  %v10988_v4 = vld [vmem:[#allocation6 + $0x464] sm:$0xf]  ;;  %v9526_v1 = vor.u32 %v10980_v28, %v9523_v45 }
 0x397   :  { %v10976_v32 = vld [vmem:[#allocation6 + $0x404] sm:$0xf] }
 0x398   :  { %5943 = vmatpush.bf16.msrb.mxu1 %v9142_v56  ;;  %5916 = vmatpush.bf16.msra.mxu3 %v9922_v59 }
 0x39a   :  { %5955 = vmatpush.bf16.msrb.mxu2 %v9286_v43  ;;  %5931 = vmatpush.bf16.msrb.mxu0 %v8998_v25  ;;  %v4129_v56 = vpop.f32.mrf.mxu2  ;;  %v9875_v43 = vld [vmem:[#allocation6 + $0x6f0] sm:$0xf0]  ;;  %v9558_v25 = vor.u32 %v10988_v4, %v9555_v8  ;;  %v9241_v4 = vld [vmem:[#allocation6 + $0x1e8] sm:$0xf]  ;;  %v10911_v8 = vld [vmem:[#allocation6 + $0x1f4] sm:$0xf0] }
 0x39b   :  { %v4130_v2 = vadd.f32 %v4129_v56, %v4117_v62  ;;  %v9507_v62 = vld [vmem:[#allocation6 + $0x410] sm:$0xf0]  ;;  %v11056_v56 = vld [vmem:[#allocation6 + $0x684] sm:$0xf] }
 0x39c   :  { %5944 = vmatpush.bf16.msrb.mxu1 %v9126_v21  ;;  %5917 = vmatpush.bf16.msra.mxu3 %v9906_v7  ;;  %v11791_v21 = vpop.f32.mrf.mxu0  ;;  %v9827_v7 = vld [vmem:[#allocation6 + $0x690] sm:$0xf0] }
 0x39d   :  { %5932 = vmatmul.bf16.vlgmr.msrb.gmra.mxu0 %v11739_v11  ;;  %v4256_v58 = vmul.f32 0.2, %v4130_v2 }
 0x39e   :  { %5976 = vmatpush.bf16.msra.mxu0 %v9622_v42  ;;  %5956 = vmatpush.bf16.msrb.mxu2 %v9270_v27  ;;  %v9667_v42 = vld [vmem:[#allocation6 + $0x550] sm:$0xf0] }
 0x39f   :  { %5945 = vmatmul.bf16.vlgmr.msrb.gmra.mxu1 %v11741_v55  ;;  %v4264_v19 = vmax.f32 %v4130_v2, %v4256_v58  ;;  %v9539_v27 = vld [vmem:[#allocation6 + $0x450] sm:$0xf0]  ;;  %v9670_v33 = vor.u32 %v11016_v14, %v9667_v42  ;;  %v9113_v2 = vld [vmem:[#allocation6 + $0xe8] sm:$0xf]  ;;  %v9830_v58 = vor.u32 %v11056_v56, %v9827_v7 }
 0x3a0   :  { %5989 = vmatpush.bf16.msra.mxu1 %v9750_v23  ;;  %v9878_v23 = vor.u32 %v11068_v10, %v9875_v43  ;;  %5918 = vmatpush.bf16.msra.mxu3 %v9890_v15  ;;  %v9542_v60 = vor.u32 %v10984_v26, %v9539_v27  ;;  %v9443_v10 = vld [vmem:[#allocation6 + $0x390] sm:$0xf0]  ;;  %v9510_v43 = vor.u32 %v10976_v32, %v9507_v62  ;;  %v10956_v26 = vld [vmem:[#allocation6 + $0x364] sm:$0xf] }
 0x3a1   :  { %v11793_v54 = vpack.c.bf16 %v4264_v19, %v4264_v19  ;;  %v9446_v30 = vor.u32 %v10960_v46, %v9443_v10  ;;  %v9242_v15 = vor.u32 %v10911_v8, %v9241_v4  ;;  %v9811_v19 = vld [vmem:[#allocation6 + $0x670] sm:$0xf0]  ;;  %v9177_v8 = vld [vmem:[#allocation6 + $0x168] sm:$0xf]  ;;  %v10943_v10 = vld [vmem:[#allocation6 + $0x2f4] sm:$0xf0] }
 0x3a2   :  { %5977 = vmatpush.bf16.msra.mxu0 %v9606_v49  ;;  %5957 = vmatpush.bf16.msrb.mxu2 %v9254_v50  ;;  %v4131_v40 = vpop.f32.mrf.mxu2  ;;  %v11012_v49 = vld [vmem:[#allocation6 + $0x524] sm:$0xf]  ;;  %v9427_v14 = vld [vmem:[#allocation6 + $0x370] sm:$0xf0]  ;;  %v9814_v42 = vor.u32 %v11052_v44, %v9811_v19  ;;  %v9369_v46 = vld [vmem:[#allocation6 + $0x2e8] sm:$0xf] }
 0x3a3   :  { %5906 = vmatmul.bf16.vlgmr.msra.gmra.mxu2 %v11793_v54  ;;  %v11060_v50 = vld [vmem:[#allocation6 + $0x6a4] sm:$0xf]  ;;  %v9654_v12 = vor.u32 %v11012_v49, %v9651_v36  ;;  %v9430_v27 = vor.u32 %v10956_v26, %v9427_v14  ;;  %v9411_v36 = vld [vmem:[#allocation6 + $0x350] sm:$0xf0]  ;;  %v9161_v26 = vld [vmem:[#allocation6 + $0x148] sm:$0xf] }
 0x3a4   :  { %5990 = vmatpush.bf16.msra.mxu1 %v9734_v48  ;;  %5963 = vmatpush.bf16.msrb.mxu3 %v9494_v20  ;;  %v9862_v48 = vor.u32 %v11064_v31, %v9859_v24  ;;  %v4157_v59 = vpop.f32.mrf.mxu0  ;;  %v9846_v3 = vor.u32 %v11060_v50, %v9843_v18  ;;  %v4144_v20 = vpop.f32.mrf.mxu3  ;;  %v11048_v40 = vld [vmem:[#allocation6 + $0x644] sm:$0xf]  ;;  %v9082_v18 = vor.u32 %v10871_v57, %v9081_v38  ;;  %v9779_v32 = vld [vmem:[#allocation6 + $0x630] sm:$0xf0]  ;;  %v10891_v14 = vld [vmem:[#allocation6 + $0x154] sm:$0xf0] }
 0x3a5   :  { %v10952_v49 = vld [vmem:[#allocation6 + $0x344] sm:$0xf]  ;;  %v9065_v59 = vld [vmem:[#allocation6 + $0x88] sm:$0xf]  ;;  %v9395_v62 = vld [vmem:[#allocation6 + $0x330] sm:$0xf0] }
 0x3a6   :  { %5978 = vmatpush.bf16.msra.mxu0 %v9590_v35  ;;  %6002 = vmatpush.bf16.msra.mxu2 %v9878_v23  ;;  %v9459_v35 = vld [vmem:[#allocation6 + $0x3b0] sm:$0xf0]  ;;  %v10907_v23 = vld [vmem:[#allocation6 + $0x1d4] sm:$0xf0]  ;;  %v9414_v50 = vor.u32 %v10952_v49, %v9411_v36  ;;  %v9145_v57 = vld [vmem:[#allocation6 + $0x128] sm:$0xf] }
 0x3a7   :  { %v9763_v7 = vld [vmem:[#allocation6 + $0x610] sm:$0xf0]  ;;  %v10939_v20 = vld [vmem:[#allocation6 + $0x2d4] sm:$0xf0] }
 0x3a8   :  { %5991 = vmatpush.bf16.msra.mxu1 %v9718_v41  ;;  %5964 = vmatpush.bf16.msrb.mxu3 %v9478_v9  ;;  %v10964_v41 = vld [vmem:[#allocation6 + $0x3a4] sm:$0xf]  ;;  %v693_v9 = vperm.slane %v11774_v16, 7  ;;  %v10855_v38 = vld [vmem:[#allocation6 + $0x34] sm:$0xf0] }
 0x3a9   :  { %v9462_v34 = vor.u32 %v10964_v41, %v9459_v35  ;;  %v10867_v41 = vld [vmem:[#allocation6 + $0x94] sm:$0xf0]  ;;  %v9193_v35 = vld [vmem:[#allocation6 + $0x188] sm:$0xf] }
 0x3aa   :  { %5979 = vmatpush.bf16.msra.mxu0 %v9574_v6  ;;  %6003 = vmatpush.bf16.msra.mxu2 %v9862_v48  ;;  %v11798_v6 = vpop.f32.mrf.mxu2  ;;  %v10903_v48 = vld [vmem:[#allocation6 + $0x1b4] sm:$0xf0]  ;;  %v4143_v4 = vadd.f32 %v11796_v61, %v693_v9 }
 0x3ac   :  { %5992 = vmatpush.bf16.msra.mxu1 %v9702_v29  ;;  %v10879_v29 = vld [vmem:[#allocation6 + $0xf4] sm:$0xf0]  ;;  %5965 = vmatpush.bf16.msrb.mxu3 %v9462_v34  ;;  %v9066_v34 = vor.u32 %v10867_v41, %v9065_v59  ;;  %v4156_v61 = vadd.f32 %v11791_v21, %v4143_v4  ;;  %v9321_v59 = vld [vmem:[#allocation6 + $0x288] sm:$0xf] }
 0x3ad   :  { %v9114_v0 = vor.u32 %v10879_v29, %v9113_v2  ;;  %v9049_v2 = vld [vmem:[#allocation6 + $0x68] sm:$0xf]  ;;  %v10863_v29 = vld [vmem:[#allocation6 + $0x74] sm:$0xf0] }
 0x3ae   :  { %5980 = vmatpush.bf16.msra.mxu0 %v9558_v25  ;;  %6004 = vmatpush.bf16.msra.mxu2 %v9846_v3  ;;  %v9225_v25 = vld [vmem:[#allocation6 + $0x1c8] sm:$0xf]  ;;  %v10948_v3 = vld [vmem:[#allocation6 + $0x324] sm:$0xf]  ;;  %v9050_v19 = vor.u32 %v10863_v29, %v9049_v2  ;;  %v10887_v21 = vld [vmem:[#allocation6 + $0x134] sm:$0xf0] }
 0x3af   :  { %v9226_v24 = vor.u32 %v10907_v23, %v9225_v25  ;;  %v9398_v16 = vor.u32 %v10948_v3, %v9395_v62  ;;  %v9370_v25 = vor.u32 %v10943_v10, %v9369_v46  ;;  %v10859_v23 = vld [vmem:[#allocation6 + $0x54] sm:$0xf0]  ;;  %v9609_v4 = vld [vmem:[#allocation6 + $0x4c8] sm:$0xf] }
 0x3b0   :  { %5993 = vmatpush.bf16.msra.mxu1 %v9686_v17  ;;  %v9097_v17 = vld [vmem:[#allocation6 + $0xc8] sm:$0xf]  ;;  %5966 = vmatpush.bf16.msrb.mxu3 %v9446_v30  ;;  %v9379_v30 = vld [vmem:[#allocation6 + $0x310] sm:$0xf0]  ;;  %v11007_v3 = vld [vmem:[#allocation6 + $0x4f4] sm:$0xf0] }
 0x3b1   :  { %v9098_v31 = vor.u32 %v10875_v22, %v9097_v17  ;;  %v9033_v22 = vld [vmem:[#allocation6 + $0x48] sm:$0xf]  ;;  %v10927_v29 = vld [vmem:[#allocation6 + $0x274] sm:$0xf0] }
 0x3b2   :  { %5981 = vmatpush.bf16.msra.mxu0 %v9542_v60  ;;  %6005 = vmatpush.bf16.msra.mxu2 %v9830_v58  ;;  %v9209_v60 = vld [vmem:[#allocation6 + $0x1a8] sm:$0xf]  ;;  %v4183_v28 = vpop.f32.mrf.mxu2  ;;  %v10944_v58 = vld [vmem:[#allocation6 + $0x304] sm:$0xf]  ;;  %v11035_v10 = vld [vmem:[#allocation6 + $0x5d4] sm:$0xf0] }
 0x3b3   :  { %5958 = vmatmul.bf16.vlgmr.msrb.gmra.mxu2 %v11749_v37  ;;  %v9210_v52 = vor.u32 %v10903_v48, %v9209_v60  ;;  %v9382_v44 = vor.u32 %v10944_v58, %v9379_v30  ;;  %v9337_v60 = vld [vmem:[#allocation6 + $0x2a8] sm:$0xf]  ;;  %v10935_v48 = vld [vmem:[#allocation6 + $0x2b4] sm:$0xf0] }
 0x3b4   :  { %5994 = vmatpush.bf16.msra.mxu1 %v9670_v33  ;;  %v9795_v33 = vld [vmem:[#allocation6 + $0x650] sm:$0xf0]  ;;  %5967 = vmatpush.bf16.msrb.mxu3 %v9430_v27  ;;  %v9034_v27 = vor.u32 %v10859_v23, %v9033_v22  ;;  %v9737_v46 = vld [vmem:[#allocation6 + $0x5c8] sm:$0xf]  ;;  %v10923_v22 = vld [vmem:[#allocation6 + $0x254] sm:$0xf0] }
 0x3b5   :  { %v9798_v45 = vor.u32 %v11048_v40, %v9795_v33  ;;  %v4169_v40 = vadd.f32 %v11789_v13, %v4156_v61  ;;  %v9593_v61 = vld [vmem:[#allocation6 + $0x4a8] sm:$0xf] }
 0x3b6   :  { %5982 = vmatpush.bf16.msra.mxu0 %v9526_v1  ;;  %6006 = vmatpush.bf16.msra.mxu2 %v9814_v42  ;;  %v10899_v1 = vld [vmem:[#allocation6 + $0x194] sm:$0xf0]  ;;  %v9353_v42 = vld [vmem:[#allocation6 + $0x2c8] sm:$0xf] }
 0x3b7   :  { %v9194_v56 = vor.u32 %v10899_v1, %v9193_v35  ;;  %v9354_v33 = vor.u32 %v10939_v20, %v9353_v42  ;;  %v4182_v13 = vadd.f32 %v11798_v6, %v4169_v40  ;;  %v10931_v35 = vld [vmem:[#allocation6 + $0x294] sm:$0xf0]  ;;  %v9625_v1 = vld [vmem:[#allocation6 + $0x4e8] sm:$0xf]  ;;  %v11817_v20 = vld [vmem:[#allocation7] sm:$0xf] }
 0x3b8   :  { %5995 = vmatpush.bf16.msra.mxu1 %v9654_v12  ;;  %v11044_v12 = vld [vmem:[#allocation6 + $0x624] sm:$0xf]  ;;  %5968 = vmatpush.bf16.msrb.mxu3 %v9414_v50  ;;  %v9001_v50 = vld [vmem:[#allocation6 + $0x8] sm:$0xf] }
 0x3b9   :  { %v9782_v39 = vor.u32 %v11044_v12, %v9779_v32  ;;  %v9129_v12 = vld [vmem:[#allocation6 + $0x108] sm:$0xf]  ;;  %v10883_v32 = vld [vmem:[#allocation6 + $0x114] sm:$0xf0] }
 0x3ba   :  { %5983 = vmatpush.bf16.msra.mxu0 %v9510_v43  ;;  %6007 = vmatpush.bf16.msra.mxu2 %v9798_v45  ;;  %v9146_v45 = vor.u32 %v10887_v21, %v9145_v57  ;;  %v9305_v6 = vld [vmem:[#allocation6 + $0x268] sm:$0xf]  ;;  %v11027_v57 = vld [vmem:[#allocation6 + $0x594] sm:$0xf0] }
 0x3bb   :  { %v9306_v30 = vor.u32 %v10927_v29, %v9305_v6  ;;  %v9577_v40 = vld [vmem:[#allocation6 + $0x488] sm:$0xf] }
 0x3bc   :  { %5996 = vmatpush.bf16.msra.mxu1 %v9638_v5  ;;  %v10895_v5 = vld [vmem:[#allocation6 + $0x174] sm:$0xf0]  ;;  %5969 = vmatpush.bf16.msrb.mxu3 %v9398_v16  ;;  %v11805_v43 = vpop.f32.mrf.mxu1 }
 0x3bd   :  { %5984 = vmatmul.bf16.vlgmr.msra.gmra.mxu0 %v11770_v51  ;;  %v9178_v17 = vor.u32 %v10895_v5, %v9177_v8  ;;  %v11003_v8 = vld [vmem:[#allocation6 + $0x4d4] sm:$0xf0] }
 0x3be   :  { %6028 = vmatpush.bf16.msrb.mxu0 %v9114_v0  ;;  %6008 = vmatpush.bf16.msra.mxu2 %v9782_v39  ;;  %v9766_v0 = vor.u32 %v11040_v63, %v9763_v7  ;;  %v9753_v39 = vld [vmem:[#allocation6 + $0x5e8] sm:$0xf]  ;;  %v11039_v63 = vld [vmem:[#allocation6 + $0x5f4] sm:$0xf0]  ;;  %v9626_v7 = vor.u32 %v11007_v3, %v9625_v1 }
 0x3bf   :  { %5997 = vmatmul.bf16.vlgmr.msra.gmra.mxu1 %v11768_v53  ;;  %v9754_v2 = vor.u32 %v11039_v63, %v9753_v39  ;;  %v9881_v1 = vld [vmem:[#allocation6 + $0x6e8] sm:$0xf]  ;;  %v11071_v3 = vld [vmem:[#allocation6 + $0x6f4] sm:$0xf0] }
 0x3c0   :  { %6041 = vmatpush.bf16.msrb.mxu1 %v9242_v15  ;;  %v11807_v15 = vpop.f32.mrf.mxu0  ;;  %5970 = vmatpush.bf16.msrb.mxu3 %v9382_v44  ;;  %v9289_v44 = vld [vmem:[#allocation6 + $0x248] sm:$0xf] }
 0x3c2   :  { %6029 = vmatpush.bf16.msrb.mxu0 %v9098_v31  ;;  %6009 = vmatpush.bf16.msra.mxu2 %v9766_v0  ;;  %v9162_v31 = vor.u32 %v10891_v14, %v9161_v26  ;;  %v9610_v0 = vor.u32 %v11003_v8, %v9609_v4  ;;  %v11031_v26 = vld [vmem:[#allocation6 + $0x5b4] sm:$0xf0]  ;;  %v9290_v14 = vor.u32 %v10923_v22, %v9289_v44  ;;  %v9545_v8 = vld [vmem:[#allocation6 + $0x448] sm:$0xf]  ;;  %v9971_v22 = vld [vmem:[#allocation6 + $0x7b0] sm:$0xf0] }
 0x3c3   :  { %v9882_v4 = vor.u32 %v11071_v3, %v9881_v1 }
 0x3c4   :  { %6042 = vmatpush.bf16.msrb.mxu1 %v9226_v24  ;;  %v9017_v24 = vld [vmem:[#allocation6 + $0x28] sm:$0xf]  ;;  %v4222_v28 = vpop.f32.mrf.mxu1 }
 0x3c5   :  { %6010 = vmatmul.bf16.vlgmr.msra.gmra.mxu2 %v11793_v54  ;;  %v9018_v9 = vor.u32 %v10855_v38, %v9017_v24  ;;  %v10919_v24 = vld [vmem:[#allocation6 + $0x234] sm:$0xf0] }
 0x3c6   :  { %6030 = vmatpush.bf16.msrb.mxu0 %v9082_v18  ;;  %6054 = vmatpush.bf16.msrb.mxu2 %v9370_v25  ;;  %v4194_v36 = vpop.f32.mrf.mxu3  ;;  %v10851_v18 = vld [vmem:[#allocation6 + $0x14] sm:$0xf0] }
 0x3c7   :  { %v4195_v62 = vadd.f32 %v4194_v36, %v4182_v13  ;;  %v9002_v16 = vor.u32 %v10851_v18, %v9001_v50  ;;  %v10999_v25 = vld [vmem:[#allocation6 + $0x4b4] sm:$0xf0]  ;;  %v9257_v36 = vld [vmem:[#allocation6 + $0x208] sm:$0xf]  ;;  %v11100_v50 = vld [vmem:[#allocation6 + $0x7e4] sm:$0xf] }
 0x3c8   :  { %6043 = vmatpush.bf16.msrb.mxu1 %v9210_v52  ;;  %v4209_v49 = vpop.f32.mrf.mxu0  ;;  %v9338_v52 = vor.u32 %v10935_v48, %v9337_v60  ;;  %v4233_v41 = vpop.f32.mrf.mxu2  ;;  %v9594_v42 = vor.u32 %v10999_v25, %v9593_v61  ;;  %v4532_v48 = vperm.slane %v11817_v20, 0  ;;  %v10003_v18 = vld [vmem:[#allocation6 + $0x7f0] sm:$0xf0]  ;;  %v9561_v13 = vld [vmem:[#allocation6 + $0x468] sm:$0xf] }
 0x3c9   :  { %v4208_v5 = vadd.f32 %v11807_v15, %v4195_v62  ;;  %v9721_v15 = vld [vmem:[#allocation6 + $0x5a8] sm:$0xf] }
 0x3ca   :  { %6031 = vmatpush.bf16.msrb.mxu0 %v9066_v34  ;;  %6055 = vmatpush.bf16.msrb.mxu2 %v9354_v33  ;;  %v9130_v34 = vor.u32 %v10883_v32, %v9129_v12  ;;  %v10995_v33 = vld [vmem:[#allocation6 + $0x494] sm:$0xf0] }
 0x3cb   :  { %v4221_v23 = vadd.f32 %v11805_v43, %v4208_v5  ;;  %v9705_v43 = vld [vmem:[#allocation6 + $0x588] sm:$0xf]  ;;  %v9578_v49 = vor.u32 %v10995_v33, %v9577_v40  ;;  %v10991_v32 = vld [vmem:[#allocation6 + $0x474] sm:$0xf0] }
 0x3cc   :  { %6044 = vmatpush.bf16.msrb.mxu1 %v9194_v56  ;;  %v9322_v56 = vor.u32 %v10931_v35, %v9321_v59  ;;  %v9689_v59 = vld [vmem:[#allocation6 + $0x568] sm:$0xf]  ;;  %v11023_v35 = vld [vmem:[#allocation6 + $0x574] sm:$0xf0] }
 0x3cd   :  { %v4234_v38 = vadd.f32 %v4233_v41, %v4221_v23  ;;  %v9690_v29 = vor.u32 %v11023_v35, %v9689_v59  ;;  %v10987_v5 = vld [vmem:[#allocation6 + $0x454] sm:$0xf0] }
 0x3ce   :  { %6032 = vmatpush.bf16.msrb.mxu0 %v9050_v19  ;;  %6056 = vmatpush.bf16.msrb.mxu2 %v9338_v52  ;;  %v4196_v58 = vpop.f32.mrf.mxu3  ;;  %v9738_v19 = vor.u32 %v11035_v10, %v9737_v46  ;;  %v9673_v46 = vld [vmem:[#allocation6 + $0x548] sm:$0xf] }
 0x3cf   :  { %v11019_v58 = vld [vmem:[#allocation6 + $0x554] sm:$0xf0] }
 0x3d0   :  { %6045 = vmatpush.bf16.msrb.mxu1 %v9178_v17  ;;  %v4235_v17 = vpop.f32.mrf.mxu2  ;;  %v9674_v25 = vor.u32 %v11019_v58, %v9673_v46  ;;  %v9923_v58 = vld [vmem:[#allocation6 + $0x750] sm:$0xf0] }
 0x3d1   :  { %v11092_v17 = vld [vmem:[#allocation6 + $0x7a4] sm:$0xf] }
 0x3d2   :  { %6033 = vmatpush.bf16.msrb.mxu0 %v9034_v27  ;;  %6057 = vmatpush.bf16.msrb.mxu2 %v9322_v56  ;;  %v9273_v27 = vld [vmem:[#allocation6 + $0x228] sm:$0xf]  ;;  %v11096_v56 = vld [vmem:[#allocation6 + $0x7c4] sm:$0xf]  ;;  %v9974_v40 = vor.u32 %v11092_v17, %v9971_v22  ;;  %v11051_v17 = vld [vmem:[#allocation6 + $0x654] sm:$0xf0] }
 0x3d3   :  { %v9274_v28 = vor.u32 %v10919_v24, %v9273_v27  ;;  %v11015_v27 = vld [vmem:[#allocation6 + $0x534] sm:$0xf0]  ;;  %v10869_v22 = vld [vmem:[#allocation6 + $0xac] sm:$0xf] }
 0x3d4   :  { %6046 = vmatpush.bf16.msrb.mxu1 %v9162_v31  ;;  %v9722_v31 = vor.u32 %v11031_v26, %v9721_v15  ;;  %v9529_v15 = vld [vmem:[#allocation6 + $0x428] sm:$0xf]  ;;  %v10983_v26 = vld [vmem:[#allocation6 + $0x434] sm:$0xf0] }
 0x3d5   :  { %v11063_v24 = vld [vmem:[#allocation6 + $0x6b4] sm:$0xf0]  ;;  %v9530_v33 = vor.u32 %v10983_v26, %v9529_v15 }
 0x3d6   :  { %6034 = vmatpush.bf16.msrb.mxu0 %v9018_v9  ;;  %6058 = vmatpush.bf16.msrb.mxu2 %v9306_v30  ;;  %v4246_v21 = vpop.f32.mrf.mxu3  ;;  %v10915_v9 = vld [vmem:[#allocation6 + $0x214] sm:$0xf0]  ;;  %v9865_v30 = vld [vmem:[#allocation6 + $0x6c8] sm:$0xf] }
 0x3d7   :  { %v4247_v60 = vadd.f32 %v4246_v21, %v4234_v38  ;;  %v9258_v63 = vor.u32 %v10915_v9, %v9257_v36  ;;  %v11088_v38 = vld [vmem:[#allocation6 + $0x784] sm:$0xf]  ;;  %v11011_v36 = vld [vmem:[#allocation6 + $0x514] sm:$0xf0] }
 0x3d8   :  { %6047 = vmatpush.bf16.msrb.mxu1 %v9146_v45  ;;  %v9706_v45 = vor.u32 %v11027_v57, %v9705_v43  ;;  %v9955_v43 = vld [vmem:[#allocation6 + $0x790] sm:$0xf0]  ;;  %v9513_v57 = vld [vmem:[#allocation6 + $0x408] sm:$0xf] }
 0x3d9   :  { %v4257_v52 = vmul.f32 0.2, %v4247_v60 }
 0x3da   :  { %6035 = vmatpush.bf16.msrb.mxu0 %v9002_v16  ;;  %6059 = vmatpush.bf16.msrb.mxu2 %v9290_v14  ;;  %v5829_v41 = vpop.f32.mrf.mxu0  ;;  %v10006_v16 = vor.u32 %v11100_v50, %v10003_v18  ;;  %v9657_v14 = vld [vmem:[#allocation6 + $0x528] sm:$0xf]  ;;  %v11059_v18 = vld [vmem:[#allocation6 + $0x694] sm:$0xf0] }
 0x3db   :  { %v4265_v62 = vmax.f32 %v4247_v60, %v4257_v52  ;;  %v5830_v39 = vadd.f32 %v5829_v41, %v4532_v48  ;;  %v9658_v60 = vor.u32 %v11015_v27, %v9657_v14  ;;  %v9833_v50 = vld [vmem:[#allocation6 + $0x688] sm:$0xf]  ;;  %v9115_v52 = vld [vmem:[#allocation6 + $0xf8] sm:$0xf0]  ;;  %v9958_v41 = vor.u32 %v11088_v38, %v9955_v43  ;;  %v11076_v14 = vld [vmem:[#allocation6 + $0x724] sm:$0xf] }
 0x3dc   :  { %6048 = vmatpush.bf16.msrb.mxu1 %v9130_v34  ;;  %v5842_v12 = vpop.f32.mrf.mxu1  ;;  %v9562_v34 = vor.u32 %v10991_v32, %v9561_v13  ;;  %v10877_v13 = vld [vmem:[#allocation6 + $0xec] sm:$0xf]  ;;  %v9243_v32 = vld [vmem:[#allocation6 + $0x1f8] sm:$0xf0]  ;;  %v9834_v3 = vor.u32 %v11059_v18, %v9833_v50  ;;  %v9497_v18 = vld [vmem:[#allocation6 + $0x3e8] sm:$0xf] }
 0x3dd   :  { %6036 = vmatmul.bf16.vlgmr.msrb.gmra.mxu0 %v11739_v11  ;;  %v11820_v6 = vpack.c.bf16 %v4265_v62, %v4265_v62  ;;  %v11084_v62 = vld [vmem:[#allocation6 + $0x764] sm:$0xf]  ;;  %v9067_v38 = vld [vmem:[#allocation6 + $0x98] sm:$0xf0]  ;;  %v10897_v43 = vld [vmem:[#allocation6 + $0x18c] sm:$0xf] }
 0x3de   :  { %6080 = vmatpush.bf16.msra.mxu0 %v9626_v7  ;;  %6060 = vmatpush.bf16.msrb.mxu2 %v9274_v28  ;;  %v9987_v7 = vld [vmem:[#allocation6 + $0x7d0] sm:$0xf0]  ;;  %v4248_v10 = vpop.f32.mrf.mxu3  ;;  %v10979_v28 = vld [vmem:[#allocation6 + $0x414] sm:$0xf0] }
 0x3df   :  { %6049 = vmatmul.bf16.vlgmr.msrb.gmra.mxu1 %v11741_v55  ;;  %5919 = vmatmul.bf16.vlgmr.msra.gmra.mxu3 %v11820_v6  ;;  %v9990_v44 = vor.u32 %v11096_v56, %v9987_v7  ;;  %v9514_v35 = vor.u32 %v10979_v28, %v9513_v57  ;;  %v11055_v56 = vld [vmem:[#allocation6 + $0x674] sm:$0xf0]  ;;  %v10873_v7 = vld [vmem:[#allocation6 + $0xcc] sm:$0xf]  ;;  %v11080_v10 = vld [vmem:[#allocation6 + $0x744] sm:$0xf] }
 0x3e0   :  { %6093 = vmatpush.bf16.msra.mxu1 %v9754_v2  ;;  %v5843_v2 = vadd.f32 %v5842_v12, %v5830_v39  ;;  %6015 = vmatpush.bf16.msra.mxu3 %v10006_v16  ;;  %v10909_v12 = vld [vmem:[#allocation6 + $0x1ec] sm:$0xf]  ;;  %v9939_v39 = vld [vmem:[#allocation6 + $0x770] sm:$0xf0]  ;;  %v9926_v15 = vor.u32 %v11080_v10, %v9923_v58  ;;  %v9195_v57 = vld [vmem:[#allocation6 + $0x198] sm:$0xf0] }
 0x3e1   :  { %v9246_v16 = vor.u32 %v10909_v12, %v9243_v32  ;;  %v9891_v28 = vld [vmem:[#allocation6 + $0x710] sm:$0xf0]  ;;  %v9198_v50 = vor.u32 %v10897_v43, %v9195_v57  ;;  %v9051_v32 = vld [vmem:[#allocation6 + $0x78] sm:$0xf0]  ;;  %v10937_v10 = vld [vmem:[#allocation6 + $0x2cc] sm:$0xf] }
 0x3e2   :  { %6081 = vmatpush.bf16.msra.mxu0 %v9610_v0  ;;  %v11067_v0 = vld [vmem:[#allocation6 + $0x6d4] sm:$0xf0]  ;;  %6061 = vmatpush.bf16.msrb.mxu2 %v9258_v63  ;;  %v9118_v63 = vor.u32 %v10877_v13, %v9115_v52  ;;  %v10861_v52 = vld [vmem:[#allocation6 + $0x6c] sm:$0xf]  ;;  %v9355_v58 = vld [vmem:[#allocation6 + $0x2d8] sm:$0xf0] }
 0x3e3   :  { %v9866_v23 = vor.u32 %v11067_v0, %v9865_v30  ;;  %v10975_v13 = vld [vmem:[#allocation6 + $0x3f4] sm:$0xf0]  ;;  %v10849_v43 = vld [vmem:[#allocation6 + $0xc] sm:$0xf]  ;;  %v9003_v57 = vld [vmem:[#allocation6 + $0x18] sm:$0xf0] }
 0x3e4   :  { %6094 = vmatpush.bf16.msra.mxu1 %v9738_v19  ;;  %v9546_v19 = vor.u32 %v10987_v5, %v9545_v8  ;;  %v5844_v61 = vpop.f32.mrf.mxu1  ;;  %6016 = vmatpush.bf16.msra.mxu3 %v9990_v44  ;;  %v9942_v8 = vor.u32 %v11084_v62, %v9939_v39  ;;  %v10941_v62 = vld [vmem:[#allocation6 + $0x2ec] sm:$0xf]  ;;  %v9371_v39 = vld [vmem:[#allocation6 + $0x2f8] sm:$0xf0] }
 0x3e5   :  { %6062 = vmatmul.bf16.vlgmr.msrb.gmra.mxu2 %v11749_v37  ;;  %v9083_v61 = vld [vmem:[#allocation6 + $0xb8] sm:$0xf0] }
 0x3e6   :  { %6082 = vmatpush.bf16.msra.mxu0 %v9594_v42  ;;  %6106 = vmatpush.bf16.msra.mxu2 %v9882_v4  ;;  %v5831_v42 = vpop.f32.mrf.mxu0  ;;  %v9227_v4 = vld [vmem:[#allocation6 + $0x1d8] sm:$0xf0]  ;;  %v9086_v27 = vor.u32 %v10869_v22, %v9083_v61  ;;  %v10967_v22 = vld [vmem:[#allocation6 + $0x3b4] sm:$0xf0]  ;;  %v10853_v61 = vld [vmem:[#allocation6 + $0x2c] sm:$0xf] }
 0x3e7   :  { %v9907_v42 = vld [vmem:[#allocation6 + $0x730] sm:$0xf0] }
 0x3e8   :  { %6095 = vmatpush.bf16.msra.mxu1 %v9722_v31  ;;  %v9849_v31 = vld [vmem:[#allocation6 + $0x6a8] sm:$0xf]  ;;  %v5855_v21 = vpop.f32.mrf.mxu2  ;;  %6017 = vmatpush.bf16.msra.mxu3 %v9974_v40  ;;  %v11047_v40 = vld [vmem:[#allocation6 + $0x634] sm:$0xf0] }
 0x3e9   :  { %v9850_v48 = vor.u32 %v11063_v24, %v9849_v31  ;;  %v5856_v9 = vadd.f32 %v5855_v21, %v5843_v2  ;;  %v9099_v2 = vld [vmem:[#allocation6 + $0xd8] sm:$0xf0]  ;;  %v9785_v24 = vld [vmem:[#allocation6 + $0x628] sm:$0xf]  ;;  %v9910_v21 = vor.u32 %v11076_v14, %v9907_v42  ;;  %v10933_v42 = vld [vmem:[#allocation6 + $0x2ac] sm:$0xf] }
 0x3ea   :  { %6083 = vmatpush.bf16.msra.mxu0 %v9578_v49  ;;  %6107 = vmatpush.bf16.msra.mxu2 %v9866_v23  ;;  %v9641_v49 = vld [vmem:[#allocation6 + $0x508] sm:$0xf]  ;;  %v9102_v0 = vor.u32 %v10873_v7, %v9099_v2  ;;  %v9211_v23 = vld [vmem:[#allocation6 + $0x1b8] sm:$0xf0] }
 0x3eb   :  { %v9642_v1 = vor.u32 %v11011_v36, %v9641_v49  ;;  %v9769_v49 = vld [vmem:[#allocation6 + $0x608] sm:$0xf]  ;;  %v11043_v36 = vld [vmem:[#allocation6 + $0x614] sm:$0xf0]  ;;  %v9147_v14 = vld [vmem:[#allocation6 + $0x138] sm:$0xf0] }
 0x3ec   :  { %6096 = vmatpush.bf16.msra.mxu1 %v9706_v45  ;;  %v5868_v45 = vpop.f32.mrf.mxu3  ;;  %6018 = vmatpush.bf16.msra.mxu3 %v9958_v41  ;;  %v10893_v41 = vld [vmem:[#allocation6 + $0x16c] sm:$0xf]  ;;  %v9481_v2 = vld [vmem:[#allocation6 + $0x3c8] sm:$0xf] }
 0x3ed   :  { %v11824_v59 = vadd.f32 %v5868_v45, %v5856_v9 }
 0x3ee   :  { %6084 = vmatpush.bf16.msra.mxu0 %v9562_v34  ;;  %6108 = vmatpush.bf16.msra.mxu2 %v9850_v48  ;;  %v9817_v34 = vld [vmem:[#allocation6 + $0x668] sm:$0xf]  ;;  %v9786_v48 = vor.u32 %v11047_v40, %v9785_v24 }
 0x3ef   :  { %v9818_v46 = vor.u32 %v11055_v56, %v9817_v34  ;;  %5971 = vmatmul.bf16.vlgmr.msrb.gmra.mxu3 %v11751_v47  ;;  %v9054_v56 = vor.u32 %v10861_v52, %v9051_v32  ;;  %v9449_v24 = vld [vmem:[#allocation6 + $0x388] sm:$0xf] }
 0x3f0   :  { %6097 = vmatpush.bf16.msra.mxu1 %v9690_v29  ;;  %v10905_v29 = vld [vmem:[#allocation6 + $0x1cc] sm:$0xf]  ;;  %v5857_v5 = vpop.f32.mrf.mxu2  ;;  %6019 = vmatpush.bf16.msra.mxu3 %v9942_v8  ;;  %v9374_v8 = vor.u32 %v10941_v62, %v9371_v39  ;;  %v9307_v62 = vld [vmem:[#allocation6 + $0x278] sm:$0xf0] }
 0x3f1   :  { %v9230_v44 = vor.u32 %v10905_v29, %v9227_v4  ;;  %v10971_v29 = vld [vmem:[#allocation6 + $0x3d4] sm:$0xf0]  ;;  %v10857_v4 = vld [vmem:[#allocation6 + $0x4c] sm:$0xf]  ;;  %v9035_v5 = vld [vmem:[#allocation6 + $0x58] sm:$0xf0] }
 0x3f2   :  { %6085 = vmatpush.bf16.msra.mxu0 %v9546_v19  ;;  %6109 = vmatpush.bf16.msra.mxu2 %v9834_v3  ;;  %v9801_v19 = vld [vmem:[#allocation6 + $0x648] sm:$0xf]  ;;  %v11001_v39 = vld [vmem:[#allocation6 + $0x4cc] sm:$0xf] }
 0x3f3   :  { %v9802_v26 = vor.u32 %v11051_v17, %v9801_v19  ;;  %v9465_v17 = vld [vmem:[#allocation6 + $0x3a8] sm:$0xf] }
 0x3f4   :  { %6098 = vmatpush.bf16.msra.mxu1 %v9674_v25  ;;  %v5870_v30 = vpop.f32.mrf.mxu3  ;;  %v10901_v25 = vld [vmem:[#allocation6 + $0x1ac] sm:$0xf]  ;;  %6020 = vmatpush.bf16.msra.mxu3 %v9926_v15  ;;  %v9019_v15 = vld [vmem:[#allocation6 + $0x38] sm:$0xf0] }
 0x3f5   :  { %v9214_v31 = vor.u32 %v10901_v25, %v9211_v23  ;;  %v9482_v30 = vor.u32 %v10971_v29, %v9481_v2  ;;  %v9358_v23 = vor.u32 %v10937_v10, %v9355_v58  ;;  %v9022_v40 = vor.u32 %v10853_v61, %v9019_v15  ;;  %v10997_v10 = vld [vmem:[#allocation6 + $0x4ac] sm:$0xf]  ;;  %v9595_v58 = vld [vmem:[#allocation6 + $0x4b8] sm:$0xf0]  ;;  %v10951_v61 = vld [vmem:[#allocation6 + $0x334] sm:$0xf0] }
 0x3f6   :  { %6086 = vmatpush.bf16.msra.mxu0 %v9530_v33  ;;  %6110 = vmatpush.bf16.msra.mxu2 %v9818_v46  ;;  %v10865_v33 = vld [vmem:[#allocation6 + $0x8c] sm:$0xf]  ;;  %v9275_v15 = vld [vmem:[#allocation6 + $0x238] sm:$0xf0] }
 0x3f7   :  { %v9070_v45 = vor.u32 %v10865_v33, %v9067_v38  ;;  %v10889_v46 = vld [vmem:[#allocation6 + $0x14c] sm:$0xf]  ;;  %v10963_v38 = vld [vmem:[#allocation6 + $0x394] sm:$0xf0] }
 0x3f8   :  { %6099 = vmatpush.bf16.msra.mxu1 %v9658_v60  ;;  %v11072_v60 = vld [vmem:[#allocation6 + $0x704] sm:$0xf]  ;;  %6021 = vmatpush.bf16.msra.mxu3 %v9910_v21 }
 0x3f9   :  { %v9894_v3 = vor.u32 %v11072_v60, %v9891_v28  ;;  %v10881_v60 = vld [vmem:[#allocation6 + $0x10c] sm:$0xf] }
 0x3fa   :  { %6087 = vmatpush.bf16.msra.mxu0 %v9514_v35  ;;  %6111 = vmatpush.bf16.msra.mxu2 %v9802_v26  ;;  %v5881_v12 = vpop.f32.mrf.mxu0  ;;  %v9179_v35 = vld [vmem:[#allocation6 + $0x178] sm:$0xf0]  ;;  %v10885_v26 = vld [vmem:[#allocation6 + $0x12c] sm:$0xf] }
 0x3fb   :  { %v9182_v7 = vor.u32 %v10893_v41, %v9179_v35  ;;  %v9150_v33 = vor.u32 %v10885_v26, %v9147_v14  ;;  %v10929_v28 = vld [vmem:[#allocation6 + $0x28c] sm:$0xf]  ;;  %v9433_v41 = vld [vmem:[#allocation6 + $0x368] sm:$0xf]  ;;  %v10959_v35 = vld [vmem:[#allocation6 + $0x374] sm:$0xf0] }
 0x3fc   :  { %6100 = vmatpush.bf16.msra.mxu1 %v9642_v1  ;;  %v5894_v9 = vpop.f32.mrf.mxu1  ;;  %v5882_v1 = vadd.f32 %v5881_v12, %v11824_v59  ;;  %v9163_v59 = vld [vmem:[#allocation6 + $0x158] sm:$0xf0]  ;;  %6022 = vmatpush.bf16.msra.mxu3 %v9894_v3  ;;  %v10993_v26 = vld [vmem:[#allocation6 + $0x48c] sm:$0xf] }
 0x3fd   :  { %6088 = vmatmul.bf16.vlgmr.msra.gmra.mxu0 %v11770_v51  ;;  %v9166_v19 = vor.u32 %v10889_v46, %v9163_v59  ;;  %v9291_v59 = vld [vmem:[#allocation6 + $0x258] sm:$0xf0] }
 0x3fe   :  { %6132 = vmatpush.bf16.msrb.mxu0 %v9118_v63  ;;  %6112 = vmatpush.bf16.msra.mxu2 %v9786_v48  ;;  %v9770_v63 = vor.u32 %v11043_v36, %v9769_v49  ;;  %v11830_v34 = vadd.f32 %v5894_v9, %v5882_v1  ;;  %v9131_v48 = vld [vmem:[#allocation6 + $0x118] sm:$0xf0]  ;;  %v11005_v36 = vld [vmem:[#allocation6 + $0x4ec] sm:$0xf] }
 0x3ff   :  { %6101 = vmatmul.bf16.vlgmr.msra.gmra.mxu1 %v11768_v53  ;;  %6023 = vmatmul.bf16.vlgmr.msra.gmra.mxu3 %v11820_v6  ;;  %v9323_v49 = vld [vmem:[#allocation6 + $0x298] sm:$0xf0]  ;;  %v9134_v52 = vor.u32 %v10881_v60, %v9131_v48  ;;  %v10925_v1 = vld [vmem:[#allocation6 + $0x26c] sm:$0xf]  ;;  %v10009_v48 = vld [vmem:[#allocation6 + $0x7e8] sm:$0xf] }
 0x400   :  { %6145 = vmatpush.bf16.msrb.mxu1 %v9246_v16  ;;  %v9498_v16 = vor.u32 %v10975_v13, %v9497_v18  ;;  %v9627_v9 = vld [vmem:[#allocation6 + $0x4f8] sm:$0xf0]  ;;  %v9006_v13 = vor.u32 %v10849_v43, %v9003_v57  ;;  %v9326_v12 = vor.u32 %v10929_v28, %v9323_v49  ;;  %v9310_v2 = vor.u32 %v10925_v1, %v9307_v62  ;;  %v10913_v43 = vld [vmem:[#allocation6 + $0x20c] sm:$0xf]  ;;  %v11103_v28 = vld [vmem:[#allocation6 + $0x7f4] sm:$0xf0] }
 0x401   :  { %v9755_v18 = vld [vmem:[#allocation6 + $0x5f8] sm:$0xf0]  ;;  %v9630_v32 = vor.u32 %v11005_v36, %v9627_v9  ;;  %v10989_v49 = vld [vmem:[#allocation6 + $0x46c] sm:$0xf]  ;;  %v11099_v62 = vld [vmem:[#allocation6 + $0x7d4] sm:$0xf0] }
 0x402   :  { %6133 = vmatpush.bf16.msrb.mxu0 %v9102_v0  ;;  %6113 = vmatpush.bf16.msra.mxu2 %v9770_v63  ;;  %v5883_v25 = vpop.f32.mrf.mxu0  ;;  %v9611_v63 = vld [vmem:[#allocation6 + $0x4d8] sm:$0xf0] }
 0x403   :  { %6067 = vmatpush.bf16.msrb.mxu3 %v9498_v16  ;;  %v11033_v16 = vld [vmem:[#allocation6 + $0x5cc] sm:$0xf]  ;;  %v9614_v29 = vor.u32 %v11001_v39, %v9611_v63  ;;  %v9579_v14 = vld [vmem:[#allocation6 + $0x498] sm:$0xf0] }
 0x404   :  { %6146 = vmatpush.bf16.msrb.mxu1 %v9230_v44  ;;  %v5896_v0 = vpop.f32.mrf.mxu1  ;;  %v9038_v44 = vor.u32 %v10857_v4, %v9035_v5  ;;  %v9417_v4 = vld [vmem:[#allocation6 + $0x348] sm:$0xf]  ;;  %v10921_v5 = vld [vmem:[#allocation6 + $0x24c] sm:$0xf]  ;;  %v9259_v57 = vld [vmem:[#allocation6 + $0x218] sm:$0xf0] }
 0x405   :  { %6114 = vmatmul.bf16.vlgmr.msra.gmra.mxu2 %v11793_v54  ;;  %v9723_v0 = vld [vmem:[#allocation6 + $0x5b8] sm:$0xf0]  ;;  %v10917_v25 = vld [vmem:[#allocation6 + $0x22c] sm:$0xf] }
 0x406   :  { %6134 = vmatpush.bf16.msrb.mxu0 %v9086_v27  ;;  %6158 = vmatpush.bf16.msrb.mxu2 %v9374_v8  ;;  %v9339_v27 = vld [vmem:[#allocation6 + $0x2b8] sm:$0xf0]  ;;  %v10955_v8 = vld [vmem:[#allocation6 + $0x354] sm:$0xf0]  ;;  %v10985_v39 = vld [vmem:[#allocation6 + $0x44c] sm:$0xf] }
 0x407   :  { %6068 = vmatpush.bf16.msrb.mxu3 %v9482_v30  ;;  %v9342_v21 = vor.u32 %v10933_v42, %v9339_v27  ;;  %v11029_v30 = vld [vmem:[#allocation6 + $0x5ac] sm:$0xf]  ;;  %v9563_v9 = vld [vmem:[#allocation6 + $0x478] sm:$0xf0] }
 0x408   :  { %6147 = vmatpush.bf16.msrb.mxu1 %v9214_v31  ;;  %v9466_v31 = vor.u32 %v10967_v22, %v9465_v17  ;;  %v9598_v17 = vor.u32 %v10997_v10, %v9595_v58  ;;  %v9401_v22 = vld [vmem:[#allocation6 + $0x328] sm:$0xf]  ;;  %v11025_v42 = vld [vmem:[#allocation6 + $0x58c] sm:$0xf]  ;;  %v11095_v58 = vld [vmem:[#allocation6 + $0x7b4] sm:$0xf0] }
 0x409   :  { %v9402_v27 = vor.u32 %v10951_v61, %v9401_v22  ;;  %v9977_v10 = vld [vmem:[#allocation6 + $0x7a8] sm:$0xf]  ;;  %v11061_v22 = vld [vmem:[#allocation6 + $0x6ac] sm:$0xf]  ;;  %v9851_v61 = vld [vmem:[#allocation6 + $0x6b8] sm:$0xf0] }
 0x40a   :  { %6135 = vmatpush.bf16.msrb.mxu0 %v9070_v45  ;;  %6159 = vmatpush.bf16.msrb.mxu2 %v9358_v23  ;;  %v9450_v45 = vor.u32 %v10963_v38, %v9449_v24  ;;  %v9726_v23 = vor.u32 %v11029_v30, %v9723_v0  ;;  %v10947_v38 = vld [vmem:[#allocation6 + $0x314] sm:$0xf0]  ;;  %v10981_v30 = vld [vmem:[#allocation6 + $0x42c] sm:$0xf] }
 0x40b   :  { %6069 = vmatpush.bf16.msrb.mxu3 %v9466_v31  ;;  %v9385_v31 = vld [vmem:[#allocation6 + $0x308] sm:$0xf] }
 0x40c   :  { %6148 = vmatpush.bf16.msrb.mxu1 %v9198_v50  ;;  %v11037_v50 = vld [vmem:[#allocation6 + $0x5ec] sm:$0xf] }
 0x40d   :  { %v9758_v3 = vor.u32 %v11037_v50, %v9755_v18  ;;  %v9691_v50 = vld [vmem:[#allocation6 + $0x578] sm:$0xf0]  ;;  %v9386_v18 = vor.u32 %v10947_v38, %v9385_v31 }
 0x40e   :  { %6136 = vmatpush.bf16.msrb.mxu0 %v9054_v56  ;;  %6160 = vmatpush.bf16.msrb.mxu2 %v9342_v21  ;;  %v9739_v56 = vld [vmem:[#allocation6 + $0x5d8] sm:$0xf0] }
 0x40f   :  { %6070 = vmatpush.bf16.msrb.mxu3 %v9450_v45  ;;  %v9742_v46 = vor.u32 %v11033_v16, %v9739_v56  ;;  %v11021_v45 = vld [vmem:[#allocation6 + $0x56c] sm:$0xf]  ;;  %v9547_v16 = vld [vmem:[#allocation6 + $0x458] sm:$0xf0] }
 0x410   :  { %6149 = vmatpush.bf16.msrb.mxu1 %v9182_v7  ;;  %v9434_v7 = vor.u32 %v10959_v35, %v9433_v41  ;;  %v10010_v41 = vor.u32 %v11103_v28, %v10009_v48  ;;  %v9566_v35 = vor.u32 %v10989_v49, %v9563_v9  ;;  %v9694_v1 = vor.u32 %v11021_v45, %v9691_v50  ;;  %v11017_v56 = vld [vmem:[#allocation6 + $0x54c] sm:$0xf]  ;;  %v9643_v31 = vld [vmem:[#allocation6 + $0x518] sm:$0xf0]  ;;  %v11087_v48 = vld [vmem:[#allocation6 + $0x774] sm:$0xf0] }
 0x411   :  { %v11053_v28 = vld [vmem:[#allocation6 + $0x66c] sm:$0xf]  ;;  %v10065_v9 = vld [vmem:[#allocation9 + $0x60] sm:$0xf] }
 0x412   :  { %6137 = vmatpush.bf16.msrb.mxu0 %v9038_v44  ;;  %6161 = vmatpush.bf16.msrb.mxu2 %v9326_v12  ;;  %v9418_v44 = vor.u32 %v10955_v8, %v9417_v4  ;;  %v11117_v45 = vld [vmem:[#allocation9 + $0x64] sm:$0xf0] }
 0x413   :  { %6071 = vmatpush.bf16.msrb.mxu3 %v9434_v7  ;;  %v9675_v7 = vld [vmem:[#allocation6 + $0x558] sm:$0xf0] }
 0x414   :  { %6150 = vmatpush.bf16.msrb.mxu1 %v9166_v19  ;;  %v9294_v19 = vor.u32 %v10921_v5, %v9291_v59  ;;  %v9678_v59 = vor.u32 %v11017_v56, %v9675_v7  ;;  %v11079_v56 = vld [vmem:[#allocation6 + $0x734] sm:$0xf0]  ;;  %v11045_v7 = vld [vmem:[#allocation6 + $0x62c] sm:$0xf] }
 0x416   :  { %6138 = vmatpush.bf16.msrb.mxu0 %v9022_v40  ;;  %6162 = vmatpush.bf16.msrb.mxu2 %v9310_v2  ;;  %v9278_v40 = vor.u32 %v10917_v25, %v9275_v15  ;;  %v11065_v2 = vld [vmem:[#allocation6 + $0x6cc] sm:$0xf]  ;;  %v9978_v25 = vor.u32 %v11095_v58, %v9977_v10  ;;  %v9897_v10 = vld [vmem:[#allocation6 + $0x708] sm:$0xf]  ;;  %v11075_v58 = vld [vmem:[#allocation6 + $0x714] sm:$0xf0] }
 0x417   :  { %6072 = vmatpush.bf16.msrb.mxu3 %v9418_v44  ;;  %v9531_v44 = vld [vmem:[#allocation6 + $0x438] sm:$0xf0] }
 0x418   :  { %6151 = vmatpush.bf16.msrb.mxu1 %v9150_v33  ;;  %v9582_v33 = vor.u32 %v10993_v26, %v9579_v14  ;;  %v9534_v15 = vor.u32 %v10981_v30, %v9531_v44  ;;  %v11091_v14 = vld [vmem:[#allocation6 + $0x794] sm:$0xf0]  ;;  %v11041_v30 = vld [vmem:[#allocation6 + $0x60c] sm:$0xf]  ;;  %v9771_v44 = vld [vmem:[#allocation6 + $0x618] sm:$0xf0] }
 0x41a   :  { %6139 = vmatpush.bf16.msrb.mxu0 %v9006_v13  ;;  %6163 = vmatpush.bf16.msrb.mxu2 %v9294_v19  ;;  %v5933_v21 = vpop.f32.mrf.mxu0  ;;  %v11069_v13 = vld [vmem:[#allocation6 + $0x6ec] sm:$0xf] }
 0x41b   :  { %6073 = vmatpush.bf16.msrb.mxu3 %v9402_v27  ;;  %v11013_v19 = vld [vmem:[#allocation6 + $0x52c] sm:$0xf] }
 0x41c   :  { %6152 = vmatpush.bf16.msrb.mxu1 %v9134_v52  ;;  %v5946_v24 = vpop.f32.mrf.mxu1  ;;  %v9883_v52 = vld [vmem:[#allocation6 + $0x6f8] sm:$0xf0]  ;;  %v11009_v27 = vld [vmem:[#allocation6 + $0x50c] sm:$0xf] }
 0x41d   :  { %6140 = vmatmul.bf16.vlgmr.msrb.gmra.mxu0 %v11739_v11  ;;  %v4533_v11 = vperm.slane %v11817_v20, 1  ;;  %v9886_v63 = vor.u32 %v11069_v13, %v9883_v52  ;;  %v9929_v52 = vld [vmem:[#allocation6 + $0x748] sm:$0xf] }
 0x41e   :  { %6184 = vmatpush.bf16.msra.mxu0 %v9630_v32  ;;  %6164 = vmatpush.bf16.msrb.mxu2 %v9278_v40  ;;  %v9262_v32 = vor.u32 %v10913_v43, %v9259_v57  ;;  %v9835_v40 = vld [vmem:[#allocation6 + $0x698] sm:$0xf0]  ;;  %v9646_v57 = vor.u32 %v11009_v27, %v9643_v31  ;;  %v11109_v27 = vld [vmem:[#allocation9 + $0x24] sm:$0xf0] }
 0x41f   :  { %6153 = vmatmul.bf16.vlgmr.msrb.gmra.mxu1 %v11741_v55  ;;  %v9707_v55 = vld [vmem:[#allocation6 + $0x598] sm:$0xf0]  ;;  %v5934_v36 = vadd.f32 %v5933_v21, %v4533_v11  ;;  %6074 = vmatpush.bf16.msrb.mxu3 %v9386_v18  ;;  %v10977_v11 = vld [vmem:[#allocation6 + $0x40c] sm:$0xf] }
 0x420   :  { %6197 = vmatpush.bf16.msra.mxu1 %v9758_v3  ;;  %v9710_v60 = vor.u32 %v11025_v42, %v9707_v55  ;;  %v9993_v3 = vld [vmem:[#allocation6 + $0x7c8] sm:$0xf]  ;;  %v9515_v42 = vld [vmem:[#allocation6 + $0x418] sm:$0xf0]  ;;  %v9854_v55 = vor.u32 %v11061_v22, %v9851_v61  ;;  %v10041_v22 = vld [vmem:[#allocation9 + $0x30] sm:$0xf] }
 0x421   :  { %v11837_v12 = vadd.f32 %v5946_v24, %v5934_v36  ;;  %v9994_v8 = vor.u32 %v11099_v62, %v9993_v3  ;;  %v11057_v24 = vld [vmem:[#allocation6 + $0x68c] sm:$0xf]  ;;  %v9518_v43 = vor.u32 %v10977_v11, %v9515_v42  ;;  %v9819_v36 = vld [vmem:[#allocation6 + $0x678] sm:$0xf0]  ;;  %v10057_v3 = vld [vmem:[#allocation9 + $0x50] sm:$0xf] }
 0x422   :  { %6185 = vmatpush.bf16.msra.mxu0 %v9614_v29  ;;  %v9867_v29 = vld [vmem:[#allocation6 + $0x6d8] sm:$0xf0]  ;;  %6165 = vmatpush.bf16.msrb.mxu2 %v9262_v32  ;;  %v5935_v5 = vpop.f32.mrf.mxu0  ;;  %v9838_v21 = vor.u32 %v11057_v24, %v9835_v40  ;;  %v9822_v13 = vor.u32 %v11053_v28, %v9819_v36  ;;  %v11083_v32 = vld [vmem:[#allocation6 + $0x754] sm:$0xf0]  ;;  %v10017_v36 = vld [vmem:[#allocation9] sm:$0xf] }
 0x423   :  { %6119 = vmatpush.bf16.msra.mxu3 %v10010_v41  ;;  %v9870_v0 = vor.u32 %v11065_v2, %v9867_v29  ;;  %v11049_v41 = vld [vmem:[#allocation6 + $0x64c] sm:$0xf]  ;;  %v11115_v62 = vld [vmem:[#allocation9 + $0x54] sm:$0xf0] }
 0x424   :  { %6198 = vmatpush.bf16.msra.mxu1 %v9742_v46  ;;  %v5948_v4 = vpop.f32.mrf.mxu1  ;;  %v9550_v46 = vor.u32 %v10985_v39, %v9547_v16  ;;  %6075 = vmatmul.bf16.vlgmr.msrb.gmra.mxu3 %v11751_v47  ;;  %v9930_v39 = vor.u32 %v11083_v32, %v9929_v52  ;;  %v9913_v16 = vld [vmem:[#allocation6 + $0x728] sm:$0xf]  ;;  %v10058_v2 = vor.u32 %v11115_v62, %v10057_v3  ;;  %v9787_v29 = vld [vmem:[#allocation6 + $0x638] sm:$0xf0] }
 0x425   :  { %6166 = vmatmul.bf16.vlgmr.msrb.gmra.mxu2 %v11749_v37  ;;  %v11119_v37 = vld [vmem:[#allocation9 + $0x74] sm:$0xf0]  ;;  %v10049_v4 = vld [vmem:[#allocation9 + $0x40] sm:$0xf]  ;;  %v11116_v62 = vld [vmem:[#allocation9 + $0x64] sm:$0xf] }
 0x426   :  { %6186 = vmatpush.bf16.msra.mxu0 %v9598_v17  ;;  %6210 = vmatpush.bf16.msra.mxu2 %v9886_v63  ;;  %v9659_v17 = vld [vmem:[#allocation6 + $0x538] sm:$0xf0]  ;;  %v11841_v50 = vpop.f32.mrf.mxu2 }
 0x427   :  { %6120 = vmatpush.bf16.msra.mxu3 %v9994_v8  ;;  %v9662_v26 = vor.u32 %v11013_v19, %v9659_v17  ;;  %v11113_v8 = vld [vmem:[#allocation9 + $0x44] sm:$0xf0]  ;;  %v9499_v17 = vld [vmem:[#allocation6 + $0x3f8] sm:$0xf0] }
 0x428   :  { %6199 = vmatpush.bf16.msra.mxu1 %v9726_v23  ;;  %v9961_v23 = vld [vmem:[#allocation6 + $0x788] sm:$0xf]  ;;  %v10973_v19 = vld [vmem:[#allocation6 + $0x3ec] sm:$0xf]  ;;  %v11111_v61 = vld [vmem:[#allocation9 + $0x34] sm:$0xf0] }
 0x429   :  { %v9962_v38 = vor.u32 %v11091_v14, %v9961_v23  ;;  %v9774_v23 = vor.u32 %v11041_v30, %v9771_v44  ;;  %v9483_v14 = vld [vmem:[#allocation6 + $0x3d8] sm:$0xf0]  ;;  %v10042_v11 = vor.u32 %v11111_v61, %v10041_v22  ;;  %v10949_v30 = vld [vmem:[#allocation6 + $0x32c] sm:$0xf]  ;;  %v11112_v22 = vld [vmem:[#allocation9 + $0x44] sm:$0xf] }
 0x42a   :  { %6187 = vmatpush.bf16.msra.mxu0 %v9582_v33  ;;  %6211 = vmatpush.bf16.msra.mxu2 %v9870_v0  ;;  %v10073_v33 = vld [vmem:[#allocation9 + $0x70] sm:$0xf]  ;;  %v10050_v0 = vor.u32 %v11113_v8, %v10049_v4  ;;  %v11135_v52 = vld [vmem:[#allocation9 + $0xf4] sm:$0xf0]  ;;  %v10051_v61 = vld [vmem:[#allocation9 + $0x48] sm:$0xf0] }
 0x42b   :  { %6121 = vmatpush.bf16.msra.mxu3 %v9978_v25  ;;  %v10074_v49 = vor.u32 %v11119_v37, %v10073_v33  ;;  %v9898_v25 = vor.u32 %v11075_v58, %v9897_v10  ;;  %v10965_v37 = vld [vmem:[#allocation6 + $0x3ac] sm:$0xf]  ;;  %v11131_v58 = vld [vmem:[#allocation9 + $0xd4] sm:$0xf0] }
 0x42c   :  { %6200 = vmatpush.bf16.msra.mxu1 %v9710_v60  ;;  %v9945_v60 = vld [vmem:[#allocation6 + $0x768] sm:$0xf] }
 0x42d   :  { %v9946_v18 = vor.u32 %v11087_v48, %v9945_v60  ;;  %v10961_v48 = vld [vmem:[#allocation6 + $0x38c] sm:$0xf] }
 0x42e   :  { %6188 = vmatpush.bf16.msra.mxu0 %v9566_v35  ;;  %6212 = vmatpush.bf16.msra.mxu2 %v9854_v55  ;;  %v10066_v35 = vor.u32 %v11117_v45, %v10065_v9  ;;  %v5909_v5 = vpop.f32.mrf.mxu2  ;;  %v10033_v55 = vld [vmem:[#allocation9 + $0x20] sm:$0xf]  ;;  %v11105_v9 = vld [vmem:[#allocation9 + $0x4] sm:$0xf0]  ;;  %v11118_v45 = vld [vmem:[#allocation9 + $0x74] sm:$0xf] }
 0x42f   :  { %6122 = vmatpush.bf16.msra.mxu3 %v9962_v38  ;;  %v9467_v38 = vld [vmem:[#allocation6 + $0x3b8] sm:$0xf0]  ;;  %v11114_v5 = vld [vmem:[#allocation9 + $0x54] sm:$0xf] }
 0x430   :  { %6201 = vmatpush.bf16.msra.mxu1 %v9694_v1  ;;  %v9803_v1 = vld [vmem:[#allocation6 + $0x658] sm:$0xf0]  ;;  %v9470_v60 = vor.u32 %v10965_v37, %v9467_v38  ;;  %v11110_v37 = vld [vmem:[#allocation9 + $0x34] sm:$0xf]  ;;  %v10043_v38 = vld [vmem:[#allocation9 + $0x38] sm:$0xf0] }
 0x431   :  { %v9806_v63 = vor.u32 %v11049_v41, %v9803_v1  ;;  %v9435_v1 = vld [vmem:[#allocation6 + $0x378] sm:$0xf0] }
 0x432   :  { %6189 = vmatpush.bf16.msra.mxu0 %v9550_v46  ;;  %6213 = vmatpush.bf16.msra.mxu2 %v9838_v21  ;;  %v11107_v21 = vld [vmem:[#allocation9 + $0x14] sm:$0xf0] }
 0x433   :  { %6123 = vmatpush.bf16.msra.mxu3 %v9946_v18  ;;  %v10075_v18 = vld [vmem:[#allocation9 + $0x78] sm:$0xf0] }
 0x434   :  { %6202 = vmatpush.bf16.msra.mxu1 %v9678_v59  ;;  %v9914_v59 = vor.u32 %v11079_v56, %v9913_v16  ;;  %v10078_v3 = vor.u32 %v11118_v45, %v10075_v18  ;;  %v11133_v56 = vld [vmem:[#allocation9 + $0xe4] sm:$0xf0]  ;;  %v10035_v45 = vld [vmem:[#allocation9 + $0x28] sm:$0xf0]  ;;  %v10097_v18 = vld [vmem:[#allocation9 + $0xa0] sm:$0xf] }
 0x436   :  { %6190 = vmatpush.bf16.msra.mxu0 %v9534_v15  ;;  %6214 = vmatpush.bf16.msra.mxu2 %v9822_v13  ;;  %v9502_v15 = vor.u32 %v10973_v19, %v9499_v17  ;;  %v5959_v42 = vpop.f32.mrf.mxu2  ;;  %v10137_v13 = vld [vmem:[#allocation9 + $0xf0] sm:$0xf]  ;;  %v4534_v19 = vperm.slane %v11817_v20, 2  ;;  %v10054_v20 = vor.u32 %v11112_v22, %v10051_v61  ;;  %v11085_v22 = vld [vmem:[#allocation6 + $0x76c] sm:$0xf] }
 0x437   :  { %6124 = vmatpush.bf16.msra.mxu3 %v9930_v39  ;;  %v11850_v31 = vadd.f32 %v5959_v42, %v11837_v12  ;;  %v9451_v12 = vld [vmem:[#allocation6 + $0x398] sm:$0xf0]  ;;  %v10138_v41 = vor.u32 %v11135_v52, %v10137_v13  ;;  %v10067_v39 = vld [vmem:[#allocation9 + $0x68] sm:$0xf0]  ;;  %v11125_v13 = vld [vmem:[#allocation9 + $0xa4] sm:$0xf0] }
 0x438   :  { %6203 = vmatpush.bf16.msra.mxu1 %v9662_v26  ;;  %v10969_v26 = vld [vmem:[#allocation6 + $0x3cc] sm:$0xf]  ;;  %v9454_v32 = vor.u32 %v10961_v48, %v9451_v12  ;;  %v10070_v8 = vor.u32 %v11116_v62, %v10067_v39  ;;  %v9387_v42 = vld [vmem:[#allocation6 + $0x318] sm:$0xf0]  ;;  %v10098_v52 = vor.u32 %v11125_v13, %v10097_v18  ;;  %v11126_v13 = vld [vmem:[#allocation9 + $0xb4] sm:$0xf] }
 0x439   :  { %v9486_v33 = vor.u32 %v10969_v26, %v9483_v14  ;;  %v9979_v62 = vld [vmem:[#allocation6 + $0x7b8] sm:$0xf0] }
 0x43a   :  { %6191 = vmatpush.bf16.msra.mxu0 %v9518_v43  ;;  %6215 = vmatpush.bf16.msra.mxu2 %v9806_v63  ;;  %v10034_v43 = vor.u32 %v11109_v27, %v10033_v55  ;;  %v10129_v63 = vld [vmem:[#allocation9 + $0xe0] sm:$0xf]  ;;  %v9947_v61 = vld [vmem:[#allocation6 + $0x778] sm:$0xf0] }
 0x43b   :  { %6125 = vmatpush.bf16.msra.mxu3 %v9914_v59  ;;  %v10059_v59 = vld [vmem:[#allocation9 + $0x58] sm:$0xf0] }
 0x43c   :  { %6204 = vmatpush.bf16.msra.mxu1 %v9646_v57  ;;  %v11845_v46 = vpop.f32.mrf.mxu1  ;;  %v10025_v57 = vld [vmem:[#allocation9 + $0x10] sm:$0xf]  ;;  %v10062_v17 = vor.u32 %v11114_v5, %v10059_v59  ;;  %v9963_v5 = vld [vmem:[#allocation6 + $0x798] sm:$0xf0] }
 0x43d   :  { %6192 = vmatmul.bf16.vlgmr.msra.gmra.mxu0 %v11770_v51  ;;  %v11847_v51 = vpop.f32.mrf.mxu0  ;;  %v10026_v28 = vor.u32 %v11107_v21, %v10025_v57  ;;  %v11127_v57 = vld [vmem:[#allocation9 + $0xb4] sm:$0xf0] }
 0x43e   :  { %6638 = vmatpush.bf16.msrb.mxu0 %v10074_v49  ;;  %v5961_v49 = vpop.f32.mrf.mxu2 }
 0x43f   :  { %6205 = vmatmul.bf16.vlgmr.msra.gmra.mxu1 %v11768_v53  ;;  %v9790_v53 = vor.u32 %v11045_v7, %v9787_v29  ;;  %6126 = vmatpush.bf16.msra.mxu3 %v9898_v25  ;;  %v10953_v7 = vld [vmem:[#allocation6 + $0x34c] sm:$0xf]  ;;  %v10130_v29 = vor.u32 %v11133_v56, %v10129_v63  ;;  %v10113_v25 = vld [vmem:[#allocation9 + $0xc0] sm:$0xf]  ;;  %v9995_v49 = vld [vmem:[#allocation6 + $0x7d8] sm:$0xf0] }
 0x440   :  { %6651 = vmatpush.bf16.msrb.mxu1 %v10138_v41  ;;  %v11106_v63 = vld [vmem:[#allocation9 + $0x14] sm:$0xf] }
 0x441   :  { %6216 = vmatpush.bf16.msra.mxu2 %v9790_v53  ;;  %v10121_v53 = vld [vmem:[#allocation9 + $0xd0] sm:$0xf] }
 0x442   :  { %6639 = vmatpush.bf16.msrb.mxu0 %v10066_v35  ;;  %6127 = vmatmul.bf16.vlgmr.msra.gmra.mxu3 %v11820_v6  ;;  %v10957_v35 = vld [vmem:[#allocation6 + $0x36c] sm:$0xf]  ;;  %v10122_v44 = vor.u32 %v11131_v58, %v10121_v53  ;;  %v11134_v53 = vld [vmem:[#allocation9 + $0xf4] sm:$0xf]  ;;  %v11104_v58 = vld [vmem:[#allocation9 + $0x4] sm:$0xf] }
 0x443   :  { %6171 = vmatpush.bf16.msrb.mxu3 %v9502_v15  ;;  %v9438_v16 = vor.u32 %v10957_v35, %v9435_v1  ;;  %v11129_v15 = vld [vmem:[#allocation9 + $0xc4] sm:$0xf0] }
 0x444   :  { %v6000_v24 = vpop.f32.mrf.mxu1  ;;  %6652 = vmatpush.bf16.msrb.mxu1 %v10130_v29  ;;  %v10114_v55 = vor.u32 %v11129_v15, %v10113_v25  ;;  %v10081_v29 = vld [vmem:[#allocation9 + $0x80] sm:$0xf] }
 0x445   :  { %6217 = vmatpush.bf16.msra.mxu2 %v9774_v23  ;;  %v5987_v40 = vpop.f32.mrf.mxu0 }
 0x446   :  { %6640 = vmatpush.bf16.msrb.mxu0 %v10058_v2  ;;  %v9419_v2 = vld [vmem:[#allocation6 + $0x358] sm:$0xf0]  ;;  %v11101_v40 = vld [vmem:[#allocation6 + $0x7ec] sm:$0xf] }
 0x447   :  { %6172 = vmatpush.bf16.msrb.mxu3 %v9486_v33  ;;  %v9422_v10 = vor.u32 %v10953_v7, %v9419_v2  ;;  %v10011_v33 = vld [vmem:[#allocation6 + $0x7f8] sm:$0xf0]  ;;  %v11089_v2 = vld [vmem:[#allocation6 + $0x78c] sm:$0xf] }
 0x448   :  { %6218 = vmatmul.bf16.vlgmr.msra.gmra.mxu2 %v11793_v54  ;;  %v10018_v54 = vor.u32 %v11105_v9, %v10017_v36  ;;  %v11854_v4 = vpop.f32.mrf.mxu2  ;;  %6653 = vmatpush.bf16.msrb.mxu1 %v10122_v44  ;;  %v10014_v12 = vor.u32 %v11101_v40, %v10011_v33  ;;  %v10046_v36 = vor.u32 %v11110_v37, %v10043_v38  ;;  %v11108_v9 = vld [vmem:[#allocation9 + $0x24] sm:$0xf]  ;;  %v11130_v40 = vld [vmem:[#allocation9 + $0xd4] sm:$0xf]  ;;  %v10123_v33 = vld [vmem:[#allocation9 + $0xd8] sm:$0xf0] }
 0x449   :  { %v10038_v39 = vor.u32 %v11108_v9, %v10035_v45  ;;  %v11077_v38 = vld [vmem:[#allocation6 + $0x72c] sm:$0xf]  ;;  %v9899_v9 = vld [vmem:[#allocation6 + $0x718] sm:$0xf0] }
 0x44a   :  { %6641 = vmatpush.bf16.msrb.mxu0 %v10050_v0  ;;  %v9403_v0 = vld [vmem:[#allocation6 + $0x338] sm:$0xf0] }
 0x44b   :  { %6173 = vmatpush.bf16.msrb.mxu3 %v9470_v60  ;;  %v9406_v23 = vor.u32 %v10949_v30, %v9403_v0  ;;  %v10019_v30 = vld [vmem:[#allocation9 + $0x8] sm:$0xf0] }
 0x44c   :  { %6654 = vmatpush.bf16.msrb.mxu1 %v10114_v55  ;;  %v10022_v25 = vor.u32 %v11104_v58, %v10019_v30  ;;  %v9931_v55 = vld [vmem:[#allocation6 + $0x758] sm:$0xf0] }
 0x44e   :  { %6642 = vmatpush.bf16.msrb.mxu0 %v10042_v11  ;;  %v10945_v11 = vld [vmem:[#allocation6 + $0x30c] sm:$0xf] }
 0x44f   :  { %6174 = vmatpush.bf16.msrb.mxu3 %v9454_v32  ;;  %v9390_v60 = vor.u32 %v10945_v11, %v9387_v42  ;;  %v10089_v32 = vld [vmem:[#allocation9 + $0x90] sm:$0xf]  ;;  %v11081_v42 = vld [vmem:[#allocation6 + $0x74c] sm:$0xf] }
 0x450   :  { %v6013_v24 = vpop.f32.mrf.mxu2  ;;  %v9934_v37 = vor.u32 %v11081_v42, %v9931_v55  ;;  %v10169_v55 = vld [vmem:[#allocation9 + $0x130] sm:$0xf] }
 0x452   :  { %6643 = vmatpush.bf16.msrb.mxu0 %v10034_v43  ;;  %v10105_v43 = vld [vmem:[#allocation9 + $0xb0] sm:$0xf] }
 0x453   :  { %6175 = vmatpush.bf16.msrb.mxu3 %v9438_v16  ;;  %v10106_v48 = vor.u32 %v11127_v57, %v10105_v43  ;;  %v10027_v16 = vld [vmem:[#allocation9 + $0x18] sm:$0xf0]  ;;  %v9915_v43 = vld [vmem:[#allocation6 + $0x738] sm:$0xf0] }
 0x454   :  { %v10030_v59 = vor.u32 %v11106_v63, %v10027_v16  ;;  %v10201_v63 = vld [vmem:[#allocation9 + $0x170] sm:$0xf] }
 0x455   :  { %6655 = vmatpush.bf16.msrb.mxu1 %v10106_v48  ;;  %v10115_v48 = vld [vmem:[#allocation9 + $0xc8] sm:$0xf0] }
 0x456   :  { %6644 = vmatpush.bf16.msrb.mxu0 %v10026_v28  ;;  %v11097_v28 = vld [vmem:[#allocation6 + $0x7cc] sm:$0xf] }
 0x457   :  { %6176 = vmatpush.bf16.msrb.mxu3 %v9422_v10  ;;  %v9998_v1 = vor.u32 %v11097_v28, %v9995_v49  ;;  %v10139_v10 = vld [vmem:[#allocation9 + $0xf8] sm:$0xf0]  ;;  %v9918_v28 = vor.u32 %v11077_v38, %v9915_v43 }
 0x458   :  { %v10142_v44 = vor.u32 %v11134_v53, %v10139_v10  ;;  %v10083_v53 = vld [vmem:[#allocation9 + $0x88] sm:$0xf0] }
 0x459   :  { %6656 = vmatpush.bf16.msrb.mxu1 %v10098_v52  ;;  %v10107_v52 = vld [vmem:[#allocation9 + $0xb8] sm:$0xf0] }
 0x45a   :  { %6645 = vmatpush.bf16.msrb.mxu0 %v10018_v54  ;;  %v6037_v26 = vpop.f32.mrf.mxu0  ;;  %v11123_v54 = vld [vmem:[#allocation9 + $0x94] sm:$0xf0] }
 0x45b   :  { %v6038_v27 = vadd.f32 %v6037_v26, %v4534_v19  ;;  %6177 = vmatpush.bf16.msrb.mxu3 %v9406_v23  ;;  %v10090_v56 = vor.u32 %v11123_v54, %v10089_v32  ;;  %v11132_v19 = vld [vmem:[#allocation9 + $0xe4] sm:$0xf]  ;;  %v5908_v23 = vadd.f32 %v11841_v50, %v11830_v34  ;;  %v10126_v34 = vor.u32 %v11130_v40, %v10123_v33 }
 0x45c   :  { %v6050_v14 = vpop.f32.mrf.mxu1 }
 0x45d   :  { %v11857_v21 = vadd.f32 %v6050_v14, %v6038_v27  ;;  %6657 = vmatpush.bf16.msrb.mxu1 %v10090_v56  ;;  %v9950_v14 = vor.u32 %v11085_v22, %v9947_v61  ;;  %v11151_v56 = vld [vmem:[#allocation9 + $0x174] sm:$0xf0] }
 0x45e   :  { %6690 = vmatpush.bf16.msra.mxu0 %v10078_v3  ;;  %v11093_v3 = vld [vmem:[#allocation6 + $0x7ac] sm:$0xf] }
 0x45f   :  { %6178 = vmatpush.bf16.msrb.mxu3 %v9390_v60  ;;  %v9982_v7 = vor.u32 %v11093_v3, %v9979_v62  ;;  %v11128_v60 = vld [vmem:[#allocation9 + $0xc4] sm:$0xf]  ;;  %v11122_v62 = vld [vmem:[#allocation9 + $0x94] sm:$0xf] }
 0x460   :  { %v10118_v49 = vor.u32 %v11128_v60, %v10115_v48  ;;  %v10153_v60 = vld [vmem:[#allocation9 + $0x110] sm:$0xf]  ;;  %v11139_v48 = vld [vmem:[#allocation9 + $0x114] sm:$0xf0] }
 0x462   :  { %6691 = vmatpush.bf16.msra.mxu0 %v10070_v8  ;;  %v6039_v41 = vpop.f32.mrf.mxu0  ;;  %6179 = vmatmul.bf16.vlgmr.msrb.gmra.mxu3 %v11751_v47  ;;  %v11121_v8 = vld [vmem:[#allocation9 + $0x84] sm:$0xf0]  ;;  %v9966_v47 = vor.u32 %v11089_v2, %v9963_v5  ;;  %v5920_v26 = vpop.f32.mrf.mxu3  ;;  %v10202_v2 = vor.u32 %v11151_v56, %v10201_v63 }
 0x463   :  { %6223 = vmatpush.bf16.msra.mxu3 %v10014_v12  ;;  %v10082_v0 = vor.u32 %v11121_v8, %v10081_v29  ;;  %v5921_v11 = vadd.f32 %v5920_v26, %v5908_v23  ;;  %v10110_v41 = vor.u32 %v11126_v13, %v10107_v52  ;;  %v10203_v13 = vld [vmem:[#allocation9 + $0x178] sm:$0xf0] }
 0x464   :  { %v6052_v35 = vpop.f32.mrf.mxu1  ;;  %6664 = vmatpush.bf16.msrb.mxu2 %v10202_v2  ;;  %v10179_v2 = vld [vmem:[#allocation9 + $0x148] sm:$0xf0] }
 0x465   :  { %6658 = vmatpush.bf16.msrb.mxu1 %v10082_v0  ;;  %v6236_v27 = vmul.f32 0.2, %v5921_v11  ;;  %v11124_v35 = vld [vmem:[#allocation9 + $0xa4] sm:$0xf]  ;;  %v11149_v0 = vld [vmem:[#allocation9 + $0x164] sm:$0xf0] }
 0x466   :  { %6692 = vmatpush.bf16.msra.mxu0 %v10062_v17  ;;  %v10131_v17 = vld [vmem:[#allocation9 + $0xe8] sm:$0xf0] }
 0x467   :  { %6224 = vmatpush.bf16.msra.mxu3 %v9998_v1  ;;  %v10134_v15 = vor.u32 %v11132_v19, %v10131_v17  ;;  %v6240_v50 = vmax.f32 %v5921_v11, %v6236_v27  ;;  %v10099_v1 = vld [vmem:[#allocation9 + $0xa8] sm:$0xf0]  ;;  %v11143_v27 = vld [vmem:[#allocation9 + $0x134] sm:$0xf0] }
 0x468   :  { %v6063_v24 = vpop.f32.mrf.mxu2  ;;  %v10102_v3 = vor.u32 %v11124_v35, %v10099_v1  ;;  %v10170_v33 = vor.u32 %v11143_v27, %v10169_v55  ;;  %v10195_v35 = vld [vmem:[#allocation9 + $0x168] sm:$0xf0]  ;;  %v11163_v55 = vld [vmem:[#allocation9 + $0x1d4] sm:$0xf0] }
 0x469   :  { %6703 = vmatpush.bf16.msra.mxu1 %v10142_v44  ;;  %v6244_v57 = vpack.c.bf16 %v6240_v50, %v6240_v50 }
 0x46a   :  { %6693 = vmatpush.bf16.msra.mxu0 %v10054_v20  ;;  %v11863_v20 = vadd.f32 %v6063_v24, %v11857_v21  ;;  %v5922_v12 = vpop.f32.mrf.mxu3 }
 0x46b   :  { %6225 = vmatpush.bf16.msra.mxu3 %v9982_v7  ;;  %6646 = vmatmul.bf16.vlgmr.msrb.gmra.mxu0 %v6244_v57  ;;  %v10154_v12 = vor.u32 %v11139_v48, %v10153_v60  ;;  %v11159_v60 = vld [vmem:[#allocation9 + $0x1b4] sm:$0xf0]  ;;  %v10225_v48 = vld [vmem:[#allocation9 + $0x1a0] sm:$0xf] }
 0x46d   :  { %6704 = vmatpush.bf16.msra.mxu1 %v10134_v15 }
 0x46e   :  { %6694 = vmatpush.bf16.msra.mxu0 %v10046_v36  ;;  %v11073_v36 = vld [vmem:[#allocation6 + $0x70c] sm:$0xf] }
 0x46f   :  { %6226 = vmatpush.bf16.msra.mxu3 %v9966_v47  ;;  %v9902_v32 = vor.u32 %v11073_v36, %v9899_v9  ;;  %v11147_v47 = vld [vmem:[#allocation9 + $0x154] sm:$0xf0] }
 0x470   :  { %v6065_v18 = vpop.f32.mrf.mxu2 }
 0x471   :  { %6705 = vmatpush.bf16.msra.mxu1 %v10126_v34  ;;  %v11150_v18 = vld [vmem:[#allocation9 + $0x174] sm:$0xf] }
 0x472   :  { %6695 = vmatpush.bf16.msra.mxu0 %v10038_v39  ;;  %v5972_v54 = vpop.f32.mrf.mxu3  ;;  %v10091_v39 = vld [vmem:[#allocation9 + $0x98] sm:$0xf0] }
 0x473   :  { %6227 = vmatpush.bf16.msra.mxu3 %v9950_v14  ;;  %v5973_v16 = vadd.f32 %v5972_v54, %v11850_v31  ;;  %v10094_v5 = vor.u32 %v11122_v62, %v10091_v39  ;;  %v10193_v31 = vld [vmem:[#allocation9 + $0x160] sm:$0xf]  ;;  %v11209_v14 = vld [vmem:[#allocation7] sm:$0xf]  ;;  %v11146_v54 = vld [vmem:[#allocation9 + $0x154] sm:$0xf] }
 0x474   :  { %v10194_v44 = vor.u32 %v11149_v0, %v10193_v31  ;;  %v4535_v11 = vperm.slane %v11209_v14, 3  ;;  %v11165_v14 = vld [vmem:[#allocation9 + $0x1e4] sm:$0xf0] }
 0x475   :  { %6706 = vmatpush.bf16.msra.mxu1 %v10118_v49  ;;  %v5986_v29 = vadd.f32 %v11847_v51, %v5973_v16  ;;  %v11137_v49 = vld [vmem:[#allocation9 + $0x104] sm:$0xf0] }
 0x476   :  { %6696 = vmatpush.bf16.msra.mxu0 %v10030_v59  ;;  %v11120_v59 = vld [vmem:[#allocation9 + $0x84] sm:$0xf]  ;;  %6665 = vmatpush.bf16.msrb.mxu2 %v10194_v44 }
 0x477   :  { %6228 = vmatpush.bf16.msra.mxu3 %v9934_v37  ;;  %v5999_v10 = vadd.f32 %v11845_v46, %v5986_v29  ;;  %v10086_v58 = vor.u32 %v11120_v59, %v10083_v53  ;;  %v11145_v46 = vld [vmem:[#allocation9 + $0x144] sm:$0xf0]  ;;  %v11142_v59 = vld [vmem:[#allocation9 + $0x134] sm:$0xf]  ;;  %v10171_v53 = vld [vmem:[#allocation9 + $0x138] sm:$0xf0] }
 0x478   :  { %v11141_v37 = vld [vmem:[#allocation9 + $0x124] sm:$0xf0] }
 0x479   :  { %6707 = vmatpush.bf16.msra.mxu1 %v10110_v41  ;;  %v6012_v51 = vadd.f32 %v11854_v4, %v5999_v10  ;;  %v10161_v4 = vld [vmem:[#allocation9 + $0x120] sm:$0xf]  ;;  %v11148_v41 = vld [vmem:[#allocation9 + $0x164] sm:$0xf]  ;;  %v10174_v10 = vor.u32 %v11142_v59, %v10171_v53  ;;  %v10243_v59 = vld [vmem:[#allocation9 + $0x1c8] sm:$0xf0] }
 0x47a   :  { %6697 = vmatpush.bf16.msra.mxu0 %v10022_v25  ;;  %v11865_v45 = vpop.f32.mrf.mxu0  ;;  %v5974_v30 = vpop.f32.mrf.mxu3  ;;  %v10177_v25 = vld [vmem:[#allocation9 + $0x140] sm:$0xf]  ;;  %v10162_v43 = vor.u32 %v11141_v37, %v10161_v4  ;;  %v10198_v1 = vor.u32 %v11148_v41, %v10195_v35  ;;  %v11153_v41 = vld [vmem:[#allocation9 + $0x184] sm:$0xf0]  ;;  %v11166_v35 = vld [vmem:[#allocation9 + $0x1f4] sm:$0xf] }
 0x47b   :  { %6229 = vmatpush.bf16.msra.mxu3 %v9918_v28  ;;  %v10178_v23 = vor.u32 %v11145_v46, %v10177_v25  ;;  %v10145_v28 = vld [vmem:[#allocation9 + $0x100] sm:$0xf]  ;;  %v10163_v30 = vld [vmem:[#allocation9 + $0x128] sm:$0xf0] }
 0x47c   :  { %v11867_v21 = vpop.f32.mrf.mxu1  ;;  %v10146_v52 = vor.u32 %v11137_v49, %v10145_v28  ;;  %v10147_v25 = vld [vmem:[#allocation9 + $0x108] sm:$0xf0]  ;;  %v11157_v28 = vld [vmem:[#allocation9 + $0x1a4] sm:$0xf0] }
 0x47d   :  { %6708 = vmatpush.bf16.msra.mxu1 %v10102_v3  ;;  %6698 = vmatmul.bf16.vlgmr.msra.gmra.mxu0 %v6244_v57  ;;  %v10187_v3 = vld [vmem:[#allocation9 + $0x158] sm:$0xf0] }
 0x47e   :  { %v10190_v62 = vor.u32 %v11146_v54, %v10187_v3 }
 0x47f   :  { %6230 = vmatpush.bf16.msra.mxu3 %v9902_v32  ;;  %v10206_v32 = vor.u32 %v11150_v18, %v10203_v13  ;;  %v10217_v18 = vld [vmem:[#allocation9 + $0x190] sm:$0xf]  ;;  %v11155_v13 = vld [vmem:[#allocation9 + $0x194] sm:$0xf0] }
 0x481   :  { %6709 = vmatpush.bf16.msra.mxu1 %v10094_v5 }
 0x482   :  { %v6091_v7 = vpop.f32.mrf.mxu0  ;;  %6231 = vmatmul.bf16.vlgmr.msra.gmra.mxu3 %v11820_v6  ;;  %v10185_v6 = vld [vmem:[#allocation9 + $0x150] sm:$0xf]  ;;  %v6024_v19 = vpop.f32.mrf.mxu3 }
 0x483   :  { %v10186_v17 = vor.u32 %v11147_v47, %v10185_v6  ;;  %v6025_v61 = vadd.f32 %v6024_v19, %v6012_v51  ;;  %v11144_v7 = vld [vmem:[#allocation9 + $0x144] sm:$0xf]  ;;  %v10265_v6 = vld [vmem:[#allocation9 + $0x1f0] sm:$0xf]  ;;  %v11167_v47 = vld [vmem:[#allocation9 + $0x1f4] sm:$0xf0] }
 0x484   :  { %v6104_v8 = vpop.f32.mrf.mxu1  ;;  %v10155_v19 = vld [vmem:[#allocation9 + $0x118] sm:$0xf0] }
 0x485   :  { %6710 = vmatpush.bf16.msra.mxu1 %v10086_v58  ;;  %6666 = vmatpush.bf16.msrb.mxu2 %v10186_v17  ;;  %v6237_v15 = vmul.f32 0.2, %v6025_v61  ;;  %v10182_v8 = vor.u32 %v11144_v7, %v10179_v2  ;;  %v11140_v58 = vld [vmem:[#allocation9 + $0x124] sm:$0xf]  ;;  %v10266_v17 = vor.u32 %v11167_v47, %v10265_v6  ;;  %v10251_v7 = vld [vmem:[#allocation9 + $0x1d8] sm:$0xf0] }
 0x486   :  { %v10166_v51 = vor.u32 %v11140_v58, %v10163_v30  ;;  %v11158_v30 = vld [vmem:[#allocation9 + $0x1b4] sm:$0xf]  ;;  %v10227_v6 = vld [vmem:[#allocation9 + $0x1a8] sm:$0xf0] }
 0x487   :  { %v6241_v26 = vmax.f32 %v6025_v61, %v6237_v15  ;;  %6677 = vmatpush.bf16.msrb.mxu3 %v10266_v17  ;;  %v11136_v61 = vld [vmem:[#allocation9 + $0x104] sm:$0xf]  ;;  %v10219_v17 = vld [vmem:[#allocation9 + $0x198] sm:$0xf0] }
 0x488   :  { %v11874_v22 = vpop.f32.mrf.mxu2  ;;  %v10150_v15 = vor.u32 %v11136_v61, %v10147_v25  ;;  %v11152_v61 = vld [vmem:[#allocation9 + $0x184] sm:$0xf]  ;;  %v10211_v25 = vld [vmem:[#allocation9 + $0x188] sm:$0xf0] }
 0x489   :  { %6667 = vmatpush.bf16.msrb.mxu2 %v10178_v23  ;;  %v6245_v42 = vpack.c.bf16 %v6241_v26, %v6241_v26  ;;  %v10257_v26 = vld [vmem:[#allocation9 + $0x1e0] sm:$0xf] }
 0x48a   :  { %v6026_v38 = vpop.f32.mrf.mxu3 }
 0x48b   :  { %6659 = vmatmul.bf16.vlgmr.msrb.gmra.mxu1 %v6245_v42 }
 0x48d   :  { %6668 = vmatpush.bf16.msrb.mxu2 %v10170_v33  ;;  %v11161_v33 = vld [vmem:[#allocation9 + $0x1c4] sm:$0xf0] }
 0x490   :  { %v6117_v50 = vpop.f32.mrf.mxu2 }
 0x491   :  { %6669 = vmatpush.bf16.msrb.mxu2 %v10162_v43 }
 0x495   :  { %6670 = vmatpush.bf16.msrb.mxu2 %v10154_v12 }
 0x499   :  { %6671 = vmatpush.bf16.msrb.mxu2 %v10146_v52  ;;  %v10218_v52 = vor.u32 %v11155_v13, %v10217_v18  ;;  %v11171_v18 = vld [vmem:[#allocation12 + $0x18] sm:$0xff] }
 0x49a   :  { %v6141_v24 = vpop.f32.mrf.mxu0 }
 0x49b   :  { %v6142_v34 = vadd.f32 %v6141_v24, %v4535_v11  ;;  %6711 = vmatmul.bf16.vlgmr.msra.gmra.mxu1 %v6245_v42  ;;  %v10258_v11 = vor.u32 %v11165_v14, %v10257_v26  ;;  %v10249_v42 = vld [vmem:[#allocation9 + $0x1d0] sm:$0xf] }
 0x49c   :  { %v6154_v40 = vpop.f32.mrf.mxu1  ;;  %v10250_v27 = vor.u32 %v11163_v55, %v10249_v42  ;;  %v6312_v55 = vld [vmem:[#allocation10] sm:$0x3] }
 0x49d   :  { %v6155_v57 = vadd.f32 %v6154_v40, %v6142_v34  ;;  %6716 = vmatpush.bf16.msra.mxu2 %v10206_v32  ;;  %6678 = vmatpush.bf16.msrb.mxu3 %v10258_v11  ;;  %v10241_v40 = vld [vmem:[#allocation9 + $0x1c0] sm:$0xf] }
 0x49e   :  { %v10242_v50 = vor.u32 %v11161_v33, %v10241_v40  ;;  %v10209_v32 = vld [vmem:[#allocation9 + $0x180] sm:$0xf] }
 0x49f   :  { %v10210_v54 = vor.u32 %v11153_v41, %v10209_v32 }
 0x4a1   :  { %6717 = vmatpush.bf16.msra.mxu2 %v10198_v1  ;;  %6679 = vmatpush.bf16.msrb.mxu3 %v10250_v27  ;;  %v10267_v1 = vld [vmem:[#allocation9 + $0x1f8] sm:$0xf0] }
 0x4a2   :  { %v6143_v36 = vpop.f32.mrf.mxu0  ;;  %v10270_v3 = vor.u32 %v11166_v35, %v10267_v1  ;;  %v11169_v35 = vld [vmem:[#allocation12 + $0x8] sm:$0xff] }
 0x4a3   :  { %v11181_v1 = vld [vmem:[#allocation12 + $0x68] sm:$0xff] }
 0x4a4   :  { %v6156_v9 = vpop.f32.mrf.mxu1 }
 0x4a5   :  { %6718 = vmatpush.bf16.msra.mxu2 %v10190_v62  ;;  %6680 = vmatpush.bf16.msrb.mxu3 %v10242_v50  ;;  %v11164_v62 = vld [vmem:[#allocation9 + $0x1e4] sm:$0xf] }
 0x4a7   :  { %v6076_v39 = vpop.f32.mrf.mxu3 }
 0x4a8   :  { %v6077_v63 = vadd.f32 %v6076_v39, %v11863_v20  ;;  %v6167_v16 = vpop.f32.mrf.mxu2  ;;  %v10259_v39 = vld [vmem:[#allocation9 + $0x1e8] sm:$0xf0] }
 0x4a9   :  { %v11877_v56 = vadd.f32 %v6167_v16, %v6155_v57  ;;  %6719 = vmatpush.bf16.msra.mxu2 %v10182_v8  ;;  %v10233_v57 = vld [vmem:[#allocation9 + $0x1b0] sm:$0xf]  ;;  %v11162_v16 = vld [vmem:[#allocation9 + $0x1d4] sm:$0xf] }
 0x4aa   :  { %v6090_v29 = vadd.f32 %v11865_v45, %v6077_v63  ;;  %v11138_v45 = vld [vmem:[#allocation9 + $0x114] sm:$0xf]  ;;  %v10234_v12 = vor.u32 %v11159_v60, %v10233_v57  ;;  %v10262_v63 = vor.u32 %v11164_v62, %v10259_v39  ;;  %v10254_v2 = vor.u32 %v11162_v16, %v10251_v7  ;;  %v11179_v62 = vld [vmem:[#allocation12 + $0x58] sm:$0xff]  ;;  %v11176_v16 = vld [vmem:[#allocation12 + $0x40] sm:$0xff] }
 0x4ab   :  { %v11178_v39 = vld [vmem:[#allocation12 + $0x50] sm:$0xff] }
 0x4ac   :  { %v6103_v5 = vadd.f32 %v11867_v21, %v6090_v29  ;;  %v10158_v21 = vor.u32 %v11138_v45, %v10155_v19  ;;  %6681 = vmatpush.bf16.msrb.mxu3 %v10234_v12  ;;  %v11154_v19 = vld [vmem:[#allocation9 + $0x194] sm:$0xf]  ;;  %v11183_v12 = vld [vmem:[#allocation12 + $0x78] sm:$0xff] }
 0x4ad   :  { %6720 = vmatpush.bf16.msra.mxu2 %v10174_v10  ;;  %6893 = vmatpush.bf16.msrb.mxu1 %v11183_v12 }
 0x4ae   :  { %v6116_v4 = vadd.f32 %v11874_v22, %v6103_v5  ;;  %v10226_v22 = vor.u32 %v11157_v28, %v10225_v48  ;;  %v11160_v5 = vld [vmem:[#allocation9 + $0x1c4] sm:$0xf]  ;;  %v11175_v48 = vld [vmem:[#allocation12 + $0x38] sm:$0xff]  ;;  %v11174_v28 = vld [vmem:[#allocation12 + $0x30] sm:$0xff] }
 0x4af   :  { %v6078_v0 = vpop.f32.mrf.mxu3  ;;  %v10246_v53 = vor.u32 %v11160_v5, %v10243_v59  ;;  %6880 = vmatpush.bf16.msrb.mxu0 %v11175_v48 }
 0x4b0   :  { %v6169_v44 = vpop.f32.mrf.mxu2  ;;  %6682 = vmatpush.bf16.msrb.mxu3 %v10226_v22  ;;  %v10235_v0 = vld [vmem:[#allocation9 + $0x1b8] sm:$0xf0] }
 0x4b1   :  { %6721 = vmatpush.bf16.msra.mxu2 %v10166_v51  ;;  %v10238_v44 = vor.u32 %v11158_v30, %v10235_v0  ;;  %v11156_v51 = vld [vmem:[#allocation9 + $0x1a4] sm:$0xf] }
 0x4b2   :  { %v10230_v45 = vor.u32 %v11156_v51, %v10227_v6 }
 0x4b3   :  { %6881 = vmatpush.bf16.msrb.mxu0 %v11174_v28 }
 0x4b4   :  { %6683 = vmatpush.bf16.msrb.mxu3 %v10218_v52  ;;  %v11170_v52 = vld [vmem:[#allocation12 + $0x10] sm:$0xff] }
 0x4b5   :  { %6722 = vmatpush.bf16.msra.mxu2 %v10158_v21 }
 0x4b8   :  { %6684 = vmatpush.bf16.msrb.mxu3 %v10210_v54  ;;  %v11168_v54 = vld [vmem:[#allocation12] sm:$0xff] }
 0x4b9   :  { %6723 = vmatpush.bf16.msra.mxu2 %v10150_v15 }
 0x4ba   :  { %v11881_v31 = vpop.f32.mrf.mxu0 }
 0x4bc   :  { %v11883_v20 = vpop.f32.mrf.mxu1  ;;  %6729 = vmatpush.bf16.msra.mxu3 %v10270_v3  ;;  %v11180_v3 = vld [vmem:[#allocation12 + $0x60] sm:$0xff] }
 0x4c0   :  { %6730 = vmatpush.bf16.msra.mxu3 %v10262_v63  ;;  %v11177_v63 = vld [vmem:[#allocation12 + $0x48] sm:$0xff] }
 0x4c2   :  { %v6195_v46 = vpop.f32.mrf.mxu0 }
 0x4c4   :  { %v6208_v23 = vpop.f32.mrf.mxu1  ;;  %6731 = vmatpush.bf16.msra.mxu3 %v10254_v2 }
 0x4c5   :  { %v6128_v24 = vpop.f32.mrf.mxu3 }
 0x4c6   :  { %v6129_v37 = vadd.f32 %v6128_v24, %v6116_v4  ;;  %v6314_v24 = vperm.slane %v6312_v55, 0 }
 0x4c8   :  { %v6238_v38 = vmul.f32 0.2, %v6129_v37  ;;  %6732 = vmatpush.bf16.msra.mxu3 %v10246_v53 }
 0x4ca   :  { %v6242_v43 = vmax.f32 %v6129_v37, %v6238_v38  ;;  %v6315_v38 = vperm.slane %v6312_v55, 1 }
 0x4cb   :  { %v11886_v34 = vpop.f32.mrf.mxu2 }
 0x4cc   :  { %v6246_v49 = vpack.c.bf16 %v6242_v43, %v6242_v43  ;;  %6733 = vmatpush.bf16.msra.mxu3 %v10238_v44 }
 0x4cd   :  { %v6130_v36 = vpop.f32.mrf.mxu3 }
 0x4ce   :  { %6672 = vmatmul.bf16.vlgmr.msrb.gmra.mxu2 %v6246_v49  ;;  %v11173_v36 = vld [vmem:[#allocation12 + $0x28] sm:$0xff] }
 0x4cf   :  { %6882 = vmatpush.bf16.msrb.mxu0 %v11173_v36 }
 0x4d0   :  { %6734 = vmatpush.bf16.msra.mxu3 %v10230_v45 }
 0x4d3   :  { %v6221_v9 = vpop.f32.mrf.mxu2 }
 0x4d4   :  { %v11172_v9 = vld [vmem:[#allocation12 + $0x20] sm:$0xff] }
 0x4d5   :  { %6883 = vmatpush.bf16.msrb.mxu0 %v11172_v9 }
 0x4d9   :  { %6884 = vmatpush.bf16.msrb.mxu0 %v11171_v18 }
 0x4dd   :  { %6885 = vmatpush.bf16.msrb.mxu0 %v11170_v52 }
 0x4de   :  { %6724 = vmatmul.bf16.vlgmr.msra.gmra.mxu2 %v6246_v49  ;;  %v11182_v49 = vld [vmem:[#allocation12 + $0x70] sm:$0xff] }
 0x4df   :  { %6894 = vmatpush.bf16.msrb.mxu1 %v11182_v49 }
 0x4e1   :  { %6886 = vmatpush.bf16.msrb.mxu0 %v11169_v35 }
 0x4e3   :  { %6895 = vmatpush.bf16.msrb.mxu1 %v11181_v1 }
 0x4e5   :  { %v6180_v29 = vpop.f32.mrf.mxu3  ;;  %6887 = vmatpush.bf16.msrb.mxu0 %v11168_v54 }
 0x4e6   :  { %v6181_v8 = vadd.f32 %v6180_v29, %v11877_v56  ;;  %v10222_v56 = vor.u32 %v11154_v19, %v10219_v17  ;;  %v11201_v19 = vld [vmem:[#allocation13] ss:$0 sm:$0xff] }
 0x4e7   :  { %6896 = vmatpush.bf16.msrb.mxu1 %v11180_v3 }
 0x4e8   :  { %v6194_v10 = vadd.f32 %v11881_v31, %v6181_v8  ;;  %v6647_v21 = vpop.f32.mrf.mxu0  ;;  %6735 = vmatpush.bf16.msra.mxu3 %v10222_v56  ;;  %v10214_v31 = vor.u32 %v11152_v61, %v10211_v25 }
 0x4e9   :  { %v6648_v40 = vadd.f32 %v6647_v21, %v6314_v24 }
 0x4ea   :  { %v6207_v58 = vadd.f32 %v11883_v20, %v6194_v10 }
 0x4eb   :  { %6897 = vmatpush.bf16.msrb.mxu1 %v11179_v62 }
 0x4ec   :  { %6736 = vmatpush.bf16.msra.mxu3 %v10214_v31  ;;  %v6220_v20 = vadd.f32 %v11886_v34, %v6207_v58 }
 0x4ed   :  { %v6182_v47 = vpop.f32.mrf.mxu3 }
 0x4ef   :  { %6898 = vmatpush.bf16.msrb.mxu1 %v11178_v39 }
 0x4f0   :  { %v6649_v46 = vpop.f32.mrf.mxu0 }
 0x4f3   :  { %6899 = vmatpush.bf16.msrb.mxu1 %v11177_v63 }
 0x4f7   :  { %6900 = vmatpush.bf16.msrb.mxu1 %v11176_v16 }
 0x4fa   :  { %v6699_v15 = vpop.f32.mrf.mxu0 }
 0x4fb   :  { %v6700_v43 = vadd.f32 %v6699_v15, %v6315_v38 }
 0x502   :  { %v6701_v4 = vpop.f32.mrf.mxu0 }
 0x505   :  { %v6232_v23 = vpop.f32.mrf.mxu3 }
 0x506   :  { %v6233_v26 = vadd.f32 %v6232_v23, %v6220_v20 }
 0x508   :  { %v6239_v14 = vmul.f32 0.2, %v6233_v26  ;;  %v6660_v33 = vpop.f32.mrf.mxu1 }
 0x509   :  { %v6661_v37 = vadd.f32 %v6660_v33, %v6648_v40 }
 0x50a   :  { %v6243_v11 = vmax.f32 %v6233_v26, %v6239_v14 }
 0x50c   :  { %v6247_v42 = vpack.c.bf16 %v6243_v11, %v6243_v11 }
 0x50d   :  { %v6234_v27 = vpop.f32.mrf.mxu3 }
 0x50e   :  { %6685 = vmatmul.bf16.vlgmr.msrb.gmra.mxu3 %v6247_v42 }
 0x510   :  { %v6662_v50 = vpop.f32.mrf.mxu1 }
 0x518   :  { %v6712_v57 = vpop.f32.mrf.mxu1 }
 0x519   :  { %v6713_v34 = vadd.f32 %v6712_v57, %v6700_v43 }
 0x51e   :  { %6737 = vmatmul.bf16.vlgmr.msra.gmra.mxu3 %v6247_v42 }
 0x520   :  { %v6714_v60 = vpop.f32.mrf.mxu1 }
 0x551   :  { %v6673_v22 = vpop.f32.mrf.mxu2 }
 0x552   :  { %v6674_v7 = vadd.f32 %v6673_v22, %v6661_v37 }
 0x559   :  { %v6675_v13 = vpop.f32.mrf.mxu2 }
 0x561   :  { %v6725_v32 = vpop.f32.mrf.mxu2 }
 0x562   :  { %v6726_v10 = vadd.f32 %v6725_v32, %v6713_v34 }
 0x569   :  { %v6727_v41 = vpop.f32.mrf.mxu2 }
 0x591   :  { %v6686_v2 = vpop.f32.mrf.mxu3 }
 0x592   :  { %v6687_v29 = vadd.f32 %v6686_v2, %v6674_v7 }
 0x594   :  { %v6742_v8 = vmul.f32 0.2, %v6687_v29 }
 0x596   :  { %v6744_v5 = vmax.f32 %v6687_v29, %v6742_v8 }
 0x598   :  { %v6746_v59 = vpack.c.bf16 %v6744_v5, %v6744_v5 }
 0x599   :  { %v6688_v53 = vpop.f32.mrf.mxu3 }
 0x59a   :  { %6888 = vmatmul.bf16.vlgmr.msrb.gmra.mxu0 %v6746_v59 }
 0x5a1   :  { %v6738_v58 = vpop.f32.mrf.mxu3 }
 0x5a2   :  { %v6739_v30 = vadd.f32 %v6738_v58, %v6726_v10 }
 0x5a4   :  { %v6743_v0 = vmul.f32 0.2, %v6739_v30 }
 0x5a6   :  { %v6745_v44 = vmax.f32 %v6739_v30, %v6743_v0 }
 0x5a8   :  { %v6747_v51 = vpack.c.bf16 %v6745_v44, %v6745_v44 }
 0x5a9   :  { %v6740_v6 = vpop.f32.mrf.mxu3 }
 0x5aa   :  { %6901 = vmatmul.bf16.vlgmr.msrb.gmra.mxu1 %v6747_v51 }
 0x617   :  { %v6889_v47 = vpop.f32.mrf.mxu0 }
 0x618   :  { %v6890_v17 = vadd.f32 %v11201_v19, %v6889_v47 }
 0x61f   :  { %v6891_v45 = vpop.f32.mrf.mxu0 }
 0x627   :  { %v6902_v56 = vpop.f32.mrf.mxu1 }
 0x628   :  { %v6903_v21 = vadd.f32 %v6902_v56, %v6890_v17 }
 0x62a   :  { %v10335_v61 = vmul.f32 -1.442695, %v6903_v21 }
 0x62c   :  { %11202 = vpow2.f32 %v10335_v61 }
 0x62f   :  { %v6904_v25 = vpop.f32.mrf.mxu1 }
 0x632   :  { %v11203_v31 = vpop.eup %11202 }
 0x633   :  { %v6909_v46 = vadd.f32 1.0, %v11203_v31 }
 0x635   :  { %11204 = vrcp.f32 %v6909_v46  ;;  %v6921_v26 = vand.u32 2147483648, %v6909_v46  ;;  %v6919_v11 = vand.u32 2147483647, %v6909_v46  ;;  %vm6915_vm4 = vweird.f32 %v6909_v46 }
 0x637   :  { %v6922_v55 = vor.u32 1.1754944e-38, %v6921_v26  ;;  %vm6920_vm6 = vcmp.eq.f32.partialorder %v6919_v11, 8.507059e+37 }
 0x63b   :  { %v11205_v20 = vpop.eup %11204 }
 0x63c   :  { %v6911_v23 = vmul.f32 %v11205_v20, %v6909_v46  ;;  %vm6916_vm3 = vweird.f32 %v11205_v20 }
 0x63d   :  { %vm6917_vm5 = vmor %vm6915_vm4, %vm6916_vm3 }
 0x63e   :  { %v6912_v15 = vsub.f32 1.0, %v6911_v23 }
 0x640   :  { %v6913_v14 = vmul.f32 %v11205_v20, %v6912_v15 }
 0x642   :  { %v6914_v42 = vadd.f32 %v11205_v20, %v6913_v14 }
 0x644   :  { %v6918_v27 = vsel %vm6917_vm5, %v11205_v20, %v6914_v42 }
 0x645   :  { %v6923_v4 = vsel %vm6920_vm6, %v6922_v55, %v6918_v27 }
 0x646   :  { %6925 = vst [vmem:[%s11904_s9] sm:$0xff] %v6923_v4 }
 0x647   :  { %6930 = vsyncpa [#allocation3], 1 }
 0x648   :  { %6931 = vsyncpa [#allocation5], 1 }
 0x649   :  { %6932 = vsyncpa [#allocation8], 1 }
 0x64a   :  { %6933 = vsyncpa [#allocation11], 1 }
 0x64b   :  { %6934 = vsyncpa [#allocation14], 1 }

</bundles_post_ra>
